<compile_context>
chip_gen: v7x
topology: tpu7x:2x2x1
jax: 0.10.0
libtpu: 0.0.40
codegen_flags: <defaults>
</compile_context>

<pallas_src>
import numpy as np
import jax
import jax.numpy as jnp
from jax import lax
from jax.experimental import pallas as pl
from jax.experimental.pallas import tpu as pltpu

_EPS = 1e-5
_PH1 = 8          # halo rows for the (k,1)-conv input buffer (needs <= 5)
_PH2 = 16         # halo rows for the dilated-3x3 input buffer (needs <= 11)
_PHC = 8          # halo rows for the conv_cat input buffer (needs 1)
_NUM_BRANCH = 6   # x0 .. x5 feed conv_cat


def _conv_specs(cin, cout):
    """(KH, KW, Cin, Cout) of the 22 convs, in execution order."""
    specs = [(1, 1, cin, cout)]                       # branch0: 1x1
    for i in range(1, 6):
        k = 2 * i + 1                                 # 3, 5, 7, 9, 11
        specs += [(1, 1, cin, cout),                  # branch i: 1x1
                  (1, k, cout, cout),                 # (1, k), pad (0, i)
                  (k, 1, cout, cout),                 # (k, 1), pad (i, 0)
                  (3, 3, cout, cout)]                 # 3x3, pad = dil = k
    specs.append((3, 3, 6 * cout, cout))              # conv_cat
    return specs


def _slot_plan():
    """Static slot index of every banded (W*C, W*C) weight matrix in wbuf."""
    slots, n = {}, 0
    slots[("b0",)] = n; n += 1
    for bi in range(1, 6):
        k = 2 * bi + 1
        slots[("br", bi, "1x1")] = n; n += 1
        slots[("br", bi, "wk")] = n; n += 1
        for kh in range(k):
            slots[("br", bi, "hk", kh)] = n; n += 1
        for kh in range(3):
            slots[("br", bi, "dil", kh)] = n; n += 1
    return slots, n


def _make_multi_scale_kernel(N, H, W, C, slots):
    NH, WC = N * H, W * C
    inv_m = 1.0 / float(N * H * W)

    def kernel(x_ref, wbuf_ref, wcat_ref, pmat_ref, gamma_ref, beta_ref,
               out_ref, pha_ref, phb_ref, pe_ref):
        f32, bf16 = jnp.float32, jnp.bfloat16

        # Zero the (small, lane-dense) halo scratch buffers once; interiors are
        # always overwritten before being read, halos stay zero => implicit
        # H-direction zero padding.
        pha_ref[...] = jnp.zeros(pha_ref.shape, f32)
        phb_ref[...] = jnp.zeros(phb_ref.shape, f32)
        pe_ref[...] = jnp.zeros(pe_ref.shape, f32)

        pmat = pmat_ref[...]                       # (WC, WC) channel pooling

        def mm(a, slot):
            # (NH, WC) @ (WC, WC) banded matmul: bf16 MXU operands, f32 accum.
            return jnp.dot(a.astype(bf16), wbuf_ref[slot],
                           preferred_element_type=f32)

        def bn_relu(acc, idx):
            # Training-mode BatchNorm2d + ReLU.  Channels live strided across
            # lanes (lane = w*C + c); pooling with pmat sums the W lanes of
            # each channel and broadcasts the result back to those lanes.
            # Centered two-pass variance (biased, eps=1e-5), all in f32.
            mean = jnp.sum(jnp.dot(acc, pmat, preferred_element_type=f32),
                           axis=0, keepdims=True) * inv_m
            cen = acc - mean
            var = jnp.sum(jnp.dot(cen * cen, pmat, preferred_element_type=f32),
                          axis=0, keepdims=True) * inv_m
            scale = gamma_ref[pl.ds(idx, 1), :] * lax.rsqrt(var + _EPS)
            shift = beta_ref[pl.ds(idx, 1), :] - mean * scale
            return jnp.maximum(acc * scale + shift, 0.0)

        x2d = x_ref[...]                           # (NH, WC) f32

        # ---------------- branch0 : 1x1 ----------------
        y = bn_relu(mm(x2d, slots[("b0",)]), 0)
        pe_ref[:, pl.ds(_PHC, H), pl.ds(0, WC)] = y.reshape(N, H, WC)
        prev = y

        # ---------------- branches 1..5 ----------------
        for bi in range(1, 6):
            k = 2 * bi + 1
            bn_base = 1 + (bi - 1) * 4

            # 1x1 conv on the residual input (x + x_{bi-1})
            a = bn_relu(mm(x2d + prev, slots[("br", bi, "1x1")]), bn_base)

            # (1, k) conv along W, pad bi: ONE banded matmul (W shifts and
            # W zero-padding are encoded in the weight's band structure).
            a = bn_relu(mm(a, slots[("br", bi, "wk")]), bn_base + 1)
            pha_ref[:, pl.ds(_PH1, H), :] = a.reshape(N, H, WC)

            # (k, 1) conv along H, pad bi: k block-diagonal matmuls over
            # H-shifted slabs of the halo buffer.
            acc = None
            for kh in range(k):
                p = pha_ref[:, pl.ds(_PH1 - bi + kh, H), :].reshape(NH, WC)
                t = mm(p, slots[("br", bi, "hk", kh)])
                acc = t if acc is None else acc + t
            a = bn_relu(acc, bn_base + 2)
            phb_ref[:, pl.ds(_PH2, H), :] = a.reshape(N, H, WC)

            # 3x3 conv, pad = dilation = k: 3 banded matmuls (W dilation lives
            # in the bands, H dilation in the slab offsets).
            acc = None
            for kh in range(3):
                p = phb_ref[:, pl.ds(_PH2 + (kh - 1) * k, H), :].reshape(NH, WC)
                t = mm(p, slots[("br", bi, "dil", kh)])
                acc = t if acc is None else acc + t
            y = bn_relu(acc, bn_base + 3)
            pe_ref[:, pl.ds(_PHC, H), pl.ds(bi * WC, WC)] = y.reshape(N, H, WC)
            prev = y

        # ------- conv_cat : 3x3, pad 1, over the 6-way channel concat -------
        # Branch outputs already sit in disjoint 128-lane slices of pe_ref, so
        # each kh tap is one contiguous (NH, 6*WC) slab and one K=768 matmul.
        acc = None
        for kh in range(3):
            p = pe_ref[:, pl.ds(_PHC + kh - 1, H), :].reshape(NH, _NUM_BRANCH * WC)
            t = jnp.dot(p.astype(bf16), wcat_ref[kh], preferred_element_type=f32)
            acc = t if acc is None else acc + t
        out_ref[...] = bn_relu(acc, 21).astype(out_ref.dtype)

    return kernel


def multi_scale_forward(x, wbuf, wcat, pmat, gamma_lane, beta_lane):
    """x: (N, H, W, C) NHWC f32.  Packed params from pack_multi_scale_params."""
    N, H, W, C = x.shape
    NH, WC = N * H, W * C
    slots, _ = _slot_plan()

    specs = _conv_specs(C, C)
    npix = N * H * W
    flops = 2 * npix * sum(kh * kw * cin * cout for kh, kw, cin, cout in specs)
    bytes_accessed = (4 * x.size + 2 * wbuf.size + 2 * wcat.size
                      + 4 * (pmat.size + gamma_lane.size + beta_lane.size)
                      + 4 * npix * C)

    out2d = pl.pallas_call(
        _make_multi_scale_kernel(N, H, W, C, slots),
        out_shape=jax.ShapeDtypeStruct((NH, WC), jnp.float32),
        scratch_shapes=[
            pltpu.VMEM((N, H + 2 * _PH1, WC), jnp.float32),              # (k,1) halo
            pltpu.VMEM((N, H + 2 * _PH2, WC), jnp.float32),              # dilated-3x3 halo
            pltpu.VMEM((N, H + 2 * _PHC, _NUM_BRANCH * WC), jnp.float32),  # conv_cat input
        ],
        compiler_params=pltpu.CompilerParams(
            vmem_limit_bytes=32 * 1024 * 1024),
        cost_estimate=pl.CostEstimate(
            flops=int(flops),
            transcendentals=len(specs) * C,
            bytes_accessed=int(bytes_accessed)),
    )(x.reshape(NH, WC), wbuf, wcat, pmat, gamma_lane, beta_lane)
    return out2d.reshape(N, H, W, C)


# ------------------- host-side parameter construction -------------------

def init_multi_scale(key, in_channel, out_channel):
    # The residual adds (x + x_i) in the forward require in_channel == out_channel.
    assert in_channel == out_channel
    specs = _conv_specs(in_channel, out_channel)
    keys = jax.random.split(key, len(specs))
    weights = [
        jax.random.normal(kk, (kh, kw, cin, cout), jnp.float32)
        / float((kh * kw * cin) ** 0.5)
        for kk, (kh, kw, cin, cout) in zip(keys, specs)
    ]
    gamma = jnp.ones((len(specs), out_channel), jnp.float32)   # BN affine defaults
    beta = jnp.zeros((len(specs), out_channel), jnp.float32)
    return weights, gamma, beta


def pack_multi_scale_params(weights, gamma, beta, H, W):
    """Host-side prep: fold every conv into banded (W*C, W*C) bf16 matmul
    weights (W shifts + W zero-padding encoded in bands), pack them into one
    buffer, build the BN channel-pooling matrix, lane-broadcast gamma/beta."""
    C = int(weights[0].shape[-1])
    WC = W * C
    slots, n_slots = _slot_plan()
    w_np = [np.asarray(w, np.float32) for w in weights]

    def blockdiag(w2):                       # (C, C) -> (WC, WC)
        m = np.zeros((WC, WC), np.float32)
        for wi in range(W):
            m[wi * C:(wi + 1) * C, wi * C:(wi + 1) * C] = w2
        return m

    def banded(taps, offsets):               # taps: list of (C, C), offsets: w_in - w_out
        m = np.zeros((WC, WC), np.float32)
        for w_out in range(W):
            for tap, off in zip(taps, offsets):
                w_in = w_out + off
                if 0 <= w_in < W:
                    m[w_in * C:(w_in + 1) * C, w_out * C:(w_out + 1) * C] += tap
        return m

    wbuf = np.zeros((n_slots, WC, WC), np.float32)
    wbuf[slots[("b0",)]] = blockdiag(w_np[0][0, 0])
    for bi in range(1, 6):
        k = 2 * bi + 1
        base = 1 + (bi - 1) * 4
        wbuf[slots[("br", bi, "1x1")]] = blockdiag(w_np[base][0, 0])
        # (1, k) conv along W, padding bi: w_in = w_out + kw - bi
        wbuf[slots[("br", bi, "wk")]] = banded(
            [w_np[base + 1][0, kw] for kw in range(k)],
            [kw - bi for kw in range(k)])
        # (k, 1) conv along H: per-kh block diagonal
        for kh in range(k):
            wbuf[slots[("br", bi, "hk", kh)]] = blockdiag(w_np[base + 2][kh, 0])
        # 3x3 conv, pad = dilation = k: per-kh, W offsets (kw-1)*k
        for kh in range(3):
            wbuf[slots[("br", bi, "dil", kh)]] = banded(
                [w_np[base + 3][kh, kw] for kw in range(3)],
                [(kw - 1) * k for kw in range(3)])

    # conv_cat (3, 3, 6C, C) -> per-kh (6*WC, WC): branch b occupies rows
    # [b*WC, (b+1)*WC), matching branch b's 128-lane slice of the pe buffer.
    wc = w_np[-1]
    wcat = np.zeros((3, _NUM_BRANCH * WC, WC), np.float32)
    for kh in range(3):
        for b in range(_NUM_BRANCH):
            wcat[kh, b * WC:(b + 1) * WC, :] = banded(
                [wc[kh, kw, b * C:(b + 1) * C, :] for kw in range(3)],
                [kw - 1 for kw in range(3)])

    # BN channel-pooling matrix: pmat[i, j] = 1 iff lanes i, j hold the same channel.
    lane_c = np.arange(WC) % C
    pmat = (lane_c[:, None] == lane_c[None, :]).astype(np.float32)

    # gamma/beta broadcast to lane form (lane = w*C + c).
    gamma_lane = np.tile(np.asarray(gamma, np.float32), (1, W))
    beta_lane = np.tile(np.asarray(beta, np.float32), (1, W))

    return (jnp.asarray(wbuf, jnp.bfloat16),
            jnp.asarray(wcat, jnp.bfloat16),
            jnp.asarray(pmat, jnp.float32),
            jnp.asarray(gamma_lane, jnp.float32),
            jnp.asarray(beta_lane, jnp.float32))


if __name__ == "__main__":
    key = jax.random.PRNGKey(0)
    kx, kp = jax.random.split(key)

    # NHWC with W*C = 128 lanes (PyTorch NCHW equivalent: (2, 8, 16, 16)).
    N, H, W, C = 2, 16, 16, 8
    x = jax.random.normal(kx, (N, H, W, C), jnp.float32)
    weights, gamma, beta = init_multi_scale(kp, C, C)
    packed = pack_multi_scale_params(weights, gamma, beta, H, W)

    fwd = jax.jit(multi_scale_forward)
    out = fwd(x, *packed)
    jax.block_until_ready(out)

    assert out.shape == (N, H, W, C), out.shape
    assert bool(jnp.all(jnp.isfinite(out)))
    assert bool(jnp.all(out >= 0.0))   # ReLU output
    print("KERNEL_OK")
</pallas_src>

<mosaic_0001>
module attributes {stable_mosaic.version = 11 : i64} {
  func.func @kernel(%arg0: memref<32x128xf32, #tpu.memory_space<vmem>>, %arg1: memref<61x128x128xbf16, #tpu.memory_space<vmem>>, %arg2: memref<3x768x128xbf16, #tpu.memory_space<vmem>>, %arg3: memref<128x128xf32, #tpu.memory_space<vmem>>, %arg4: memref<22x128xf32, #tpu.memory_space<vmem>>, %arg5: memref<22x128xf32, #tpu.memory_space<vmem>>, %arg6: memref<32x128xf32, #tpu.memory_space<vmem>>, %arg7: memref<2x32x128xf32, #tpu.memory_space<vmem>>, %arg8: memref<2x48x128xf32, #tpu.memory_space<vmem>>, %arg9: memref<2x32x768xf32, #tpu.memory_space<vmem>>) attributes {dimension_semantics = [], scalar_prefetch = 0 : i64, scratch_operands = 3 : i64, tpu.core_type = #tpu.core_type<tc>} {
    %cst = arith.constant 0.000000e+00 : f32
    %0 = vector.broadcast %cst : f32 to vector<2x32x128xf32>
    %c0 = arith.constant 0 : index
    %c0_0 = arith.constant 0 : index
    %c0_1 = arith.constant 0 : index
    %1 = vector.load %arg7[%c0, %c0_0, %c0_1] : memref<2x32x128xf32, #tpu.memory_space<vmem>>, vector<2x32x128xf32>
    tpu.vector_store %arg7[%c0, %c0_0, %c0_1], %0 {strides = array<i32>} : memref<2x32x128xf32, #tpu.memory_space<vmem>>, vector<2x32x128xf32>,
    %cst_2 = arith.constant 0.000000e+00 : f32
    %2 = vector.broadcast %cst_2 : f32 to vector<2x48x128xf32>
    %c0_3 = arith.constant 0 : index
    %c0_4 = arith.constant 0 : index
    %c0_5 = arith.constant 0 : index
    %3 = vector.load %arg8[%c0_3, %c0_4, %c0_5] : memref<2x48x128xf32, #tpu.memory_space<vmem>>, vector<2x48x128xf32>
    tpu.vector_store %arg8[%c0_3, %c0_4, %c0_5], %2 {strides = array<i32>} : memref<2x48x128xf32, #tpu.memory_space<vmem>>, vector<2x48x128xf32>,
    %cst_6 = arith.constant 0.000000e+00 : f32
    %4 = vector.broadcast %cst_6 : f32 to vector<2x32x768xf32>
    %c0_7 = arith.constant 0 : index
    %c0_8 = arith.constant 0 : index
    %c0_9 = arith.constant 0 : index
    %5 = vector.load %arg9[%c0_7, %c0_8, %c0_9] : memref<2x32x768xf32, #tpu.memory_space<vmem>>, vector<2x32x768xf32>
    tpu.vector_store %arg9[%c0_7, %c0_8, %c0_9], %4 {strides = array<i32>} : memref<2x32x768xf32, #tpu.memory_space<vmem>>, vector<2x32x768xf32>,
    %c0_10 = arith.constant 0 : index
    %c0_11 = arith.constant 0 : index
    %6 = vector.load %arg3[%c0_10, %c0_11] : memref<128x128xf32, #tpu.memory_space<vmem>>, vector<128x128xf32>
    %c0_12 = arith.constant 0 : index
    %c0_13 = arith.constant 0 : index
    %7 = vector.load %arg0[%c0_12, %c0_13] : memref<32x128xf32, #tpu.memory_space<vmem>>, vector<32x128xf32>
    %8 = arith.truncf %7 : vector<32x128xf32> to vector<32x128xbf16>
    %c0_14 = arith.constant 0 : index
    %c0_15 = arith.constant 0 : index
    %c0_16 = arith.constant 0 : index
    %9 = vector.load %arg1[%c0_14, %c0_15, %c0_16] : memref<61x128x128xbf16, #tpu.memory_space<vmem>>, vector<1x128x128xbf16>
    %10 = vector.shape_cast %9 : vector<1x128x128xbf16> to vector<128x128xbf16>
    %cst_17 = arith.constant dense<0.000000e+00> : vector<32x128xf32>
    %11 = tpu.matmul %8, %10, %cst_17 {dimension_numbers = #tpu.dot_dimension_numbers<[1], [0], [0], [1], [0, 0, 1, 1], [], []>} : vector<32x128xbf16>, vector<128x128xbf16>, vector<32x128xf32> -> vector<32x128xf32>
    %cst_18 = arith.constant dense<0.000000e+00> : vector<32x128xf32>
    %12 = tpu.matmul %11, %6, %cst_18 {dimension_numbers = #tpu.dot_dimension_numbers<[1], [0], [0], [1], [0, 0, 1, 1], [], []>} : vector<32x128xf32>, vector<128x128xf32>, vector<32x128xf32> -> vector<32x128xf32>
    %cst_19 = arith.constant dense<0.000000e+00> : vector<128xf32>
    %13 = vector.multi_reduction <add>, %12, %cst_19 [0] : vector<32x128xf32> to vector<128xf32>
    %14 = vector.shape_cast %13 : vector<128xf32> to vector<1x128xf32>
    %cst_20 = arith.constant 0.001953125 : f32
    %15 = vector.broadcast %cst_20 : f32 to vector<1x128xf32>
    %16 = arith.mulf %14, %15 : vector<1x128xf32>
    %17 = vector.broadcast %16 : vector<1x128xf32> to vector<32x128xf32>
    %18 = arith.subf %11, %17 : vector<32x128xf32>
    %19 = arith.mulf %18, %18 : vector<32x128xf32>
    %cst_21 = arith.constant dense<0.000000e+00> : vector<32x128xf32>
    %20 = tpu.matmul %19, %6, %cst_21 {dimension_numbers = #tpu.dot_dimension_numbers<[1], [0], [0], [1], [0, 0, 1, 1], [], []>} : vector<32x128xf32>, vector<128x128xf32>, vector<32x128xf32> -> vector<32x128xf32>
    %cst_22 = arith.constant dense<0.000000e+00> : vector<128xf32>
    %21 = vector.multi_reduction <add>, %20, %cst_22 [0] : vector<32x128xf32> to vector<128xf32>
    %22 = vector.shape_cast %21 : vector<128xf32> to vector<1x128xf32>
    %cst_23 = arith.constant 0.001953125 : f32
    %23 = vector.broadcast %cst_23 : f32 to vector<1x128xf32>
    %24 = arith.mulf %22, %23 : vector<1x128xf32>
    %c0_24 = arith.constant 0 : index
    %c0_25 = arith.constant 0 : index
    %25 = vector.load %arg4[%c0_24, %c0_25] : memref<22x128xf32, #tpu.memory_space<vmem>>, vector<1x128xf32>
    %cst_26 = arith.constant 9.99999974E-6 : f32
    %26 = vector.broadcast %cst_26 : f32 to vector<1x128xf32>
    %27 = arith.addf %24, %26 : vector<1x128xf32>
    %28 = math.rsqrt %27 : vector<1x128xf32>
    %29 = arith.mulf %25, %28 : vector<1x128xf32>
    %c0_27 = arith.constant 0 : index
    %c0_28 = arith.constant 0 : index
    %30 = vector.load %arg5[%c0_27, %c0_28] : memref<22x128xf32, #tpu.memory_space<vmem>>, vector<1x128xf32>
    %31 = arith.mulf %16, %29 : vector<1x128xf32>
    %32 = arith.subf %30, %31 : vector<1x128xf32>
    %33 = vector.broadcast %29 : vector<1x128xf32> to vector<32x128xf32>
    %34 = arith.mulf %11, %33 : vector<32x128xf32>
    %35 = vector.broadcast %32 : vector<1x128xf32> to vector<32x128xf32>
    %36 = arith.addf %34, %35 : vector<32x128xf32>
    %cst_29 = arith.constant 0.000000e+00 : f32
    %37 = vector.broadcast %cst_29 : f32 to vector<32x128xf32>
    %38 = arith.maximumf %36, %37 : vector<32x128xf32>
    %39 = vector.shape_cast %38 : vector<32x128xf32> to vector<2x16x128xf32>
    %c0_30 = arith.constant 0 : index
    %c8 = arith.constant 8 : index
    %c0_31 = arith.constant 0 : index
    %40 = vector.load %arg9[%c0_30, %c8, %c0_31] : memref<2x32x768xf32, #tpu.memory_space<vmem>>, vector<2x16x128xf32>
    tpu.vector_store %arg9[%c0_30, %c8, %c0_31], %39 {strides = array<i32>} : memref<2x32x768xf32, #tpu.memory_space<vmem>>, vector<2x16x128xf32>,
    %41 = arith.addf %7, %38 : vector<32x128xf32>
    %42 = arith.truncf %41 : vector<32x128xf32> to vector<32x128xbf16>
    %c1 = arith.constant 1 : index
    %c0_32 = arith.constant 0 : index
    %c0_33 = arith.constant 0 : index
    %43 = vector.load %arg1[%c1, %c0_32, %c0_33] : memref<61x128x128xbf16, #tpu.memory_space<vmem>>, vector<1x128x128xbf16>
    %44 = vector.shape_cast %43 : vector<1x128x128xbf16> to vector<128x128xbf16>
    %cst_34 = arith.constant dense<0.000000e+00> : vector<32x128xf32>
    %45 = tpu.matmul %42, %44, %cst_34 {dimension_numbers = #tpu.dot_dimension_numbers<[1], [0], [0], [1], [0, 0, 1, 1], [], []>} : vector<32x128xbf16>, vector<128x128xbf16>, vector<32x128xf32> -> vector<32x128xf32>
    %cst_35 = arith.constant dense<0.000000e+00> : vector<32x128xf32>
    %46 = tpu.matmul %45, %6, %cst_35 {dimension_numbers = #tpu.dot_dimension_numbers<[1], [0], [0], [1], [0, 0, 1, 1], [], []>} : vector<32x128xf32>, vector<128x128xf32>, vector<32x128xf32> -> vector<32x128xf32>
    %cst_36 = arith.constant dense<0.000000e+00> : vector<128xf32>
    %47 = vector.multi_reduction <add>, %46, %cst_36 [0] : vector<32x128xf32> to vector<128xf32>
    %48 = vector.shape_cast %47 : vector<128xf32> to vector<1x128xf32>
    %cst_37 = arith.constant 0.001953125 : f32
    %49 = vector.broadcast %cst_37 : f32 to vector<1x128xf32>
    %50 = arith.mulf %48, %49 : vector<1x128xf32>
    %51 = vector.broadcast %50 : vector<1x128xf32> to vector<32x128xf32>
    %52 = arith.subf %45, %51 : vector<32x128xf32>
    %53 = arith.mulf %52, %52 : vector<32x128xf32>
    %cst_38 = arith.constant dense<0.000000e+00> : vector<32x128xf32>
    %54 = tpu.matmul %53, %6, %cst_38 {dimension_numbers = #tpu.dot_dimension_numbers<[1], [0], [0], [1], [0, 0, 1, 1], [], []>} : vector<32x128xf32>, vector<128x128xf32>, vector<32x128xf32> -> vector<32x128xf32>
    %cst_39 = arith.constant dense<0.000000e+00> : vector<128xf32>
    %55 = vector.multi_reduction <add>, %54, %cst_39 [0] : vector<32x128xf32> to vector<128xf32>
    %56 = vector.shape_cast %55 : vector<128xf32> to vector<1x128xf32>
    %cst_40 = arith.constant 0.001953125 : f32
    %57 = vector.broadcast %cst_40 : f32 to vector<1x128xf32>
    %58 = arith.mulf %56, %57 : vector<1x128xf32>
    %c1_41 = arith.constant 1 : index
    %c0_42 = arith.constant 0 : index
    %59 = vector.load %arg4[%c1_41, %c0_42] : memref<22x128xf32, #tpu.memory_space<vmem>>, vector<1x128xf32>
    %cst_43 = arith.constant 9.99999974E-6 : f32
    %60 = vector.broadcast %cst_43 : f32 to vector<1x128xf32>
    %61 = arith.addf %58, %60 : vector<1x128xf32>
    %62 = math.rsqrt %61 : vector<1x128xf32>
    %63 = arith.mulf %59, %62 : vector<1x128xf32>
    %c1_44 = arith.constant 1 : index
    %c0_45 = arith.constant 0 : index
    %64 = vector.load %arg5[%c1_44, %c0_45] : memref<22x128xf32, #tpu.memory_space<vmem>>, vector<1x128xf32>
    %65 = arith.mulf %50, %63 : vector<1x128xf32>
    %66 = arith.subf %64, %65 : vector<1x128xf32>
    %67 = vector.broadcast %63 : vector<1x128xf32> to vector<32x128xf32>
    %68 = arith.mulf %45, %67 : vector<32x128xf32>
    %69 = vector.broadcast %66 : vector<1x128xf32> to vector<32x128xf32>
    %70 = arith.addf %68, %69 : vector<32x128xf32>
    %cst_46 = arith.constant 0.000000e+00 : f32
    %71 = vector.broadcast %cst_46 : f32 to vector<32x128xf32>
    %72 = arith.maximumf %70, %71 : vector<32x128xf32>
    %73 = arith.truncf %72 : vector<32x128xf32> to vector<32x128xbf16>
    %c2 = arith.constant 2 : index
    %c0_47 = arith.constant 0 : index
    %c0_48 = arith.constant 0 : index
    %74 = vector.load %arg1[%c2, %c0_47, %c0_48] : memref<61x128x128xbf16, #tpu.memory_space<vmem>>, vector<1x128x128xbf16>
    %75 = vector.shape_cast %74 : vector<1x128x128xbf16> to vector<128x128xbf16>
    %cst_49 = arith.constant dense<0.000000e+00> : vector<32x128xf32>
    %76 = tpu.matmul %73, %75, %cst_49 {dimension_numbers = #tpu.dot_dimension_numbers<[1], [0], [0], [1], [0, 0, 1, 1], [], []>} : vector<32x128xbf16>, vector<128x128xbf16>, vector<32x128xf32> -> vector<32x128xf32>
    %cst_50 = arith.constant dense<0.000000e+00> : vector<32x128xf32>
    %77 = tpu.matmul %76, %6, %cst_50 {dimension_numbers = #tpu.dot_dimension_numbers<[1], [0], [0], [1], [0, 0, 1, 1], [], []>} : vector<32x128xf32>, vector<128x128xf32>, vector<32x128xf32> -> vector<32x128xf32>
    %cst_51 = arith.constant dense<0.000000e+00> : vector<128xf32>
    %78 = vector.multi_reduction <add>, %77, %cst_51 [0] : vector<32x128xf32> to vector<128xf32>
    %79 = vector.shape_cast %78 : vector<128xf32> to vector<1x128xf32>
    %cst_52 = arith.constant 0.001953125 : f32
    %80 = vector.broadcast %cst_52 : f32 to vector<1x128xf32>
    %81 = arith.mulf %79, %80 : vector<1x128xf32>
    %82 = vector.broadcast %81 : vector<1x128xf32> to vector<32x128xf32>
    %83 = arith.subf %76, %82 : vector<32x128xf32>
    %84 = arith.mulf %83, %83 : vector<32x128xf32>
    %cst_53 = arith.constant dense<0.000000e+00> : vector<32x128xf32>
    %85 = tpu.matmul %84, %6, %cst_53 {dimension_numbers = #tpu.dot_dimension_numbers<[1], [0], [0], [1], [0, 0, 1, 1], [], []>} : vector<32x128xf32>, vector<128x128xf32>, vector<32x128xf32> -> vector<32x128xf32>
    %cst_54 = arith.constant dense<0.000000e+00> : vector<128xf32>
    %86 = vector.multi_reduction <add>, %85, %cst_54 [0] : vector<32x128xf32> to vector<128xf32>
    %87 = vector.shape_cast %86 : vector<128xf32> to vector<1x128xf32>
    %cst_55 = arith.constant 0.001953125 : f32
    %88 = vector.broadcast %cst_55 : f32 to vector<1x128xf32>
    %89 = arith.mulf %87, %88 : vector<1x128xf32>
    %c2_56 = arith.constant 2 : index
    %c0_57 = arith.constant 0 : index
    %90 = vector.load %arg4[%c2_56, %c0_57] : memref<22x128xf32, #tpu.memory_space<vmem>>, vector<1x128xf32>
    %cst_58 = arith.constant 9.99999974E-6 : f32
    %91 = vector.broadcast %cst_58 : f32 to vector<1x128xf32>
    %92 = arith.addf %89, %91 : vector<1x128xf32>
    %93 = math.rsqrt %92 : vector<1x128xf32>
    %94 = arith.mulf %90, %93 : vector<1x128xf32>
    %c2_59 = arith.constant 2 : index
    %c0_60 = arith.constant 0 : index
    %95 = vector.load %arg5[%c2_59, %c0_60] : memref<22x128xf32, #tpu.memory_space<vmem>>, vector<1x128xf32>
    %96 = arith.mulf %81, %94 : vector<1x128xf32>
    %97 = arith.subf %95, %96 : vector<1x128xf32>
    %98 = vector.broadcast %94 : vector<1x128xf32> to vector<32x128xf32>
    %99 = arith.mulf %76, %98 : vector<32x128xf32>
    %100 = vector.broadcast %97 : vector<1x128xf32> to vector<32x128xf32>
    %101 = arith.addf %99, %100 : vector<32x128xf32>
    %cst_61 = arith.constant 0.000000e+00 : f32
    %102 = vector.broadcast %cst_61 : f32 to vector<32x128xf32>
    %103 = arith.maximumf %101, %102 : vector<32x128xf32>
    %104 = vector.shape_cast %103 : vector<32x128xf32> to vector<2x16x128xf32>
    %c0_62 = arith.constant 0 : index
    %c8_63 = arith.constant 8 : index
    %c0_64 = arith.constant 0 : index
    %105 = vector.load %arg7[%c0_62, %c8_63, %c0_64] : memref<2x32x128xf32, #tpu.memory_space<vmem>>, vector<2x16x128xf32>
    tpu.vector_store %arg7[%c0_62, %c8_63, %c0_64], %104 {strides = array<i32>} : memref<2x32x128xf32, #tpu.memory_space<vmem>>, vector<2x16x128xf32>,
    %c0_65 = arith.constant 0 : index
    %c7 = arith.constant 7 : index
    %c0_66 = arith.constant 0 : index
    %106 = vector.load %arg7[%c0_65, %c7, %c0_66] : memref<2x32x128xf32, #tpu.memory_space<vmem>>, vector<2x16x128xf32>
    %107 = vector.shape_cast %106 : vector<2x16x128xf32> to vector<32x128xf32>
    %108 = arith.truncf %107 : vector<32x128xf32> to vector<32x128xbf16>
    %c3 = arith.constant 3 : index
    %c0_67 = arith.constant 0 : index
    %c0_68 = arith.constant 0 : index
    %109 = vector.load %arg1[%c3, %c0_67, %c0_68] : memref<61x128x128xbf16, #tpu.memory_space<vmem>>, vector<1x128x128xbf16>
    %110 = vector.shape_cast %109 : vector<1x128x128xbf16> to vector<128x128xbf16>
    %cst_69 = arith.constant dense<0.000000e+00> : vector<32x128xf32>
    %111 = tpu.matmul %108, %110, %cst_69 {dimension_numbers = #tpu.dot_dimension_numbers<[1], [0], [0], [1], [0, 0, 1, 1], [], []>} : vector<32x128xbf16>, vector<128x128xbf16>, vector<32x128xf32> -> vector<32x128xf32>
    %c0_70 = arith.constant 0 : index
    %c8_71 = arith.constant 8 : index
    %c0_72 = arith.constant 0 : index
    %112 = vector.load %arg7[%c0_70, %c8_71, %c0_72] : memref<2x32x128xf32, #tpu.memory_space<vmem>>, vector<2x16x128xf32>
    %113 = vector.shape_cast %112 : vector<2x16x128xf32> to vector<32x128xf32>
    %114 = arith.truncf %113 : vector<32x128xf32> to vector<32x128xbf16>
    %c4 = arith.constant 4 : index
    %c0_73 = arith.constant 0 : index
    %c0_74 = arith.constant 0 : index
    %115 = vector.load %arg1[%c4, %c0_73, %c0_74] : memref<61x128x128xbf16, #tpu.memory_space<vmem>>, vector<1x128x128xbf16>
    %116 = vector.shape_cast %115 : vector<1x128x128xbf16> to vector<128x128xbf16>
    %cst_75 = arith.constant dense<0.000000e+00> : vector<32x128xf32>
    %117 = tpu.matmul %114, %116, %cst_75 {dimension_numbers = #tpu.dot_dimension_numbers<[1], [0], [0], [1], [0, 0, 1, 1], [], []>} : vector<32x128xbf16>, vector<128x128xbf16>, vector<32x128xf32> -> vector<32x128xf32>
    %118 = arith.addf %111, %117 : vector<32x128xf32>
    %c0_76 = arith.constant 0 : index
    %c9 = arith.constant 9 : index
    %c0_77 = arith.constant 0 : index
    %119 = vector.load %arg7[%c0_76, %c9, %c0_77] : memref<2x32x128xf32, #tpu.memory_space<vmem>>, vector<2x16x128xf32>
    %120 = vector.shape_cast %119 : vector<2x16x128xf32> to vector<32x128xf32>
    %121 = arith.truncf %120 : vector<32x128xf32> to vector<32x128xbf16>
    %c5 = arith.constant 5 : index
    %c0_78 = arith.constant 0 : index
    %c0_79 = arith.constant 0 : index
    %122 = vector.load %arg1[%c5, %c0_78, %c0_79] : memref<61x128x128xbf16, #tpu.memory_space<vmem>>, vector<1x128x128xbf16>
    %123 = vector.shape_cast %122 : vector<1x128x128xbf16> to vector<128x128xbf16>
    %cst_80 = arith.constant dense<0.000000e+00> : vector<32x128xf32>
    %124 = tpu.matmul %121, %123, %cst_80 {dimension_numbers = #tpu.dot_dimension_numbers<[1], [0], [0], [1], [0, 0, 1, 1], [], []>} : vector<32x128xbf16>, vector<128x128xbf16>, vector<32x128xf32> -> vector<32x128xf32>
    %125 = arith.addf %118, %124 : vector<32x128xf32>
    %cst_81 = arith.constant dense<0.000000e+00> : vector<32x128xf32>
    %126 = tpu.matmul %125, %6, %cst_81 {dimension_numbers = #tpu.dot_dimension_numbers<[1], [0], [0], [1], [0, 0, 1, 1], [], []>} : vector<32x128xf32>, vector<128x128xf32>, vector<32x128xf32> -> vector<32x128xf32>
    %cst_82 = arith.constant dense<0.000000e+00> : vector<128xf32>
    %127 = vector.multi_reduction <add>, %126, %cst_82 [0] : vector<32x128xf32> to vector<128xf32>
    %128 = vector.shape_cast %127 : vector<128xf32> to vector<1x128xf32>
    %cst_83 = arith.constant 0.001953125 : f32
    %129 = vector.broadcast %cst_83 : f32 to vector<1x128xf32>
    %130 = arith.mulf %128, %129 : vector<1x128xf32>
    %131 = vector.broadcast %130 : vector<1x128xf32> to vector<32x128xf32>
    %132 = arith.subf %125, %131 : vector<32x128xf32>
    %133 = arith.mulf %132, %132 : vector<32x128xf32>
    %cst_84 = arith.constant dense<0.000000e+00> : vector<32x128xf32>
    %134 = tpu.matmul %133, %6, %cst_84 {dimension_numbers = #tpu.dot_dimension_numbers<[1], [0], [0], [1], [0, 0, 1, 1], [], []>} : vector<32x128xf32>, vector<128x128xf32>, vector<32x128xf32> -> vector<32x128xf32>
    %cst_85 = arith.constant dense<0.000000e+00> : vector<128xf32>
    %135 = vector.multi_reduction <add>, %134, %cst_85 [0] : vector<32x128xf32> to vector<128xf32>
    %136 = vector.shape_cast %135 : vector<128xf32> to vector<1x128xf32>
    %cst_86 = arith.constant 0.001953125 : f32
    %137 = vector.broadcast %cst_86 : f32 to vector<1x128xf32>
    %138 = arith.mulf %136, %137 : vector<1x128xf32>
    %c3_87 = arith.constant 3 : index
    %c0_88 = arith.constant 0 : index
    %139 = vector.load %arg4[%c3_87, %c0_88] : memref<22x128xf32, #tpu.memory_space<vmem>>, vector<1x128xf32>
    %cst_89 = arith.constant 9.99999974E-6 : f32
    %140 = vector.broadcast %cst_89 : f32 to vector<1x128xf32>
    %141 = arith.addf %138, %140 : vector<1x128xf32>
    %142 = math.rsqrt %141 : vector<1x128xf32>
    %143 = arith.mulf %139, %142 : vector<1x128xf32>
    %c3_90 = arith.constant 3 : index
    %c0_91 = arith.constant 0 : index
    %144 = vector.load %arg5[%c3_90, %c0_91] : memref<22x128xf32, #tpu.memory_space<vmem>>, vector<1x128xf32>
    %145 = arith.mulf %130, %143 : vector<1x128xf32>
    %146 = arith.subf %144, %145 : vector<1x128xf32>
    %147 = vector.broadcast %143 : vector<1x128xf32> to vector<32x128xf32>
    %148 = arith.mulf %125, %147 : vector<32x128xf32>
    %149 = vector.broadcast %146 : vector<1x128xf32> to vector<32x128xf32>
    %150 = arith.addf %148, %149 : vector<32x128xf32>
    %cst_92 = arith.constant 0.000000e+00 : f32
    %151 = vector.broadcast %cst_92 : f32 to vector<32x128xf32>
    %152 = arith.maximumf %150, %151 : vector<32x128xf32>
    %153 = vector.shape_cast %152 : vector<32x128xf32> to vector<2x16x128xf32>
    %c0_93 = arith.constant 0 : index
    %c16 = arith.constant 16 : index
    %c0_94 = arith.constant 0 : index
    %154 = vector.load %arg8[%c0_93, %c16, %c0_94] : memref<2x48x128xf32, #tpu.memory_space<vmem>>, vector<2x16x128xf32>
    tpu.vector_store %arg8[%c0_93, %c16, %c0_94], %153 {strides = array<i32>} : memref<2x48x128xf32, #tpu.memory_space<vmem>>, vector<2x16x128xf32>,
    %c0_95 = arith.constant 0 : index
    %c13 = arith.constant 13 : index
    %c0_96 = arith.constant 0 : index
    %155 = vector.load %arg8[%c0_95, %c13, %c0_96] : memref<2x48x128xf32, #tpu.memory_space<vmem>>, vector<2x16x128xf32>
    %156 = vector.shape_cast %155 : vector<2x16x128xf32> to vector<32x128xf32>
    %157 = arith.truncf %156 : vector<32x128xf32> to vector<32x128xbf16>
    %c6 = arith.constant 6 : index
    %c0_97 = arith.constant 0 : index
    %c0_98 = arith.constant 0 : index
    %158 = vector.load %arg1[%c6, %c0_97, %c0_98] : memref<61x128x128xbf16, #tpu.memory_space<vmem>>, vector<1x128x128xbf16>
    %159 = vector.shape_cast %158 : vector<1x128x128xbf16> to vector<128x128xbf16>
    %cst_99 = arith.constant dense<0.000000e+00> : vector<32x128xf32>
    %160 = tpu.matmul %157, %159, %cst_99 {dimension_numbers = #tpu.dot_dimension_numbers<[1], [0], [0], [1], [0, 0, 1, 1], [], []>} : vector<32x128xbf16>, vector<128x128xbf16>, vector<32x128xf32> -> vector<32x128xf32>
    %c0_100 = arith.constant 0 : index
    %c16_101 = arith.constant 16 : index
    %c0_102 = arith.constant 0 : index
    %161 = vector.load %arg8[%c0_100, %c16_101, %c0_102] : memref<2x48x128xf32, #tpu.memory_space<vmem>>, vector<2x16x128xf32>
    %162 = vector.shape_cast %161 : vector<2x16x128xf32> to vector<32x128xf32>
    %163 = arith.truncf %162 : vector<32x128xf32> to vector<32x128xbf16>
    %c7_103 = arith.constant 7 : index
    %c0_104 = arith.constant 0 : index
    %c0_105 = arith.constant 0 : index
    %164 = vector.load %arg1[%c7_103, %c0_104, %c0_105] : memref<61x128x128xbf16, #tpu.memory_space<vmem>>, vector<1x128x128xbf16>
    %165 = vector.shape_cast %164 : vector<1x128x128xbf16> to vector<128x128xbf16>
    %cst_106 = arith.constant dense<0.000000e+00> : vector<32x128xf32>
    %166 = tpu.matmul %163, %165, %cst_106 {dimension_numbers = #tpu.dot_dimension_numbers<[1], [0], [0], [1], [0, 0, 1, 1], [], []>} : vector<32x128xbf16>, vector<128x128xbf16>, vector<32x128xf32> -> vector<32x128xf32>
    %167 = arith.addf %160, %166 : vector<32x128xf32>
    %c0_107 = arith.constant 0 : index
    %c19 = arith.constant 19 : index
    %c0_108 = arith.constant 0 : index
    %168 = vector.load %arg8[%c0_107, %c19, %c0_108] : memref<2x48x128xf32, #tpu.memory_space<vmem>>, vector<2x16x128xf32>
    %169 = vector.shape_cast %168 : vector<2x16x128xf32> to vector<32x128xf32>
    %170 = arith.truncf %169 : vector<32x128xf32> to vector<32x128xbf16>
    %c8_109 = arith.constant 8 : index
    %c0_110 = arith.constant 0 : index
    %c0_111 = arith.constant 0 : index
    %171 = vector.load %arg1[%c8_109, %c0_110, %c0_111] : memref<61x128x128xbf16, #tpu.memory_space<vmem>>, vector<1x128x128xbf16>
    %172 = vector.shape_cast %171 : vector<1x128x128xbf16> to vector<128x128xbf16>
    %cst_112 = arith.constant dense<0.000000e+00> : vector<32x128xf32>
    %173 = tpu.matmul %170, %172, %cst_112 {dimension_numbers = #tpu.dot_dimension_numbers<[1], [0], [0], [1], [0, 0, 1, 1], [], []>} : vector<32x128xbf16>, vector<128x128xbf16>, vector<32x128xf32> -> vector<32x128xf32>
    %174 = arith.addf %167, %173 : vector<32x128xf32>
    %cst_113 = arith.constant dense<0.000000e+00> : vector<32x128xf32>
    %175 = tpu.matmul %174, %6, %cst_113 {dimension_numbers = #tpu.dot_dimension_numbers<[1], [0], [0], [1], [0, 0, 1, 1], [], []>} : vector<32x128xf32>, vector<128x128xf32>, vector<32x128xf32> -> vector<32x128xf32>
    %cst_114 = arith.constant dense<0.000000e+00> : vector<128xf32>
    %176 = vector.multi_reduction <add>, %175, %cst_114 [0] : vector<32x128xf32> to vector<128xf32>
    %177 = vector.shape_cast %176 : vector<128xf32> to vector<1x128xf32>
    %cst_115 = arith.constant 0.001953125 : f32
    %178 = vector.broadcast %cst_115 : f32 to vector<1x128xf32>
    %179 = arith.mulf %177, %178 : vector<1x128xf32>
    %180 = vector.broadcast %179 : vector<1x128xf32> to vector<32x128xf32>
    %181 = arith.subf %174, %180 : vector<32x128xf32>
    %182 = arith.mulf %181, %181 : vector<32x128xf32>
    %cst_116 = arith.constant dense<0.000000e+00> : vector<32x128xf32>
    %183 = tpu.matmul %182, %6, %cst_116 {dimension_numbers = #tpu.dot_dimension_numbers<[1], [0], [0], [1], [0, 0, 1, 1], [], []>} : vector<32x128xf32>, vector<128x128xf32>, vector<32x128xf32> -> vector<32x128xf32>
    %cst_117 = arith.constant dense<0.000000e+00> : vector<128xf32>
    %184 = vector.multi_reduction <add>, %183, %cst_117 [0] : vector<32x128xf32> to vector<128xf32>
    %185 = vector.shape_cast %184 : vector<128xf32> to vector<1x128xf32>
    %cst_118 = arith.constant 0.001953125 : f32
    %186 = vector.broadcast %cst_118 : f32 to vector<1x128xf32>
    %187 = arith.mulf %185, %186 : vector<1x128xf32>
    %c4_119 = arith.constant 4 : index
    %c0_120 = arith.constant 0 : index
    %188 = vector.load %arg4[%c4_119, %c0_120] : memref<22x128xf32, #tpu.memory_space<vmem>>, vector<1x128xf32>
    %cst_121 = arith.constant 9.99999974E-6 : f32
    %189 = vector.broadcast %cst_121 : f32 to vector<1x128xf32>
    %190 = arith.addf %187, %189 : vector<1x128xf32>
    %191 = math.rsqrt %190 : vector<1x128xf32>
    %192 = arith.mulf %188, %191 : vector<1x128xf32>
    %c4_122 = arith.constant 4 : index
    %c0_123 = arith.constant 0 : index
    %193 = vector.load %arg5[%c4_122, %c0_123] : memref<22x128xf32, #tpu.memory_space<vmem>>, vector<1x128xf32>
    %194 = arith.mulf %179, %192 : vector<1x128xf32>
    %195 = arith.subf %193, %194 : vector<1x128xf32>
    %196 = vector.broadcast %192 : vector<1x128xf32> to vector<32x128xf32>
    %197 = arith.mulf %174, %196 : vector<32x128xf32>
    %198 = vector.broadcast %195 : vector<1x128xf32> to vector<32x128xf32>
    %199 = arith.addf %197, %198 : vector<32x128xf32>
    %cst_124 = arith.constant 0.000000e+00 : f32
    %200 = vector.broadcast %cst_124 : f32 to vector<32x128xf32>
    %201 = arith.maximumf %199, %200 : vector<32x128xf32>
    %202 = vector.shape_cast %201 : vector<32x128xf32> to vector<2x16x128xf32>
    %c0_125 = arith.constant 0 : index
    %c8_126 = arith.constant 8 : index
    %c128 = arith.constant 128 : index
    %203 = vector.load %arg9[%c0_125, %c8_126, %c128] : memref<2x32x768xf32, #tpu.memory_space<vmem>>, vector<2x16x128xf32>
    tpu.vector_store %arg9[%c0_125, %c8_126, %c128], %202 {strides = array<i32>} : memref<2x32x768xf32, #tpu.memory_space<vmem>>, vector<2x16x128xf32>,
    %204 = arith.addf %7, %201 : vector<32x128xf32>
    %205 = arith.truncf %204 : vector<32x128xf32> to vector<32x128xbf16>
    %c9_127 = arith.constant 9 : index
    %c0_128 = arith.constant 0 : index
    %c0_129 = arith.constant 0 : index
    %206 = vector.load %arg1[%c9_127, %c0_128, %c0_129] : memref<61x128x128xbf16, #tpu.memory_space<vmem>>, vector<1x128x128xbf16>
    %207 = vector.shape_cast %206 : vector<1x128x128xbf16> to vector<128x128xbf16>
    %cst_130 = arith.constant dense<0.000000e+00> : vector<32x128xf32>
    %208 = tpu.matmul %205, %207, %cst_130 {dimension_numbers = #tpu.dot_dimension_numbers<[1], [0], [0], [1], [0, 0, 1, 1], [], []>} : vector<32x128xbf16>, vector<128x128xbf16>, vector<32x128xf32> -> vector<32x128xf32>
    %cst_131 = arith.constant dense<0.000000e+00> : vector<32x128xf32>
    %209 = tpu.matmul %208, %6, %cst_131 {dimension_numbers = #tpu.dot_dimension_numbers<[1], [0], [0], [1], [0, 0, 1, 1], [], []>} : vector<32x128xf32>, vector<128x128xf32>, vector<32x128xf32> -> vector<32x128xf32>
    %cst_132 = arith.constant dense<0.000000e+00> : vector<128xf32>
    %210 = vector.multi_reduction <add>, %209, %cst_132 [0] : vector<32x128xf32> to vector<128xf32>
    %211 = vector.shape_cast %210 : vector<128xf32> to vector<1x128xf32>
    %cst_133 = arith.constant 0.001953125 : f32
    %212 = vector.broadcast %cst_133 : f32 to vector<1x128xf32>
    %213 = arith.mulf %211, %212 : vector<1x128xf32>
    %214 = vector.broadcast %213 : vector<1x128xf32> to vector<32x128xf32>
    %215 = arith.subf %208, %214 : vector<32x128xf32>
    %216 = arith.mulf %215, %215 : vector<32x128xf32>
    %cst_134 = arith.constant dense<0.000000e+00> : vector<32x128xf32>
    %217 = tpu.matmul %216, %6, %cst_134 {dimension_numbers = #tpu.dot_dimension_numbers<[1], [0], [0], [1], [0, 0, 1, 1], [], []>} : vector<32x128xf32>, vector<128x128xf32>, vector<32x128xf32> -> vector<32x128xf32>
    %cst_135 = arith.constant dense<0.000000e+00> : vector<128xf32>
    %218 = vector.multi_reduction <add>, %217, %cst_135 [0] : vector<32x128xf32> to vector<128xf32>
    %219 = vector.shape_cast %218 : vector<128xf32> to vector<1x128xf32>
    %cst_136 = arith.constant 0.001953125 : f32
    %220 = vector.broadcast %cst_136 : f32 to vector<1x128xf32>
    %221 = arith.mulf %219, %220 : vector<1x128xf32>
    %c5_137 = arith.constant 5 : index
    %c0_138 = arith.constant 0 : index
    %222 = vector.load %arg4[%c5_137, %c0_138] : memref<22x128xf32, #tpu.memory_space<vmem>>, vector<1x128xf32>
    %cst_139 = arith.constant 9.99999974E-6 : f32
    %223 = vector.broadcast %cst_139 : f32 to vector<1x128xf32>
    %224 = arith.addf %221, %223 : vector<1x128xf32>
    %225 = math.rsqrt %224 : vector<1x128xf32>
    %226 = arith.mulf %222, %225 : vector<1x128xf32>
    %c5_140 = arith.constant 5 : index
    %c0_141 = arith.constant 0 : index
    %227 = vector.load %arg5[%c5_140, %c0_141] : memref<22x128xf32, #tpu.memory_space<vmem>>, vector<1x128xf32>
    %228 = arith.mulf %213, %226 : vector<1x128xf32>
    %229 = arith.subf %227, %228 : vector<1x128xf32>
    %230 = vector.broadcast %226 : vector<1x128xf32> to vector<32x128xf32>
    %231 = arith.mulf %208, %230 : vector<32x128xf32>
    %232 = vector.broadcast %229 : vector<1x128xf32> to vector<32x128xf32>
    %233 = arith.addf %231, %232 : vector<32x128xf32>
    %cst_142 = arith.constant 0.000000e+00 : f32
    %234 = vector.broadcast %cst_142 : f32 to vector<32x128xf32>
    %235 = arith.maximumf %233, %234 : vector<32x128xf32>
    %236 = arith.truncf %235 : vector<32x128xf32> to vector<32x128xbf16>
    %c10 = arith.constant 10 : index
    %c0_143 = arith.constant 0 : index
    %c0_144 = arith.constant 0 : index
    %237 = vector.load %arg1[%c10, %c0_143, %c0_144] : memref<61x128x128xbf16, #tpu.memory_space<vmem>>, vector<1x128x128xbf16>
    %238 = vector.shape_cast %237 : vector<1x128x128xbf16> to vector<128x128xbf16>
    %cst_145 = arith.constant dense<0.000000e+00> : vector<32x128xf32>
    %239 = tpu.matmul %236, %238, %cst_145 {dimension_numbers = #tpu.dot_dimension_numbers<[1], [0], [0], [1], [0, 0, 1, 1], [], []>} : vector<32x128xbf16>, vector<128x128xbf16>, vector<32x128xf32> -> vector<32x128xf32>
    %cst_146 = arith.constant dense<0.000000e+00> : vector<32x128xf32>
    %240 = tpu.matmul %239, %6, %cst_146 {dimension_numbers = #tpu.dot_dimension_numbers<[1], [0], [0], [1], [0, 0, 1, 1], [], []>} : vector<32x128xf32>, vector<128x128xf32>, vector<32x128xf32> -> vector<32x128xf32>
    %cst_147 = arith.constant dense<0.000000e+00> : vector<128xf32>
    %241 = vector.multi_reduction <add>, %240, %cst_147 [0] : vector<32x128xf32> to vector<128xf32>
    %242 = vector.shape_cast %241 : vector<128xf32> to vector<1x128xf32>
    %cst_148 = arith.constant 0.001953125 : f32
    %243 = vector.broadcast %cst_148 : f32 to vector<1x128xf32>
    %244 = arith.mulf %242, %243 : vector<1x128xf32>
    %245 = vector.broadcast %244 : vector<1x128xf32> to vector<32x128xf32>
    %246 = arith.subf %239, %245 : vector<32x128xf32>
    %247 = arith.mulf %246, %246 : vector<32x128xf32>
    %cst_149 = arith.constant dense<0.000000e+00> : vector<32x128xf32>
    %248 = tpu.matmul %247, %6, %cst_149 {dimension_numbers = #tpu.dot_dimension_numbers<[1], [0], [0], [1], [0, 0, 1, 1], [], []>} : vector<32x128xf32>, vector<128x128xf32>, vector<32x128xf32> -> vector<32x128xf32>
    %cst_150 = arith.constant dense<0.000000e+00> : vector<128xf32>
    %249 = vector.multi_reduction <add>, %248, %cst_150 [0] : vector<32x128xf32> to vector<128xf32>
    %250 = vector.shape_cast %249 : vector<128xf32> to vector<1x128xf32>
    %cst_151 = arith.constant 0.001953125 : f32
    %251 = vector.broadcast %cst_151 : f32 to vector<1x128xf32>
    %252 = arith.mulf %250, %251 : vector<1x128xf32>
    %c6_152 = arith.constant 6 : index
    %c0_153 = arith.constant 0 : index
    %253 = vector.load %arg4[%c6_152, %c0_153] : memref<22x128xf32, #tpu.memory_space<vmem>>, vector<1x128xf32>
    %cst_154 = arith.constant 9.99999974E-6 : f32
    %254 = vector.broadcast %cst_154 : f32 to vector<1x128xf32>
    %255 = arith.addf %252, %254 : vector<1x128xf32>
    %256 = math.rsqrt %255 : vector<1x128xf32>
    %257 = arith.mulf %253, %256 : vector<1x128xf32>
    %c6_155 = arith.constant 6 : index
    %c0_156 = arith.constant 0 : index
    %258 = vector.load %arg5[%c6_155, %c0_156] : memref<22x128xf32, #tpu.memory_space<vmem>>, vector<1x128xf32>
    %259 = arith.mulf %244, %257 : vector<1x128xf32>
    %260 = arith.subf %258, %259 : vector<1x128xf32>
    %261 = vector.broadcast %257 : vector<1x128xf32> to vector<32x128xf32>
    %262 = arith.mulf %239, %261 : vector<32x128xf32>
    %263 = vector.broadcast %260 : vector<1x128xf32> to vector<32x128xf32>
    %264 = arith.addf %262, %263 : vector<32x128xf32>
    %cst_157 = arith.constant 0.000000e+00 : f32
    %265 = vector.broadcast %cst_157 : f32 to vector<32x128xf32>
    %266 = arith.maximumf %264, %265 : vector<32x128xf32>
    %267 = vector.shape_cast %266 : vector<32x128xf32> to vector<2x16x128xf32>
    %c0_158 = arith.constant 0 : index
    %c8_159 = arith.constant 8 : index
    %c0_160 = arith.constant 0 : index
    %268 = vector.load %arg7[%c0_158, %c8_159, %c0_160] : memref<2x32x128xf32, #tpu.memory_space<vmem>>, vector<2x16x128xf32>
    tpu.vector_store %arg7[%c0_158, %c8_159, %c0_160], %267 {strides = array<i32>} : memref<2x32x128xf32, #tpu.memory_space<vmem>>, vector<2x16x128xf32>,
    %c0_161 = arith.constant 0 : index
    %c6_162 = arith.constant 6 : index
    %c0_163 = arith.constant 0 : index
    %269 = vector.load %arg7[%c0_161, %c6_162, %c0_163] : memref<2x32x128xf32, #tpu.memory_space<vmem>>, vector<2x16x128xf32>
    %270 = vector.shape_cast %269 : vector<2x16x128xf32> to vector<32x128xf32>
    %271 = arith.truncf %270 : vector<32x128xf32> to vector<32x128xbf16>
    %c11 = arith.constant 11 : index
    %c0_164 = arith.constant 0 : index
    %c0_165 = arith.constant 0 : index
    %272 = vector.load %arg1[%c11, %c0_164, %c0_165] : memref<61x128x128xbf16, #tpu.memory_space<vmem>>, vector<1x128x128xbf16>
    %273 = vector.shape_cast %272 : vector<1x128x128xbf16> to vector<128x128xbf16>
    %cst_166 = arith.constant dense<0.000000e+00> : vector<32x128xf32>
    %274 = tpu.matmul %271, %273, %cst_166 {dimension_numbers = #tpu.dot_dimension_numbers<[1], [0], [0], [1], [0, 0, 1, 1], [], []>} : vector<32x128xbf16>, vector<128x128xbf16>, vector<32x128xf32> -> vector<32x128xf32>
    %c0_167 = arith.constant 0 : index
    %c7_168 = arith.constant 7 : index
    %c0_169 = arith.constant 0 : index
    %275 = vector.load %arg7[%c0_167, %c7_168, %c0_169] : memref<2x32x128xf32, #tpu.memory_space<vmem>>, vector<2x16x128xf32>
    %276 = vector.shape_cast %275 : vector<2x16x128xf32> to vector<32x128xf32>
    %277 = arith.truncf %276 : vector<32x128xf32> to vector<32x128xbf16>
    %c12 = arith.constant 12 : index
    %c0_170 = arith.constant 0 : index
    %c0_171 = arith.constant 0 : index
    %278 = vector.load %arg1[%c12, %c0_170, %c0_171] : memref<61x128x128xbf16, #tpu.memory_space<vmem>>, vector<1x128x128xbf16>
    %279 = vector.shape_cast %278 : vector<1x128x128xbf16> to vector<128x128xbf16>
    %cst_172 = arith.constant dense<0.000000e+00> : vector<32x128xf32>
    %280 = tpu.matmul %277, %279, %cst_172 {dimension_numbers = #tpu.dot_dimension_numbers<[1], [0], [0], [1], [0, 0, 1, 1], [], []>} : vector<32x128xbf16>, vector<128x128xbf16>, vector<32x128xf32> -> vector<32x128xf32>
    %281 = arith.addf %274, %280 : vector<32x128xf32>
    %c0_173 = arith.constant 0 : index
    %c8_174 = arith.constant 8 : index
    %c0_175 = arith.constant 0 : index
    %282 = vector.load %arg7[%c0_173, %c8_174, %c0_175] : memref<2x32x128xf32, #tpu.memory_space<vmem>>, vector<2x16x128xf32>
    %283 = vector.shape_cast %282 : vector<2x16x128xf32> to vector<32x128xf32>
    %284 = arith.truncf %283 : vector<32x128xf32> to vector<32x128xbf16>
    %c13_176 = arith.constant 13 : index
    %c0_177 = arith.constant 0 : index
    %c0_178 = arith.constant 0 : index
    %285 = vector.load %arg1[%c13_176, %c0_177, %c0_178] : memref<61x128x128xbf16, #tpu.memory_space<vmem>>, vector<1x128x128xbf16>
    %286 = vector.shape_cast %285 : vector<1x128x128xbf16> to vector<128x128xbf16>
    %cst_179 = arith.constant dense<0.000000e+00> : vector<32x128xf32>
    %287 = tpu.matmul %284, %286, %cst_179 {dimension_numbers = #tpu.dot_dimension_numbers<[1], [0], [0], [1], [0, 0, 1, 1], [], []>} : vector<32x128xbf16>, vector<128x128xbf16>, vector<32x128xf32> -> vector<32x128xf32>
    %288 = arith.addf %281, %287 : vector<32x128xf32>
    %c0_180 = arith.constant 0 : index
    %c9_181 = arith.constant 9 : index
    %c0_182 = arith.constant 0 : index
    %289 = vector.load %arg7[%c0_180, %c9_181, %c0_182] : memref<2x32x128xf32, #tpu.memory_space<vmem>>, vector<2x16x128xf32>
    %290 = vector.shape_cast %289 : vector<2x16x128xf32> to vector<32x128xf32>
    %291 = arith.truncf %290 : vector<32x128xf32> to vector<32x128xbf16>
    %c14 = arith.constant 14 : index
    %c0_183 = arith.constant 0 : index
    %c0_184 = arith.constant 0 : index
    %292 = vector.load %arg1[%c14, %c0_183, %c0_184] : memref<61x128x128xbf16, #tpu.memory_space<vmem>>, vector<1x128x128xbf16>
    %293 = vector.shape_cast %292 : vector<1x128x128xbf16> to vector<128x128xbf16>
    %cst_185 = arith.constant dense<0.000000e+00> : vector<32x128xf32>
    %294 = tpu.matmul %291, %293, %cst_185 {dimension_numbers = #tpu.dot_dimension_numbers<[1], [0], [0], [1], [0, 0, 1, 1], [], []>} : vector<32x128xbf16>, vector<128x128xbf16>, vector<32x128xf32> -> vector<32x128xf32>
    %295 = arith.addf %288, %294 : vector<32x128xf32>
    %c0_186 = arith.constant 0 : index
    %c10_187 = arith.constant 10 : index
    %c0_188 = arith.constant 0 : index
    %296 = vector.load %arg7[%c0_186, %c10_187, %c0_188] : memref<2x32x128xf32, #tpu.memory_space<vmem>>, vector<2x16x128xf32>
    %297 = vector.shape_cast %296 : vector<2x16x128xf32> to vector<32x128xf32>
    %298 = arith.truncf %297 : vector<32x128xf32> to vector<32x128xbf16>
    %c15 = arith.constant 15 : index
    %c0_189 = arith.constant 0 : index
    %c0_190 = arith.constant 0 : index
    %299 = vector.load %arg1[%c15, %c0_189, %c0_190] : memref<61x128x128xbf16, #tpu.memory_space<vmem>>, vector<1x128x128xbf16>
    %300 = vector.shape_cast %299 : vector<1x128x128xbf16> to vector<128x128xbf16>
    %cst_191 = arith.constant dense<0.000000e+00> : vector<32x128xf32>
    %301 = tpu.matmul %298, %300, %cst_191 {dimension_numbers = #tpu.dot_dimension_numbers<[1], [0], [0], [1], [0, 0, 1, 1], [], []>} : vector<32x128xbf16>, vector<128x128xbf16>, vector<32x128xf32> -> vector<32x128xf32>
    %302 = arith.addf %295, %301 : vector<32x128xf32>
    %cst_192 = arith.constant dense<0.000000e+00> : vector<32x128xf32>
    %303 = tpu.matmul %302, %6, %cst_192 {dimension_numbers = #tpu.dot_dimension_numbers<[1], [0], [0], [1], [0, 0, 1, 1], [], []>} : vector<32x128xf32>, vector<128x128xf32>, vector<32x128xf32> -> vector<32x128xf32>
    %cst_193 = arith.constant dense<0.000000e+00> : vector<128xf32>
    %304 = vector.multi_reduction <add>, %303, %cst_193 [0] : vector<32x128xf32> to vector<128xf32>
    %305 = vector.shape_cast %304 : vector<128xf32> to vector<1x128xf32>
    %cst_194 = arith.constant 0.001953125 : f32
    %306 = vector.broadcast %cst_194 : f32 to vector<1x128xf32>
    %307 = arith.mulf %305, %306 : vector<1x128xf32>
    %308 = vector.broadcast %307 : vector<1x128xf32> to vector<32x128xf32>
    %309 = arith.subf %302, %308 : vector<32x128xf32>
    %310 = arith.mulf %309, %309 : vector<32x128xf32>
    %cst_195 = arith.constant dense<0.000000e+00> : vector<32x128xf32>
    %311 = tpu.matmul %310, %6, %cst_195 {dimension_numbers = #tpu.dot_dimension_numbers<[1], [0], [0], [1], [0, 0, 1, 1], [], []>} : vector<32x128xf32>, vector<128x128xf32>, vector<32x128xf32> -> vector<32x128xf32>
    %cst_196 = arith.constant dense<0.000000e+00> : vector<128xf32>
    %312 = vector.multi_reduction <add>, %311, %cst_196 [0] : vector<32x128xf32> to vector<128xf32>
    %313 = vector.shape_cast %312 : vector<128xf32> to vector<1x128xf32>
    %cst_197 = arith.constant 0.001953125 : f32
    %314 = vector.broadcast %cst_197 : f32 to vector<1x128xf32>
    %315 = arith.mulf %313, %314 : vector<1x128xf32>
    %c7_198 = arith.constant 7 : index
    %c0_199 = arith.constant 0 : index
    %316 = vector.load %arg4[%c7_198, %c0_199] : memref<22x128xf32, #tpu.memory_space<vmem>>, vector<1x128xf32>
    %cst_200 = arith.constant 9.99999974E-6 : f32
    %317 = vector.broadcast %cst_200 : f32 to vector<1x128xf32>
    %318 = arith.addf %315, %317 : vector<1x128xf32>
    %319 = math.rsqrt %318 : vector<1x128xf32>
    %320 = arith.mulf %316, %319 : vector<1x128xf32>
    %c7_201 = arith.constant 7 : index
    %c0_202 = arith.constant 0 : index
    %321 = vector.load %arg5[%c7_201, %c0_202] : memref<22x128xf32, #tpu.memory_space<vmem>>, vector<1x128xf32>
    %322 = arith.mulf %307, %320 : vector<1x128xf32>
    %323 = arith.subf %321, %322 : vector<1x128xf32>
    %324 = vector.broadcast %320 : vector<1x128xf32> to vector<32x128xf32>
    %325 = arith.mulf %302, %324 : vector<32x128xf32>
    %326 = vector.broadcast %323 : vector<1x128xf32> to vector<32x128xf32>
    %327 = arith.addf %325, %326 : vector<32x128xf32>
    %cst_203 = arith.constant 0.000000e+00 : f32
    %328 = vector.broadcast %cst_203 : f32 to vector<32x128xf32>
    %329 = arith.maximumf %327, %328 : vector<32x128xf32>
    %330 = vector.shape_cast %329 : vector<32x128xf32> to vector<2x16x128xf32>
    %c0_204 = arith.constant 0 : index
    %c16_205 = arith.constant 16 : index
    %c0_206 = arith.constant 0 : index
    %331 = vector.load %arg8[%c0_204, %c16_205, %c0_206] : memref<2x48x128xf32, #tpu.memory_space<vmem>>, vector<2x16x128xf32>
    tpu.vector_store %arg8[%c0_204, %c16_205, %c0_206], %330 {strides = array<i32>} : memref<2x48x128xf32, #tpu.memory_space<vmem>>, vector<2x16x128xf32>,
    %c0_207 = arith.constant 0 : index
    %c11_208 = arith.constant 11 : index
    %c0_209 = arith.constant 0 : index
    %332 = vector.load %arg8[%c0_207, %c11_208, %c0_209] : memref<2x48x128xf32, #tpu.memory_space<vmem>>, vector<2x16x128xf32>
    %333 = vector.shape_cast %332 : vector<2x16x128xf32> to vector<32x128xf32>
    %334 = arith.truncf %333 : vector<32x128xf32> to vector<32x128xbf16>
    %c16_210 = arith.constant 16 : index
    %c0_211 = arith.constant 0 : index
    %c0_212 = arith.constant 0 : index
    %335 = vector.load %arg1[%c16_210, %c0_211, %c0_212] : memref<61x128x128xbf16, #tpu.memory_space<vmem>>, vector<1x128x128xbf16>
    %336 = vector.shape_cast %335 : vector<1x128x128xbf16> to vector<128x128xbf16>
    %cst_213 = arith.constant dense<0.000000e+00> : vector<32x128xf32>
    %337 = tpu.matmul %334, %336, %cst_213 {dimension_numbers = #tpu.dot_dimension_numbers<[1], [0], [0], [1], [0, 0, 1, 1], [], []>} : vector<32x128xbf16>, vector<128x128xbf16>, vector<32x128xf32> -> vector<32x128xf32>
    %c0_214 = arith.constant 0 : index
    %c16_215 = arith.constant 16 : index
    %c0_216 = arith.constant 0 : index
    %338 = vector.load %arg8[%c0_214, %c16_215, %c0_216] : memref<2x48x128xf32, #tpu.memory_space<vmem>>, vector<2x16x128xf32>
    %339 = vector.shape_cast %338 : vector<2x16x128xf32> to vector<32x128xf32>
    %340 = arith.truncf %339 : vector<32x128xf32> to vector<32x128xbf16>
    %c17 = arith.constant 17 : index
    %c0_217 = arith.constant 0 : index
    %c0_218 = arith.constant 0 : index
    %341 = vector.load %arg1[%c17, %c0_217, %c0_218] : memref<61x128x128xbf16, #tpu.memory_space<vmem>>, vector<1x128x128xbf16>
    %342 = vector.shape_cast %341 : vector<1x128x128xbf16> to vector<128x128xbf16>
    %cst_219 = arith.constant dense<0.000000e+00> : vector<32x128xf32>
    %343 = tpu.matmul %340, %342, %cst_219 {dimension_numbers = #tpu.dot_dimension_numbers<[1], [0], [0], [1], [0, 0, 1, 1], [], []>} : vector<32x128xbf16>, vector<128x128xbf16>, vector<32x128xf32> -> vector<32x128xf32>
    %344 = arith.addf %337, %343 : vector<32x128xf32>
    %c0_220 = arith.constant 0 : index
    %c21 = arith.constant 21 : index
    %c0_221 = arith.constant 0 : index
    %345 = vector.load %arg8[%c0_220, %c21, %c0_221] : memref<2x48x128xf32, #tpu.memory_space<vmem>>, vector<2x16x128xf32>
    %346 = vector.shape_cast %345 : vector<2x16x128xf32> to vector<32x128xf32>
    %347 = arith.truncf %346 : vector<32x128xf32> to vector<32x128xbf16>
    %c18 = arith.constant 18 : index
    %c0_222 = arith.constant 0 : index
    %c0_223 = arith.constant 0 : index
    %348 = vector.load %arg1[%c18, %c0_222, %c0_223] : memref<61x128x128xbf16, #tpu.memory_space<vmem>>, vector<1x128x128xbf16>
    %349 = vector.shape_cast %348 : vector<1x128x128xbf16> to vector<128x128xbf16>
    %cst_224 = arith.constant dense<0.000000e+00> : vector<32x128xf32>
    %350 = tpu.matmul %347, %349, %cst_224 {dimension_numbers = #tpu.dot_dimension_numbers<[1], [0], [0], [1], [0, 0, 1, 1], [], []>} : vector<32x128xbf16>, vector<128x128xbf16>, vector<32x128xf32> -> vector<32x128xf32>
    %351 = arith.addf %344, %350 : vector<32x128xf32>
    %cst_225 = arith.constant dense<0.000000e+00> : vector<32x128xf32>
    %352 = tpu.matmul %351, %6, %cst_225 {dimension_numbers = #tpu.dot_dimension_numbers<[1], [0], [0], [1], [0, 0, 1, 1], [], []>} : vector<32x128xf32>, vector<128x128xf32>, vector<32x128xf32> -> vector<32x128xf32>
    %cst_226 = arith.constant dense<0.000000e+00> : vector<128xf32>
    %353 = vector.multi_reduction <add>, %352, %cst_226 [0] : vector<32x128xf32> to vector<128xf32>
    %354 = vector.shape_cast %353 : vector<128xf32> to vector<1x128xf32>
    %cst_227 = arith.constant 0.001953125 : f32
    %355 = vector.broadcast %cst_227 : f32 to vector<1x128xf32>
    %356 = arith.mulf %354, %355 : vector<1x128xf32>
    %357 = vector.broadcast %356 : vector<1x128xf32> to vector<32x128xf32>
    %358 = arith.subf %351, %357 : vector<32x128xf32>
    %359 = arith.mulf %358, %358 : vector<32x128xf32>
    %cst_228 = arith.constant dense<0.000000e+00> : vector<32x128xf32>
    %360 = tpu.matmul %359, %6, %cst_228 {dimension_numbers = #tpu.dot_dimension_numbers<[1], [0], [0], [1], [0, 0, 1, 1], [], []>} : vector<32x128xf32>, vector<128x128xf32>, vector<32x128xf32> -> vector<32x128xf32>
    %cst_229 = arith.constant dense<0.000000e+00> : vector<128xf32>
    %361 = vector.multi_reduction <add>, %360, %cst_229 [0] : vector<32x128xf32> to vector<128xf32>
    %362 = vector.shape_cast %361 : vector<128xf32> to vector<1x128xf32>
    %cst_230 = arith.constant 0.001953125 : f32
    %363 = vector.broadcast %cst_230 : f32 to vector<1x128xf32>
    %364 = arith.mulf %362, %363 : vector<1x128xf32>
    %c8_231 = arith.constant 8 : index
    %c0_232 = arith.constant 0 : index
    %365 = vector.load %arg4[%c8_231, %c0_232] : memref<22x128xf32, #tpu.memory_space<vmem>>, vector<1x128xf32>
    %cst_233 = arith.constant 9.99999974E-6 : f32
    %366 = vector.broadcast %cst_233 : f32 to vector<1x128xf32>
    %367 = arith.addf %364, %366 : vector<1x128xf32>
    %368 = math.rsqrt %367 : vector<1x128xf32>
    %369 = arith.mulf %365, %368 : vector<1x128xf32>
    %c8_234 = arith.constant 8 : index
    %c0_235 = arith.constant 0 : index
    %370 = vector.load %arg5[%c8_234, %c0_235] : memref<22x128xf32, #tpu.memory_space<vmem>>, vector<1x128xf32>
    %371 = arith.mulf %356, %369 : vector<1x128xf32>
    %372 = arith.subf %370, %371 : vector<1x128xf32>
    %373 = vector.broadcast %369 : vector<1x128xf32> to vector<32x128xf32>
    %374 = arith.mulf %351, %373 : vector<32x128xf32>
    %375 = vector.broadcast %372 : vector<1x128xf32> to vector<32x128xf32>
    %376 = arith.addf %374, %375 : vector<32x128xf32>
    %cst_236 = arith.constant 0.000000e+00 : f32
    %377 = vector.broadcast %cst_236 : f32 to vector<32x128xf32>
    %378 = arith.maximumf %376, %377 : vector<32x128xf32>
    %379 = vector.shape_cast %378 : vector<32x128xf32> to vector<2x16x128xf32>
    %c0_237 = arith.constant 0 : index
    %c8_238 = arith.constant 8 : index
    %c256 = arith.constant 256 : index
    %380 = vector.load %arg9[%c0_237, %c8_238, %c256] : memref<2x32x768xf32, #tpu.memory_space<vmem>>, vector<2x16x128xf32>
    tpu.vector_store %arg9[%c0_237, %c8_238, %c256], %379 {strides = array<i32>} : memref<2x32x768xf32, #tpu.memory_space<vmem>>, vector<2x16x128xf32>,
    %381 = arith.addf %7, %378 : vector<32x128xf32>
    %382 = arith.truncf %381 : vector<32x128xf32> to vector<32x128xbf16>
    %c19_239 = arith.constant 19 : index
    %c0_240 = arith.constant 0 : index
    %c0_241 = arith.constant 0 : index
    %383 = vector.load %arg1[%c19_239, %c0_240, %c0_241] : memref<61x128x128xbf16, #tpu.memory_space<vmem>>, vector<1x128x128xbf16>
    %384 = vector.shape_cast %383 : vector<1x128x128xbf16> to vector<128x128xbf16>
    %cst_242 = arith.constant dense<0.000000e+00> : vector<32x128xf32>
    %385 = tpu.matmul %382, %384, %cst_242 {dimension_numbers = #tpu.dot_dimension_numbers<[1], [0], [0], [1], [0, 0, 1, 1], [], []>} : vector<32x128xbf16>, vector<128x128xbf16>, vector<32x128xf32> -> vector<32x128xf32>
    %cst_243 = arith.constant dense<0.000000e+00> : vector<32x128xf32>
    %386 = tpu.matmul %385, %6, %cst_243 {dimension_numbers = #tpu.dot_dimension_numbers<[1], [0], [0], [1], [0, 0, 1, 1], [], []>} : vector<32x128xf32>, vector<128x128xf32>, vector<32x128xf32> -> vector<32x128xf32>
    %cst_244 = arith.constant dense<0.000000e+00> : vector<128xf32>
    %387 = vector.multi_reduction <add>, %386, %cst_244 [0] : vector<32x128xf32> to vector<128xf32>
    %388 = vector.shape_cast %387 : vector<128xf32> to vector<1x128xf32>
    %cst_245 = arith.constant 0.001953125 : f32
    %389 = vector.broadcast %cst_245 : f32 to vector<1x128xf32>
    %390 = arith.mulf %388, %389 : vector<1x128xf32>
    %391 = vector.broadcast %390 : vector<1x128xf32> to vector<32x128xf32>
    %392 = arith.subf %385, %391 : vector<32x128xf32>
    %393 = arith.mulf %392, %392 : vector<32x128xf32>
    %cst_246 = arith.constant dense<0.000000e+00> : vector<32x128xf32>
    %394 = tpu.matmul %393, %6, %cst_246 {dimension_numbers = #tpu.dot_dimension_numbers<[1], [0], [0], [1], [0, 0, 1, 1], [], []>} : vector<32x128xf32>, vector<128x128xf32>, vector<32x128xf32> -> vector<32x128xf32>
    %cst_247 = arith.constant dense<0.000000e+00> : vector<128xf32>
    %395 = vector.multi_reduction <add>, %394, %cst_247 [0] : vector<32x128xf32> to vector<128xf32>
    %396 = vector.shape_cast %395 : vector<128xf32> to vector<1x128xf32>
    %cst_248 = arith.constant 0.001953125 : f32
    %397 = vector.broadcast %cst_248 : f32 to vector<1x128xf32>
    %398 = arith.mulf %396, %397 : vector<1x128xf32>
    %c9_249 = arith.constant 9 : index
    %c0_250 = arith.constant 0 : index
    %399 = vector.load %arg4[%c9_249, %c0_250] : memref<22x128xf32, #tpu.memory_space<vmem>>, vector<1x128xf32>
    %cst_251 = arith.constant 9.99999974E-6 : f32
    %400 = vector.broadcast %cst_251 : f32 to vector<1x128xf32>
    %401 = arith.addf %398, %400 : vector<1x128xf32>
    %402 = math.rsqrt %401 : vector<1x128xf32>
    %403 = arith.mulf %399, %402 : vector<1x128xf32>
    %c9_252 = arith.constant 9 : index
    %c0_253 = arith.constant 0 : index
    %404 = vector.load %arg5[%c9_252, %c0_253] : memref<22x128xf32, #tpu.memory_space<vmem>>, vector<1x128xf32>
    %405 = arith.mulf %390, %403 : vector<1x128xf32>
    %406 = arith.subf %404, %405 : vector<1x128xf32>
    %407 = vector.broadcast %403 : vector<1x128xf32> to vector<32x128xf32>
    %408 = arith.mulf %385, %407 : vector<32x128xf32>
    %409 = vector.broadcast %406 : vector<1x128xf32> to vector<32x128xf32>
    %410 = arith.addf %408, %409 : vector<32x128xf32>
    %cst_254 = arith.constant 0.000000e+00 : f32
    %411 = vector.broadcast %cst_254 : f32 to vector<32x128xf32>
    %412 = arith.maximumf %410, %411 : vector<32x128xf32>
    %413 = arith.truncf %412 : vector<32x128xf32> to vector<32x128xbf16>
    %c20 = arith.constant 20 : index
    %c0_255 = arith.constant 0 : index
    %c0_256 = arith.constant 0 : index
    %414 = vector.load %arg1[%c20, %c0_255, %c0_256] : memref<61x128x128xbf16, #tpu.memory_space<vmem>>, vector<1x128x128xbf16>
    %415 = vector.shape_cast %414 : vector<1x128x128xbf16> to vector<128x128xbf16>
    %cst_257 = arith.constant dense<0.000000e+00> : vector<32x128xf32>
    %416 = tpu.matmul %413, %415, %cst_257 {dimension_numbers = #tpu.dot_dimension_numbers<[1], [0], [0], [1], [0, 0, 1, 1], [], []>} : vector<32x128xbf16>, vector<128x128xbf16>, vector<32x128xf32> -> vector<32x128xf32>
    %cst_258 = arith.constant dense<0.000000e+00> : vector<32x128xf32>
    %417 = tpu.matmul %416, %6, %cst_258 {dimension_numbers = #tpu.dot_dimension_numbers<[1], [0], [0], [1], [0, 0, 1, 1], [], []>} : vector<32x128xf32>, vector<128x128xf32>, vector<32x128xf32> -> vector<32x128xf32>
    %cst_259 = arith.constant dense<0.000000e+00> : vector<128xf32>
    %418 = vector.multi_reduction <add>, %417, %cst_259 [0] : vector<32x128xf32> to vector<128xf32>
    %419 = vector.shape_cast %418 : vector<128xf32> to vector<1x128xf32>
    %cst_260 = arith.constant 0.001953125 : f32
    %420 = vector.broadcast %cst_260 : f32 to vector<1x128xf32>
    %421 = arith.mulf %419, %420 : vector<1x128xf32>
    %422 = vector.broadcast %421 : vector<1x128xf32> to vector<32x128xf32>
    %423 = arith.subf %416, %422 : vector<32x128xf32>
    %424 = arith.mulf %423, %423 : vector<32x128xf32>
    %cst_261 = arith.constant dense<0.000000e+00> : vector<32x128xf32>
    %425 = tpu.matmul %424, %6, %cst_261 {dimension_numbers = #tpu.dot_dimension_numbers<[1], [0], [0], [1], [0, 0, 1, 1], [], []>} : vector<32x128xf32>, vector<128x128xf32>, vector<32x128xf32> -> vector<32x128xf32>
    %cst_262 = arith.constant dense<0.000000e+00> : vector<128xf32>
    %426 = vector.multi_reduction <add>, %425, %cst_262 [0] : vector<32x128xf32> to vector<128xf32>
    %427 = vector.shape_cast %426 : vector<128xf32> to vector<1x128xf32>
    %cst_263 = arith.constant 0.001953125 : f32
    %428 = vector.broadcast %cst_263 : f32 to vector<1x128xf32>
    %429 = arith.mulf %427, %428 : vector<1x128xf32>
    %c10_264 = arith.constant 10 : index
    %c0_265 = arith.constant 0 : index
    %430 = vector.load %arg4[%c10_264, %c0_265] : memref<22x128xf32, #tpu.memory_space<vmem>>, vector<1x128xf32>
    %cst_266 = arith.constant 9.99999974E-6 : f32
    %431 = vector.broadcast %cst_266 : f32 to vector<1x128xf32>
    %432 = arith.addf %429, %431 : vector<1x128xf32>
    %433 = math.rsqrt %432 : vector<1x128xf32>
    %434 = arith.mulf %430, %433 : vector<1x128xf32>
    %c10_267 = arith.constant 10 : index
    %c0_268 = arith.constant 0 : index
    %435 = vector.load %arg5[%c10_267, %c0_268] : memref<22x128xf32, #tpu.memory_space<vmem>>, vector<1x128xf32>
    %436 = arith.mulf %421, %434 : vector<1x128xf32>
    %437 = arith.subf %435, %436 : vector<1x128xf32>
    %438 = vector.broadcast %434 : vector<1x128xf32> to vector<32x128xf32>
    %439 = arith.mulf %416, %438 : vector<32x128xf32>
    %440 = vector.broadcast %437 : vector<1x128xf32> to vector<32x128xf32>
    %441 = arith.addf %439, %440 : vector<32x128xf32>
    %cst_269 = arith.constant 0.000000e+00 : f32
    %442 = vector.broadcast %cst_269 : f32 to vector<32x128xf32>
    %443 = arith.maximumf %441, %442 : vector<32x128xf32>
    %444 = vector.shape_cast %443 : vector<32x128xf32> to vector<2x16x128xf32>
    %c0_270 = arith.constant 0 : index
    %c8_271 = arith.constant 8 : index
    %c0_272 = arith.constant 0 : index
    %445 = vector.load %arg7[%c0_270, %c8_271, %c0_272] : memref<2x32x128xf32, #tpu.memory_space<vmem>>, vector<2x16x128xf32>
    tpu.vector_store %arg7[%c0_270, %c8_271, %c0_272], %444 {strides = array<i32>} : memref<2x32x128xf32, #tpu.memory_space<vmem>>, vector<2x16x128xf32>,
    %c0_273 = arith.constant 0 : index
    %c5_274 = arith.constant 5 : index
    %c0_275 = arith.constant 0 : index
    %446 = vector.load %arg7[%c0_273, %c5_274, %c0_275] : memref<2x32x128xf32, #tpu.memory_space<vmem>>, vector<2x16x128xf32>
    %447 = vector.shape_cast %446 : vector<2x16x128xf32> to vector<32x128xf32>
    %448 = arith.truncf %447 : vector<32x128xf32> to vector<32x128xbf16>
    %c21_276 = arith.constant 21 : index
    %c0_277 = arith.constant 0 : index
    %c0_278 = arith.constant 0 : index
    %449 = vector.load %arg1[%c21_276, %c0_277, %c0_278] : memref<61x128x128xbf16, #tpu.memory_space<vmem>>, vector<1x128x128xbf16>
    %450 = vector.shape_cast %449 : vector<1x128x128xbf16> to vector<128x128xbf16>
    %cst_279 = arith.constant dense<0.000000e+00> : vector<32x128xf32>
    %451 = tpu.matmul %448, %450, %cst_279 {dimension_numbers = #tpu.dot_dimension_numbers<[1], [0], [0], [1], [0, 0, 1, 1], [], []>} : vector<32x128xbf16>, vector<128x128xbf16>, vector<32x128xf32> -> vector<32x128xf32>
    %c0_280 = arith.constant 0 : index
    %c6_281 = arith.constant 6 : index
    %c0_282 = arith.constant 0 : index
    %452 = vector.load %arg7[%c0_280, %c6_281, %c0_282] : memref<2x32x128xf32, #tpu.memory_space<vmem>>, vector<2x16x128xf32>
    %453 = vector.shape_cast %452 : vector<2x16x128xf32> to vector<32x128xf32>
    %454 = arith.truncf %453 : vector<32x128xf32> to vector<32x128xbf16>
    %c22 = arith.constant 22 : index
    %c0_283 = arith.constant 0 : index
    %c0_284 = arith.constant 0 : index
    %455 = vector.load %arg1[%c22, %c0_283, %c0_284] : memref<61x128x128xbf16, #tpu.memory_space<vmem>>, vector<1x128x128xbf16>
    %456 = vector.shape_cast %455 : vector<1x128x128xbf16> to vector<128x128xbf16>
    %cst_285 = arith.constant dense<0.000000e+00> : vector<32x128xf32>
    %457 = tpu.matmul %454, %456, %cst_285 {dimension_numbers = #tpu.dot_dimension_numbers<[1], [0], [0], [1], [0, 0, 1, 1], [], []>} : vector<32x128xbf16>, vector<128x128xbf16>, vector<32x128xf32> -> vector<32x128xf32>
    %458 = arith.addf %451, %457 : vector<32x128xf32>
    %c0_286 = arith.constant 0 : index
    %c7_287 = arith.constant 7 : index
    %c0_288 = arith.constant 0 : index
    %459 = vector.load %arg7[%c0_286, %c7_287, %c0_288] : memref<2x32x128xf32, #tpu.memory_space<vmem>>, vector<2x16x128xf32>
    %460 = vector.shape_cast %459 : vector<2x16x128xf32> to vector<32x128xf32>
    %461 = arith.truncf %460 : vector<32x128xf32> to vector<32x128xbf16>
    %c23 = arith.constant 23 : index
    %c0_289 = arith.constant 0 : index
    %c0_290 = arith.constant 0 : index
    %462 = vector.load %arg1[%c23, %c0_289, %c0_290] : memref<61x128x128xbf16, #tpu.memory_space<vmem>>, vector<1x128x128xbf16>
    %463 = vector.shape_cast %462 : vector<1x128x128xbf16> to vector<128x128xbf16>
    %cst_291 = arith.constant dense<0.000000e+00> : vector<32x128xf32>
    %464 = tpu.matmul %461, %463, %cst_291 {dimension_numbers = #tpu.dot_dimension_numbers<[1], [0], [0], [1], [0, 0, 1, 1], [], []>} : vector<32x128xbf16>, vector<128x128xbf16>, vector<32x128xf32> -> vector<32x128xf32>
    %465 = arith.addf %458, %464 : vector<32x128xf32>
    %c0_292 = arith.constant 0 : index
    %c8_293 = arith.constant 8 : index
    %c0_294 = arith.constant 0 : index
    %466 = vector.load %arg7[%c0_292, %c8_293, %c0_294] : memref<2x32x128xf32, #tpu.memory_space<vmem>>, vector<2x16x128xf32>
    %467 = vector.shape_cast %466 : vector<2x16x128xf32> to vector<32x128xf32>
    %468 = arith.truncf %467 : vector<32x128xf32> to vector<32x128xbf16>
    %c24 = arith.constant 24 : index
    %c0_295 = arith.constant 0 : index
    %c0_296 = arith.constant 0 : index
    %469 = vector.load %arg1[%c24, %c0_295, %c0_296] : memref<61x128x128xbf16, #tpu.memory_space<vmem>>, vector<1x128x128xbf16>
    %470 = vector.shape_cast %469 : vector<1x128x128xbf16> to vector<128x128xbf16>
    %cst_297 = arith.constant dense<0.000000e+00> : vector<32x128xf32>
    %471 = tpu.matmul %468, %470, %cst_297 {dimension_numbers = #tpu.dot_dimension_numbers<[1], [0], [0], [1], [0, 0, 1, 1], [], []>} : vector<32x128xbf16>, vector<128x128xbf16>, vector<32x128xf32> -> vector<32x128xf32>
    %472 = arith.addf %465, %471 : vector<32x128xf32>
    %c0_298 = arith.constant 0 : index
    %c9_299 = arith.constant 9 : index
    %c0_300 = arith.constant 0 : index
    %473 = vector.load %arg7[%c0_298, %c9_299, %c0_300] : memref<2x32x128xf32, #tpu.memory_space<vmem>>, vector<2x16x128xf32>
    %474 = vector.shape_cast %473 : vector<2x16x128xf32> to vector<32x128xf32>
    %475 = arith.truncf %474 : vector<32x128xf32> to vector<32x128xbf16>
    %c25 = arith.constant 25 : index
    %c0_301 = arith.constant 0 : index
    %c0_302 = arith.constant 0 : index
    %476 = vector.load %arg1[%c25, %c0_301, %c0_302] : memref<61x128x128xbf16, #tpu.memory_space<vmem>>, vector<1x128x128xbf16>
    %477 = vector.shape_cast %476 : vector<1x128x128xbf16> to vector<128x128xbf16>
    %cst_303 = arith.constant dense<0.000000e+00> : vector<32x128xf32>
    %478 = tpu.matmul %475, %477, %cst_303 {dimension_numbers = #tpu.dot_dimension_numbers<[1], [0], [0], [1], [0, 0, 1, 1], [], []>} : vector<32x128xbf16>, vector<128x128xbf16>, vector<32x128xf32> -> vector<32x128xf32>
    %479 = arith.addf %472, %478 : vector<32x128xf32>
    %c0_304 = arith.constant 0 : index
    %c10_305 = arith.constant 10 : index
    %c0_306 = arith.constant 0 : index
    %480 = vector.load %arg7[%c0_304, %c10_305, %c0_306] : memref<2x32x128xf32, #tpu.memory_space<vmem>>, vector<2x16x128xf32>
    %481 = vector.shape_cast %480 : vector<2x16x128xf32> to vector<32x128xf32>
    %482 = arith.truncf %481 : vector<32x128xf32> to vector<32x128xbf16>
    %c26 = arith.constant 26 : index
    %c0_307 = arith.constant 0 : index
    %c0_308 = arith.constant 0 : index
    %483 = vector.load %arg1[%c26, %c0_307, %c0_308] : memref<61x128x128xbf16, #tpu.memory_space<vmem>>, vector<1x128x128xbf16>
    %484 = vector.shape_cast %483 : vector<1x128x128xbf16> to vector<128x128xbf16>
    %cst_309 = arith.constant dense<0.000000e+00> : vector<32x128xf32>
    %485 = tpu.matmul %482, %484, %cst_309 {dimension_numbers = #tpu.dot_dimension_numbers<[1], [0], [0], [1], [0, 0, 1, 1], [], []>} : vector<32x128xbf16>, vector<128x128xbf16>, vector<32x128xf32> -> vector<32x128xf32>
    %486 = arith.addf %479, %485 : vector<32x128xf32>
    %c0_310 = arith.constant 0 : index
    %c11_311 = arith.constant 11 : index
    %c0_312 = arith.constant 0 : index
    %487 = vector.load %arg7[%c0_310, %c11_311, %c0_312] : memref<2x32x128xf32, #tpu.memory_space<vmem>>, vector<2x16x128xf32>
    %488 = vector.shape_cast %487 : vector<2x16x128xf32> to vector<32x128xf32>
    %489 = arith.truncf %488 : vector<32x128xf32> to vector<32x128xbf16>
    %c27 = arith.constant 27 : index
    %c0_313 = arith.constant 0 : index
    %c0_314 = arith.constant 0 : index
    %490 = vector.load %arg1[%c27, %c0_313, %c0_314] : memref<61x128x128xbf16, #tpu.memory_space<vmem>>, vector<1x128x128xbf16>
    %491 = vector.shape_cast %490 : vector<1x128x128xbf16> to vector<128x128xbf16>
    %cst_315 = arith.constant dense<0.000000e+00> : vector<32x128xf32>
    %492 = tpu.matmul %489, %491, %cst_315 {dimension_numbers = #tpu.dot_dimension_numbers<[1], [0], [0], [1], [0, 0, 1, 1], [], []>} : vector<32x128xbf16>, vector<128x128xbf16>, vector<32x128xf32> -> vector<32x128xf32>
    %493 = arith.addf %486, %492 : vector<32x128xf32>
    %cst_316 = arith.constant dense<0.000000e+00> : vector<32x128xf32>
    %494 = tpu.matmul %493, %6, %cst_316 {dimension_numbers = #tpu.dot_dimension_numbers<[1], [0], [0], [1], [0, 0, 1, 1], [], []>} : vector<32x128xf32>, vector<128x128xf32>, vector<32x128xf32> -> vector<32x128xf32>
    %cst_317 = arith.constant dense<0.000000e+00> : vector<128xf32>
    %495 = vector.multi_reduction <add>, %494, %cst_317 [0] : vector<32x128xf32> to vector<128xf32>
    %496 = vector.shape_cast %495 : vector<128xf32> to vector<1x128xf32>
    %cst_318 = arith.constant 0.001953125 : f32
    %497 = vector.broadcast %cst_318 : f32 to vector<1x128xf32>
    %498 = arith.mulf %496, %497 : vector<1x128xf32>
    %499 = vector.broadcast %498 : vector<1x128xf32> to vector<32x128xf32>
    %500 = arith.subf %493, %499 : vector<32x128xf32>
    %501 = arith.mulf %500, %500 : vector<32x128xf32>
    %cst_319 = arith.constant dense<0.000000e+00> : vector<32x128xf32>
    %502 = tpu.matmul %501, %6, %cst_319 {dimension_numbers = #tpu.dot_dimension_numbers<[1], [0], [0], [1], [0, 0, 1, 1], [], []>} : vector<32x128xf32>, vector<128x128xf32>, vector<32x128xf32> -> vector<32x128xf32>
    %cst_320 = arith.constant dense<0.000000e+00> : vector<128xf32>
    %503 = vector.multi_reduction <add>, %502, %cst_320 [0] : vector<32x128xf32> to vector<128xf32>
    %504 = vector.shape_cast %503 : vector<128xf32> to vector<1x128xf32>
    %cst_321 = arith.constant 0.001953125 : f32
    %505 = vector.broadcast %cst_321 : f32 to vector<1x128xf32>
    %506 = arith.mulf %504, %505 : vector<1x128xf32>
    %c11_322 = arith.constant 11 : index
    %c0_323 = arith.constant 0 : index
    %507 = vector.load %arg4[%c11_322, %c0_323] : memref<22x128xf32, #tpu.memory_space<vmem>>, vector<1x128xf32>
    %cst_324 = arith.constant 9.99999974E-6 : f32
    %508 = vector.broadcast %cst_324 : f32 to vector<1x128xf32>
    %509 = arith.addf %506, %508 : vector<1x128xf32>
    %510 = math.rsqrt %509 : vector<1x128xf32>
    %511 = arith.mulf %507, %510 : vector<1x128xf32>
    %c11_325 = arith.constant 11 : index
    %c0_326 = arith.constant 0 : index
    %512 = vector.load %arg5[%c11_325, %c0_326] : memref<22x128xf32, #tpu.memory_space<vmem>>, vector<1x128xf32>
    %513 = arith.mulf %498, %511 : vector<1x128xf32>
    %514 = arith.subf %512, %513 : vector<1x128xf32>
    %515 = vector.broadcast %511 : vector<1x128xf32> to vector<32x128xf32>
    %516 = arith.mulf %493, %515 : vector<32x128xf32>
    %517 = vector.broadcast %514 : vector<1x128xf32> to vector<32x128xf32>
    %518 = arith.addf %516, %517 : vector<32x128xf32>
    %cst_327 = arith.constant 0.000000e+00 : f32
    %519 = vector.broadcast %cst_327 : f32 to vector<32x128xf32>
    %520 = arith.maximumf %518, %519 : vector<32x128xf32>
    %521 = vector.shape_cast %520 : vector<32x128xf32> to vector<2x16x128xf32>
    %c0_328 = arith.constant 0 : index
    %c16_329 = arith.constant 16 : index
    %c0_330 = arith.constant 0 : index
    %522 = vector.load %arg8[%c0_328, %c16_329, %c0_330] : memref<2x48x128xf32, #tpu.memory_space<vmem>>, vector<2x16x128xf32>
    tpu.vector_store %arg8[%c0_328, %c16_329, %c0_330], %521 {strides = array<i32>} : memref<2x48x128xf32, #tpu.memory_space<vmem>>, vector<2x16x128xf32>,
    %c0_331 = arith.constant 0 : index
    %c9_332 = arith.constant 9 : index
    %c0_333 = arith.constant 0 : index
    %523 = vector.load %arg8[%c0_331, %c9_332, %c0_333] : memref<2x48x128xf32, #tpu.memory_space<vmem>>, vector<2x16x128xf32>
    %524 = vector.shape_cast %523 : vector<2x16x128xf32> to vector<32x128xf32>
    %525 = arith.truncf %524 : vector<32x128xf32> to vector<32x128xbf16>
    %c28 = arith.constant 28 : index
    %c0_334 = arith.constant 0 : index
    %c0_335 = arith.constant 0 : index
    %526 = vector.load %arg1[%c28, %c0_334, %c0_335] : memref<61x128x128xbf16, #tpu.memory_space<vmem>>, vector<1x128x128xbf16>
    %527 = vector.shape_cast %526 : vector<1x128x128xbf16> to vector<128x128xbf16>
    %cst_336 = arith.constant dense<0.000000e+00> : vector<32x128xf32>
    %528 = tpu.matmul %525, %527, %cst_336 {dimension_numbers = #tpu.dot_dimension_numbers<[1], [0], [0], [1], [0, 0, 1, 1], [], []>} : vector<32x128xbf16>, vector<128x128xbf16>, vector<32x128xf32> -> vector<32x128xf32>
    %c0_337 = arith.constant 0 : index
    %c16_338 = arith.constant 16 : index
    %c0_339 = arith.constant 0 : index
    %529 = vector.load %arg8[%c0_337, %c16_338, %c0_339] : memref<2x48x128xf32, #tpu.memory_space<vmem>>, vector<2x16x128xf32>
    %530 = vector.shape_cast %529 : vector<2x16x128xf32> to vector<32x128xf32>
    %531 = arith.truncf %530 : vector<32x128xf32> to vector<32x128xbf16>
    %c29 = arith.constant 29 : index
    %c0_340 = arith.constant 0 : index
    %c0_341 = arith.constant 0 : index
    %532 = vector.load %arg1[%c29, %c0_340, %c0_341] : memref<61x128x128xbf16, #tpu.memory_space<vmem>>, vector<1x128x128xbf16>
    %533 = vector.shape_cast %532 : vector<1x128x128xbf16> to vector<128x128xbf16>
    %cst_342 = arith.constant dense<0.000000e+00> : vector<32x128xf32>
    %534 = tpu.matmul %531, %533, %cst_342 {dimension_numbers = #tpu.dot_dimension_numbers<[1], [0], [0], [1], [0, 0, 1, 1], [], []>} : vector<32x128xbf16>, vector<128x128xbf16>, vector<32x128xf32> -> vector<32x128xf32>
    %535 = arith.addf %528, %534 : vector<32x128xf32>
    %c0_343 = arith.constant 0 : index
    %c23_344 = arith.constant 23 : index
    %c0_345 = arith.constant 0 : index
    %536 = vector.load %arg8[%c0_343, %c23_344, %c0_345] : memref<2x48x128xf32, #tpu.memory_space<vmem>>, vector<2x16x128xf32>
    %537 = vector.shape_cast %536 : vector<2x16x128xf32> to vector<32x128xf32>
    %538 = arith.truncf %537 : vector<32x128xf32> to vector<32x128xbf16>
    %c30 = arith.constant 30 : index
    %c0_346 = arith.constant 0 : index
    %c0_347 = arith.constant 0 : index
    %539 = vector.load %arg1[%c30, %c0_346, %c0_347] : memref<61x128x128xbf16, #tpu.memory_space<vmem>>, vector<1x128x128xbf16>
    %540 = vector.shape_cast %539 : vector<1x128x128xbf16> to vector<128x128xbf16>
    %cst_348 = arith.constant dense<0.000000e+00> : vector<32x128xf32>
    %541 = tpu.matmul %538, %540, %cst_348 {dimension_numbers = #tpu.dot_dimension_numbers<[1], [0], [0], [1], [0, 0, 1, 1], [], []>} : vector<32x128xbf16>, vector<128x128xbf16>, vector<32x128xf32> -> vector<32x128xf32>
    %542 = arith.addf %535, %541 : vector<32x128xf32>
    %cst_349 = arith.constant dense<0.000000e+00> : vector<32x128xf32>
    %543 = tpu.matmul %542, %6, %cst_349 {dimension_numbers = #tpu.dot_dimension_numbers<[1], [0], [0], [1], [0, 0, 1, 1], [], []>} : vector<32x128xf32>, vector<128x128xf32>, vector<32x128xf32> -> vector<32x128xf32>
    %cst_350 = arith.constant dense<0.000000e+00> : vector<128xf32>
    %544 = vector.multi_reduction <add>, %543, %cst_350 [0] : vector<32x128xf32> to vector<128xf32>
    %545 = vector.shape_cast %544 : vector<128xf32> to vector<1x128xf32>
    %cst_351 = arith.constant 0.001953125 : f32
    %546 = vector.broadcast %cst_351 : f32 to vector<1x128xf32>
    %547 = arith.mulf %545, %546 : vector<1x128xf32>
    %548 = vector.broadcast %547 : vector<1x128xf32> to vector<32x128xf32>
    %549 = arith.subf %542, %548 : vector<32x128xf32>
    %550 = arith.mulf %549, %549 : vector<32x128xf32>
    %cst_352 = arith.constant dense<0.000000e+00> : vector<32x128xf32>
    %551 = tpu.matmul %550, %6, %cst_352 {dimension_numbers = #tpu.dot_dimension_numbers<[1], [0], [0], [1], [0, 0, 1, 1], [], []>} : vector<32x128xf32>, vector<128x128xf32>, vector<32x128xf32> -> vector<32x128xf32>
    %cst_353 = arith.constant dense<0.000000e+00> : vector<128xf32>
    %552 = vector.multi_reduction <add>, %551, %cst_353 [0] : vector<32x128xf32> to vector<128xf32>
    %553 = vector.shape_cast %552 : vector<128xf32> to vector<1x128xf32>
    %cst_354 = arith.constant 0.001953125 : f32
    %554 = vector.broadcast %cst_354 : f32 to vector<1x128xf32>
    %555 = arith.mulf %553, %554 : vector<1x128xf32>
    %c12_355 = arith.constant 12 : index
    %c0_356 = arith.constant 0 : index
    %556 = vector.load %arg4[%c12_355, %c0_356] : memref<22x128xf32, #tpu.memory_space<vmem>>, vector<1x128xf32>
    %cst_357 = arith.constant 9.99999974E-6 : f32
    %557 = vector.broadcast %cst_357 : f32 to vector<1x128xf32>
    %558 = arith.addf %555, %557 : vector<1x128xf32>
    %559 = math.rsqrt %558 : vector<1x128xf32>
    %560 = arith.mulf %556, %559 : vector<1x128xf32>
    %c12_358 = arith.constant 12 : index
    %c0_359 = arith.constant 0 : index
    %561 = vector.load %arg5[%c12_358, %c0_359] : memref<22x128xf32, #tpu.memory_space<vmem>>, vector<1x128xf32>
    %562 = arith.mulf %547, %560 : vector<1x128xf32>
    %563 = arith.subf %561, %562 : vector<1x128xf32>
    %564 = vector.broadcast %560 : vector<1x128xf32> to vector<32x128xf32>
    %565 = arith.mulf %542, %564 : vector<32x128xf32>
    %566 = vector.broadcast %563 : vector<1x128xf32> to vector<32x128xf32>
    %567 = arith.addf %565, %566 : vector<32x128xf32>
    %cst_360 = arith.constant 0.000000e+00 : f32
    %568 = vector.broadcast %cst_360 : f32 to vector<32x128xf32>
    %569 = arith.maximumf %567, %568 : vector<32x128xf32>
    %570 = vector.shape_cast %569 : vector<32x128xf32> to vector<2x16x128xf32>
    %c0_361 = arith.constant 0 : index
    %c8_362 = arith.constant 8 : index
    %c384 = arith.constant 384 : index
    %571 = vector.load %arg9[%c0_361, %c8_362, %c384] : memref<2x32x768xf32, #tpu.memory_space<vmem>>, vector<2x16x128xf32>
    tpu.vector_store %arg9[%c0_361, %c8_362, %c384], %570 {strides = array<i32>} : memref<2x32x768xf32, #tpu.memory_space<vmem>>, vector<2x16x128xf32>,
    %572 = arith.addf %7, %569 : vector<32x128xf32>
    %573 = arith.truncf %572 : vector<32x128xf32> to vector<32x128xbf16>
    %c31 = arith.constant 31 : index
    %c0_363 = arith.constant 0 : index
    %c0_364 = arith.constant 0 : index
    %574 = vector.load %arg1[%c31, %c0_363, %c0_364] : memref<61x128x128xbf16, #tpu.memory_space<vmem>>, vector<1x128x128xbf16>
    %575 = vector.shape_cast %574 : vector<1x128x128xbf16> to vector<128x128xbf16>
    %cst_365 = arith.constant dense<0.000000e+00> : vector<32x128xf32>
    %576 = tpu.matmul %573, %575, %cst_365 {dimension_numbers = #tpu.dot_dimension_numbers<[1], [0], [0], [1], [0, 0, 1, 1], [], []>} : vector<32x128xbf16>, vector<128x128xbf16>, vector<32x128xf32> -> vector<32x128xf32>
    %cst_366 = arith.constant dense<0.000000e+00> : vector<32x128xf32>
    %577 = tpu.matmul %576, %6, %cst_366 {dimension_numbers = #tpu.dot_dimension_numbers<[1], [0], [0], [1], [0, 0, 1, 1], [], []>} : vector<32x128xf32>, vector<128x128xf32>, vector<32x128xf32> -> vector<32x128xf32>
    %cst_367 = arith.constant dense<0.000000e+00> : vector<128xf32>
    %578 = vector.multi_reduction <add>, %577, %cst_367 [0] : vector<32x128xf32> to vector<128xf32>
    %579 = vector.shape_cast %578 : vector<128xf32> to vector<1x128xf32>
    %cst_368 = arith.constant 0.001953125 : f32
    %580 = vector.broadcast %cst_368 : f32 to vector<1x128xf32>
    %581 = arith.mulf %579, %580 : vector<1x128xf32>
    %582 = vector.broadcast %581 : vector<1x128xf32> to vector<32x128xf32>
    %583 = arith.subf %576, %582 : vector<32x128xf32>
    %584 = arith.mulf %583, %583 : vector<32x128xf32>
    %cst_369 = arith.constant dense<0.000000e+00> : vector<32x128xf32>
    %585 = tpu.matmul %584, %6, %cst_369 {dimension_numbers = #tpu.dot_dimension_numbers<[1], [0], [0], [1], [0, 0, 1, 1], [], []>} : vector<32x128xf32>, vector<128x128xf32>, vector<32x128xf32> -> vector<32x128xf32>
    %cst_370 = arith.constant dense<0.000000e+00> : vector<128xf32>
    %586 = vector.multi_reduction <add>, %585, %cst_370 [0] : vector<32x128xf32> to vector<128xf32>
    %587 = vector.shape_cast %586 : vector<128xf32> to vector<1x128xf32>
    %cst_371 = arith.constant 0.001953125 : f32
    %588 = vector.broadcast %cst_371 : f32 to vector<1x128xf32>
    %589 = arith.mulf %587, %588 : vector<1x128xf32>
    %c13_372 = arith.constant 13 : index
    %c0_373 = arith.constant 0 : index
    %590 = vector.load %arg4[%c13_372, %c0_373] : memref<22x128xf32, #tpu.memory_space<vmem>>, vector<1x128xf32>
    %cst_374 = arith.constant 9.99999974E-6 : f32
    %591 = vector.broadcast %cst_374 : f32 to vector<1x128xf32>
    %592 = arith.addf %589, %591 : vector<1x128xf32>
    %593 = math.rsqrt %592 : vector<1x128xf32>
    %594 = arith.mulf %590, %593 : vector<1x128xf32>
    %c13_375 = arith.constant 13 : index
    %c0_376 = arith.constant 0 : index
    %595 = vector.load %arg5[%c13_375, %c0_376] : memref<22x128xf32, #tpu.memory_space<vmem>>, vector<1x128xf32>
    %596 = arith.mulf %581, %594 : vector<1x128xf32>
    %597 = arith.subf %595, %596 : vector<1x128xf32>
    %598 = vector.broadcast %594 : vector<1x128xf32> to vector<32x128xf32>
    %599 = arith.mulf %576, %598 : vector<32x128xf32>
    %600 = vector.broadcast %597 : vector<1x128xf32> to vector<32x128xf32>
    %601 = arith.addf %599, %600 : vector<32x128xf32>
    %cst_377 = arith.constant 0.000000e+00 : f32
    %602 = vector.broadcast %cst_377 : f32 to vector<32x128xf32>
    %603 = arith.maximumf %601, %602 : vector<32x128xf32>
    %604 = arith.truncf %603 : vector<32x128xf32> to vector<32x128xbf16>
    %c32 = arith.constant 32 : index
    %c0_378 = arith.constant 0 : index
    %c0_379 = arith.constant 0 : index
    %605 = vector.load %arg1[%c32, %c0_378, %c0_379] : memref<61x128x128xbf16, #tpu.memory_space<vmem>>, vector<1x128x128xbf16>
    %606 = vector.shape_cast %605 : vector<1x128x128xbf16> to vector<128x128xbf16>
    %cst_380 = arith.constant dense<0.000000e+00> : vector<32x128xf32>
    %607 = tpu.matmul %604, %606, %cst_380 {dimension_numbers = #tpu.dot_dimension_numbers<[1], [0], [0], [1], [0, 0, 1, 1], [], []>} : vector<32x128xbf16>, vector<128x128xbf16>, vector<32x128xf32> -> vector<32x128xf32>
    %cst_381 = arith.constant dense<0.000000e+00> : vector<32x128xf32>
    %608 = tpu.matmul %607, %6, %cst_381 {dimension_numbers = #tpu.dot_dimension_numbers<[1], [0], [0], [1], [0, 0, 1, 1], [], []>} : vector<32x128xf32>, vector<128x128xf32>, vector<32x128xf32> -> vector<32x128xf32>
    %cst_382 = arith.constant dense<0.000000e+00> : vector<128xf32>
    %609 = vector.multi_reduction <add>, %608, %cst_382 [0] : vector<32x128xf32> to vector<128xf32>
    %610 = vector.shape_cast %609 : vector<128xf32> to vector<1x128xf32>
    %cst_383 = arith.constant 0.001953125 : f32
    %611 = vector.broadcast %cst_383 : f32 to vector<1x128xf32>
    %612 = arith.mulf %610, %611 : vector<1x128xf32>
    %613 = vector.broadcast %612 : vector<1x128xf32> to vector<32x128xf32>
    %614 = arith.subf %607, %613 : vector<32x128xf32>
    %615 = arith.mulf %614, %614 : vector<32x128xf32>
    %cst_384 = arith.constant dense<0.000000e+00> : vector<32x128xf32>
    %616 = tpu.matmul %615, %6, %cst_384 {dimension_numbers = #tpu.dot_dimension_numbers<[1], [0], [0], [1], [0, 0, 1, 1], [], []>} : vector<32x128xf32>, vector<128x128xf32>, vector<32x128xf32> -> vector<32x128xf32>
    %cst_385 = arith.constant dense<0.000000e+00> : vector<128xf32>
    %617 = vector.multi_reduction <add>, %616, %cst_385 [0] : vector<32x128xf32> to vector<128xf32>
    %618 = vector.shape_cast %617 : vector<128xf32> to vector<1x128xf32>
    %cst_386 = arith.constant 0.001953125 : f32
    %619 = vector.broadcast %cst_386 : f32 to vector<1x128xf32>
    %620 = arith.mulf %618, %619 : vector<1x128xf32>
    %c14_387 = arith.constant 14 : index
    %c0_388 = arith.constant 0 : index
    %621 = vector.load %arg4[%c14_387, %c0_388] : memref<22x128xf32, #tpu.memory_space<vmem>>, vector<1x128xf32>
    %cst_389 = arith.constant 9.99999974E-6 : f32
    %622 = vector.broadcast %cst_389 : f32 to vector<1x128xf32>
    %623 = arith.addf %620, %622 : vector<1x128xf32>
    %624 = math.rsqrt %623 : vector<1x128xf32>
    %625 = arith.mulf %621, %624 : vector<1x128xf32>
    %c14_390 = arith.constant 14 : index
    %c0_391 = arith.constant 0 : index
    %626 = vector.load %arg5[%c14_390, %c0_391] : memref<22x128xf32, #tpu.memory_space<vmem>>, vector<1x128xf32>
    %627 = arith.mulf %612, %625 : vector<1x128xf32>
    %628 = arith.subf %626, %627 : vector<1x128xf32>
    %629 = vector.broadcast %625 : vector<1x128xf32> to vector<32x128xf32>
    %630 = arith.mulf %607, %629 : vector<32x128xf32>
    %631 = vector.broadcast %628 : vector<1x128xf32> to vector<32x128xf32>
    %632 = arith.addf %630, %631 : vector<32x128xf32>
    %cst_392 = arith.constant 0.000000e+00 : f32
    %633 = vector.broadcast %cst_392 : f32 to vector<32x128xf32>
    %634 = arith.maximumf %632, %633 : vector<32x128xf32>
    %635 = vector.shape_cast %634 : vector<32x128xf32> to vector<2x16x128xf32>
    %c0_393 = arith.constant 0 : index
    %c8_394 = arith.constant 8 : index
    %c0_395 = arith.constant 0 : index
    %636 = vector.load %arg7[%c0_393, %c8_394, %c0_395] : memref<2x32x128xf32, #tpu.memory_space<vmem>>, vector<2x16x128xf32>
    tpu.vector_store %arg7[%c0_393, %c8_394, %c0_395], %635 {strides = array<i32>} : memref<2x32x128xf32, #tpu.memory_space<vmem>>, vector<2x16x128xf32>,
    %c0_396 = arith.constant 0 : index
    %c4_397 = arith.constant 4 : index
    %c0_398 = arith.constant 0 : index
    %637 = vector.load %arg7[%c0_396, %c4_397, %c0_398] : memref<2x32x128xf32, #tpu.memory_space<vmem>>, vector<2x16x128xf32>
    %638 = vector.shape_cast %637 : vector<2x16x128xf32> to vector<32x128xf32>
    %639 = arith.truncf %638 : vector<32x128xf32> to vector<32x128xbf16>
    %c33 = arith.constant 33 : index
    %c0_399 = arith.constant 0 : index
    %c0_400 = arith.constant 0 : index
    %640 = vector.load %arg1[%c33, %c0_399, %c0_400] : memref<61x128x128xbf16, #tpu.memory_space<vmem>>, vector<1x128x128xbf16>
    %641 = vector.shape_cast %640 : vector<1x128x128xbf16> to vector<128x128xbf16>
    %cst_401 = arith.constant dense<0.000000e+00> : vector<32x128xf32>
    %642 = tpu.matmul %639, %641, %cst_401 {dimension_numbers = #tpu.dot_dimension_numbers<[1], [0], [0], [1], [0, 0, 1, 1], [], []>} : vector<32x128xbf16>, vector<128x128xbf16>, vector<32x128xf32> -> vector<32x128xf32>
    %c0_402 = arith.constant 0 : index
    %c5_403 = arith.constant 5 : index
    %c0_404 = arith.constant 0 : index
    %643 = vector.load %arg7[%c0_402, %c5_403, %c0_404] : memref<2x32x128xf32, #tpu.memory_space<vmem>>, vector<2x16x128xf32>
    %644 = vector.shape_cast %643 : vector<2x16x128xf32> to vector<32x128xf32>
    %645 = arith.truncf %644 : vector<32x128xf32> to vector<32x128xbf16>
    %c34 = arith.constant 34 : index
    %c0_405 = arith.constant 0 : index
    %c0_406 = arith.constant 0 : index
    %646 = vector.load %arg1[%c34, %c0_405, %c0_406] : memref<61x128x128xbf16, #tpu.memory_space<vmem>>, vector<1x128x128xbf16>
    %647 = vector.shape_cast %646 : vector<1x128x128xbf16> to vector<128x128xbf16>
    %cst_407 = arith.constant dense<0.000000e+00> : vector<32x128xf32>
    %648 = tpu.matmul %645, %647, %cst_407 {dimension_numbers = #tpu.dot_dimension_numbers<[1], [0], [0], [1], [0, 0, 1, 1], [], []>} : vector<32x128xbf16>, vector<128x128xbf16>, vector<32x128xf32> -> vector<32x128xf32>
    %649 = arith.addf %642, %648 : vector<32x128xf32>
    %c0_408 = arith.constant 0 : index
    %c6_409 = arith.constant 6 : index
    %c0_410 = arith.constant 0 : index
    %650 = vector.load %arg7[%c0_408, %c6_409, %c0_410] : memref<2x32x128xf32, #tpu.memory_space<vmem>>, vector<2x16x128xf32>
    %651 = vector.shape_cast %650 : vector<2x16x128xf32> to vector<32x128xf32>
    %652 = arith.truncf %651 : vector<32x128xf32> to vector<32x128xbf16>
    %c35 = arith.constant 35 : index
    %c0_411 = arith.constant 0 : index
    %c0_412 = arith.constant 0 : index
    %653 = vector.load %arg1[%c35, %c0_411, %c0_412] : memref<61x128x128xbf16, #tpu.memory_space<vmem>>, vector<1x128x128xbf16>
    %654 = vector.shape_cast %653 : vector<1x128x128xbf16> to vector<128x128xbf16>
    %cst_413 = arith.constant dense<0.000000e+00> : vector<32x128xf32>
    %655 = tpu.matmul %652, %654, %cst_413 {dimension_numbers = #tpu.dot_dimension_numbers<[1], [0], [0], [1], [0, 0, 1, 1], [], []>} : vector<32x128xbf16>, vector<128x128xbf16>, vector<32x128xf32> -> vector<32x128xf32>
    %656 = arith.addf %649, %655 : vector<32x128xf32>
    %c0_414 = arith.constant 0 : index
    %c7_415 = arith.constant 7 : index
    %c0_416 = arith.constant 0 : index
    %657 = vector.load %arg7[%c0_414, %c7_415, %c0_416] : memref<2x32x128xf32, #tpu.memory_space<vmem>>, vector<2x16x128xf32>
    %658 = vector.shape_cast %657 : vector<2x16x128xf32> to vector<32x128xf32>
    %659 = arith.truncf %658 : vector<32x128xf32> to vector<32x128xbf16>
    %c36 = arith.constant 36 : index
    %c0_417 = arith.constant 0 : index
    %c0_418 = arith.constant 0 : index
    %660 = vector.load %arg1[%c36, %c0_417, %c0_418] : memref<61x128x128xbf16, #tpu.memory_space<vmem>>, vector<1x128x128xbf16>
    %661 = vector.shape_cast %660 : vector<1x128x128xbf16> to vector<128x128xbf16>
    %cst_419 = arith.constant dense<0.000000e+00> : vector<32x128xf32>
    %662 = tpu.matmul %659, %661, %cst_419 {dimension_numbers = #tpu.dot_dimension_numbers<[1], [0], [0], [1], [0, 0, 1, 1], [], []>} : vector<32x128xbf16>, vector<128x128xbf16>, vector<32x128xf32> -> vector<32x128xf32>
    %663 = arith.addf %656, %662 : vector<32x128xf32>
    %c0_420 = arith.constant 0 : index
    %c8_421 = arith.constant 8 : index
    %c0_422 = arith.constant 0 : index
    %664 = vector.load %arg7[%c0_420, %c8_421, %c0_422] : memref<2x32x128xf32, #tpu.memory_space<vmem>>, vector<2x16x128xf32>
    %665 = vector.shape_cast %664 : vector<2x16x128xf32> to vector<32x128xf32>
    %666 = arith.truncf %665 : vector<32x128xf32> to vector<32x128xbf16>
    %c37 = arith.constant 37 : index
    %c0_423 = arith.constant 0 : index
    %c0_424 = arith.constant 0 : index
    %667 = vector.load %arg1[%c37, %c0_423, %c0_424] : memref<61x128x128xbf16, #tpu.memory_space<vmem>>, vector<1x128x128xbf16>
    %668 = vector.shape_cast %667 : vector<1x128x128xbf16> to vector<128x128xbf16>
    %cst_425 = arith.constant dense<0.000000e+00> : vector<32x128xf32>
    %669 = tpu.matmul %666, %668, %cst_425 {dimension_numbers = #tpu.dot_dimension_numbers<[1], [0], [0], [1], [0, 0, 1, 1], [], []>} : vector<32x128xbf16>, vector<128x128xbf16>, vector<32x128xf32> -> vector<32x128xf32>
    %670 = arith.addf %663, %669 : vector<32x128xf32>
    %c0_426 = arith.constant 0 : index
    %c9_427 = arith.constant 9 : index
    %c0_428 = arith.constant 0 : index
    %671 = vector.load %arg7[%c0_426, %c9_427, %c0_428] : memref<2x32x128xf32, #tpu.memory_space<vmem>>, vector<2x16x128xf32>
    %672 = vector.shape_cast %671 : vector<2x16x128xf32> to vector<32x128xf32>
    %673 = arith.truncf %672 : vector<32x128xf32> to vector<32x128xbf16>
    %c38 = arith.constant 38 : index
    %c0_429 = arith.constant 0 : index
    %c0_430 = arith.constant 0 : index
    %674 = vector.load %arg1[%c38, %c0_429, %c0_430] : memref<61x128x128xbf16, #tpu.memory_space<vmem>>, vector<1x128x128xbf16>
    %675 = vector.shape_cast %674 : vector<1x128x128xbf16> to vector<128x128xbf16>
    %cst_431 = arith.constant dense<0.000000e+00> : vector<32x128xf32>
    %676 = tpu.matmul %673, %675, %cst_431 {dimension_numbers = #tpu.dot_dimension_numbers<[1], [0], [0], [1], [0, 0, 1, 1], [], []>} : vector<32x128xbf16>, vector<128x128xbf16>, vector<32x128xf32> -> vector<32x128xf32>
    %677 = arith.addf %670, %676 : vector<32x128xf32>
    %c0_432 = arith.constant 0 : index
    %c10_433 = arith.constant 10 : index
    %c0_434 = arith.constant 0 : index
    %678 = vector.load %arg7[%c0_432, %c10_433, %c0_434] : memref<2x32x128xf32, #tpu.memory_space<vmem>>, vector<2x16x128xf32>
    %679 = vector.shape_cast %678 : vector<2x16x128xf32> to vector<32x128xf32>
    %680 = arith.truncf %679 : vector<32x128xf32> to vector<32x128xbf16>
    %c39 = arith.constant 39 : index
    %c0_435 = arith.constant 0 : index
    %c0_436 = arith.constant 0 : index
    %681 = vector.load %arg1[%c39, %c0_435, %c0_436] : memref<61x128x128xbf16, #tpu.memory_space<vmem>>, vector<1x128x128xbf16>
    %682 = vector.shape_cast %681 : vector<1x128x128xbf16> to vector<128x128xbf16>
    %cst_437 = arith.constant dense<0.000000e+00> : vector<32x128xf32>
    %683 = tpu.matmul %680, %682, %cst_437 {dimension_numbers = #tpu.dot_dimension_numbers<[1], [0], [0], [1], [0, 0, 1, 1], [], []>} : vector<32x128xbf16>, vector<128x128xbf16>, vector<32x128xf32> -> vector<32x128xf32>
    %684 = arith.addf %677, %683 : vector<32x128xf32>
    %c0_438 = arith.constant 0 : index
    %c11_439 = arith.constant 11 : index
    %c0_440 = arith.constant 0 : index
    %685 = vector.load %arg7[%c0_438, %c11_439, %c0_440] : memref<2x32x128xf32, #tpu.memory_space<vmem>>, vector<2x16x128xf32>
    %686 = vector.shape_cast %685 : vector<2x16x128xf32> to vector<32x128xf32>
    %687 = arith.truncf %686 : vector<32x128xf32> to vector<32x128xbf16>
    %c40 = arith.constant 40 : index
    %c0_441 = arith.constant 0 : index
    %c0_442 = arith.constant 0 : index
    %688 = vector.load %arg1[%c40, %c0_441, %c0_442] : memref<61x128x128xbf16, #tpu.memory_space<vmem>>, vector<1x128x128xbf16>
    %689 = vector.shape_cast %688 : vector<1x128x128xbf16> to vector<128x128xbf16>
    %cst_443 = arith.constant dense<0.000000e+00> : vector<32x128xf32>
    %690 = tpu.matmul %687, %689, %cst_443 {dimension_numbers = #tpu.dot_dimension_numbers<[1], [0], [0], [1], [0, 0, 1, 1], [], []>} : vector<32x128xbf16>, vector<128x128xbf16>, vector<32x128xf32> -> vector<32x128xf32>
    %691 = arith.addf %684, %690 : vector<32x128xf32>
    %c0_444 = arith.constant 0 : index
    %c12_445 = arith.constant 12 : index
    %c0_446 = arith.constant 0 : index
    %692 = vector.load %arg7[%c0_444, %c12_445, %c0_446] : memref<2x32x128xf32, #tpu.memory_space<vmem>>, vector<2x16x128xf32>
    %693 = vector.shape_cast %692 : vector<2x16x128xf32> to vector<32x128xf32>
    %694 = arith.truncf %693 : vector<32x128xf32> to vector<32x128xbf16>
    %c41 = arith.constant 41 : index
    %c0_447 = arith.constant 0 : index
    %c0_448 = arith.constant 0 : index
    %695 = vector.load %arg1[%c41, %c0_447, %c0_448] : memref<61x128x128xbf16, #tpu.memory_space<vmem>>, vector<1x128x128xbf16>
    %696 = vector.shape_cast %695 : vector<1x128x128xbf16> to vector<128x128xbf16>
    %cst_449 = arith.constant dense<0.000000e+00> : vector<32x128xf32>
    %697 = tpu.matmul %694, %696, %cst_449 {dimension_numbers = #tpu.dot_dimension_numbers<[1], [0], [0], [1], [0, 0, 1, 1], [], []>} : vector<32x128xbf16>, vector<128x128xbf16>, vector<32x128xf32> -> vector<32x128xf32>
    %698 = arith.addf %691, %697 : vector<32x128xf32>
    %cst_450 = arith.constant dense<0.000000e+00> : vector<32x128xf32>
    %699 = tpu.matmul %698, %6, %cst_450 {dimension_numbers = #tpu.dot_dimension_numbers<[1], [0], [0], [1], [0, 0, 1, 1], [], []>} : vector<32x128xf32>, vector<128x128xf32>, vector<32x128xf32> -> vector<32x128xf32>
    %cst_451 = arith.constant dense<0.000000e+00> : vector<128xf32>
    %700 = vector.multi_reduction <add>, %699, %cst_451 [0] : vector<32x128xf32> to vector<128xf32>
    %701 = vector.shape_cast %700 : vector<128xf32> to vector<1x128xf32>
    %cst_452 = arith.constant 0.001953125 : f32
    %702 = vector.broadcast %cst_452 : f32 to vector<1x128xf32>
    %703 = arith.mulf %701, %702 : vector<1x128xf32>
    %704 = vector.broadcast %703 : vector<1x128xf32> to vector<32x128xf32>
    %705 = arith.subf %698, %704 : vector<32x128xf32>
    %706 = arith.mulf %705, %705 : vector<32x128xf32>
    %cst_453 = arith.constant dense<0.000000e+00> : vector<32x128xf32>
    %707 = tpu.matmul %706, %6, %cst_453 {dimension_numbers = #tpu.dot_dimension_numbers<[1], [0], [0], [1], [0, 0, 1, 1], [], []>} : vector<32x128xf32>, vector<128x128xf32>, vector<32x128xf32> -> vector<32x128xf32>
    %cst_454 = arith.constant dense<0.000000e+00> : vector<128xf32>
    %708 = vector.multi_reduction <add>, %707, %cst_454 [0] : vector<32x128xf32> to vector<128xf32>
    %709 = vector.shape_cast %708 : vector<128xf32> to vector<1x128xf32>
    %cst_455 = arith.constant 0.001953125 : f32
    %710 = vector.broadcast %cst_455 : f32 to vector<1x128xf32>
    %711 = arith.mulf %709, %710 : vector<1x128xf32>
    %c15_456 = arith.constant 15 : index
    %c0_457 = arith.constant 0 : index
    %712 = vector.load %arg4[%c15_456, %c0_457] : memref<22x128xf32, #tpu.memory_space<vmem>>, vector<1x128xf32>
    %cst_458 = arith.constant 9.99999974E-6 : f32
    %713 = vector.broadcast %cst_458 : f32 to vector<1x128xf32>
    %714 = arith.addf %711, %713 : vector<1x128xf32>
    %715 = math.rsqrt %714 : vector<1x128xf32>
    %716 = arith.mulf %712, %715 : vector<1x128xf32>
    %c15_459 = arith.constant 15 : index
    %c0_460 = arith.constant 0 : index
    %717 = vector.load %arg5[%c15_459, %c0_460] : memref<22x128xf32, #tpu.memory_space<vmem>>, vector<1x128xf32>
    %718 = arith.mulf %703, %716 : vector<1x128xf32>
    %719 = arith.subf %717, %718 : vector<1x128xf32>
    %720 = vector.broadcast %716 : vector<1x128xf32> to vector<32x128xf32>
    %721 = arith.mulf %698, %720 : vector<32x128xf32>
    %722 = vector.broadcast %719 : vector<1x128xf32> to vector<32x128xf32>
    %723 = arith.addf %721, %722 : vector<32x128xf32>
    %cst_461 = arith.constant 0.000000e+00 : f32
    %724 = vector.broadcast %cst_461 : f32 to vector<32x128xf32>
    %725 = arith.maximumf %723, %724 : vector<32x128xf32>
    %726 = vector.shape_cast %725 : vector<32x128xf32> to vector<2x16x128xf32>
    %c0_462 = arith.constant 0 : index
    %c16_463 = arith.constant 16 : index
    %c0_464 = arith.constant 0 : index
    %727 = vector.load %arg8[%c0_462, %c16_463, %c0_464] : memref<2x48x128xf32, #tpu.memory_space<vmem>>, vector<2x16x128xf32>
    tpu.vector_store %arg8[%c0_462, %c16_463, %c0_464], %726 {strides = array<i32>} : memref<2x48x128xf32, #tpu.memory_space<vmem>>, vector<2x16x128xf32>,
    %c0_465 = arith.constant 0 : index
    %c7_466 = arith.constant 7 : index
    %c0_467 = arith.constant 0 : index
    %728 = vector.load %arg8[%c0_465, %c7_466, %c0_467] : memref<2x48x128xf32, #tpu.memory_space<vmem>>, vector<2x16x128xf32>
    %729 = vector.shape_cast %728 : vector<2x16x128xf32> to vector<32x128xf32>
    %730 = arith.truncf %729 : vector<32x128xf32> to vector<32x128xbf16>
    %c42 = arith.constant 42 : index
    %c0_468 = arith.constant 0 : index
    %c0_469 = arith.constant 0 : index
    %731 = vector.load %arg1[%c42, %c0_468, %c0_469] : memref<61x128x128xbf16, #tpu.memory_space<vmem>>, vector<1x128x128xbf16>
    %732 = vector.shape_cast %731 : vector<1x128x128xbf16> to vector<128x128xbf16>
    %cst_470 = arith.constant dense<0.000000e+00> : vector<32x128xf32>
    %733 = tpu.matmul %730, %732, %cst_470 {dimension_numbers = #tpu.dot_dimension_numbers<[1], [0], [0], [1], [0, 0, 1, 1], [], []>} : vector<32x128xbf16>, vector<128x128xbf16>, vector<32x128xf32> -> vector<32x128xf32>
    %c0_471 = arith.constant 0 : index
    %c16_472 = arith.constant 16 : index
    %c0_473 = arith.constant 0 : index
    %734 = vector.load %arg8[%c0_471, %c16_472, %c0_473] : memref<2x48x128xf32, #tpu.memory_space<vmem>>, vector<2x16x128xf32>
    %735 = vector.shape_cast %734 : vector<2x16x128xf32> to vector<32x128xf32>
    %736 = arith.truncf %735 : vector<32x128xf32> to vector<32x128xbf16>
    %c43 = arith.constant 43 : index
    %c0_474 = arith.constant 0 : index
    %c0_475 = arith.constant 0 : index
    %737 = vector.load %arg1[%c43, %c0_474, %c0_475] : memref<61x128x128xbf16, #tpu.memory_space<vmem>>, vector<1x128x128xbf16>
    %738 = vector.shape_cast %737 : vector<1x128x128xbf16> to vector<128x128xbf16>
    %cst_476 = arith.constant dense<0.000000e+00> : vector<32x128xf32>
    %739 = tpu.matmul %736, %738, %cst_476 {dimension_numbers = #tpu.dot_dimension_numbers<[1], [0], [0], [1], [0, 0, 1, 1], [], []>} : vector<32x128xbf16>, vector<128x128xbf16>, vector<32x128xf32> -> vector<32x128xf32>
    %740 = arith.addf %733, %739 : vector<32x128xf32>
    %c0_477 = arith.constant 0 : index
    %c25_478 = arith.constant 25 : index
    %c0_479 = arith.constant 0 : index
    %741 = vector.load %arg8[%c0_477, %c25_478, %c0_479] : memref<2x48x128xf32, #tpu.memory_space<vmem>>, vector<2x16x128xf32>
    %742 = vector.shape_cast %741 : vector<2x16x128xf32> to vector<32x128xf32>
    %743 = arith.truncf %742 : vector<32x128xf32> to vector<32x128xbf16>
    %c44 = arith.constant 44 : index
    %c0_480 = arith.constant 0 : index
    %c0_481 = arith.constant 0 : index
    %744 = vector.load %arg1[%c44, %c0_480, %c0_481] : memref<61x128x128xbf16, #tpu.memory_space<vmem>>, vector<1x128x128xbf16>
    %745 = vector.shape_cast %744 : vector<1x128x128xbf16> to vector<128x128xbf16>
    %cst_482 = arith.constant dense<0.000000e+00> : vector<32x128xf32>
    %746 = tpu.matmul %743, %745, %cst_482 {dimension_numbers = #tpu.dot_dimension_numbers<[1], [0], [0], [1], [0, 0, 1, 1], [], []>} : vector<32x128xbf16>, vector<128x128xbf16>, vector<32x128xf32> -> vector<32x128xf32>
    %747 = arith.addf %740, %746 : vector<32x128xf32>
    %cst_483 = arith.constant dense<0.000000e+00> : vector<32x128xf32>
    %748 = tpu.matmul %747, %6, %cst_483 {dimension_numbers = #tpu.dot_dimension_numbers<[1], [0], [0], [1], [0, 0, 1, 1], [], []>} : vector<32x128xf32>, vector<128x128xf32>, vector<32x128xf32> -> vector<32x128xf32>
    %cst_484 = arith.constant dense<0.000000e+00> : vector<128xf32>
    %749 = vector.multi_reduction <add>, %748, %cst_484 [0] : vector<32x128xf32> to vector<128xf32>
    %750 = vector.shape_cast %749 : vector<128xf32> to vector<1x128xf32>
    %cst_485 = arith.constant 0.001953125 : f32
    %751 = vector.broadcast %cst_485 : f32 to vector<1x128xf32>
    %752 = arith.mulf %750, %751 : vector<1x128xf32>
    %753 = vector.broadcast %752 : vector<1x128xf32> to vector<32x128xf32>
    %754 = arith.subf %747, %753 : vector<32x128xf32>
    %755 = arith.mulf %754, %754 : vector<32x128xf32>
    %cst_486 = arith.constant dense<0.000000e+00> : vector<32x128xf32>
    %756 = tpu.matmul %755, %6, %cst_486 {dimension_numbers = #tpu.dot_dimension_numbers<[1], [0], [0], [1], [0, 0, 1, 1], [], []>} : vector<32x128xf32>, vector<128x128xf32>, vector<32x128xf32> -> vector<32x128xf32>
    %cst_487 = arith.constant dense<0.000000e+00> : vector<128xf32>
    %757 = vector.multi_reduction <add>, %756, %cst_487 [0] : vector<32x128xf32> to vector<128xf32>
    %758 = vector.shape_cast %757 : vector<128xf32> to vector<1x128xf32>
    %cst_488 = arith.constant 0.001953125 : f32
    %759 = vector.broadcast %cst_488 : f32 to vector<1x128xf32>
    %760 = arith.mulf %758, %759 : vector<1x128xf32>
    %c16_489 = arith.constant 16 : index
    %c0_490 = arith.constant 0 : index
    %761 = vector.load %arg4[%c16_489, %c0_490] : memref<22x128xf32, #tpu.memory_space<vmem>>, vector<1x128xf32>
    %cst_491 = arith.constant 9.99999974E-6 : f32
    %762 = vector.broadcast %cst_491 : f32 to vector<1x128xf32>
    %763 = arith.addf %760, %762 : vector<1x128xf32>
    %764 = math.rsqrt %763 : vector<1x128xf32>
    %765 = arith.mulf %761, %764 : vector<1x128xf32>
    %c16_492 = arith.constant 16 : index
    %c0_493 = arith.constant 0 : index
    %766 = vector.load %arg5[%c16_492, %c0_493] : memref<22x128xf32, #tpu.memory_space<vmem>>, vector<1x128xf32>
    %767 = arith.mulf %752, %765 : vector<1x128xf32>
    %768 = arith.subf %766, %767 : vector<1x128xf32>
    %769 = vector.broadcast %765 : vector<1x128xf32> to vector<32x128xf32>
    %770 = arith.mulf %747, %769 : vector<32x128xf32>
    %771 = vector.broadcast %768 : vector<1x128xf32> to vector<32x128xf32>
    %772 = arith.addf %770, %771 : vector<32x128xf32>
    %cst_494 = arith.constant 0.000000e+00 : f32
    %773 = vector.broadcast %cst_494 : f32 to vector<32x128xf32>
    %774 = arith.maximumf %772, %773 : vector<32x128xf32>
    %775 = vector.shape_cast %774 : vector<32x128xf32> to vector<2x16x128xf32>
    %c0_495 = arith.constant 0 : index
    %c8_496 = arith.constant 8 : index
    %c512 = arith.constant 512 : index
    %776 = vector.load %arg9[%c0_495, %c8_496, %c512] : memref<2x32x768xf32, #tpu.memory_space<vmem>>, vector<2x16x128xf32>
    tpu.vector_store %arg9[%c0_495, %c8_496, %c512], %775 {strides = array<i32>} : memref<2x32x768xf32, #tpu.memory_space<vmem>>, vector<2x16x128xf32>,
    %777 = arith.addf %7, %774 : vector<32x128xf32>
    %778 = arith.truncf %777 : vector<32x128xf32> to vector<32x128xbf16>
    %c45 = arith.constant 45 : index
    %c0_497 = arith.constant 0 : index
    %c0_498 = arith.constant 0 : index
    %779 = vector.load %arg1[%c45, %c0_497, %c0_498] : memref<61x128x128xbf16, #tpu.memory_space<vmem>>, vector<1x128x128xbf16>
    %780 = vector.shape_cast %779 : vector<1x128x128xbf16> to vector<128x128xbf16>
    %cst_499 = arith.constant dense<0.000000e+00> : vector<32x128xf32>
    %781 = tpu.matmul %778, %780, %cst_499 {dimension_numbers = #tpu.dot_dimension_numbers<[1], [0], [0], [1], [0, 0, 1, 1], [], []>} : vector<32x128xbf16>, vector<128x128xbf16>, vector<32x128xf32> -> vector<32x128xf32>
    %cst_500 = arith.constant dense<0.000000e+00> : vector<32x128xf32>
    %782 = tpu.matmul %781, %6, %cst_500 {dimension_numbers = #tpu.dot_dimension_numbers<[1], [0], [0], [1], [0, 0, 1, 1], [], []>} : vector<32x128xf32>, vector<128x128xf32>, vector<32x128xf32> -> vector<32x128xf32>
    %cst_501 = arith.constant dense<0.000000e+00> : vector<128xf32>
    %783 = vector.multi_reduction <add>, %782, %cst_501 [0] : vector<32x128xf32> to vector<128xf32>
    %784 = vector.shape_cast %783 : vector<128xf32> to vector<1x128xf32>
    %cst_502 = arith.constant 0.001953125 : f32
    %785 = vector.broadcast %cst_502 : f32 to vector<1x128xf32>
    %786 = arith.mulf %784, %785 : vector<1x128xf32>
    %787 = vector.broadcast %786 : vector<1x128xf32> to vector<32x128xf32>
    %788 = arith.subf %781, %787 : vector<32x128xf32>
    %789 = arith.mulf %788, %788 : vector<32x128xf32>
    %cst_503 = arith.constant dense<0.000000e+00> : vector<32x128xf32>
    %790 = tpu.matmul %789, %6, %cst_503 {dimension_numbers = #tpu.dot_dimension_numbers<[1], [0], [0], [1], [0, 0, 1, 1], [], []>} : vector<32x128xf32>, vector<128x128xf32>, vector<32x128xf32> -> vector<32x128xf32>
    %cst_504 = arith.constant dense<0.000000e+00> : vector<128xf32>
    %791 = vector.multi_reduction <add>, %790, %cst_504 [0] : vector<32x128xf32> to vector<128xf32>
    %792 = vector.shape_cast %791 : vector<128xf32> to vector<1x128xf32>
    %cst_505 = arith.constant 0.001953125 : f32
    %793 = vector.broadcast %cst_505 : f32 to vector<1x128xf32>
    %794 = arith.mulf %792, %793 : vector<1x128xf32>
    %c17_506 = arith.constant 17 : index
    %c0_507 = arith.constant 0 : index
    %795 = vector.load %arg4[%c17_506, %c0_507] : memref<22x128xf32, #tpu.memory_space<vmem>>, vector<1x128xf32>
    %cst_508 = arith.constant 9.99999974E-6 : f32
    %796 = vector.broadcast %cst_508 : f32 to vector<1x128xf32>
    %797 = arith.addf %794, %796 : vector<1x128xf32>
    %798 = math.rsqrt %797 : vector<1x128xf32>
    %799 = arith.mulf %795, %798 : vector<1x128xf32>
    %c17_509 = arith.constant 17 : index
    %c0_510 = arith.constant 0 : index
    %800 = vector.load %arg5[%c17_509, %c0_510] : memref<22x128xf32, #tpu.memory_space<vmem>>, vector<1x128xf32>
    %801 = arith.mulf %786, %799 : vector<1x128xf32>
    %802 = arith.subf %800, %801 : vector<1x128xf32>
    %803 = vector.broadcast %799 : vector<1x128xf32> to vector<32x128xf32>
    %804 = arith.mulf %781, %803 : vector<32x128xf32>
    %805 = vector.broadcast %802 : vector<1x128xf32> to vector<32x128xf32>
    %806 = arith.addf %804, %805 : vector<32x128xf32>
    %cst_511 = arith.constant 0.000000e+00 : f32
    %807 = vector.broadcast %cst_511 : f32 to vector<32x128xf32>
    %808 = arith.maximumf %806, %807 : vector<32x128xf32>
    %809 = arith.truncf %808 : vector<32x128xf32> to vector<32x128xbf16>
    %c46 = arith.constant 46 : index
    %c0_512 = arith.constant 0 : index
    %c0_513 = arith.constant 0 : index
    %810 = vector.load %arg1[%c46, %c0_512, %c0_513] : memref<61x128x128xbf16, #tpu.memory_space<vmem>>, vector<1x128x128xbf16>
    %811 = vector.shape_cast %810 : vector<1x128x128xbf16> to vector<128x128xbf16>
    %cst_514 = arith.constant dense<0.000000e+00> : vector<32x128xf32>
    %812 = tpu.matmul %809, %811, %cst_514 {dimension_numbers = #tpu.dot_dimension_numbers<[1], [0], [0], [1], [0, 0, 1, 1], [], []>} : vector<32x128xbf16>, vector<128x128xbf16>, vector<32x128xf32> -> vector<32x128xf32>
    %cst_515 = arith.constant dense<0.000000e+00> : vector<32x128xf32>
    %813 = tpu.matmul %812, %6, %cst_515 {dimension_numbers = #tpu.dot_dimension_numbers<[1], [0], [0], [1], [0, 0, 1, 1], [], []>} : vector<32x128xf32>, vector<128x128xf32>, vector<32x128xf32> -> vector<32x128xf32>
    %cst_516 = arith.constant dense<0.000000e+00> : vector<128xf32>
    %814 = vector.multi_reduction <add>, %813, %cst_516 [0] : vector<32x128xf32> to vector<128xf32>
    %815 = vector.shape_cast %814 : vector<128xf32> to vector<1x128xf32>
    %cst_517 = arith.constant 0.001953125 : f32
    %816 = vector.broadcast %cst_517 : f32 to vector<1x128xf32>
    %817 = arith.mulf %815, %816 : vector<1x128xf32>
    %818 = vector.broadcast %817 : vector<1x128xf32> to vector<32x128xf32>
    %819 = arith.subf %812, %818 : vector<32x128xf32>
    %820 = arith.mulf %819, %819 : vector<32x128xf32>
    %cst_518 = arith.constant dense<0.000000e+00> : vector<32x128xf32>
    %821 = tpu.matmul %820, %6, %cst_518 {dimension_numbers = #tpu.dot_dimension_numbers<[1], [0], [0], [1], [0, 0, 1, 1], [], []>} : vector<32x128xf32>, vector<128x128xf32>, vector<32x128xf32> -> vector<32x128xf32>
    %cst_519 = arith.constant dense<0.000000e+00> : vector<128xf32>
    %822 = vector.multi_reduction <add>, %821, %cst_519 [0] : vector<32x128xf32> to vector<128xf32>
    %823 = vector.shape_cast %822 : vector<128xf32> to vector<1x128xf32>
    %cst_520 = arith.constant 0.001953125 : f32
    %824 = vector.broadcast %cst_520 : f32 to vector<1x128xf32>
    %825 = arith.mulf %823, %824 : vector<1x128xf32>
    %c18_521 = arith.constant 18 : index
    %c0_522 = arith.constant 0 : index
    %826 = vector.load %arg4[%c18_521, %c0_522] : memref<22x128xf32, #tpu.memory_space<vmem>>, vector<1x128xf32>
    %cst_523 = arith.constant 9.99999974E-6 : f32
    %827 = vector.broadcast %cst_523 : f32 to vector<1x128xf32>
    %828 = arith.addf %825, %827 : vector<1x128xf32>
    %829 = math.rsqrt %828 : vector<1x128xf32>
    %830 = arith.mulf %826, %829 : vector<1x128xf32>
    %c18_524 = arith.constant 18 : index
    %c0_525 = arith.constant 0 : index
    %831 = vector.load %arg5[%c18_524, %c0_525] : memref<22x128xf32, #tpu.memory_space<vmem>>, vector<1x128xf32>
    %832 = arith.mulf %817, %830 : vector<1x128xf32>
    %833 = arith.subf %831, %832 : vector<1x128xf32>
    %834 = vector.broadcast %830 : vector<1x128xf32> to vector<32x128xf32>
    %835 = arith.mulf %812, %834 : vector<32x128xf32>
    %836 = vector.broadcast %833 : vector<1x128xf32> to vector<32x128xf32>
    %837 = arith.addf %835, %836 : vector<32x128xf32>
    %cst_526 = arith.constant 0.000000e+00 : f32
    %838 = vector.broadcast %cst_526 : f32 to vector<32x128xf32>
    %839 = arith.maximumf %837, %838 : vector<32x128xf32>
    %840 = vector.shape_cast %839 : vector<32x128xf32> to vector<2x16x128xf32>
    %c0_527 = arith.constant 0 : index
    %c8_528 = arith.constant 8 : index
    %c0_529 = arith.constant 0 : index
    %841 = vector.load %arg7[%c0_527, %c8_528, %c0_529] : memref<2x32x128xf32, #tpu.memory_space<vmem>>, vector<2x16x128xf32>
    tpu.vector_store %arg7[%c0_527, %c8_528, %c0_529], %840 {strides = array<i32>} : memref<2x32x128xf32, #tpu.memory_space<vmem>>, vector<2x16x128xf32>,
    %c0_530 = arith.constant 0 : index
    %c3_531 = arith.constant 3 : index
    %c0_532 = arith.constant 0 : index
    %842 = vector.load %arg7[%c0_530, %c3_531, %c0_532] : memref<2x32x128xf32, #tpu.memory_space<vmem>>, vector<2x16x128xf32>
    %843 = vector.shape_cast %842 : vector<2x16x128xf32> to vector<32x128xf32>
    %844 = arith.truncf %843 : vector<32x128xf32> to vector<32x128xbf16>
    %c47 = arith.constant 47 : index
    %c0_533 = arith.constant 0 : index
    %c0_534 = arith.constant 0 : index
    %845 = vector.load %arg1[%c47, %c0_533, %c0_534] : memref<61x128x128xbf16, #tpu.memory_space<vmem>>, vector<1x128x128xbf16>
    %846 = vector.shape_cast %845 : vector<1x128x128xbf16> to vector<128x128xbf16>
    %cst_535 = arith.constant dense<0.000000e+00> : vector<32x128xf32>
    %847 = tpu.matmul %844, %846, %cst_535 {dimension_numbers = #tpu.dot_dimension_numbers<[1], [0], [0], [1], [0, 0, 1, 1], [], []>} : vector<32x128xbf16>, vector<128x128xbf16>, vector<32x128xf32> -> vector<32x128xf32>
    %c0_536 = arith.constant 0 : index
    %c4_537 = arith.constant 4 : index
    %c0_538 = arith.constant 0 : index
    %848 = vector.load %arg7[%c0_536, %c4_537, %c0_538] : memref<2x32x128xf32, #tpu.memory_space<vmem>>, vector<2x16x128xf32>
    %849 = vector.shape_cast %848 : vector<2x16x128xf32> to vector<32x128xf32>
    %850 = arith.truncf %849 : vector<32x128xf32> to vector<32x128xbf16>
    %c48 = arith.constant 48 : index
    %c0_539 = arith.constant 0 : index
    %c0_540 = arith.constant 0 : index
    %851 = vector.load %arg1[%c48, %c0_539, %c0_540] : memref<61x128x128xbf16, #tpu.memory_space<vmem>>, vector<1x128x128xbf16>
    %852 = vector.shape_cast %851 : vector<1x128x128xbf16> to vector<128x128xbf16>
    %cst_541 = arith.constant dense<0.000000e+00> : vector<32x128xf32>
    %853 = tpu.matmul %850, %852, %cst_541 {dimension_numbers = #tpu.dot_dimension_numbers<[1], [0], [0], [1], [0, 0, 1, 1], [], []>} : vector<32x128xbf16>, vector<128x128xbf16>, vector<32x128xf32> -> vector<32x128xf32>
    %854 = arith.addf %847, %853 : vector<32x128xf32>
    %c0_542 = arith.constant 0 : index
    %c5_543 = arith.constant 5 : index
    %c0_544 = arith.constant 0 : index
    %855 = vector.load %arg7[%c0_542, %c5_543, %c0_544] : memref<2x32x128xf32, #tpu.memory_space<vmem>>, vector<2x16x128xf32>
    %856 = vector.shape_cast %855 : vector<2x16x128xf32> to vector<32x128xf32>
    %857 = arith.truncf %856 : vector<32x128xf32> to vector<32x128xbf16>
    %c49 = arith.constant 49 : index
    %c0_545 = arith.constant 0 : index
    %c0_546 = arith.constant 0 : index
    %858 = vector.load %arg1[%c49, %c0_545, %c0_546] : memref<61x128x128xbf16, #tpu.memory_space<vmem>>, vector<1x128x128xbf16>
    %859 = vector.shape_cast %858 : vector<1x128x128xbf16> to vector<128x128xbf16>
    %cst_547 = arith.constant dense<0.000000e+00> : vector<32x128xf32>
    %860 = tpu.matmul %857, %859, %cst_547 {dimension_numbers = #tpu.dot_dimension_numbers<[1], [0], [0], [1], [0, 0, 1, 1], [], []>} : vector<32x128xbf16>, vector<128x128xbf16>, vector<32x128xf32> -> vector<32x128xf32>
    %861 = arith.addf %854, %860 : vector<32x128xf32>
    %c0_548 = arith.constant 0 : index
    %c6_549 = arith.constant 6 : index
    %c0_550 = arith.constant 0 : index
    %862 = vector.load %arg7[%c0_548, %c6_549, %c0_550] : memref<2x32x128xf32, #tpu.memory_space<vmem>>, vector<2x16x128xf32>
    %863 = vector.shape_cast %862 : vector<2x16x128xf32> to vector<32x128xf32>
    %864 = arith.truncf %863 : vector<32x128xf32> to vector<32x128xbf16>
    %c50 = arith.constant 50 : index
    %c0_551 = arith.constant 0 : index
    %c0_552 = arith.constant 0 : index
    %865 = vector.load %arg1[%c50, %c0_551, %c0_552] : memref<61x128x128xbf16, #tpu.memory_space<vmem>>, vector<1x128x128xbf16>
    %866 = vector.shape_cast %865 : vector<1x128x128xbf16> to vector<128x128xbf16>
    %cst_553 = arith.constant dense<0.000000e+00> : vector<32x128xf32>
    %867 = tpu.matmul %864, %866, %cst_553 {dimension_numbers = #tpu.dot_dimension_numbers<[1], [0], [0], [1], [0, 0, 1, 1], [], []>} : vector<32x128xbf16>, vector<128x128xbf16>, vector<32x128xf32> -> vector<32x128xf32>
    %868 = arith.addf %861, %867 : vector<32x128xf32>
    %c0_554 = arith.constant 0 : index
    %c7_555 = arith.constant 7 : index
    %c0_556 = arith.constant 0 : index
    %869 = vector.load %arg7[%c0_554, %c7_555, %c0_556] : memref<2x32x128xf32, #tpu.memory_space<vmem>>, vector<2x16x128xf32>
    %870 = vector.shape_cast %869 : vector<2x16x128xf32> to vector<32x128xf32>
    %871 = arith.truncf %870 : vector<32x128xf32> to vector<32x128xbf16>
    %c51 = arith.constant 51 : index
    %c0_557 = arith.constant 0 : index
    %c0_558 = arith.constant 0 : index
    %872 = vector.load %arg1[%c51, %c0_557, %c0_558] : memref<61x128x128xbf16, #tpu.memory_space<vmem>>, vector<1x128x128xbf16>
    %873 = vector.shape_cast %872 : vector<1x128x128xbf16> to vector<128x128xbf16>
    %cst_559 = arith.constant dense<0.000000e+00> : vector<32x128xf32>
    %874 = tpu.matmul %871, %873, %cst_559 {dimension_numbers = #tpu.dot_dimension_numbers<[1], [0], [0], [1], [0, 0, 1, 1], [], []>} : vector<32x128xbf16>, vector<128x128xbf16>, vector<32x128xf32> -> vector<32x128xf32>
    %875 = arith.addf %868, %874 : vector<32x128xf32>
    %c0_560 = arith.constant 0 : index
    %c8_561 = arith.constant 8 : index
    %c0_562 = arith.constant 0 : index
    %876 = vector.load %arg7[%c0_560, %c8_561, %c0_562] : memref<2x32x128xf32, #tpu.memory_space<vmem>>, vector<2x16x128xf32>
    %877 = vector.shape_cast %876 : vector<2x16x128xf32> to vector<32x128xf32>
    %878 = arith.truncf %877 : vector<32x128xf32> to vector<32x128xbf16>
    %c52 = arith.constant 52 : index
    %c0_563 = arith.constant 0 : index
    %c0_564 = arith.constant 0 : index
    %879 = vector.load %arg1[%c52, %c0_563, %c0_564] : memref<61x128x128xbf16, #tpu.memory_space<vmem>>, vector<1x128x128xbf16>
    %880 = vector.shape_cast %879 : vector<1x128x128xbf16> to vector<128x128xbf16>
    %cst_565 = arith.constant dense<0.000000e+00> : vector<32x128xf32>
    %881 = tpu.matmul %878, %880, %cst_565 {dimension_numbers = #tpu.dot_dimension_numbers<[1], [0], [0], [1], [0, 0, 1, 1], [], []>} : vector<32x128xbf16>, vector<128x128xbf16>, vector<32x128xf32> -> vector<32x128xf32>
    %882 = arith.addf %875, %881 : vector<32x128xf32>
    %c0_566 = arith.constant 0 : index
    %c9_567 = arith.constant 9 : index
    %c0_568 = arith.constant 0 : index
    %883 = vector.load %arg7[%c0_566, %c9_567, %c0_568] : memref<2x32x128xf32, #tpu.memory_space<vmem>>, vector<2x16x128xf32>
    %884 = vector.shape_cast %883 : vector<2x16x128xf32> to vector<32x128xf32>
    %885 = arith.truncf %884 : vector<32x128xf32> to vector<32x128xbf16>
    %c53 = arith.constant 53 : index
    %c0_569 = arith.constant 0 : index
    %c0_570 = arith.constant 0 : index
    %886 = vector.load %arg1[%c53, %c0_569, %c0_570] : memref<61x128x128xbf16, #tpu.memory_space<vmem>>, vector<1x128x128xbf16>
    %887 = vector.shape_cast %886 : vector<1x128x128xbf16> to vector<128x128xbf16>
    %cst_571 = arith.constant dense<0.000000e+00> : vector<32x128xf32>
    %888 = tpu.matmul %885, %887, %cst_571 {dimension_numbers = #tpu.dot_dimension_numbers<[1], [0], [0], [1], [0, 0, 1, 1], [], []>} : vector<32x128xbf16>, vector<128x128xbf16>, vector<32x128xf32> -> vector<32x128xf32>
    %889 = arith.addf %882, %888 : vector<32x128xf32>
    %c0_572 = arith.constant 0 : index
    %c10_573 = arith.constant 10 : index
    %c0_574 = arith.constant 0 : index
    %890 = vector.load %arg7[%c0_572, %c10_573, %c0_574] : memref<2x32x128xf32, #tpu.memory_space<vmem>>, vector<2x16x128xf32>
    %891 = vector.shape_cast %890 : vector<2x16x128xf32> to vector<32x128xf32>
    %892 = arith.truncf %891 : vector<32x128xf32> to vector<32x128xbf16>
    %c54 = arith.constant 54 : index
    %c0_575 = arith.constant 0 : index
    %c0_576 = arith.constant 0 : index
    %893 = vector.load %arg1[%c54, %c0_575, %c0_576] : memref<61x128x128xbf16, #tpu.memory_space<vmem>>, vector<1x128x128xbf16>
    %894 = vector.shape_cast %893 : vector<1x128x128xbf16> to vector<128x128xbf16>
    %cst_577 = arith.constant dense<0.000000e+00> : vector<32x128xf32>
    %895 = tpu.matmul %892, %894, %cst_577 {dimension_numbers = #tpu.dot_dimension_numbers<[1], [0], [0], [1], [0, 0, 1, 1], [], []>} : vector<32x128xbf16>, vector<128x128xbf16>, vector<32x128xf32> -> vector<32x128xf32>
    %896 = arith.addf %889, %895 : vector<32x128xf32>
    %c0_578 = arith.constant 0 : index
    %c11_579 = arith.constant 11 : index
    %c0_580 = arith.constant 0 : index
    %897 = vector.load %arg7[%c0_578, %c11_579, %c0_580] : memref<2x32x128xf32, #tpu.memory_space<vmem>>, vector<2x16x128xf32>
    %898 = vector.shape_cast %897 : vector<2x16x128xf32> to vector<32x128xf32>
    %899 = arith.truncf %898 : vector<32x128xf32> to vector<32x128xbf16>
    %c55 = arith.constant 55 : index
    %c0_581 = arith.constant 0 : index
    %c0_582 = arith.constant 0 : index
    %900 = vector.load %arg1[%c55, %c0_581, %c0_582] : memref<61x128x128xbf16, #tpu.memory_space<vmem>>, vector<1x128x128xbf16>
    %901 = vector.shape_cast %900 : vector<1x128x128xbf16> to vector<128x128xbf16>
    %cst_583 = arith.constant dense<0.000000e+00> : vector<32x128xf32>
    %902 = tpu.matmul %899, %901, %cst_583 {dimension_numbers = #tpu.dot_dimension_numbers<[1], [0], [0], [1], [0, 0, 1, 1], [], []>} : vector<32x128xbf16>, vector<128x128xbf16>, vector<32x128xf32> -> vector<32x128xf32>
    %903 = arith.addf %896, %902 : vector<32x128xf32>
    %c0_584 = arith.constant 0 : index
    %c12_585 = arith.constant 12 : index
    %c0_586 = arith.constant 0 : index
    %904 = vector.load %arg7[%c0_584, %c12_585, %c0_586] : memref<2x32x128xf32, #tpu.memory_space<vmem>>, vector<2x16x128xf32>
    %905 = vector.shape_cast %904 : vector<2x16x128xf32> to vector<32x128xf32>
    %906 = arith.truncf %905 : vector<32x128xf32> to vector<32x128xbf16>
    %c56 = arith.constant 56 : index
    %c0_587 = arith.constant 0 : index
    %c0_588 = arith.constant 0 : index
    %907 = vector.load %arg1[%c56, %c0_587, %c0_588] : memref<61x128x128xbf16, #tpu.memory_space<vmem>>, vector<1x128x128xbf16>
    %908 = vector.shape_cast %907 : vector<1x128x128xbf16> to vector<128x128xbf16>
    %cst_589 = arith.constant dense<0.000000e+00> : vector<32x128xf32>
    %909 = tpu.matmul %906, %908, %cst_589 {dimension_numbers = #tpu.dot_dimension_numbers<[1], [0], [0], [1], [0, 0, 1, 1], [], []>} : vector<32x128xbf16>, vector<128x128xbf16>, vector<32x128xf32> -> vector<32x128xf32>
    %910 = arith.addf %903, %909 : vector<32x128xf32>
    %c0_590 = arith.constant 0 : index
    %c13_591 = arith.constant 13 : index
    %c0_592 = arith.constant 0 : index
    %911 = vector.load %arg7[%c0_590, %c13_591, %c0_592] : memref<2x32x128xf32, #tpu.memory_space<vmem>>, vector<2x16x128xf32>
    %912 = vector.shape_cast %911 : vector<2x16x128xf32> to vector<32x128xf32>
    %913 = arith.truncf %912 : vector<32x128xf32> to vector<32x128xbf16>
    %c57 = arith.constant 57 : index
    %c0_593 = arith.constant 0 : index
    %c0_594 = arith.constant 0 : index
    %914 = vector.load %arg1[%c57, %c0_593, %c0_594] : memref<61x128x128xbf16, #tpu.memory_space<vmem>>, vector<1x128x128xbf16>
    %915 = vector.shape_cast %914 : vector<1x128x128xbf16> to vector<128x128xbf16>
    %cst_595 = arith.constant dense<0.000000e+00> : vector<32x128xf32>
    %916 = tpu.matmul %913, %915, %cst_595 {dimension_numbers = #tpu.dot_dimension_numbers<[1], [0], [0], [1], [0, 0, 1, 1], [], []>} : vector<32x128xbf16>, vector<128x128xbf16>, vector<32x128xf32> -> vector<32x128xf32>
    %917 = arith.addf %910, %916 : vector<32x128xf32>
    %cst_596 = arith.constant dense<0.000000e+00> : vector<32x128xf32>
    %918 = tpu.matmul %917, %6, %cst_596 {dimension_numbers = #tpu.dot_dimension_numbers<[1], [0], [0], [1], [0, 0, 1, 1], [], []>} : vector<32x128xf32>, vector<128x128xf32>, vector<32x128xf32> -> vector<32x128xf32>
    %cst_597 = arith.constant dense<0.000000e+00> : vector<128xf32>
    %919 = vector.multi_reduction <add>, %918, %cst_597 [0] : vector<32x128xf32> to vector<128xf32>
    %920 = vector.shape_cast %919 : vector<128xf32> to vector<1x128xf32>
    %cst_598 = arith.constant 0.001953125 : f32
    %921 = vector.broadcast %cst_598 : f32 to vector<1x128xf32>
    %922 = arith.mulf %920, %921 : vector<1x128xf32>
    %923 = vector.broadcast %922 : vector<1x128xf32> to vector<32x128xf32>
    %924 = arith.subf %917, %923 : vector<32x128xf32>
    %925 = arith.mulf %924, %924 : vector<32x128xf32>
    %cst_599 = arith.constant dense<0.000000e+00> : vector<32x128xf32>
    %926 = tpu.matmul %925, %6, %cst_599 {dimension_numbers = #tpu.dot_dimension_numbers<[1], [0], [0], [1], [0, 0, 1, 1], [], []>} : vector<32x128xf32>, vector<128x128xf32>, vector<32x128xf32> -> vector<32x128xf32>
    %cst_600 = arith.constant dense<0.000000e+00> : vector<128xf32>
    %927 = vector.multi_reduction <add>, %926, %cst_600 [0] : vector<32x128xf32> to vector<128xf32>
    %928 = vector.shape_cast %927 : vector<128xf32> to vector<1x128xf32>
    %cst_601 = arith.constant 0.001953125 : f32
    %929 = vector.broadcast %cst_601 : f32 to vector<1x128xf32>
    %930 = arith.mulf %928, %929 : vector<1x128xf32>
    %c19_602 = arith.constant 19 : index
    %c0_603 = arith.constant 0 : index
    %931 = vector.load %arg4[%c19_602, %c0_603] : memref<22x128xf32, #tpu.memory_space<vmem>>, vector<1x128xf32>
    %cst_604 = arith.constant 9.99999974E-6 : f32
    %932 = vector.broadcast %cst_604 : f32 to vector<1x128xf32>
    %933 = arith.addf %930, %932 : vector<1x128xf32>
    %934 = math.rsqrt %933 : vector<1x128xf32>
    %935 = arith.mulf %931, %934 : vector<1x128xf32>
    %c19_605 = arith.constant 19 : index
    %c0_606 = arith.constant 0 : index
    %936 = vector.load %arg5[%c19_605, %c0_606] : memref<22x128xf32, #tpu.memory_space<vmem>>, vector<1x128xf32>
    %937 = arith.mulf %922, %935 : vector<1x128xf32>
    %938 = arith.subf %936, %937 : vector<1x128xf32>
    %939 = vector.broadcast %935 : vector<1x128xf32> to vector<32x128xf32>
    %940 = arith.mulf %917, %939 : vector<32x128xf32>
    %941 = vector.broadcast %938 : vector<1x128xf32> to vector<32x128xf32>
    %942 = arith.addf %940, %941 : vector<32x128xf32>
    %cst_607 = arith.constant 0.000000e+00 : f32
    %943 = vector.broadcast %cst_607 : f32 to vector<32x128xf32>
    %944 = arith.maximumf %942, %943 : vector<32x128xf32>
    %945 = vector.shape_cast %944 : vector<32x128xf32> to vector<2x16x128xf32>
    %c0_608 = arith.constant 0 : index
    %c16_609 = arith.constant 16 : index
    %c0_610 = arith.constant 0 : index
    %946 = vector.load %arg8[%c0_608, %c16_609, %c0_610] : memref<2x48x128xf32, #tpu.memory_space<vmem>>, vector<2x16x128xf32>
    tpu.vector_store %arg8[%c0_608, %c16_609, %c0_610], %945 {strides = array<i32>} : memref<2x48x128xf32, #tpu.memory_space<vmem>>, vector<2x16x128xf32>,
    %c0_611 = arith.constant 0 : index
    %c5_612 = arith.constant 5 : index
    %c0_613 = arith.constant 0 : index
    %947 = vector.load %arg8[%c0_611, %c5_612, %c0_613] : memref<2x48x128xf32, #tpu.memory_space<vmem>>, vector<2x16x128xf32>
    %948 = vector.shape_cast %947 : vector<2x16x128xf32> to vector<32x128xf32>
    %949 = arith.truncf %948 : vector<32x128xf32> to vector<32x128xbf16>
    %c58 = arith.constant 58 : index
    %c0_614 = arith.constant 0 : index
    %c0_615 = arith.constant 0 : index
    %950 = vector.load %arg1[%c58, %c0_614, %c0_615] : memref<61x128x128xbf16, #tpu.memory_space<vmem>>, vector<1x128x128xbf16>
    %951 = vector.shape_cast %950 : vector<1x128x128xbf16> to vector<128x128xbf16>
    %cst_616 = arith.constant dense<0.000000e+00> : vector<32x128xf32>
    %952 = tpu.matmul %949, %951, %cst_616 {dimension_numbers = #tpu.dot_dimension_numbers<[1], [0], [0], [1], [0, 0, 1, 1], [], []>} : vector<32x128xbf16>, vector<128x128xbf16>, vector<32x128xf32> -> vector<32x128xf32>
    %c0_617 = arith.constant 0 : index
    %c16_618 = arith.constant 16 : index
    %c0_619 = arith.constant 0 : index
    %953 = vector.load %arg8[%c0_617, %c16_618, %c0_619] : memref<2x48x128xf32, #tpu.memory_space<vmem>>, vector<2x16x128xf32>
    %954 = vector.shape_cast %953 : vector<2x16x128xf32> to vector<32x128xf32>
    %955 = arith.truncf %954 : vector<32x128xf32> to vector<32x128xbf16>
    %c59 = arith.constant 59 : index
    %c0_620 = arith.constant 0 : index
    %c0_621 = arith.constant 0 : index
    %956 = vector.load %arg1[%c59, %c0_620, %c0_621] : memref<61x128x128xbf16, #tpu.memory_space<vmem>>, vector<1x128x128xbf16>
    %957 = vector.shape_cast %956 : vector<1x128x128xbf16> to vector<128x128xbf16>
    %cst_622 = arith.constant dense<0.000000e+00> : vector<32x128xf32>
    %958 = tpu.matmul %955, %957, %cst_622 {dimension_numbers = #tpu.dot_dimension_numbers<[1], [0], [0], [1], [0, 0, 1, 1], [], []>} : vector<32x128xbf16>, vector<128x128xbf16>, vector<32x128xf32> -> vector<32x128xf32>
    %959 = arith.addf %952, %958 : vector<32x128xf32>
    %c0_623 = arith.constant 0 : index
    %c27_624 = arith.constant 27 : index
    %c0_625 = arith.constant 0 : index
    %960 = vector.load %arg8[%c0_623, %c27_624, %c0_625] : memref<2x48x128xf32, #tpu.memory_space<vmem>>, vector<2x16x128xf32>
    %961 = vector.shape_cast %960 : vector<2x16x128xf32> to vector<32x128xf32>
    %962 = arith.truncf %961 : vector<32x128xf32> to vector<32x128xbf16>
    %c60 = arith.constant 60 : index
    %c0_626 = arith.constant 0 : index
    %c0_627 = arith.constant 0 : index
    %963 = vector.load %arg1[%c60, %c0_626, %c0_627] : memref<61x128x128xbf16, #tpu.memory_space<vmem>>, vector<1x128x128xbf16>
    %964 = vector.shape_cast %963 : vector<1x128x128xbf16> to vector<128x128xbf16>
    %cst_628 = arith.constant dense<0.000000e+00> : vector<32x128xf32>
    %965 = tpu.matmul %962, %964, %cst_628 {dimension_numbers = #tpu.dot_dimension_numbers<[1], [0], [0], [1], [0, 0, 1, 1], [], []>} : vector<32x128xbf16>, vector<128x128xbf16>, vector<32x128xf32> -> vector<32x128xf32>
    %966 = arith.addf %959, %965 : vector<32x128xf32>
    %cst_629 = arith.constant dense<0.000000e+00> : vector<32x128xf32>
    %967 = tpu.matmul %966, %6, %cst_629 {dimension_numbers = #tpu.dot_dimension_numbers<[1], [0], [0], [1], [0, 0, 1, 1], [], []>} : vector<32x128xf32>, vector<128x128xf32>, vector<32x128xf32> -> vector<32x128xf32>
    %cst_630 = arith.constant dense<0.000000e+00> : vector<128xf32>
    %968 = vector.multi_reduction <add>, %967, %cst_630 [0] : vector<32x128xf32> to vector<128xf32>
    %969 = vector.shape_cast %968 : vector<128xf32> to vector<1x128xf32>
    %cst_631 = arith.constant 0.001953125 : f32
    %970 = vector.broadcast %cst_631 : f32 to vector<1x128xf32>
    %971 = arith.mulf %969, %970 : vector<1x128xf32>
    %972 = vector.broadcast %971 : vector<1x128xf32> to vector<32x128xf32>
    %973 = arith.subf %966, %972 : vector<32x128xf32>
    %974 = arith.mulf %973, %973 : vector<32x128xf32>
    %cst_632 = arith.constant dense<0.000000e+00> : vector<32x128xf32>
    %975 = tpu.matmul %974, %6, %cst_632 {dimension_numbers = #tpu.dot_dimension_numbers<[1], [0], [0], [1], [0, 0, 1, 1], [], []>} : vector<32x128xf32>, vector<128x128xf32>, vector<32x128xf32> -> vector<32x128xf32>
    %cst_633 = arith.constant dense<0.000000e+00> : vector<128xf32>
    %976 = vector.multi_reduction <add>, %975, %cst_633 [0] : vector<32x128xf32> to vector<128xf32>
    %977 = vector.shape_cast %976 : vector<128xf32> to vector<1x128xf32>
    %cst_634 = arith.constant 0.001953125 : f32
    %978 = vector.broadcast %cst_634 : f32 to vector<1x128xf32>
    %979 = arith.mulf %977, %978 : vector<1x128xf32>
    %c20_635 = arith.constant 20 : index
    %c0_636 = arith.constant 0 : index
    %980 = vector.load %arg4[%c20_635, %c0_636] : memref<22x128xf32, #tpu.memory_space<vmem>>, vector<1x128xf32>
    %cst_637 = arith.constant 9.99999974E-6 : f32
    %981 = vector.broadcast %cst_637 : f32 to vector<1x128xf32>
    %982 = arith.addf %979, %981 : vector<1x128xf32>
    %983 = math.rsqrt %982 : vector<1x128xf32>
    %984 = arith.mulf %980, %983 : vector<1x128xf32>
    %c20_638 = arith.constant 20 : index
    %c0_639 = arith.constant 0 : index
    %985 = vector.load %arg5[%c20_638, %c0_639] : memref<22x128xf32, #tpu.memory_space<vmem>>, vector<1x128xf32>
    %986 = arith.mulf %971, %984 : vector<1x128xf32>
    %987 = arith.subf %985, %986 : vector<1x128xf32>
    %988 = vector.broadcast %984 : vector<1x128xf32> to vector<32x128xf32>
    %989 = arith.mulf %966, %988 : vector<32x128xf32>
    %990 = vector.broadcast %987 : vector<1x128xf32> to vector<32x128xf32>
    %991 = arith.addf %989, %990 : vector<32x128xf32>
    %cst_640 = arith.constant 0.000000e+00 : f32
    %992 = vector.broadcast %cst_640 : f32 to vector<32x128xf32>
    %993 = arith.maximumf %991, %992 : vector<32x128xf32>
    %994 = vector.shape_cast %993 : vector<32x128xf32> to vector<2x16x128xf32>
    %c0_641 = arith.constant 0 : index
    %c8_642 = arith.constant 8 : index
    %c640 = arith.constant 640 : index
    %995 = vector.load %arg9[%c0_641, %c8_642, %c640] : memref<2x32x768xf32, #tpu.memory_space<vmem>>, vector<2x16x128xf32>
    tpu.vector_store %arg9[%c0_641, %c8_642, %c640], %994 {strides = array<i32>} : memref<2x32x768xf32, #tpu.memory_space<vmem>>, vector<2x16x128xf32>,
    %c0_643 = arith.constant 0 : index
    %c7_644 = arith.constant 7 : index
    %c0_645 = arith.constant 0 : index
    %996 = vector.load %arg9[%c0_643, %c7_644, %c0_645] : memref<2x32x768xf32, #tpu.memory_space<vmem>>, vector<2x16x768xf32>
    %997 = vector.shape_cast %996 : vector<2x16x768xf32> to vector<32x768xf32>
    %998 = arith.truncf %997 : vector<32x768xf32> to vector<32x768xbf16>
    %c0_646 = arith.constant 0 : index
    %c0_647 = arith.constant 0 : index
    %c0_648 = arith.constant 0 : index
    %999 = vector.load %arg2[%c0_646, %c0_647, %c0_648] : memref<3x768x128xbf16, #tpu.memory_space<vmem>>, vector<1x768x128xbf16>
    %1000 = vector.shape_cast %999 : vector<1x768x128xbf16> to vector<768x128xbf16>
    %cst_649 = arith.constant dense<0.000000e+00> : vector<32x128xf32>
    %1001 = tpu.matmul %998, %1000, %cst_649 {dimension_numbers = #tpu.dot_dimension_numbers<[1], [0], [0], [1], [0, 0, 1, 1], [], []>} : vector<32x768xbf16>, vector<768x128xbf16>, vector<32x128xf32> -> vector<32x128xf32>
    %c0_650 = arith.constant 0 : index
    %c8_651 = arith.constant 8 : index
    %c0_652 = arith.constant 0 : index
    %1002 = vector.load %arg9[%c0_650, %c8_651, %c0_652] : memref<2x32x768xf32, #tpu.memory_space<vmem>>, vector<2x16x768xf32>
    %1003 = vector.shape_cast %1002 : vector<2x16x768xf32> to vector<32x768xf32>
    %1004 = arith.truncf %1003 : vector<32x768xf32> to vector<32x768xbf16>
    %c1_653 = arith.constant 1 : index
    %c0_654 = arith.constant 0 : index
    %c0_655 = arith.constant 0 : index
    %1005 = vector.load %arg2[%c1_653, %c0_654, %c0_655] : memref<3x768x128xbf16, #tpu.memory_space<vmem>>, vector<1x768x128xbf16>
    %1006 = vector.shape_cast %1005 : vector<1x768x128xbf16> to vector<768x128xbf16>
    %cst_656 = arith.constant dense<0.000000e+00> : vector<32x128xf32>
    %1007 = tpu.matmul %1004, %1006, %cst_656 {dimension_numbers = #tpu.dot_dimension_numbers<[1], [0], [0], [1], [0, 0, 1, 1], [], []>} : vector<32x768xbf16>, vector<768x128xbf16>, vector<32x128xf32> -> vector<32x128xf32>
    %1008 = arith.addf %1001, %1007 : vector<32x128xf32>
    %c0_657 = arith.constant 0 : index
    %c9_658 = arith.constant 9 : index
    %c0_659 = arith.constant 0 : index
    %1009 = vector.load %arg9[%c0_657, %c9_658, %c0_659] : memref<2x32x768xf32, #tpu.memory_space<vmem>>, vector<2x16x768xf32>
    %1010 = vector.shape_cast %1009 : vector<2x16x768xf32> to vector<32x768xf32>
    %1011 = arith.truncf %1010 : vector<32x768xf32> to vector<32x768xbf16>
    %c2_660 = arith.constant 2 : index
    %c0_661 = arith.constant 0 : index
    %c0_662 = arith.constant 0 : index
    %1012 = vector.load %arg2[%c2_660, %c0_661, %c0_662] : memref<3x768x128xbf16, #tpu.memory_space<vmem>>, vector<1x768x128xbf16>
    %1013 = vector.shape_cast %1012 : vector<1x768x128xbf16> to vector<768x128xbf16>
    %cst_663 = arith.constant dense<0.000000e+00> : vector<32x128xf32>
    %1014 = tpu.matmul %1011, %1013, %cst_663 {dimension_numbers = #tpu.dot_dimension_numbers<[1], [0], [0], [1], [0, 0, 1, 1], [], []>} : vector<32x768xbf16>, vector<768x128xbf16>, vector<32x128xf32> -> vector<32x128xf32>
    %1015 = arith.addf %1008, %1014 : vector<32x128xf32>
    %cst_664 = arith.constant dense<0.000000e+00> : vector<32x128xf32>
    %1016 = tpu.matmul %1015, %6, %cst_664 {dimension_numbers = #tpu.dot_dimension_numbers<[1], [0], [0], [1], [0, 0, 1, 1], [], []>} : vector<32x128xf32>, vector<128x128xf32>, vector<32x128xf32> -> vector<32x128xf32>
    %cst_665 = arith.constant dense<0.000000e+00> : vector<128xf32>
    %1017 = vector.multi_reduction <add>, %1016, %cst_665 [0] : vector<32x128xf32> to vector<128xf32>
    %1018 = vector.shape_cast %1017 : vector<128xf32> to vector<1x128xf32>
    %cst_666 = arith.constant 0.001953125 : f32
    %1019 = vector.broadcast %cst_666 : f32 to vector<1x128xf32>
    %1020 = arith.mulf %1018, %1019 : vector<1x128xf32>
    %1021 = vector.broadcast %1020 : vector<1x128xf32> to vector<32x128xf32>
    %1022 = arith.subf %1015, %1021 : vector<32x128xf32>
    %1023 = arith.mulf %1022, %1022 : vector<32x128xf32>
    %cst_667 = arith.constant dense<0.000000e+00> : vector<32x128xf32>
    %1024 = tpu.matmul %1023, %6, %cst_667 {dimension_numbers = #tpu.dot_dimension_numbers<[1], [0], [0], [1], [0, 0, 1, 1], [], []>} : vector<32x128xf32>, vector<128x128xf32>, vector<32x128xf32> -> vector<32x128xf32>
    %cst_668 = arith.constant dense<0.000000e+00> : vector<128xf32>
    %1025 = vector.multi_reduction <add>, %1024, %cst_668 [0] : vector<32x128xf32> to vector<128xf32>
    %1026 = vector.shape_cast %1025 : vector<128xf32> to vector<1x128xf32>
    %cst_669 = arith.constant 0.001953125 : f32
    %1027 = vector.broadcast %cst_669 : f32 to vector<1x128xf32>
    %1028 = arith.mulf %1026, %1027 : vector<1x128xf32>
    %c21_670 = arith.constant 21 : index
    %c0_671 = arith.constant 0 : index
    %1029 = vector.load %arg4[%c21_670, %c0_671] : memref<22x128xf32, #tpu.memory_space<vmem>>, vector<1x128xf32>
    %cst_672 = arith.constant 9.99999974E-6 : f32
    %1030 = vector.broadcast %cst_672 : f32 to vector<1x128xf32>
    %1031 = arith.addf %1028, %1030 : vector<1x128xf32>
    %1032 = math.rsqrt %1031 : vector<1x128xf32>
    %1033 = arith.mulf %1029, %1032 : vector<1x128xf32>
    %c21_673 = arith.constant 21 : index
    %c0_674 = arith.constant 0 : index
    %1034 = vector.load %arg5[%c21_673, %c0_674] : memref<22x128xf32, #tpu.memory_space<vmem>>, vector<1x128xf32>
    %1035 = arith.mulf %1020, %1033 : vector<1x128xf32>
    %1036 = arith.subf %1034, %1035 : vector<1x128xf32>
    %1037 = vector.broadcast %1033 : vector<1x128xf32> to vector<32x128xf32>
    %1038 = arith.mulf %1015, %1037 : vector<32x128xf32>
    %1039 = vector.broadcast %1036 : vector<1x128xf32> to vector<32x128xf32>
    %1040 = arith.addf %1038, %1039 : vector<32x128xf32>
    %cst_675 = arith.constant 0.000000e+00 : f32
    %1041 = vector.broadcast %cst_675 : f32 to vector<32x128xf32>
    %1042 = arith.maximumf %1040, %1041 : vector<32x128xf32>
    %c0_676 = arith.constant 0 : index
    %c0_677 = arith.constant 0 : index
    %1043 = vector.load %arg6[%c0_676, %c0_677] : memref<32x128xf32, #tpu.memory_space<vmem>>, vector<32x128xf32>
    tpu.vector_store %arg6[%c0_676, %c0_677], %1042 {strides = array<i32>} : memref<32x128xf32, #tpu.memory_space<vmem>>, vector<32x128xf32>,
    return
  }
}

</mosaic_0001>

<bundles_post_ra>
// kernel: multi_scale_forward.1
= control target key start
LH: loop header
LB: loop body
LE: loop exit
PB: predicated region body
PF: predicated region fallthrough
CT: control target
= control target key end

     0   :  { %11 = vsyncpa [#allocation6], 0  ;;  %s23950_s0 = inlined_call_operand.vmem [shape: f32[32,128], index: 0, kind: input, shape index: {}]   ;;  %s23951_s1 = inlined_call_operand.hbm [shape: bf16[61,128,128], index: 1, kind: input, shape index: {}]   ;;  %s23952_s2 = inlined_call_operand.hbm [shape: bf16[3,768,128], index: 2, kind: input, shape index: {}]   ;;  %s23953_s3 = inlined_call_operand.hbm [shape: f32[128,128], index: 3, kind: input, shape index: {}]   ;;  %s23954_s4 = inlined_call_operand.hbm [shape: f32[22,128], index: 4, kind: input, shape index: {}]   ;;  %s23955_s5 = inlined_call_operand.hbm [shape: f32[22,128], index: 5, kind: input, shape index: {}]   ;;  %s23956_s6 = inlined_call_operand.vmem [shape: f32[32,128], index: 6, kind: output, shape index: {}]  }
   0x1   :  { %12 = vsyncpa [#allocation8], 0 }
   0x2   :  { %13 = vsyncpa [#allocation11], 0  ;;  %s22237_s21 = smov [#allocation7]   ;;  %s22121_s25 = scalar_lea.hbm %s23952_s2, 18432 }
   0x3   :  { %s33_s22 = sshll.u32 %s22237_s21, 4  ;;  %p22122_p0 = scmp.ne.s32.totalorder %s23952_s2, %s22121_s25  ;;  %s34_s22 = int_to_ptr.vmem [resolvable:$true] %s33_s22 }
   0x4   :  { %p22125_p1 = scmp.lt.u32.totalorder %s22121_s25, %s23952_s2 }
   0x6   :  { %p22127_p2 = pnand %p22125_p1, %p22122_p0 }
   0x8   :  { %22130 = shalt.err (!%p22127_p2)
}
   0x9   :  { %s22131_s30 = scalar_lea.vmem %s34_s22, 18432  ;;  %p22136_p4 = scmp.lt.s32.totalorder %s34_s22, %s34_s22 }
   0xa   :  { %p22132_p3 = scmp.ne.s32.totalorder %s34_s22, %s22131_s30  ;;  %p22137_p5 = scmp.lt.s32.totalorder %s22131_s30, %s22131_s30 }
   0xc   :  { %p22138_p6 = por %p22137_p5, %p22136_p4 }
   0xe   :  { %p22139_p7 = pnand %p22138_p6, %p22132_p3 }
  0x10   :  { %22142 = shalt.err (!%p22139_p7)
}
  0x11   :  { %s22238_s7 = smov 64   ;;  %s22239_s8 = smov 4  }
  0x12   :  { %39 = dma.hbm_to_vmem [thread:$0]  %s23952_s2, 18432, %s34_s22, [#allocation8], %s22238_s7, %s22238_s7, %s22239_s8  }
  0x13   :  { %s22240_s11 = smov [#allocation10]   ;;  %s22241_s13 = smov [#allocation5]  }
  0x14   :  { %s57_s12 = sshll.u32 %s22240_s11, 4  ;;  %s21_s14 = sshll.u32 %s22241_s13, 4  ;;  %s58_s12 = int_to_ptr.vmem [resolvable:$true] %s57_s12  ;;  %s22_s14 = int_to_ptr.vmem [resolvable:$true] %s21_s14 }
  0x15   :  { %s22143_s17 = scalar_lea.hbm %s23954_s4, 384 }
  0x16   :  { %p22144_p8 = scmp.ne.s32.totalorder %s23954_s4, %s22143_s17  ;;  %p22147_p9 = scmp.lt.u32.totalorder %s22143_s17, %s23954_s4 }
  0x18   :  { %p22149_p10 = pnand %p22147_p9, %p22144_p8 }
  0x1a   :  { %22152 = shalt.err (!%p22149_p10)
}
  0x1b   :  { %s22153_s2 = scalar_lea.vmem %s58_s12, 384  ;;  %p22158_p12 = scmp.lt.s32.totalorder %s58_s12, %s58_s12 }
  0x1c   :  { %p22154_p11 = scmp.ne.s32.totalorder %s58_s12, %s22153_s2  ;;  %p22159_p13 = scmp.lt.s32.totalorder %s22153_s2, %s22153_s2 }
  0x1e   :  { %p22160_p0 = por %p22159_p13, %p22158_p12 }
  0x20   :  { %p22161_p1 = pnand %p22160_p0, %p22154_p11 }
  0x22   :  { %22164 = shalt.err (!%p22161_p1)
}
  0x23   :  { %s22242_s22 = smov 128   ;;  %s22243_s23 = smov 8  }
  0x24   :  { %63 = dma.hbm_to_vmem [thread:$0]  %s23954_s4, 384, %s58_s12, [#allocation11], %s22242_s22, %s22242_s22, %s22243_s23  }
  0x25   :  { %s22165_s28 = scalar_lea.hbm %s23951_s1, 62464 }
  0x26   :  { %p22166_p2 = scmp.ne.s32.totalorder %s23951_s1, %s22165_s28  ;;  %p22169_p3 = scmp.lt.u32.totalorder %s22165_s28, %s23951_s1 }
  0x28   :  { %p22171_p4 = pnand %p22169_p3, %p22166_p2 }
  0x2a   :  { %22174 = shalt.err (!%p22171_p4)
}
  0x2b   :  { %s22175_s11 = scalar_lea.vmem %s22_s14, 62464  ;;  %p22180_p6 = scmp.lt.s32.totalorder %s22_s14, %s22_s14 }
  0x2c   :  { %p22176_p5 = scmp.ne.s32.totalorder %s22_s14, %s22175_s11  ;;  %p22181_p7 = scmp.lt.s32.totalorder %s22175_s11, %s22175_s11 }
  0x2e   :  { %p22182_p8 = por %p22181_p7, %p22180_p6 }
  0x30   :  { %p22183_p9 = pnand %p22182_p8, %p22176_p5 }
  0x32   :  { %22186 = shalt.err (!%p22183_p9)
}
  0x33   :  { %27 = dma.hbm_to_vmem [thread:$0]  %s23951_s1, 62464, %s22_s14, [#allocation6], %s22238_s7, %s22238_s7, %s22239_s8  }
  0x34   :  { %s22244_s13 = smov [#allocation9]   ;;  %s22245_s16 = smov [#allocation12]  }
  0x35   :  { %s45_s15 = sshll.u32 %s22244_s13, 4  ;;  %s69_s17 = sshll.u32 %s22245_s16, 4  ;;  %s46_s15 = int_to_ptr.vmem [resolvable:$true] %s45_s15  ;;  %s70_s17 = int_to_ptr.vmem [resolvable:$true] %s69_s17 }
  0x36   :  { %s22187_s20 = scalar_lea.hbm %s23953_s3, 2048 }
  0x37   :  { %p22188_p10 = scmp.ne.s32.totalorder %s23953_s3, %s22187_s20  ;;  %p22191_p11 = scmp.lt.u32.totalorder %s22187_s20, %s23953_s3 }
  0x39   :  { %p22193_p12 = pnand %p22191_p11, %p22188_p10 }
  0x3b   :  { %22196 = shalt.err (!%p22193_p12)
}
  0x3c   :  { %s22197_s1 = scalar_lea.vmem %s46_s15, 2048  ;;  %p22202_p0 = scmp.lt.s32.totalorder %s46_s15, %s46_s15 }
  0x3d   :  { %p22198_p13 = scmp.ne.s32.totalorder %s46_s15, %s22197_s1  ;;  %p22203_p1 = scmp.lt.s32.totalorder %s22197_s1, %s22197_s1 }
  0x3f   :  { %p22204_p2 = por %p22203_p1, %p22202_p0 }
  0x41   :  { %p22205_p3 = pnand %p22204_p2, %p22198_p13 }
  0x43   :  { %22208 = shalt.err (!%p22205_p3)
}
  0x44   :  { %51 = dma.hbm_to_vmem [thread:$0]  %s23953_s3, 2048, %s46_s15, [#allocation8], %s22242_s22, %s22242_s22, %s22243_s23  }
  0x45   :  { %s22209_s27 = scalar_lea.hbm %s23955_s5, 384 }
  0x46   :  { %p22210_p4 = scmp.ne.s32.totalorder %s23955_s5, %s22209_s27  ;;  %p22213_p5 = scmp.lt.u32.totalorder %s22209_s27, %s23955_s5 }
  0x48   :  { %p22215_p6 = pnand %p22213_p5, %p22210_p4 }
  0x4a   :  { %22218 = shalt.err (!%p22215_p6)
}
  0x4b   :  { %s22219_s10 = scalar_lea.vmem %s70_s17, 384  ;;  %p22224_p8 = scmp.lt.s32.totalorder %s70_s17, %s70_s17 }
  0x4c   :  { %p22220_p7 = scmp.ne.s32.totalorder %s70_s17, %s22219_s10  ;;  %p22225_p9 = scmp.lt.s32.totalorder %s22219_s10, %s22219_s10 }
  0x4e   :  { %p22226_p10 = por %p22225_p9, %p22224_p8 }
  0x50   :  { %p22227_p11 = pnand %p22226_p10, %p22220_p7 }
  0x52   :  { %22230 = shalt.err (!%p22227_p11)
}
  0x53   :  { %75 = dma.hbm_to_vmem [thread:$0]  %s23955_s5, 384, %s70_s17, [#allocation11], %s22242_s22, %s22242_s22, %s22243_s23  }
  0x54   :  { %22231 = dma.done.wait [#allocation6], 62464  }
  0x55   :  { %22232 = vsyncadd [#allocation6], 4294904832 }
  0x56   :  { %22233 = dma.done.wait [#allocation8], 20480  }
  0x57   :  { %22234 = vsyncadd [#allocation8], 4294946816 }
  0x58   :  { %22235 = dma.done.wait [#allocation11], 768  }
  0x59   :  { %22236 = vsyncadd [#allocation11], 4294966528  ;;  %v21425_v0 = vld [vmem:[#allocation5] sm:$0xff]   ;;  %v21426_v1 = vld [vmem:[#allocation5 + $0x8] sm:$0xff]   ;;  %vm12456_vm0 = vcmask 1040384   ;;  %vm13712_vm1 = vcmask 1046528  }
  0x5a   :  { %16955 = vmatprep.subr.bf16.mxu0 %v21425_v0  ;;  %v21427_v2 = vld [vmem:[#allocation5 + $0x10] sm:$0xff]   ;;  %v21428_v3 = vld [vmem:[#allocation5 + $0x18] sm:$0xff]   ;;  %v176_v4 = vld [vmem:[%s23950_s0] sm:$0xff] }
  0x5b   :  { %16956 = vmatpush3.bf16.msra.mxu0 %v21425_v0  ;;  %v177_v5 = vld [vmem:[%s23950_s0 + $0x8] sm:$0xff]  ;;  %v160_v7 = vld [vmem:[#allocation9] sm:$0xff]  ;;  %v162_v10 = vld [vmem:[#allocation9 + $0x10] sm:$0xff] }
  0x5c   :  { %16957 = vmatprep.subr.bf16.mxu0 %v21426_v1  ;;  %v180_v6 = vpack.c.bf16 %v177_v5, %v176_v4  ;;  %v161_v8 = vld [vmem:[#allocation9 + $0x8] sm:$0xff]  ;;  %v163_v11 = vld [vmem:[#allocation9 + $0x18] sm:$0xff]  ;;  %v164_v13 = vld [vmem:[#allocation9 + $0x20] sm:$0xff] }
  0x5d   :  { %v22363_v9 = vpack.c.bf16 %v161_v8, %v160_v7  ;;  %v22365_v12 = vpack.c.bf16 %v163_v11, %v162_v10  ;;  %v165_v14 = vld [vmem:[#allocation9 + $0x28] sm:$0xff]  ;;  %v21429_v15 = vld [vmem:[#allocation5 + $0x20] sm:$0xff]   ;;  %v166_v16 = vld [vmem:[#allocation9 + $0x30] sm:$0xff] }
  0x5e   :  { %16971 = vmatprep.mubr.bf16.mxu0 %v180_v6  ;;  %v167_v17 = vld [vmem:[#allocation9 + $0x38] sm:$0xff]  ;;  %v21430_v18 = vld [vmem:[#allocation5 + $0x28] sm:$0xff]   ;;  %v22370_v19 = vpack.c.bf16 %v165_v14, %v164_v13  ;;  %v168_v20 = vld [vmem:[#allocation9 + $0x40] sm:$0xff] }
  0x5f   :  { %16958 = vmatpush3.bf16.msra.mxu0 %v21426_v1  ;;  %19848 = vmatprep.subr.bf16.mxu1 %v22363_v9  ;;  %v169_v21 = vld [vmem:[#allocation9 + $0x48] sm:$0xff]  ;;  %v21431_v22 = vld [vmem:[#allocation5 + $0x30] sm:$0xff]   ;;  %v22374_v23 = vpack.c.bf16 %v167_v17, %v166_v16  ;;  %v171_v25 = vld [vmem:[#allocation9 + $0x58] sm:$0xff] }
  0x60   :  { %16959 = vmatprep.subr.bf16.mxu0 %v21427_v2  ;;  %19850 = vmatpush3.bf16.msra.mxu1 %v22363_v9  ;;  %v170_v24 = vld [vmem:[#allocation9 + $0x50] sm:$0xff]  ;;  %v21432_v26 = vld [vmem:[#allocation5 + $0x38] sm:$0xff]   ;;  %v22378_v27 = vpack.c.bf16 %v169_v21, %v168_v20  ;;  %v172_v30 = vld [vmem:[#allocation9 + $0x60] sm:$0xff] }
  0x61   :  { %19852 = vmatprep.subr.bf16.mxu1 %v22365_v12  ;;  %v178_v28 = vld [vmem:[%s23950_s0 + $0x10] sm:$0xff]  ;;  %v179_v29 = vld [vmem:[%s23950_s0 + $0x18] sm:$0xff]  ;;  %v173_v31 = vld [vmem:[#allocation9 + $0x68] sm:$0xff]  ;;  %v22388_v32 = vpack.c.bf16 %v171_v25, %v170_v24 }
  0x62   :  { %v181_v33 = vpack.c.bf16 %v179_v29, %v178_v28  ;;  %v22392_v34 = vpack.c.bf16 %v173_v31, %v172_v30  ;;  %v174_v35 = vld [vmem:[#allocation9 + $0x70] sm:$0xff]  ;;  %v175_v36 = vld [vmem:[#allocation9 + $0x78] sm:$0xff]  ;;  %v21433_v0 = vld [vmem:[#allocation5 + $0x40] sm:$0xff]   ;;  %v500_v29 = vlaneseq }
  0x63   :  { %16960 = vmatpush3.bf16.msra.mxu0 %v21427_v2  ;;  %v22411_v37 = vpack.c.bf16 %v175_v36, %v174_v35  ;;  %v21434_v1 = vld [vmem:[#allocation5 + $0x48] sm:$0xff]   ;;  %v21435_v2 = vld [vmem:[#allocation5 + $0x50] sm:$0xff]   ;;  %v21436_v4 = vld [vmem:[#allocation5 + $0x58] sm:$0xff]  }
  0x64   :  { %16961 = vmatprep.subr.bf16.mxu0 %v21428_v3  ;;  %19854 = vmatpush3.bf16.msra.mxu1 %v22365_v12  ;;  %v21437_v5 = vld [vmem:[#allocation5 + $0x60] sm:$0xff]   ;;  %v21438_v6 = vld [vmem:[#allocation5 + $0x68] sm:$0xff]   ;;  %v21439_v7 = vld [vmem:[#allocation5 + $0x70] sm:$0xff]   ;;  %v501_v30 = vshrl.u32 %v500_v29, 7 }
  0x65   :  { %19856 = vmatprep.subr.bf16.mxu1 %v22370_v19  ;;  %v21440_v8 = vld [vmem:[#allocation5 + $0x78] sm:$0xff]   ;;  %v493_v31 = vld [vmem:[#allocation10] sm:$0x1] }
  0x67   :  { %16962 = vmatpush3.bf16.msra.mxu0 %v21428_v3  ;;  %v22246_v3 = vmov 0.0  }
  0x68   :  { %16963 = vmatprep.subr.bf16.mxu0 %v21429_v15  ;;  %19858 = vmatpush3.bf16.msra.mxu1 %v22370_v19  ;;  %92 = vst [vmem:[#allocation2] sm:$0xff] %v22246_v3  ;;  %95 = vst [vmem:[#allocation2 + $0x18] sm:$0xff] %v22246_v3 }
  0x69   :  { %19860 = vmatprep.subr.bf16.mxu1 %v22374_v23  ;;  %96 = vst [vmem:[#allocation2 + $0x20] sm:$0xff] %v22246_v3  ;;  %99 = vst [vmem:[#allocation2 + $0x38] sm:$0xff] %v22246_v3 }
  0x6a   :  { %100 = vst [vmem:[#allocation3] sm:$0xff] %v22246_v3  ;;  %101 = vst [vmem:[#allocation3 + $0x8] sm:$0xff] %v22246_v3 }
  0x6b   :  { %16964 = vmatpush3.bf16.msra.mxu0 %v21429_v15  ;;  %104 = vst [vmem:[#allocation3 + $0x20] sm:$0xff] %v22246_v3  ;;  %105 = vst [vmem:[#allocation3 + $0x28] sm:$0xff] %v22246_v3 }
  0x6c   :  { %16965 = vmatprep.subr.bf16.mxu0 %v21430_v18  ;;  %19862 = vmatpush3.bf16.msra.mxu1 %v22374_v23  ;;  %106 = vst [vmem:[#allocation3 + $0x30] sm:$0xff] %v22246_v3  ;;  %107 = vst [vmem:[#allocation3 + $0x38] sm:$0xff] %v22246_v3 }
  0x6d   :  { %19864 = vmatprep.subr.bf16.mxu1 %v22378_v27  ;;  %110 = vst [vmem:[#allocation3 + $0x50] sm:$0xff] %v22246_v3  ;;  %111 = vst [vmem:[#allocation3 + $0x58] sm:$0xff] %v22246_v3 }
  0x6e   :  { %112 = vst [vmem:[#allocation4] sm:$0xff] %v22246_v3  ;;  %113 = vst [vmem:[#allocation4 + $0x8] sm:$0xff] %v22246_v3 }
  0x6f   :  { %16966 = vmatpush3.bf16.msra.mxu0 %v21430_v18  ;;  %114 = vst [vmem:[#allocation4 + $0x10] sm:$0xff] %v22246_v3  ;;  %115 = vst [vmem:[#allocation4 + $0x18] sm:$0xff] %v22246_v3 }
  0x70   :  { %16967 = vmatprep.subr.bf16.mxu0 %v21431_v22  ;;  %19866 = vmatpush3.bf16.msra.mxu1 %v22378_v27  ;;  %116 = vst [vmem:[#allocation4 + $0x20] sm:$0xff] %v22246_v3  ;;  %117 = vst [vmem:[#allocation4 + $0x28] sm:$0xff] %v22246_v3 }
  0x71   :  { %19868 = vmatprep.subr.bf16.mxu1 %v22388_v32  ;;  %130 = vst [vmem:[#allocation4 + $0x90] sm:$0xff] %v22246_v3  ;;  %131 = vst [vmem:[#allocation4 + $0x98] sm:$0xff] %v22246_v3 }
  0x72   :  { %132 = vst [vmem:[#allocation4 + $0xa0] sm:$0xff] %v22246_v3  ;;  %133 = vst [vmem:[#allocation4 + $0xa8] sm:$0xff] %v22246_v3 }
  0x73   :  { %16968 = vmatpush3.bf16.msra.mxu0 %v21431_v22  ;;  %134 = vst [vmem:[#allocation4 + $0xb0] sm:$0xff] %v22246_v3  ;;  %135 = vst [vmem:[#allocation4 + $0xb8] sm:$0xff] %v22246_v3 }
  0x74   :  { %16969 = vmatprep.subr.bf16.mxu0 %v21432_v26  ;;  %19870 = vmatpush3.bf16.msra.mxu1 %v22388_v32  ;;  %136 = vst [vmem:[#allocation4 + $0xc0] sm:$0xff] %v22246_v3  ;;  %137 = vst [vmem:[#allocation4 + $0xc8] sm:$0xff] %v22246_v3 }
  0x75   :  { %19872 = vmatprep.subr.bf16.mxu1 %v22392_v34  ;;  %138 = vst [vmem:[#allocation4 + $0xd0] sm:$0xff] %v22246_v3  ;;  %139 = vst [vmem:[#allocation4 + $0xd8] sm:$0xff] %v22246_v3 }
  0x76   :  { %140 = vst [vmem:[#allocation4 + $0xe0] sm:$0xff] %v22246_v3  ;;  %141 = vst [vmem:[#allocation4 + $0xe8] sm:$0xff] %v22246_v3 }
  0x77   :  { %16970 = vmatpush3.bf16.msra.mxu0 %v21432_v26  ;;  %154 = vst [vmem:[#allocation4 + $0x150] sm:$0xff] %v22246_v3  ;;  %155 = vst [vmem:[#allocation4 + $0x158] sm:$0xff] %v22246_v3 }
  0x78   :  { %19880 = vmatprep.subr.bf16.mxu0 %v22363_v9  ;;  %19874 = vmatpush3.bf16.msra.mxu1 %v22392_v34  ;;  %156 = vst [vmem:[#allocation4 + $0x160] sm:$0xff] %v22246_v3  ;;  %157 = vst [vmem:[#allocation4 + $0x168] sm:$0xff] %v22246_v3 }
  0x79   :  { %19876 = vmatprep.subr.bf16.mxu1 %v22411_v37  ;;  %158 = vst [vmem:[#allocation4 + $0x170] sm:$0xff] %v22246_v3  ;;  %159 = vst [vmem:[#allocation4 + $0x178] sm:$0xff] %v22246_v3 }
  0x7a   :  { %16972 = vmatmul.mubr.bf16.vlgmr.msra.gmra.mrb[0].mxu0 %v181_v33  ;;  %v22456_v33 = vsub.s32 0, %v501_v30 }
  0x7b   :  { %19882 = vmatpush3.bf16.msra.mxu0 %v22363_v9 }
  0x7c   :  { %19884 = vmatprep.subr.bf16.mxu0 %v22365_v12  ;;  %19878 = vmatpush3.bf16.msra.mxu1 %v22411_v37 }
  0x7d   :  { %17051 = vmatprep.subr.bf16.mxu1 %v21433_v0 }
  0x7f   :  { %19886 = vmatpush3.bf16.msra.mxu0 %v22365_v12 }
  0x80   :  { %19888 = vmatprep.subr.bf16.mxu0 %v22370_v19 }
  0x83   :  { %19890 = vmatpush3.bf16.msra.mxu0 %v22370_v19 }
  0x84   :  { %19892 = vmatprep.subr.bf16.mxu0 %v22374_v23 }
  0x87   :  { %19894 = vmatpush3.bf16.msra.mxu0 %v22374_v23 }
  0x88   :  { %19896 = vmatprep.subr.bf16.mxu0 %v22378_v27 }
  0x8b   :  { %19898 = vmatpush3.bf16.msra.mxu0 %v22378_v27 }
  0x8c   :  { %19900 = vmatprep.subr.bf16.mxu0 %v22388_v32 }
  0x8f   :  { %19902 = vmatpush3.bf16.msra.mxu0 %v22388_v32 }
  0x90   :  { %19904 = vmatprep.subr.bf16.mxu0 %v22392_v34 }
  0x93   :  { %19906 = vmatpush3.bf16.msra.mxu0 %v22392_v34 }
  0x94   :  { %19908 = vmatprep.subr.bf16.mxu0 %v22411_v37 }
  0x97   :  { %19910 = vmatpush3.bf16.msra.mxu0 %v22411_v37 }
  0x98   :  { %19912 = vmatprep.subr.bf16.mxu0 %v22363_v9 }
 0x14d   :  { %v22418_v38 = vpop.f32.mrb[0].mxu0 }
 0x14e   :  { %v22420_v39 = vpop.f32.mrb[1].mxu0 }
 0x14f   :  { %v22422_v40 = vpop.f32.mrb[2].mxu0  ;;  %17007 = vmatprep.mubr.f32.mxu1 %v22420_v39 }
 0x150   :  { %v22425_v41 = vpop.f32.mrb[3].mxu0 }
 0x151   :  { %17008 = vmatmul.mubr.f32.vlgmr.msra.gmra.mrb[0].mxu1 %v22425_v41 }
 0x152   :  { %17010 = vmatprep.mubr.f32.mxu1 %v22418_v38  ;;  %17052 = vmatpush3.bf16.msra.mxu1 %v21433_v0 }
 0x153   :  { %17053 = vmatprep.subr.bf16.mxu1 %v21434_v1 }
 0x155   :  { %17011 = vmatmul.mubr.f32.gmra.mrb[2].mxu1 %v22422_v40 }
 0x156   :  { %17054 = vmatpush3.bf16.msra.mxu1 %v21434_v1 }
 0x157   :  { %17055 = vmatprep.subr.bf16.mxu1 %v21435_v2 }
 0x15a   :  { %17056 = vmatpush3.bf16.msra.mxu1 %v21435_v2 }
 0x15b   :  { %17057 = vmatprep.subr.bf16.mxu1 %v21436_v4 }
 0x15e   :  { %17058 = vmatpush3.bf16.msra.mxu1 %v21436_v4 }
 0x15f   :  { %17059 = vmatprep.subr.bf16.mxu1 %v21437_v5 }
 0x162   :  { %17060 = vmatpush3.bf16.msra.mxu1 %v21437_v5 }
 0x163   :  { %17061 = vmatprep.subr.bf16.mxu1 %v21438_v6 }
 0x166   :  { %17062 = vmatpush3.bf16.msra.mxu1 %v21438_v6 }
 0x167   :  { %17063 = vmatprep.subr.bf16.mxu1 %v21439_v7 }
 0x16a   :  { %17064 = vmatpush3.bf16.msra.mxu1 %v21439_v7 }
 0x16b   :  { %17065 = vmatprep.subr.bf16.mxu1 %v21440_v8 }
 0x16e   :  { %17066 = vmatpush3.bf16.msra.mxu1 %v21440_v8 }
 0x16f   :  { %19944 = vmatprep.subr.bf16.mxu1 %v22363_v9 }
 0x224   :  { %v17009_v42 = vpop.f32.mrb[0].mxu1 }
 0x225   :  { %v361_v43 = vpop.f32.mrb[1].mxu1 }
 0x226   :  { %v380_v44 = vadd.f32 %v17009_v42, %v361_v43  ;;  %v497_v42 = vld [vmem:[#allocation12] sm:$0x1] }
 0x228   :  { %v17012_v45 = vpop.f32.mrb[2].mxu1 }
 0x229   :  { %v371_v46 = vpop.f32.mrb[3].mxu1 }
 0x22a   :  { %v381_v47 = vadd.f32 %v380_v44, %v371_v46 }
 0x22c   :  { %v382_v48 = vadd.f32 %v17012_v45, %v381_v47 }
 0x22e   :  { %v383_v49 = vrot.slane %v382_v48, 4 }
 0x230   :  { %v384_v50 = vadd.f32 %v383_v49, %v382_v48 }
 0x232   :  { %v385_v51 = vrot.slane %v384_v50, 2 }
 0x234   :  { %v386_v52 = vadd.f32 %v385_v51, %v384_v50 }
 0x236   :  { %v387_v53 = vrot.slane %v386_v52, 1 }
 0x238   :  { %v388_v54 = vadd.f32 %v387_v53, %v386_v52 }
 0x23a   :  { %v22430_v55 = vmul.f32 0.001953125, %v388_v54 }
 0x23c   :  { %v390_v56 = vsub.f32 %v22420_v39, %v22430_v55  ;;  %v391_v57 = vsub.f32 %v22425_v41, %v22430_v55  ;;  %v392_v58 = vsub.f32 %v22418_v38, %v22430_v55  ;;  %v393_v61 = vsub.f32 %v22422_v40, %v22430_v55 }
 0x23e   :  { %v394_v59 = vmul.f32 %v390_v56, %v390_v56  ;;  %v395_v60 = vmul.f32 %v391_v57, %v391_v57  ;;  %v396_v62 = vmul.f32 %v392_v58, %v392_v58  ;;  %v397_v63 = vmul.f32 %v393_v61, %v393_v61  ;;  %v22104_v61 = vld [vmem:[%s23950_s0 + $0x18] sm:$0xff] }
 0x240   :  { %17045 = vmatprep.mubr.f32.mxu0 %v394_v59  ;;  %v22103_v59 = vld [vmem:[%s23950_s0 + $0x10] sm:$0xff] }
 0x241   :  { %17046 = vmatmul.mubr.f32.vlgmr.msra.gmra.mrb[4].mxu0 %v395_v60 }
 0x242   :  { %17048 = vmatprep.mubr.f32.mxu0 %v396_v62  ;;  %19914 = vmatpush3.bf16.msra.mxu0 %v22363_v9 }
 0x243   :  { %19916 = vmatprep.subr.bf16.mxu0 %v22365_v12 }
 0x245   :  { %17049 = vmatmul.mubr.f32.gmra.mrb[6].mxu0 %v397_v63 }
 0x246   :  { %19918 = vmatpush3.bf16.msra.mxu0 %v22365_v12 }
 0x247   :  { %19920 = vmatprep.subr.bf16.mxu0 %v22370_v19 }
 0x24a   :  { %19922 = vmatpush3.bf16.msra.mxu0 %v22370_v19 }
 0x24b   :  { %19924 = vmatprep.subr.bf16.mxu0 %v22374_v23 }
 0x24e   :  { %19926 = vmatpush3.bf16.msra.mxu0 %v22374_v23 }
 0x24f   :  { %19928 = vmatprep.subr.bf16.mxu0 %v22378_v27 }
 0x252   :  { %19930 = vmatpush3.bf16.msra.mxu0 %v22378_v27 }
 0x253   :  { %19932 = vmatprep.subr.bf16.mxu0 %v22388_v32 }
 0x256   :  { %19934 = vmatpush3.bf16.msra.mxu0 %v22388_v32 }
 0x257   :  { %19936 = vmatprep.subr.bf16.mxu0 %v22392_v34 }
 0x25a   :  { %19938 = vmatpush3.bf16.msra.mxu0 %v22392_v34 }
 0x25b   :  { %19940 = vmatprep.subr.bf16.mxu0 %v22411_v37 }
 0x25e   :  { %19942 = vmatpush3.bf16.msra.mxu0 %v22411_v37 }
 0x314   :  { %v17047_v10 = vpop.f32.mrb[4].mxu0 }
 0x315   :  { %v464_v11 = vpop.f32.mrb[5].mxu0 }
 0x316   :  { %v483_v13 = vadd.f32 %v17047_v10, %v464_v11 }
 0x318   :  { %v17050_v14 = vpop.f32.mrb[6].mxu0 }
 0x319   :  { %v474_v15 = vpop.f32.mrb[7].mxu0 }
 0x31a   :  { %v484_v16 = vadd.f32 %v483_v13, %v474_v15 }
 0x31c   :  { %v485_v17 = vadd.f32 %v17050_v14, %v484_v16 }
 0x31e   :  { %v486_v18 = vrot.slane %v485_v17, 4 }
 0x320   :  { %v487_v20 = vadd.f32 %v486_v18, %v485_v17 }
 0x322   :  { %v488_v21 = vrot.slane %v487_v20, 2 }
 0x324   :  { %v489_v22 = vadd.f32 %v488_v21, %v487_v20 }
 0x326   :  { %v490_v24 = vrot.slane %v489_v22, 1 }
 0x328   :  { %v491_v25 = vadd.f32 %v490_v24, %v489_v22 }
 0x32a   :  { %v492_v26 = vmul.f32 0.001953125, %v491_v25 }
 0x32c   :  { %v494_v28 = vadd.f32 1e-05, %v492_v26 }
 0x32e   :  { %22057 = vrsqrt.f32 %v494_v28 }
 0x338   :  { %v22058_v35 = vpop.eup %22057 }
 0x339   :  { %v496_v36 = vmul.f32 %v22058_v35, %v493_v31  ;;  %v21441_v35 = vld [vmem:[#allocation5 + $0x80] sm:$0xff]  }
 0x33a   :  { %17147 = vmatprep.subr.bf16.mxu0 %v21441_v35 }
 0x33b   :  { %v498_v43 = vmul.f32 %v496_v36, %v22430_v55  ;;  %v503_v44 = vrot.slane %v496_v36, %v22456_v33  ;;  %v21442_v36 = vld [vmem:[#allocation5 + $0x88] sm:$0xff]  }
 0x33d   :  { %v499_v45 = vsub.f32 %v497_v42, %v498_v43  ;;  %v504_v46 = vmul.f32 %v503_v44, %v22420_v39  ;;  %v505_v47 = vmul.f32 %v503_v44, %v22425_v41  ;;  %v506_v48 = vmul.f32 %v22418_v38, %v503_v44  ;;  %v22101_v39 = vld [vmem:[%s23950_s0] sm:$0xff]  ;;  %v22102_v38 = vld [vmem:[%s23950_s0 + $0x8] sm:$0xff]  ;;  %v21443_v42 = vld [vmem:[#allocation5 + $0x90] sm:$0xff]  }
 0x33e   :  { %v507_v49 = vmul.f32 %v22422_v40, %v503_v44  ;;  %v21444_v43 = vld [vmem:[#allocation5 + $0x98] sm:$0xff]   ;;  %v21445_v44 = vld [vmem:[#allocation5 + $0xa0] sm:$0xff]  }
 0x33f   :  { %v511_v50 = vrot.slane %v499_v45, %v22456_v33  ;;  %v21446_v45 = vld [vmem:[#allocation5 + $0xa8] sm:$0xff]  }
 0x341   :  { %v512_v51 = vadd.f32 %v511_v50, %v504_v46  ;;  %v513_v52 = vadd.f32 %v511_v50, %v505_v47  ;;  %v514_v53 = vadd.f32 %v511_v50, %v506_v48  ;;  %v515_v54 = vadd.f32 %v511_v50, %v507_v49  ;;  %v21447_v46 = vld [vmem:[#allocation5 + $0xb0] sm:$0xff]   ;;  %v21448_v47 = vld [vmem:[#allocation5 + $0xb8] sm:$0xff]  }
 0x343   :  { %v516_v56 = vmax.f32 %v512_v51, 0.0  ;;  %v517_v57 = vmax.f32 %v513_v52, 0.0  ;;  %v518_v55 = vmax.f32 %v514_v53, 0.0  ;;  %v519_v58 = vmax.f32 %v515_v54, 0.0 }
 0x345   :  { %520 = vst [vmem:[#allocation4 + $0x30] sm:$0xff] %v516_v56  ;;  %521 = vst [vmem:[#allocation4 + $0x60] sm:$0xff] %v517_v57  ;;  %v524_v41 = vadd.f32 %v22101_v39, %v516_v56  ;;  %v525_v40 = vadd.f32 %v22102_v38, %v517_v57  ;;  %v526_v60 = vadd.f32 %v22103_v59, %v518_v55  ;;  %v842_v59 = vld [vmem:[#allocation10 + $0x1] sm:$0x1] }
 0x346   :  { %522 = vst [vmem:[#allocation4 + $0xf0] sm:$0xff] %v518_v55  ;;  %523 = vst [vmem:[#allocation4 + $0x120] sm:$0xff] %v519_v58  ;;  %v527_v62 = vadd.f32 %v22104_v61, %v519_v58 }
 0x347   :  { %v528_v63 = vpack.c.bf16 %v525_v40, %v524_v41 }
 0x348   :  { %v529_v0 = vpack.c.bf16 %v527_v62, %v526_v60  ;;  %v846_v62 = vld [vmem:[#allocation12 + $0x1] sm:$0x1] }
 0x349   :  { %17067 = vmatprep.mubr.bf16.mxu1 %v528_v63 }
 0x34a   :  { %17068 = vmatmul.mubr.bf16.vlgmr.msra.gmra.mrb[4].mxu1 %v529_v0 }
 0x34b   :  { %19946 = vmatpush3.bf16.msra.mxu1 %v22363_v9 }
 0x34c   :  { %19948 = vmatprep.subr.bf16.mxu1 %v22365_v12 }
 0x34f   :  { %19950 = vmatpush3.bf16.msra.mxu1 %v22365_v12 }
 0x350   :  { %19952 = vmatprep.subr.bf16.mxu1 %v22370_v19 }
 0x353   :  { %19954 = vmatpush3.bf16.msra.mxu1 %v22370_v19 }
 0x354   :  { %19956 = vmatprep.subr.bf16.mxu1 %v22374_v23 }
 0x357   :  { %19958 = vmatpush3.bf16.msra.mxu1 %v22374_v23 }
 0x358   :  { %19960 = vmatprep.subr.bf16.mxu1 %v22378_v27 }
 0x35b   :  { %19962 = vmatpush3.bf16.msra.mxu1 %v22378_v27 }
 0x35c   :  { %19964 = vmatprep.subr.bf16.mxu1 %v22388_v32 }
 0x35f   :  { %19966 = vmatpush3.bf16.msra.mxu1 %v22388_v32 }
 0x360   :  { %19968 = vmatprep.subr.bf16.mxu1 %v22392_v34 }
 0x363   :  { %19970 = vmatpush3.bf16.msra.mxu1 %v22392_v34 }
 0x364   :  { %19972 = vmatprep.subr.bf16.mxu1 %v22411_v37 }
 0x367   :  { %19974 = vmatpush3.bf16.msra.mxu1 %v22411_v37 }
 0x368   :  { %19976 = vmatprep.subr.bf16.mxu1 %v22363_v9 }
 0x41d   :  { %v22493_v1 = vpop.f32.mrb[4].mxu1 }
 0x41e   :  { %v22495_v2 = vpop.f32.mrb[5].mxu1 }
 0x41f   :  { %v22497_v3 = vpop.f32.mrb[6].mxu1  ;;  %17103 = vmatprep.mubr.f32.mxu0 %v22495_v2 }
 0x420   :  { %v22500_v4 = vpop.f32.mrb[7].mxu1 }
 0x421   :  { %17104 = vmatmul.mubr.f32.vlgmr.msra.gmra.mrb[8].mxu0 %v22500_v4 }
 0x422   :  { %17106 = vmatprep.mubr.f32.mxu0 %v22493_v1  ;;  %17148 = vmatpush3.bf16.msra.mxu0 %v21441_v35 }
 0x423   :  { %17149 = vmatprep.subr.bf16.mxu0 %v21442_v36 }
 0x425   :  { %17107 = vmatmul.mubr.f32.gmra.mrb[10].mxu0 %v22497_v3 }
 0x426   :  { %17150 = vmatpush3.bf16.msra.mxu0 %v21442_v36 }
 0x427   :  { %17151 = vmatprep.subr.bf16.mxu0 %v21443_v42 }
 0x42a   :  { %17152 = vmatpush3.bf16.msra.mxu0 %v21443_v42 }
 0x42b   :  { %17153 = vmatprep.subr.bf16.mxu0 %v21444_v43 }
 0x42e   :  { %17154 = vmatpush3.bf16.msra.mxu0 %v21444_v43 }
 0x42f   :  { %17155 = vmatprep.subr.bf16.mxu0 %v21445_v44 }
 0x432   :  { %17156 = vmatpush3.bf16.msra.mxu0 %v21445_v44 }
 0x433   :  { %17157 = vmatprep.subr.bf16.mxu0 %v21446_v45 }
 0x436   :  { %17158 = vmatpush3.bf16.msra.mxu0 %v21446_v45 }
 0x437   :  { %17159 = vmatprep.subr.bf16.mxu0 %v21447_v46 }
 0x43a   :  { %17160 = vmatpush3.bf16.msra.mxu0 %v21447_v46 }
 0x43b   :  { %17161 = vmatprep.subr.bf16.mxu0 %v21448_v47 }
 0x43e   :  { %17162 = vmatpush3.bf16.msra.mxu0 %v21448_v47 }
 0x43f   :  { %20008 = vmatprep.subr.bf16.mxu0 %v22363_v9 }
 0x4f4   :  { %v17105_v5 = vpop.f32.mrb[8].mxu0 }
 0x4f5   :  { %v710_v6 = vpop.f32.mrb[9].mxu0 }
 0x4f6   :  { %v729_v7 = vadd.f32 %v17105_v5, %v710_v6 }
 0x4f8   :  { %v17108_v8 = vpop.f32.mrb[10].mxu0 }
 0x4f9   :  { %v720_v10 = vpop.f32.mrb[11].mxu0 }
 0x4fa   :  { %v730_v11 = vadd.f32 %v729_v7, %v720_v10 }
 0x4fc   :  { %v731_v13 = vadd.f32 %v17108_v8, %v730_v11 }
 0x4fe   :  { %v732_v14 = vrot.slane %v731_v13, 4 }
 0x500   :  { %v733_v15 = vadd.f32 %v732_v14, %v731_v13 }
 0x502   :  { %v734_v16 = vrot.slane %v733_v15, 2 }
 0x504   :  { %v735_v17 = vadd.f32 %v734_v16, %v733_v15 }
 0x506   :  { %v736_v18 = vrot.slane %v735_v17, 1 }
 0x508   :  { %v737_v20 = vadd.f32 %v736_v18, %v735_v17 }
 0x50a   :  { %v22505_v21 = vmul.f32 0.001953125, %v737_v20 }
 0x50c   :  { %v739_v22 = vsub.f32 %v22495_v2, %v22505_v21  ;;  %v740_v24 = vsub.f32 %v22500_v4, %v22505_v21  ;;  %v741_v25 = vsub.f32 %v22493_v1, %v22505_v21  ;;  %v742_v29 = vsub.f32 %v22497_v3, %v22505_v21 }
 0x50e   :  { %v743_v26 = vmul.f32 %v739_v22, %v739_v22  ;;  %v744_v28 = vmul.f32 %v740_v24, %v740_v24  ;;  %v745_v30 = vmul.f32 %v741_v25, %v741_v25  ;;  %v746_v31 = vmul.f32 %v742_v29, %v742_v29 }
 0x510   :  { %17141 = vmatprep.mubr.f32.mxu1 %v743_v26 }
 0x511   :  { %17142 = vmatmul.mubr.f32.vlgmr.msra.gmra.mrb[8].mxu1 %v744_v28 }
 0x512   :  { %17144 = vmatprep.mubr.f32.mxu1 %v745_v30  ;;  %19978 = vmatpush3.bf16.msra.mxu1 %v22363_v9 }
 0x513   :  { %19980 = vmatprep.subr.bf16.mxu1 %v22365_v12 }
 0x515   :  { %17145 = vmatmul.mubr.f32.gmra.mrb[10].mxu1 %v746_v31 }
 0x516   :  { %19982 = vmatpush3.bf16.msra.mxu1 %v22365_v12 }
 0x517   :  { %19984 = vmatprep.subr.bf16.mxu1 %v22370_v19 }
 0x51a   :  { %19986 = vmatpush3.bf16.msra.mxu1 %v22370_v19 }
 0x51b   :  { %19988 = vmatprep.subr.bf16.mxu1 %v22374_v23 }
 0x51e   :  { %19990 = vmatpush3.bf16.msra.mxu1 %v22374_v23 }
 0x51f   :  { %19992 = vmatprep.subr.bf16.mxu1 %v22378_v27 }
 0x522   :  { %19994 = vmatpush3.bf16.msra.mxu1 %v22378_v27 }
 0x523   :  { %19996 = vmatprep.subr.bf16.mxu1 %v22388_v32 }
 0x526   :  { %19998 = vmatpush3.bf16.msra.mxu1 %v22388_v32 }
 0x527   :  { %20000 = vmatprep.subr.bf16.mxu1 %v22392_v34 }
 0x52a   :  { %20002 = vmatpush3.bf16.msra.mxu1 %v22392_v34 }
 0x52b   :  { %20004 = vmatprep.subr.bf16.mxu1 %v22411_v37 }
 0x52e   :  { %20006 = vmatpush3.bf16.msra.mxu1 %v22411_v37 }
 0x5e4   :  { %v17143_v48 = vpop.f32.mrb[8].mxu1 }
 0x5e5   :  { %v813_v49 = vpop.f32.mrb[9].mxu1 }
 0x5e6   :  { %v832_v50 = vadd.f32 %v17143_v48, %v813_v49 }
 0x5e8   :  { %v17146_v51 = vpop.f32.mrb[10].mxu1 }
 0x5e9   :  { %v823_v52 = vpop.f32.mrb[11].mxu1 }
 0x5ea   :  { %v833_v53 = vadd.f32 %v832_v50, %v823_v52 }
 0x5ec   :  { %v834_v54 = vadd.f32 %v17146_v51, %v833_v53 }
 0x5ee   :  { %v835_v56 = vrot.slane %v834_v54, 4 }
 0x5f0   :  { %v836_v57 = vadd.f32 %v835_v56, %v834_v54 }
 0x5f2   :  { %v837_v55 = vrot.slane %v836_v57, 2 }
 0x5f4   :  { %v838_v58 = vadd.f32 %v837_v55, %v836_v57  ;;  %v21449_v57 = vld [vmem:[#allocation5 + $0x100] sm:$0xff]   ;;  %v21450_v55 = vld [vmem:[#allocation5 + $0x108] sm:$0xff]  }
 0x5f5   :  { %17243 = vmatprep.subr.bf16.mxu1 %v21449_v57 }
 0x5f6   :  { %v839_v39 = vrot.slane %v838_v58, 1 }
 0x5f8   :  { %v840_v41 = vadd.f32 %v839_v39, %v838_v58  ;;  %v21451_v58 = vld [vmem:[#allocation5 + $0x110] sm:$0xff]   ;;  %v21452_v39 = vld [vmem:[#allocation5 + $0x118] sm:$0xff]  }
 0x5fa   :  { %v841_v38 = vmul.f32 0.001953125, %v840_v41  ;;  %v21453_v41 = vld [vmem:[#allocation5 + $0x120] sm:$0xff]  }
 0x5fc   :  { %v843_v40 = vadd.f32 1e-05, %v841_v38  ;;  %v21454_v38 = vld [vmem:[#allocation5 + $0x128] sm:$0xff]  }
 0x5fe   :  { %22059 = vrsqrt.f32 %v843_v40  ;;  %v21455_v40 = vld [vmem:[#allocation5 + $0x130] sm:$0xff]  }
 0x608   :  { %v22060_v60 = vpop.eup %22059 }
 0x609   :  { %v845_v61 = vmul.f32 %v22060_v60, %v842_v59  ;;  %v21456_v59 = vld [vmem:[#allocation5 + $0x138] sm:$0xff]   ;;  %v21457_v60 = vld [vmem:[#allocation5 + $0xc0] sm:$0xff]  }
 0x60b   :  { %v847_v63 = vmul.f32 %v845_v61, %v22505_v21  ;;  %v852_v0 = vrot.slane %v845_v61, %v22456_v33 }
 0x60d   :  { %v848_v5 = vsub.f32 %v846_v62, %v847_v63  ;;  %v853_v6 = vmul.f32 %v852_v0, %v22495_v2  ;;  %v854_v7 = vmul.f32 %v852_v0, %v22500_v4  ;;  %v855_v8 = vmul.f32 %v22493_v1, %v852_v0 }
 0x60e   :  { %v856_v10 = vmul.f32 %v22497_v3, %v852_v0 }
 0x60f   :  { %v860_v11 = vrot.slane %v848_v5, %v22456_v33 }
 0x611   :  { %v861_v13 = vadd.f32 %v860_v11, %v853_v6  ;;  %v862_v14 = vadd.f32 %v860_v11, %v854_v7  ;;  %v863_v15 = vadd.f32 %v860_v11, %v855_v8  ;;  %v864_v16 = vadd.f32 %v860_v11, %v856_v10 }
 0x613   :  { %v865_v17 = vmax.f32 %v861_v13, 0.0  ;;  %v866_v18 = vmax.f32 %v862_v14, 0.0  ;;  %v867_v20 = vmax.f32 %v863_v15, 0.0  ;;  %v868_v21 = vmax.f32 %v864_v16, 0.0 }
 0x615   :  { %v869_v22 = vpack.c.bf16 %v866_v18, %v865_v17  ;;  %v870_v24 = vpack.c.bf16 %v868_v21, %v867_v20  ;;  %v1183_v18 = vld [vmem:[#allocation10 + $0x2] sm:$0x1] }
 0x617   :  { %17163 = vmatprep.mubr.bf16.mxu0 %v869_v22  ;;  %v1187_v22 = vld [vmem:[#allocation12 + $0x2] sm:$0x1] }
 0x618   :  { %17164 = vmatmul.mubr.bf16.vlgmr.msra.gmra.mrb[12].mxu0 %v870_v24 }
 0x619   :  { %20010 = vmatpush3.bf16.msra.mxu0 %v22363_v9 }
 0x61a   :  { %20012 = vmatprep.subr.bf16.mxu0 %v22365_v12 }
 0x61d   :  { %20014 = vmatpush3.bf16.msra.mxu0 %v22365_v12 }
 0x61e   :  { %20016 = vmatprep.subr.bf16.mxu0 %v22370_v19 }
 0x621   :  { %20018 = vmatpush3.bf16.msra.mxu0 %v22370_v19 }
 0x622   :  { %20020 = vmatprep.subr.bf16.mxu0 %v22374_v23 }
 0x625   :  { %20022 = vmatpush3.bf16.msra.mxu0 %v22374_v23 }
 0x626   :  { %20024 = vmatprep.subr.bf16.mxu0 %v22378_v27 }
 0x629   :  { %20026 = vmatpush3.bf16.msra.mxu0 %v22378_v27 }
 0x62a   :  { %20028 = vmatprep.subr.bf16.mxu0 %v22388_v32 }
 0x62d   :  { %20030 = vmatpush3.bf16.msra.mxu0 %v22388_v32 }
 0x62e   :  { %20032 = vmatprep.subr.bf16.mxu0 %v22392_v34 }
 0x631   :  { %20034 = vmatpush3.bf16.msra.mxu0 %v22392_v34 }
 0x632   :  { %20036 = vmatprep.subr.bf16.mxu0 %v22411_v37 }
 0x635   :  { %20038 = vmatpush3.bf16.msra.mxu0 %v22411_v37 }
 0x636   :  { %20040 = vmatprep.subr.bf16.mxu0 %v22363_v9 }
 0x6eb   :  { %v22554_v1 = vpop.f32.mrb[12].mxu0 }
 0x6ec   :  { %v22556_v2 = vpop.f32.mrb[13].mxu0 }
 0x6ed   :  { %v22558_v3 = vpop.f32.mrb[14].mxu0  ;;  %17199 = vmatprep.mubr.f32.mxu1 %v22556_v2 }
 0x6ee   :  { %v22561_v4 = vpop.f32.mrb[15].mxu0 }
 0x6ef   :  { %17200 = vmatmul.mubr.f32.vlgmr.msra.gmra.mrb[12].mxu1 %v22561_v4 }
 0x6f0   :  { %17202 = vmatprep.mubr.f32.mxu1 %v22554_v1  ;;  %17244 = vmatpush3.bf16.msra.mxu1 %v21449_v57  ;;  %v21464_v57 = vld [vmem:[#allocation5 + $0xf8] sm:$0xff]  }
 0x6f1   :  { %17245 = vmatprep.subr.bf16.mxu1 %v21450_v55 }
 0x6f3   :  { %17203 = vmatmul.mubr.f32.gmra.mrb[14].mxu1 %v22558_v3 }
 0x6f4   :  { %17246 = vmatpush3.bf16.msra.mxu1 %v21450_v55  ;;  %v21465_v55 = vld [vmem:[#allocation5 + $0x140] sm:$0xff]  }
 0x6f5   :  { %17247 = vmatprep.subr.bf16.mxu1 %v21451_v58 }
 0x6f8   :  { %17248 = vmatpush3.bf16.msra.mxu1 %v21451_v58 }
 0x6f9   :  { %17249 = vmatprep.subr.bf16.mxu1 %v21452_v39 }
 0x6fc   :  { %17250 = vmatpush3.bf16.msra.mxu1 %v21452_v39 }
 0x6fd   :  { %17251 = vmatprep.subr.bf16.mxu1 %v21453_v41 }
 0x700   :  { %17252 = vmatpush3.bf16.msra.mxu1 %v21453_v41 }
 0x701   :  { %17253 = vmatprep.subr.bf16.mxu1 %v21454_v38 }
 0x704   :  { %17254 = vmatpush3.bf16.msra.mxu1 %v21454_v38 }
 0x705   :  { %17255 = vmatprep.subr.bf16.mxu1 %v21455_v40 }
 0x708   :  { %17256 = vmatpush3.bf16.msra.mxu1 %v21455_v40 }
 0x709   :  { %17257 = vmatprep.subr.bf16.mxu1 %v21456_v59 }
 0x70c   :  { %17258 = vmatpush3.bf16.msra.mxu1 %v21456_v59  ;;  %v21466_v59 = vld [vmem:[#allocation5 + $0x148] sm:$0xff]  }
 0x70d   :  { %17263 = vmatprep.subr.bf16.mxu1 %v21457_v60 }
 0x7c2   :  { %v17201_v25 = vpop.f32.mrb[12].mxu1 }
 0x7c3   :  { %v1051_v26 = vpop.f32.mrb[13].mxu1 }
 0x7c4   :  { %v1070_v28 = vadd.f32 %v17201_v25, %v1051_v26 }
 0x7c6   :  { %v17204_v29 = vpop.f32.mrb[14].mxu1 }
 0x7c7   :  { %v1061_v30 = vpop.f32.mrb[15].mxu1 }
 0x7c8   :  { %v1071_v31 = vadd.f32 %v1070_v28, %v1061_v30 }
 0x7ca   :  { %v1072_v35 = vadd.f32 %v17204_v29, %v1071_v31 }
 0x7cc   :  { %v1073_v36 = vrot.slane %v1072_v35, 4 }
 0x7ce   :  { %v1074_v42 = vadd.f32 %v1073_v36, %v1072_v35 }
 0x7d0   :  { %v1075_v43 = vrot.slane %v1074_v42, 2 }
 0x7d2   :  { %v1076_v44 = vadd.f32 %v1075_v43, %v1074_v42 }
 0x7d4   :  { %v1077_v45 = vrot.slane %v1076_v44, 1 }
 0x7d6   :  { %v1078_v46 = vadd.f32 %v1077_v45, %v1076_v44 }
 0x7d8   :  { %v22566_v47 = vmul.f32 0.001953125, %v1078_v46 }
 0x7da   :  { %v1080_v48 = vsub.f32 %v22556_v2, %v22566_v47  ;;  %v1081_v49 = vsub.f32 %v22561_v4, %v22566_v47  ;;  %v1082_v50 = vsub.f32 %v22554_v1, %v22566_v47  ;;  %v1083_v53 = vsub.f32 %v22558_v3, %v22566_v47 }
 0x7dc   :  { %v1084_v51 = vmul.f32 %v1080_v48, %v1080_v48  ;;  %v1085_v52 = vmul.f32 %v1081_v49, %v1081_v49  ;;  %v1086_v54 = vmul.f32 %v1082_v50, %v1082_v50  ;;  %v1087_v56 = vmul.f32 %v1083_v53, %v1083_v53  ;;  %v21458_v49 = vld [vmem:[#allocation5 + $0xc8] sm:$0xff]   ;;  %v21461_v53 = vld [vmem:[#allocation5 + $0xe0] sm:$0xff]  }
 0x7de   :  { %17237 = vmatprep.mubr.f32.mxu0 %v1084_v51 }
 0x7df   :  { %17238 = vmatmul.mubr.f32.vlgmr.msra.gmra.mrb[16].mxu0 %v1085_v52  ;;  %v21460_v52 = vld [vmem:[#allocation5 + $0xd8] sm:$0xff]  }
 0x7e0   :  { %17240 = vmatprep.mubr.f32.mxu0 %v1086_v54  ;;  %20042 = vmatpush3.bf16.msra.mxu0 %v22363_v9  ;;  %v21462_v54 = vld [vmem:[#allocation5 + $0xe8] sm:$0xff]  }
 0x7e1   :  { %20044 = vmatprep.subr.bf16.mxu0 %v22365_v12 }
 0x7e3   :  { %17241 = vmatmul.mubr.f32.gmra.mrb[18].mxu0 %v1087_v56  ;;  %v21463_v56 = vld [vmem:[#allocation5 + $0xf0] sm:$0xff]  }
 0x7e4   :  { %20046 = vmatpush3.bf16.msra.mxu0 %v22365_v12 }
 0x7e5   :  { %20048 = vmatprep.subr.bf16.mxu0 %v22370_v19 }
 0x7e8   :  { %20050 = vmatpush3.bf16.msra.mxu0 %v22370_v19 }
 0x7e9   :  { %20052 = vmatprep.subr.bf16.mxu0 %v22374_v23 }
 0x7ec   :  { %20054 = vmatpush3.bf16.msra.mxu0 %v22374_v23 }
 0x7ed   :  { %20056 = vmatprep.subr.bf16.mxu0 %v22378_v27 }
 0x7f0   :  { %20058 = vmatpush3.bf16.msra.mxu0 %v22378_v27 }
 0x7f1   :  { %20060 = vmatprep.subr.bf16.mxu0 %v22388_v32 }
 0x7f4   :  { %20062 = vmatpush3.bf16.msra.mxu0 %v22388_v32 }
 0x7f5   :  { %20064 = vmatprep.subr.bf16.mxu0 %v22392_v34 }
 0x7f8   :  { %20066 = vmatpush3.bf16.msra.mxu0 %v22392_v34 }
 0x7f9   :  { %20068 = vmatprep.subr.bf16.mxu0 %v22411_v37 }
 0x7fc   :  { %20070 = vmatpush3.bf16.msra.mxu0 %v22411_v37 }
 0x7fd   :  { %20072 = vmatprep.subr.bf16.mxu0 %v22363_v9 }
 0x8b2   :  { %v17239_v61 = vpop.f32.mrb[16].mxu0 }
 0x8b3   :  { %v1154_v62 = vpop.f32.mrb[17].mxu0 }
 0x8b4   :  { %v1173_v63 = vadd.f32 %v17239_v61, %v1154_v62  ;;  %v21467_v61 = vld [vmem:[#allocation5 + $0x150] sm:$0xff]   ;;  %v21468_v62 = vld [vmem:[#allocation5 + $0x158] sm:$0xff]  }
 0x8b6   :  { %v17242_v0 = vpop.f32.mrb[18].mxu0 }
 0x8b7   :  { %v1164_v5 = vpop.f32.mrb[19].mxu0 }
 0x8b8   :  { %v1174_v6 = vadd.f32 %v1173_v63, %v1164_v5  ;;  %v21469_v63 = vld [vmem:[#allocation5 + $0x160] sm:$0xff]   ;;  %v21471_v5 = vld [vmem:[#allocation5 + $0x170] sm:$0xff]  }
 0x8ba   :  { %v1175_v7 = vadd.f32 %v17242_v0, %v1174_v6  ;;  %v21470_v0 = vld [vmem:[#allocation5 + $0x168] sm:$0xff]   ;;  %v21472_v6 = vld [vmem:[#allocation5 + $0x178] sm:$0xff]  }
 0x8bc   :  { %v1176_v8 = vrot.slane %v1175_v7, 4 }
 0x8be   :  { %v1177_v10 = vadd.f32 %v1176_v8, %v1175_v7 }
 0x8c0   :  { %v1178_v11 = vrot.slane %v1177_v10, 2 }
 0x8c2   :  { %v1179_v13 = vadd.f32 %v1178_v11, %v1177_v10 }
 0x8c4   :  { %v1180_v14 = vrot.slane %v1179_v13, 1 }
 0x8c6   :  { %v1181_v15 = vadd.f32 %v1180_v14, %v1179_v13 }
 0x8c8   :  { %v1182_v16 = vmul.f32 0.001953125, %v1181_v15 }
 0x8ca   :  { %v1184_v17 = vadd.f32 1e-05, %v1182_v16 }
 0x8cc   :  { %22061 = vrsqrt.f32 %v1184_v17 }
 0x8d6   :  { %v22062_v20 = vpop.eup %22061 }
 0x8d7   :  { %v1186_v21 = vmul.f32 %v22062_v20, %v1183_v18 }
 0x8d9   :  { %v1188_v24 = vmul.f32 %v1186_v21, %v22566_v47  ;;  %v1193_v25 = vrot.slane %v1186_v21, %v22456_v33 }
 0x8db   :  { %v1189_v26 = vsub.f32 %v1187_v22, %v1188_v24  ;;  %v1194_v28 = vmul.f32 %v1193_v25, %v22556_v2  ;;  %v1195_v29 = vmul.f32 %v1193_v25, %v22561_v4  ;;  %v1196_v30 = vmul.f32 %v22554_v1, %v1193_v25  ;;  %v21459_v1 = vld [vmem:[#allocation5 + $0xd0] sm:$0xff]  }
 0x8dc   :  { %v1197_v31 = vmul.f32 %v22558_v3, %v1193_v25 }
 0x8dd   :  { %v1201_v35 = vrot.slane %v1189_v26, %v22456_v33 }
 0x8df   :  { %v1202_v36 = vadd.f32 %v1201_v35, %v1194_v28  ;;  %v1203_v42 = vadd.f32 %v1201_v35, %v1195_v29  ;;  %v1204_v43 = vadd.f32 %v1201_v35, %v1196_v30  ;;  %v1205_v44 = vadd.f32 %v1201_v35, %v1197_v31 }
 0x8e1   :  { %v1206_v45 = vmax.f32 %v1202_v36, 0.0  ;;  %v1207_v46 = vmax.f32 %v1203_v42, 0.0  ;;  %v1208_v47 = vmax.f32 %v1204_v43, 0.0  ;;  %v1209_v48 = vmax.f32 %v1205_v44, 0.0 }
 0x8e3   :  { %1212 = vst [vmem:[#allocation2 + $0x28] sm:$0xff] %v1208_v47  ;;  %1213 = vst [vmem:[#allocation2 + $0x30] sm:$0xff] %v1209_v48  ;;  %v1241_v2 = vpack.c.bf16 %v1207_v46, %v1206_v45  ;;  %v1242_v4 = vpack.c.bf16 %v1209_v48, %v1208_v47 }
 0x8e4   :  { %1210 = vst [vmem:[#allocation2 + $0x8] sm:$0xff] %v1206_v45  ;;  %1211 = vst [vmem:[#allocation2 + $0x10] sm:$0xff] %v1207_v46 }
 0x8e5   :  { %17259 = vmatprep.mubr.bf16.mxu1 %v1241_v2  ;;  %v21473_v2 = vld [vmem:[#allocation5 + $0x1c0] sm:$0xff]  }
 0x8e6   :  { %17260 = vmatmul.mubr.bf16.vlgmr.msra.gmra.mrb[16].mxu1 %v1242_v4  ;;  %v21474_v4 = vld [vmem:[#allocation5 + $0x1c8] sm:$0xff]  }
 0x8e7   :  { %17264 = vmatpush3.bf16.msra.mxu1 %v21457_v60 }
 0x8e8   :  { %17265 = vmatprep.subr.bf16.mxu1 %v21458_v49 }
 0x8ea   :  { %v1216_v58 = vld [vmem:[#allocation2 + $0x27] sm:$0xff]  ;;  %v1217_v39 = vld [vmem:[#allocation2 + $0x2f] sm:$0xff] }
 0x8eb   :  { %v1214_v3 = vld [vmem:[#allocation2 + $0x7] sm:$0xff]  ;;  %v1215_v50 = vld [vmem:[#allocation2 + $0xf] sm:$0xff]  ;;  %17266 = vmatpush3.bf16.msra.mxu1 %v21458_v49  ;;  %v1219_v40 = vpack.c.bf16 %v1217_v39, %v1216_v58 }
 0x8ec   :  { %v1218_v51 = vpack.c.bf16 %v1215_v50, %v1214_v3  ;;  %17267 = vmatprep.subr.bf16.mxu1 %v21459_v1  ;;  %v1454_v41 = vld [vmem:[#allocation2 + $0x9] sm:$0xff]  ;;  %v1455_v38 = vld [vmem:[#allocation2 + $0x11] sm:$0xff]  ;;  %v21477_v3 = vld [vmem:[#allocation5 + $0x1e0] sm:$0xff]  }
 0x8ed   :  { %v1458_v60 = vpack.c.bf16 %v1455_v38, %v1454_v41  ;;  %v1456_v7 = vld [vmem:[#allocation2 + $0x29] sm:$0xff]  ;;  %v1457_v8 = vld [vmem:[#allocation2 + $0x31] sm:$0xff] }
 0x8ee   :  { %17279 = vmatprep.mubr.bf16.mxu1 %v1218_v51  ;;  %v1459_v10 = vpack.c.bf16 %v1457_v8, %v1456_v7  ;;  %v21475_v49 = vld [vmem:[#allocation5 + $0x1d0] sm:$0xff]   ;;  %v21478_v50 = vld [vmem:[#allocation5 + $0x1e8] sm:$0xff]   ;;  %v1780_v8 = vld [vmem:[#allocation12 + $0x3] sm:$0x1] }
 0x8ef   :  { %17268 = vmatpush3.bf16.msra.mxu1 %v21459_v1  ;;  %v21476_v1 = vld [vmem:[#allocation5 + $0x1d8] sm:$0xff]   ;;  %v21479_v51 = vld [vmem:[#allocation5 + $0x1f0] sm:$0xff]  }
 0x8f0   :  { %17269 = vmatprep.subr.bf16.mxu1 %v21460_v52 }
 0x8f3   :  { %17270 = vmatpush3.bf16.msra.mxu1 %v21460_v52  ;;  %v21480_v52 = vld [vmem:[#allocation5 + $0x1f8] sm:$0xff]  }
 0x8f4   :  { %17271 = vmatprep.subr.bf16.mxu1 %v21461_v53 }
 0x8f7   :  { %17272 = vmatpush3.bf16.msra.mxu1 %v21461_v53  ;;  %v21481_v53 = vld [vmem:[#allocation5 + $0x180] sm:$0xff]  }
 0x8f8   :  { %17273 = vmatprep.subr.bf16.mxu1 %v21462_v54 }
 0x8fb   :  { %17274 = vmatpush3.bf16.msra.mxu1 %v21462_v54 }
 0x8fc   :  { %17275 = vmatprep.subr.bf16.mxu1 %v21463_v56 }
 0x8ff   :  { %17276 = vmatpush3.bf16.msra.mxu1 %v21463_v56 }
 0x900   :  { %17277 = vmatprep.subr.bf16.mxu1 %v21464_v57 }
 0x903   :  { %17278 = vmatpush3.bf16.msra.mxu1 %v21464_v57 }
 0x904   :  { %17283 = vmatprep.subr.bf16.mxu1 %v21465_v55 }
 0x906   :  { %17280 = vmatmul.mubr.bf16.vlgmr.msra.gmra.mrb[16].mxu1 %v1219_v40 }
 0x907   :  { %17284 = vmatpush3.bf16.msra.mxu1 %v21465_v55  ;;  %17299 = vmatprep.mubr.bf16.mxu1 %v1458_v60 }
 0x908   :  { %17285 = vmatprep.subr.bf16.mxu1 %v21466_v59 }
 0x90b   :  { %17286 = vmatpush3.bf16.msra.mxu1 %v21466_v59 }
 0x90c   :  { %17287 = vmatprep.subr.bf16.mxu1 %v21467_v61 }
 0x90f   :  { %17288 = vmatpush3.bf16.msra.mxu1 %v21467_v61 }
 0x910   :  { %17289 = vmatprep.subr.bf16.mxu1 %v21468_v62 }
 0x913   :  { %17290 = vmatpush3.bf16.msra.mxu1 %v21468_v62 }
 0x914   :  { %17291 = vmatprep.subr.bf16.mxu1 %v21469_v63 }
 0x917   :  { %17292 = vmatpush3.bf16.msra.mxu1 %v21469_v63 }
 0x918   :  { %17293 = vmatprep.subr.bf16.mxu1 %v21470_v0 }
 0x91b   :  { %17294 = vmatpush3.bf16.msra.mxu1 %v21470_v0 }
 0x91c   :  { %17295 = vmatprep.subr.bf16.mxu1 %v21471_v5 }
 0x91f   :  { %17296 = vmatpush3.bf16.msra.mxu1 %v21471_v5  ;;  %v1776_v5 = vld [vmem:[#allocation10 + $0x3] sm:$0x1] }
 0x920   :  { %17297 = vmatprep.subr.bf16.mxu1 %v21472_v6 }
 0x923   :  { %17298 = vmatpush3.bf16.msra.mxu1 %v21472_v6 }
 0x924   :  { %20104 = vmatprep.subr.bf16.mxu1 %v22363_v9 }
 0x926   :  { %17300 = vmatmul.mubr.bf16.vlgmr.msra.gmra.mrb[16].mxu1 %v1459_v10 }
 0x927   :  { %20106 = vmatpush3.bf16.msra.mxu1 %v22363_v9 }
 0x928   :  { %20108 = vmatprep.subr.bf16.mxu1 %v22365_v12 }
 0x92b   :  { %20110 = vmatpush3.bf16.msra.mxu1 %v22365_v12 }
 0x92c   :  { %20112 = vmatprep.subr.bf16.mxu1 %v22370_v19 }
 0x92f   :  { %20114 = vmatpush3.bf16.msra.mxu1 %v22370_v19 }
 0x930   :  { %20116 = vmatprep.subr.bf16.mxu1 %v22374_v23 }
 0x933   :  { %20118 = vmatpush3.bf16.msra.mxu1 %v22374_v23 }
 0x934   :  { %20120 = vmatprep.subr.bf16.mxu1 %v22378_v27 }
 0x937   :  { %20122 = vmatpush3.bf16.msra.mxu1 %v22378_v27 }
 0x938   :  { %20124 = vmatprep.subr.bf16.mxu1 %v22388_v32 }
 0x93b   :  { %20126 = vmatpush3.bf16.msra.mxu1 %v22388_v32 }
 0x93c   :  { %20128 = vmatprep.subr.bf16.mxu1 %v22392_v34 }
 0x93f   :  { %20130 = vmatpush3.bf16.msra.mxu1 %v22392_v34 }
 0x940   :  { %20132 = vmatprep.subr.bf16.mxu1 %v22411_v37 }
 0x943   :  { %20134 = vmatpush3.bf16.msra.mxu1 %v22411_v37 }
 0x944   :  { %20136 = vmatprep.subr.bf16.mxu1 %v22363_v9 }
 0x9f9   :  { %v22616_v11 = vpop.f32.mrb[16].mxu1 }
 0x9fa   :  { %v22618_v13 = vpop.f32.mrb[17].mxu1 }
 0x9fb   :  { %v22620_v14 = vpop.f32.mrb[18].mxu1  ;;  %17335 = vmatprep.mubr.f32.mxu0 %v22618_v13 }
 0x9fc   :  { %v22623_v15 = vpop.f32.mrb[19].mxu1 }
 0x9fd   :  { %17336 = vmatmul.mubr.f32.vlgmr.msra.gmra.mrb[20].mxu0 %v22623_v15 }
 0x9fe   :  { %17338 = vmatprep.mubr.f32.mxu0 %v22616_v11  ;;  %20074 = vmatpush3.bf16.msra.mxu0 %v22363_v9 }
 0x9ff   :  { %20076 = vmatprep.subr.bf16.mxu0 %v22365_v12 }
 0xa01   :  { %17339 = vmatmul.mubr.f32.gmra.mrb[22].mxu0 %v22620_v14 }
 0xa02   :  { %20078 = vmatpush3.bf16.msra.mxu0 %v22365_v12 }
 0xa03   :  { %20080 = vmatprep.subr.bf16.mxu0 %v22370_v19 }
 0xa06   :  { %20082 = vmatpush3.bf16.msra.mxu0 %v22370_v19 }
 0xa07   :  { %20084 = vmatprep.subr.bf16.mxu0 %v22374_v23 }
 0xa0a   :  { %20086 = vmatpush3.bf16.msra.mxu0 %v22374_v23 }
 0xa0b   :  { %20088 = vmatprep.subr.bf16.mxu0 %v22378_v27 }
 0xa0e   :  { %20090 = vmatpush3.bf16.msra.mxu0 %v22378_v27 }
 0xa0f   :  { %20092 = vmatprep.subr.bf16.mxu0 %v22388_v32 }
 0xa12   :  { %20094 = vmatpush3.bf16.msra.mxu0 %v22388_v32 }
 0xa13   :  { %20096 = vmatprep.subr.bf16.mxu0 %v22392_v34 }
 0xa16   :  { %20098 = vmatpush3.bf16.msra.mxu0 %v22392_v34 }
 0xa17   :  { %20100 = vmatprep.subr.bf16.mxu0 %v22411_v37 }
 0xa1a   :  { %20102 = vmatpush3.bf16.msra.mxu0 %v22411_v37 }
 0xa1b   :  { %17379 = vmatprep.subr.bf16.mxu0 %v21473_v2 }
 0xad0   :  { %v17337_v16 = vpop.f32.mrb[20].mxu0 }
 0xad1   :  { %v1644_v17 = vpop.f32.mrb[21].mxu0 }
 0xad2   :  { %v1663_v18 = vadd.f32 %v17337_v16, %v1644_v17 }
 0xad4   :  { %v17340_v20 = vpop.f32.mrb[22].mxu0 }
 0xad5   :  { %v1654_v21 = vpop.f32.mrb[23].mxu0 }
 0xad6   :  { %v1664_v22 = vadd.f32 %v1663_v18, %v1654_v21 }
 0xad8   :  { %v1665_v24 = vadd.f32 %v17340_v20, %v1664_v22 }
 0xada   :  { %v1666_v25 = vrot.slane %v1665_v24, 4 }
 0xadc   :  { %v1667_v26 = vadd.f32 %v1666_v25, %v1665_v24 }
 0xade   :  { %v1668_v28 = vrot.slane %v1667_v26, 2 }
 0xae0   :  { %v1669_v29 = vadd.f32 %v1668_v28, %v1667_v26 }
 0xae2   :  { %v1670_v30 = vrot.slane %v1669_v29, 1 }
 0xae4   :  { %v1671_v31 = vadd.f32 %v1670_v30, %v1669_v29 }
 0xae6   :  { %v1672_v35 = vmul.f32 0.001953125, %v1671_v31 }
 0xae8   :  { %v1673_v36 = vsub.f32 %v22618_v13, %v1672_v35  ;;  %v1674_v42 = vsub.f32 %v22623_v15, %v1672_v35  ;;  %v1675_v43 = vsub.f32 %v22616_v11, %v1672_v35  ;;  %v1676_v46 = vsub.f32 %v22620_v14, %v1672_v35 }
 0xaea   :  { %v1677_v44 = vmul.f32 %v1673_v36, %v1673_v36  ;;  %v1678_v45 = vmul.f32 %v1674_v42, %v1674_v42  ;;  %v1679_v47 = vmul.f32 %v1675_v43, %v1675_v43  ;;  %v1680_v48 = vmul.f32 %v1676_v46, %v1676_v46  ;;  %v21482_v42 = vld [vmem:[#allocation5 + $0x188] sm:$0xff]   ;;  %v21485_v46 = vld [vmem:[#allocation5 + $0x1a0] sm:$0xff]  }
 0xaec   :  { %17373 = vmatprep.mubr.f32.mxu0 %v1677_v44 }
 0xaed   :  { %17374 = vmatmul.mubr.f32.vlgmr.msra.gmra.mrb[24].mxu0 %v1678_v45  ;;  %v21484_v45 = vld [vmem:[#allocation5 + $0x198] sm:$0xff]  }
 0xaee   :  { %17376 = vmatprep.mubr.f32.mxu0 %v1679_v47  ;;  %17380 = vmatpush3.bf16.msra.mxu0 %v21473_v2  ;;  %v21486_v47 = vld [vmem:[#allocation5 + $0x1a8] sm:$0xff]   ;;  %v21488_v2 = vld [vmem:[#allocation5 + $0x1b8] sm:$0xff]  }
 0xaef   :  { %17381 = vmatprep.subr.bf16.mxu0 %v21474_v4 }
 0xaf1   :  { %17377 = vmatmul.mubr.f32.gmra.mrb[26].mxu0 %v1680_v48  ;;  %v21487_v48 = vld [vmem:[#allocation5 + $0x1b0] sm:$0xff]  }
 0xaf2   :  { %17382 = vmatpush3.bf16.msra.mxu0 %v21474_v4  ;;  %v21489_v4 = vld [vmem:[#allocation5 + $0x200] sm:$0xff]  }
 0xaf3   :  { %17383 = vmatprep.subr.bf16.mxu0 %v21475_v49 }
 0xaf6   :  { %17384 = vmatpush3.bf16.msra.mxu0 %v21475_v49 }
 0xaf7   :  { %17385 = vmatprep.subr.bf16.mxu0 %v21476_v1 }
 0xafa   :  { %17386 = vmatpush3.bf16.msra.mxu0 %v21476_v1 }
 0xafb   :  { %17387 = vmatprep.subr.bf16.mxu0 %v21477_v3 }
 0xafe   :  { %17388 = vmatpush3.bf16.msra.mxu0 %v21477_v3 }
 0xaff   :  { %17389 = vmatprep.subr.bf16.mxu0 %v21478_v50 }
 0xb02   :  { %17390 = vmatpush3.bf16.msra.mxu0 %v21478_v50 }
 0xb03   :  { %17391 = vmatprep.subr.bf16.mxu0 %v21479_v51 }
 0xb06   :  { %17392 = vmatpush3.bf16.msra.mxu0 %v21479_v51 }
 0xb07   :  { %17393 = vmatprep.subr.bf16.mxu0 %v21480_v52 }
 0xb0a   :  { %17394 = vmatpush3.bf16.msra.mxu0 %v21480_v52  ;;  %v21490_v52 = vld [vmem:[#allocation5 + $0x208] sm:$0xff]  }
 0xb0b   :  { %17399 = vmatprep.subr.bf16.mxu0 %v21481_v53 }
 0xbc0   :  { %v17375_v54 = vpop.f32.mrb[24].mxu0 }
 0xbc1   :  { %v1747_v56 = vpop.f32.mrb[25].mxu0 }
 0xbc2   :  { %v1766_v57 = vadd.f32 %v17375_v54, %v1747_v56  ;;  %v21491_v54 = vld [vmem:[#allocation5 + $0x210] sm:$0xff]   ;;  %v21492_v56 = vld [vmem:[#allocation5 + $0x218] sm:$0xff]  }
 0xbc4   :  { %v17378_v55 = vpop.f32.mrb[26].mxu0 }
 0xbc5   :  { %v1757_v58 = vpop.f32.mrb[27].mxu0 }
 0xbc6   :  { %v1767_v39 = vadd.f32 %v1766_v57, %v1757_v58  ;;  %v21493_v57 = vld [vmem:[#allocation5 + $0x220] sm:$0xff]   ;;  %v21495_v58 = vld [vmem:[#allocation5 + $0x230] sm:$0xff]  }
 0xbc8   :  { %v1768_v41 = vadd.f32 %v17378_v55, %v1767_v39  ;;  %v21494_v55 = vld [vmem:[#allocation5 + $0x228] sm:$0xff]   ;;  %v21496_v39 = vld [vmem:[#allocation5 + $0x238] sm:$0xff]  }
 0xbca   :  { %v1769_v38 = vrot.slane %v1768_v41, 4 }
 0xbcc   :  { %v1770_v40 = vadd.f32 %v1769_v38, %v1768_v41 }
 0xbce   :  { %v1771_v59 = vrot.slane %v1770_v40, 2 }
 0xbd0   :  { %v1772_v60 = vadd.f32 %v1771_v59, %v1770_v40 }
 0xbd2   :  { %v1773_v61 = vrot.slane %v1772_v60, 1 }
 0xbd4   :  { %v1774_v62 = vadd.f32 %v1773_v61, %v1772_v60 }
 0xbd6   :  { %v1775_v63 = vmul.f32 0.001953125, %v1774_v62 }
 0xbd8   :  { %v1777_v0 = vadd.f32 1e-05, %v1775_v63 }
 0xbda   :  { %22063 = vrsqrt.f32 %v1777_v0 }
 0xbe4   :  { %v22064_v6 = vpop.eup %22063 }
 0xbe5   :  { %v1779_v7 = vmul.f32 %v22064_v6, %v1776_v5 }
 0xbe7   :  { %v1781_v10 = vmul.f32 %v1779_v7, %v1672_v35  ;;  %v1786_v16 = vrot.slane %v1779_v7, %v22456_v33 }
 0xbe9   :  { %v1782_v17 = vsub.f32 %v1780_v8, %v1781_v10  ;;  %v1787_v18 = vmul.f32 %v1786_v16, %v22618_v13  ;;  %v1788_v20 = vmul.f32 %v1786_v16, %v22623_v15  ;;  %v1789_v21 = vmul.f32 %v22616_v11, %v1786_v16  ;;  %v21483_v11 = vld [vmem:[#allocation5 + $0x190] sm:$0xff]  }
 0xbea   :  { %v1790_v22 = vmul.f32 %v22620_v14, %v1786_v16 }
 0xbeb   :  { %v1794_v24 = vrot.slane %v1782_v17, %v22456_v33 }
 0xbed   :  { %v1795_v25 = vadd.f32 %v1794_v24, %v1787_v18  ;;  %v1796_v26 = vadd.f32 %v1794_v24, %v1788_v20  ;;  %v1797_v28 = vadd.f32 %v1794_v24, %v1789_v21  ;;  %v1798_v29 = vadd.f32 %v1794_v24, %v1790_v22 }
 0xbef   :  { %v1799_v30 = vmax.f32 %v1795_v25, 0.0  ;;  %v1800_v31 = vmax.f32 %v1796_v26, 0.0  ;;  %v1801_v35 = vmax.f32 %v1797_v28, 0.0  ;;  %v1802_v36 = vmax.f32 %v1798_v29, 0.0 }
 0xbf1   :  { %1805 = vst [vmem:[#allocation3 + $0x40] sm:$0xff] %v1801_v35  ;;  %1806 = vst [vmem:[#allocation3 + $0x48] sm:$0xff] %v1802_v36  ;;  %v1834_v13 = vpack.c.bf16 %v1800_v31, %v1799_v30  ;;  %v1835_v15 = vpack.c.bf16 %v1802_v36, %v1801_v35 }
 0xbf2   :  { %1803 = vst [vmem:[#allocation3 + $0x10] sm:$0xff] %v1799_v30  ;;  %1804 = vst [vmem:[#allocation3 + $0x18] sm:$0xff] %v1800_v31 }
 0xbf3   :  { %17395 = vmatprep.mubr.bf16.mxu0 %v1834_v13  ;;  %v21497_v13 = vld [vmem:[#allocation5 + $0x240] sm:$0xff]  }
 0xbf4   :  { %17396 = vmatmul.mubr.bf16.vlgmr.msra.gmra.mrb[28].mxu0 %v1835_v15  ;;  %v21498_v15 = vld [vmem:[#allocation5 + $0x248] sm:$0xff]  }
 0xbf5   :  { %17400 = vmatpush3.bf16.msra.mxu0 %v21481_v53 }
 0xbf6   :  { %17401 = vmatprep.subr.bf16.mxu0 %v21482_v42 }
 0xbf8   :  { %v1809_v49 = vld [vmem:[#allocation3 + $0x3d] sm:$0xff]  ;;  %v1810_v1 = vld [vmem:[#allocation3 + $0x45] sm:$0xff] }
 0xbf9   :  { %v1807_v14 = vld [vmem:[#allocation3 + $0xd] sm:$0xff]  ;;  %v1808_v43 = vld [vmem:[#allocation3 + $0x15] sm:$0xff]  ;;  %17402 = vmatpush3.bf16.msra.mxu0 %v21482_v42  ;;  %v1812_v51 = vpack.c.bf16 %v1810_v1, %v1809_v49  ;;  %v2049_v41 = vld [vmem:[#allocation3 + $0x43] sm:$0xff] }
 0xbfa   :  { %v1811_v44 = vpack.c.bf16 %v1808_v43, %v1807_v14  ;;  %17403 = vmatprep.subr.bf16.mxu0 %v21483_v11  ;;  %v2047_v3 = vld [vmem:[#allocation3 + $0x13] sm:$0xff]  ;;  %v2048_v50 = vld [vmem:[#allocation3 + $0x1b] sm:$0xff]  ;;  %v2050_v38 = vld [vmem:[#allocation3 + $0x4b] sm:$0xff] }
 0xbfb   :  { %v2051_v53 = vpack.c.bf16 %v2048_v50, %v2047_v3  ;;  %v2052_v40 = vpack.c.bf16 %v2050_v38, %v2049_v41  ;;  %v21499_v42 = vld [vmem:[#allocation5 + $0x250] sm:$0xff]   ;;  %v21501_v14 = vld [vmem:[#allocation5 + $0x260] sm:$0xff]   ;;  %v21502_v43 = vld [vmem:[#allocation5 + $0x268] sm:$0xff]  }
 0xbfc   :  { %17415 = vmatprep.mubr.bf16.mxu0 %v1811_v44  ;;  %v21503_v44 = vld [vmem:[#allocation5 + $0x270] sm:$0xff]   ;;  %v2373_v41 = vld [vmem:[#allocation12 + $0x4] sm:$0x1] }
 0xbfd   :  { %17404 = vmatpush3.bf16.msra.mxu0 %v21483_v11  ;;  %v21500_v11 = vld [vmem:[#allocation5 + $0x258] sm:$0xff]  }
 0xbfe   :  { %17405 = vmatprep.subr.bf16.mxu0 %v21484_v45 }
 0xc01   :  { %17406 = vmatpush3.bf16.msra.mxu0 %v21484_v45  ;;  %v21504_v45 = vld [vmem:[#allocation5 + $0x278] sm:$0xff]  }
 0xc02   :  { %17407 = vmatprep.subr.bf16.mxu0 %v21485_v46 }
 0xc05   :  { %17408 = vmatpush3.bf16.msra.mxu0 %v21485_v46 }
 0xc06   :  { %17409 = vmatprep.subr.bf16.mxu0 %v21486_v47 }
 0xc09   :  { %17410 = vmatpush3.bf16.msra.mxu0 %v21486_v47 }
 0xc0a   :  { %17411 = vmatprep.subr.bf16.mxu0 %v21487_v48 }
 0xc0d   :  { %17412 = vmatpush3.bf16.msra.mxu0 %v21487_v48 }
 0xc0e   :  { %17413 = vmatprep.subr.bf16.mxu0 %v21488_v2 }
 0xc11   :  { %17414 = vmatpush3.bf16.msra.mxu0 %v21488_v2 }
 0xc12   :  { %17419 = vmatprep.subr.bf16.mxu0 %v21489_v4 }
 0xc14   :  { %17416 = vmatmul.mubr.bf16.vlgmr.msra.gmra.mrb[28].mxu0 %v1812_v51 }
 0xc15   :  { %17420 = vmatpush3.bf16.msra.mxu0 %v21489_v4  ;;  %17435 = vmatprep.mubr.bf16.mxu0 %v2051_v53 }
 0xc16   :  { %17421 = vmatprep.subr.bf16.mxu0 %v21490_v52 }
 0xc19   :  { %17422 = vmatpush3.bf16.msra.mxu0 %v21490_v52 }
 0xc1a   :  { %17423 = vmatprep.subr.bf16.mxu0 %v21491_v54 }
 0xc1d   :  { %17424 = vmatpush3.bf16.msra.mxu0 %v21491_v54 }
 0xc1e   :  { %17425 = vmatprep.subr.bf16.mxu0 %v21492_v56 }
 0xc21   :  { %17426 = vmatpush3.bf16.msra.mxu0 %v21492_v56 }
 0xc22   :  { %17427 = vmatprep.subr.bf16.mxu0 %v21493_v57 }
 0xc25   :  { %17428 = vmatpush3.bf16.msra.mxu0 %v21493_v57 }
 0xc26   :  { %17429 = vmatprep.subr.bf16.mxu0 %v21494_v55 }
 0xc29   :  { %17430 = vmatpush3.bf16.msra.mxu0 %v21494_v55  ;;  %v2369_v55 = vld [vmem:[#allocation10 + $0x4] sm:$0x1] }
 0xc2a   :  { %17431 = vmatprep.subr.bf16.mxu0 %v21495_v58 }
 0xc2d   :  { %17432 = vmatpush3.bf16.msra.mxu0 %v21495_v58 }
 0xc2e   :  { %17433 = vmatprep.subr.bf16.mxu0 %v21496_v39 }
 0xc31   :  { %17434 = vmatpush3.bf16.msra.mxu0 %v21496_v39 }
 0xc32   :  { %20168 = vmatprep.subr.bf16.mxu0 %v22363_v9 }
 0xc34   :  { %17436 = vmatmul.mubr.bf16.vlgmr.msra.gmra.mrb[28].mxu0 %v2052_v40 }
 0xc35   :  { %20170 = vmatpush3.bf16.msra.mxu0 %v22363_v9 }
 0xc36   :  { %20172 = vmatprep.subr.bf16.mxu0 %v22365_v12 }
 0xc39   :  { %20174 = vmatpush3.bf16.msra.mxu0 %v22365_v12 }
 0xc3a   :  { %20176 = vmatprep.subr.bf16.mxu0 %v22370_v19 }
 0xc3d   :  { %20178 = vmatpush3.bf16.msra.mxu0 %v22370_v19 }
 0xc3e   :  { %20180 = vmatprep.subr.bf16.mxu0 %v22374_v23 }
 0xc41   :  { %20182 = vmatpush3.bf16.msra.mxu0 %v22374_v23 }
 0xc42   :  { %20184 = vmatprep.subr.bf16.mxu0 %v22378_v27 }
 0xc45   :  { %20186 = vmatpush3.bf16.msra.mxu0 %v22378_v27 }
 0xc46   :  { %20188 = vmatprep.subr.bf16.mxu0 %v22388_v32 }
 0xc49   :  { %20190 = vmatpush3.bf16.msra.mxu0 %v22388_v32 }
 0xc4a   :  { %20192 = vmatprep.subr.bf16.mxu0 %v22392_v34 }
 0xc4d   :  { %20194 = vmatpush3.bf16.msra.mxu0 %v22392_v34 }
 0xc4e   :  { %20196 = vmatprep.subr.bf16.mxu0 %v22411_v37 }
 0xc51   :  { %20198 = vmatpush3.bf16.msra.mxu0 %v22411_v37 }
 0xd07   :  { %v22669_v59 = vpop.f32.mrb[28].mxu0 }
 0xd08   :  { %v22671_v60 = vpop.f32.mrb[29].mxu0 }
 0xd09   :  { %v22673_v61 = vpop.f32.mrb[30].mxu0  ;;  %17471 = vmatprep.mubr.f32.mxu1 %v22671_v60 }
 0xd0a   :  { %v22676_v62 = vpop.f32.mrb[31].mxu0 }
 0xd0b   :  { %17472 = vmatmul.mubr.f32.vlgmr.msra.gmra.mrb[20].mxu1 %v22676_v62 }
 0xd0c   :  { %17474 = vmatprep.mubr.f32.mxu1 %v22669_v59  ;;  %20138 = vmatpush3.bf16.msra.mxu1 %v22363_v9 }
 0xd0d   :  { %20140 = vmatprep.subr.bf16.mxu1 %v22365_v12 }
 0xd0f   :  { %17475 = vmatmul.mubr.f32.gmra.mrb[22].mxu1 %v22673_v61 }
 0xd10   :  { %20142 = vmatpush3.bf16.msra.mxu1 %v22365_v12 }
 0xd11   :  { %20144 = vmatprep.subr.bf16.mxu1 %v22370_v19 }
 0xd14   :  { %20146 = vmatpush3.bf16.msra.mxu1 %v22370_v19 }
 0xd15   :  { %20148 = vmatprep.subr.bf16.mxu1 %v22374_v23 }
 0xd18   :  { %20150 = vmatpush3.bf16.msra.mxu1 %v22374_v23 }
 0xd19   :  { %20152 = vmatprep.subr.bf16.mxu1 %v22378_v27 }
 0xd1c   :  { %20154 = vmatpush3.bf16.msra.mxu1 %v22378_v27 }
 0xd1d   :  { %20156 = vmatprep.subr.bf16.mxu1 %v22388_v32 }
 0xd20   :  { %20158 = vmatpush3.bf16.msra.mxu1 %v22388_v32 }
 0xd21   :  { %20160 = vmatprep.subr.bf16.mxu1 %v22392_v34 }
 0xd24   :  { %20162 = vmatpush3.bf16.msra.mxu1 %v22392_v34 }
 0xd25   :  { %20164 = vmatprep.subr.bf16.mxu1 %v22411_v37 }
 0xd28   :  { %20166 = vmatpush3.bf16.msra.mxu1 %v22411_v37 }
 0xd29   :  { %17515 = vmatprep.subr.bf16.mxu1 %v21497_v13 }
 0xdde   :  { %v17473_v63 = vpop.f32.mrb[20].mxu1 }
 0xddf   :  { %v2237_v0 = vpop.f32.mrb[21].mxu1 }
 0xde0   :  { %v2256_v5 = vadd.f32 %v17473_v63, %v2237_v0 }
 0xde2   :  { %v17476_v6 = vpop.f32.mrb[22].mxu1 }
 0xde3   :  { %v2247_v7 = vpop.f32.mrb[23].mxu1 }
 0xde4   :  { %v2257_v8 = vadd.f32 %v2256_v5, %v2247_v7 }
 0xde6   :  { %v2258_v10 = vadd.f32 %v17476_v6, %v2257_v8 }
 0xde8   :  { %v2259_v16 = vrot.slane %v2258_v10, 4 }
 0xdea   :  { %v2260_v17 = vadd.f32 %v2259_v16, %v2258_v10 }
 0xdec   :  { %v2261_v18 = vrot.slane %v2260_v17, 2 }
 0xdee   :  { %v2262_v20 = vadd.f32 %v2261_v18, %v2260_v17 }
 0xdf0   :  { %v2263_v21 = vrot.slane %v2262_v20, 1 }
 0xdf2   :  { %v2264_v22 = vadd.f32 %v2263_v21, %v2262_v20 }
 0xdf4   :  { %v2265_v24 = vmul.f32 0.001953125, %v2264_v22 }
 0xdf6   :  { %v2266_v25 = vsub.f32 %v22671_v60, %v2265_v24  ;;  %v2267_v26 = vsub.f32 %v22676_v62, %v2265_v24  ;;  %v2268_v28 = vsub.f32 %v22669_v59, %v2265_v24  ;;  %v2269_v31 = vsub.f32 %v22673_v61, %v2265_v24 }
 0xdf8   :  { %v2270_v29 = vmul.f32 %v2266_v25, %v2266_v25  ;;  %v2271_v30 = vmul.f32 %v2267_v26, %v2267_v26  ;;  %v2272_v35 = vmul.f32 %v2268_v28, %v2268_v28  ;;  %v2273_v36 = vmul.f32 %v2269_v31, %v2269_v31  ;;  %v22107_v25 = vld [vmem:[%s23950_s0 + $0x10] sm:$0xff]  ;;  %v22108_v28 = vld [vmem:[%s23950_s0 + $0x18] sm:$0xff] }
 0xdfa   :  { %17509 = vmatprep.mubr.f32.mxu1 %v2270_v29 }
 0xdfb   :  { %17510 = vmatmul.mubr.f32.vlgmr.msra.gmra.mrb[24].mxu1 %v2271_v30 }
 0xdfc   :  { %17512 = vmatprep.mubr.f32.mxu1 %v2272_v35  ;;  %17516 = vmatpush3.bf16.msra.mxu1 %v21497_v13 }
 0xdfd   :  { %17517 = vmatprep.subr.bf16.mxu1 %v21498_v15 }
 0xdff   :  { %17513 = vmatmul.mubr.f32.gmra.mrb[26].mxu1 %v2273_v36 }
 0xe00   :  { %17518 = vmatpush3.bf16.msra.mxu1 %v21498_v15 }
 0xe01   :  { %17519 = vmatprep.subr.bf16.mxu1 %v21499_v42 }
 0xe04   :  { %17520 = vmatpush3.bf16.msra.mxu1 %v21499_v42 }
 0xe05   :  { %17521 = vmatprep.subr.bf16.mxu1 %v21500_v11 }
 0xe08   :  { %17522 = vmatpush3.bf16.msra.mxu1 %v21500_v11 }
 0xe09   :  { %17523 = vmatprep.subr.bf16.mxu1 %v21501_v14 }
 0xe0c   :  { %17524 = vmatpush3.bf16.msra.mxu1 %v21501_v14 }
 0xe0d   :  { %17525 = vmatprep.subr.bf16.mxu1 %v21502_v43 }
 0xe10   :  { %17526 = vmatpush3.bf16.msra.mxu1 %v21502_v43 }
 0xe11   :  { %17527 = vmatprep.subr.bf16.mxu1 %v21503_v44 }
 0xe14   :  { %17528 = vmatpush3.bf16.msra.mxu1 %v21503_v44 }
 0xe15   :  { %17529 = vmatprep.subr.bf16.mxu1 %v21504_v45 }
 0xe18   :  { %17530 = vmatpush3.bf16.msra.mxu1 %v21504_v45 }
 0xe19   :  { %20200 = vmatprep.subr.bf16.mxu1 %v22363_v9 }
 0xece   :  { %v17511_v46 = vpop.f32.mrb[24].mxu1 }
 0xecf   :  { %v2340_v47 = vpop.f32.mrb[25].mxu1 }
 0xed0   :  { %v2359_v48 = vadd.f32 %v17511_v46, %v2340_v47 }
 0xed2   :  { %v17514_v2 = vpop.f32.mrb[26].mxu1 }
 0xed3   :  { %v2350_v4 = vpop.f32.mrb[27].mxu1 }
 0xed4   :  { %v2360_v49 = vadd.f32 %v2359_v48, %v2350_v4 }
 0xed6   :  { %v2361_v1 = vadd.f32 %v17514_v2, %v2360_v49 }
 0xed8   :  { %v2362_v3 = vrot.slane %v2361_v1, 4 }
 0xeda   :  { %v2363_v50 = vadd.f32 %v2362_v3, %v2361_v1 }
 0xedc   :  { %v2364_v51 = vrot.slane %v2363_v50, 2 }
 0xede   :  { %v2365_v52 = vadd.f32 %v2364_v51, %v2363_v50 }
 0xee0   :  { %v2366_v53 = vrot.slane %v2365_v52, 1 }
 0xee2   :  { %v2367_v54 = vadd.f32 %v2366_v53, %v2365_v52 }
 0xee4   :  { %v2368_v56 = vmul.f32 0.001953125, %v2367_v54 }
 0xee6   :  { %v2370_v57 = vadd.f32 1e-05, %v2368_v56 }
 0xee8   :  { %22065 = vrsqrt.f32 %v2370_v57 }
 0xef2   :  { %v22066_v58 = vpop.eup %22065 }
 0xef3   :  { %v2372_v39 = vmul.f32 %v22066_v58, %v2369_v55  ;;  %v21505_v58 = vld [vmem:[#allocation5 + $0x280] sm:$0xff]  }
 0xef4   :  { %17611 = vmatprep.subr.bf16.mxu0 %v21505_v58 }
 0xef5   :  { %v2374_v38 = vmul.f32 %v2372_v39, %v2265_v24  ;;  %v2379_v40 = vrot.slane %v2372_v39, %v22456_v33  ;;  %v21506_v39 = vld [vmem:[#allocation5 + $0x288] sm:$0xff]  }
 0xef7   :  { %v2375_v63 = vsub.f32 %v2373_v41, %v2374_v38  ;;  %v2380_v0 = vmul.f32 %v2379_v40, %v22671_v60  ;;  %v2381_v5 = vmul.f32 %v2379_v40, %v22676_v62  ;;  %v2382_v6 = vmul.f32 %v22669_v59, %v2379_v40  ;;  %v22105_v60 = vld [vmem:[%s23950_s0] sm:$0xff]  ;;  %v22106_v59 = vld [vmem:[%s23950_s0 + $0x8] sm:$0xff]  ;;  %v21507_v41 = vld [vmem:[#allocation5 + $0x290] sm:$0xff]  }
 0xef8   :  { %v2383_v7 = vmul.f32 %v22673_v61, %v2379_v40  ;;  %v21508_v38 = vld [vmem:[#allocation5 + $0x298] sm:$0xff]   ;;  %v21509_v40 = vld [vmem:[#allocation5 + $0x2a0] sm:$0xff]  }
 0xef9   :  { %v2387_v8 = vrot.slane %v2375_v63, %v22456_v33  ;;  %v21510_v63 = vld [vmem:[#allocation5 + $0x2a8] sm:$0xff]  }
 0xefb   :  { %v2388_v10 = vadd.f32 %v2387_v8, %v2380_v0  ;;  %v2389_v16 = vadd.f32 %v2387_v8, %v2381_v5  ;;  %v2390_v17 = vadd.f32 %v2387_v8, %v2382_v6  ;;  %v2391_v18 = vadd.f32 %v2387_v8, %v2383_v7  ;;  %v21511_v0 = vld [vmem:[#allocation5 + $0x2b0] sm:$0xff]   ;;  %v21512_v5 = vld [vmem:[#allocation5 + $0x2b8] sm:$0xff]  }
 0xefd   :  { %v2392_v20 = vmax.f32 %v2388_v10, 0.0  ;;  %v2393_v21 = vmax.f32 %v2389_v16, 0.0  ;;  %v2394_v22 = vmax.f32 %v2390_v17, 0.0  ;;  %v2395_v24 = vmax.f32 %v2391_v18, 0.0 }
 0xeff   :  { %2396 = vst [vmem:[#allocation4 + $0x38] sm:$0xff] %v2392_v20  ;;  %2397 = vst [vmem:[#allocation4 + $0x68] sm:$0xff] %v2393_v21  ;;  %v2400_v62 = vadd.f32 %v22105_v60, %v2392_v20  ;;  %v2401_v61 = vadd.f32 %v22106_v59, %v2393_v21  ;;  %v2402_v26 = vadd.f32 %v22107_v25, %v2394_v22  ;;  %v2718_v25 = vld [vmem:[#allocation10 + $0x5] sm:$0x1] }
 0xf00   :  { %2398 = vst [vmem:[#allocation4 + $0xf8] sm:$0xff] %v2394_v22  ;;  %2399 = vst [vmem:[#allocation4 + $0x128] sm:$0xff] %v2395_v24  ;;  %v2403_v29 = vadd.f32 %v22108_v28, %v2395_v24 }
 0xf01   :  { %v2404_v30 = vpack.c.bf16 %v2401_v61, %v2400_v62 }
 0xf02   :  { %v2405_v31 = vpack.c.bf16 %v2403_v29, %v2402_v26  ;;  %v2722_v29 = vld [vmem:[#allocation12 + $0x5] sm:$0x1] }
 0xf03   :  { %17531 = vmatprep.mubr.bf16.mxu1 %v2404_v30 }
 0xf04   :  { %17532 = vmatmul.mubr.bf16.vlgmr.msra.gmra.mrb[28].mxu1 %v2405_v31 }
 0xf05   :  { %20202 = vmatpush3.bf16.msra.mxu1 %v22363_v9 }
 0xf06   :  { %20204 = vmatprep.subr.bf16.mxu1 %v22365_v12 }
 0xf09   :  { %20206 = vmatpush3.bf16.msra.mxu1 %v22365_v12 }
 0xf0a   :  { %20208 = vmatprep.subr.bf16.mxu1 %v22370_v19 }
 0xf0d   :  { %20210 = vmatpush3.bf16.msra.mxu1 %v22370_v19 }
 0xf0e   :  { %20212 = vmatprep.subr.bf16.mxu1 %v22374_v23 }
 0xf11   :  { %20214 = vmatpush3.bf16.msra.mxu1 %v22374_v23 }
 0xf12   :  { %20216 = vmatprep.subr.bf16.mxu1 %v22378_v27 }
 0xf15   :  { %20218 = vmatpush3.bf16.msra.mxu1 %v22378_v27 }
 0xf16   :  { %20220 = vmatprep.subr.bf16.mxu1 %v22388_v32 }
 0xf19   :  { %20222 = vmatpush3.bf16.msra.mxu1 %v22388_v32 }
 0xf1a   :  { %20224 = vmatprep.subr.bf16.mxu1 %v22392_v34 }
 0xf1d   :  { %20226 = vmatpush3.bf16.msra.mxu1 %v22392_v34 }
 0xf1e   :  { %20228 = vmatprep.subr.bf16.mxu1 %v22411_v37 }
 0xf21   :  { %20230 = vmatpush3.bf16.msra.mxu1 %v22411_v37 }
 0xf22   :  { %20232 = vmatprep.subr.bf16.mxu1 %v22363_v9 }
 0xfd7   :  { %v22735_v35 = vpop.f32.mrb[28].mxu1 }
 0xfd8   :  { %v22737_v36 = vpop.f32.mrb[29].mxu1 }
 0xfd9   :  { %v22739_v13 = vpop.f32.mrb[30].mxu1  ;;  %17567 = vmatprep.mubr.f32.mxu0 %v22737_v36 }
 0xfda   :  { %v22742_v15 = vpop.f32.mrb[31].mxu1 }
 0xfdb   :  { %17568 = vmatmul.mubr.f32.vlgmr.msra.gmra.mrb[32].mxu0 %v22742_v15 }
 0xfdc   :  { %17570 = vmatprep.mubr.f32.mxu0 %v22735_v35  ;;  %17612 = vmatpush3.bf16.msra.mxu0 %v21505_v58 }
 0xfdd   :  { %17613 = vmatprep.subr.bf16.mxu0 %v21506_v39 }
 0xfdf   :  { %17571 = vmatmul.mubr.f32.gmra.mrb[34].mxu0 %v22739_v13 }
 0xfe0   :  { %17614 = vmatpush3.bf16.msra.mxu0 %v21506_v39 }
 0xfe1   :  { %17615 = vmatprep.subr.bf16.mxu0 %v21507_v41 }
 0xfe4   :  { %17616 = vmatpush3.bf16.msra.mxu0 %v21507_v41 }
 0xfe5   :  { %17617 = vmatprep.subr.bf16.mxu0 %v21508_v38 }
 0xfe8   :  { %17618 = vmatpush3.bf16.msra.mxu0 %v21508_v38 }
 0xfe9   :  { %17619 = vmatprep.subr.bf16.mxu0 %v21509_v40 }
 0xfec   :  { %17620 = vmatpush3.bf16.msra.mxu0 %v21509_v40 }
 0xfed   :  { %17621 = vmatprep.subr.bf16.mxu0 %v21510_v63 }
 0xff0   :  { %17622 = vmatpush3.bf16.msra.mxu0 %v21510_v63 }
 0xff1   :  { %17623 = vmatprep.subr.bf16.mxu0 %v21511_v0 }
 0xff4   :  { %17624 = vmatpush3.bf16.msra.mxu0 %v21511_v0 }
 0xff5   :  { %17625 = vmatprep.subr.bf16.mxu0 %v21512_v5 }
 0xff8   :  { %17626 = vmatpush3.bf16.msra.mxu0 %v21512_v5 }
 0xff9   :  { %20264 = vmatprep.subr.bf16.mxu0 %v22363_v9 }
0x10ae   :  { %v17569_v42 = vpop.f32.mrb[32].mxu0 }
0x10af   :  { %v2586_v11 = vpop.f32.mrb[33].mxu0 }
0x10b0   :  { %v2605_v14 = vadd.f32 %v17569_v42, %v2586_v11 }
0x10b2   :  { %v17572_v43 = vpop.f32.mrb[34].mxu0 }
0x10b3   :  { %v2596_v44 = vpop.f32.mrb[35].mxu0 }
0x10b4   :  { %v2606_v45 = vadd.f32 %v2605_v14, %v2596_v44 }
0x10b6   :  { %v2607_v46 = vadd.f32 %v17572_v43, %v2606_v45 }
0x10b8   :  { %v2608_v47 = vrot.slane %v2607_v46, 4 }
0x10ba   :  { %v2609_v48 = vadd.f32 %v2608_v47, %v2607_v46 }
0x10bc   :  { %v2610_v2 = vrot.slane %v2609_v48, 2 }
0x10be   :  { %v2611_v4 = vadd.f32 %v2610_v2, %v2609_v48 }
0x10c0   :  { %v2612_v49 = vrot.slane %v2611_v4, 1 }
0x10c2   :  { %v2613_v1 = vadd.f32 %v2612_v49, %v2611_v4 }
0x10c4   :  { %v22747_v3 = vmul.f32 0.001953125, %v2613_v1 }
0x10c6   :  { %v2615_v50 = vsub.f32 %v22737_v36, %v22747_v3  ;;  %v2616_v51 = vsub.f32 %v22742_v15, %v22747_v3  ;;  %v2617_v52 = vsub.f32 %v22735_v35, %v22747_v3  ;;  %v2618_v56 = vsub.f32 %v22739_v13, %v22747_v3 }
0x10c8   :  { %v2619_v53 = vmul.f32 %v2615_v50, %v2615_v50  ;;  %v2620_v54 = vmul.f32 %v2616_v51, %v2616_v51  ;;  %v2621_v57 = vmul.f32 %v2617_v52, %v2617_v52  ;;  %v2622_v55 = vmul.f32 %v2618_v56, %v2618_v56 }
0x10ca   :  { %17605 = vmatprep.mubr.f32.mxu1 %v2619_v53 }
0x10cb   :  { %17606 = vmatmul.mubr.f32.vlgmr.msra.gmra.mrb[32].mxu1 %v2620_v54 }
0x10cc   :  { %17608 = vmatprep.mubr.f32.mxu1 %v2621_v57  ;;  %20234 = vmatpush3.bf16.msra.mxu1 %v22363_v9 }
0x10cd   :  { %20236 = vmatprep.subr.bf16.mxu1 %v22365_v12 }
0x10cf   :  { %17609 = vmatmul.mubr.f32.gmra.mrb[34].mxu1 %v2622_v55 }
0x10d0   :  { %20238 = vmatpush3.bf16.msra.mxu1 %v22365_v12 }
0x10d1   :  { %20240 = vmatprep.subr.bf16.mxu1 %v22370_v19 }
0x10d4   :  { %20242 = vmatpush3.bf16.msra.mxu1 %v22370_v19 }
0x10d5   :  { %20244 = vmatprep.subr.bf16.mxu1 %v22374_v23 }
0x10d8   :  { %20246 = vmatpush3.bf16.msra.mxu1 %v22374_v23 }
0x10d9   :  { %20248 = vmatprep.subr.bf16.mxu1 %v22378_v27 }
0x10dc   :  { %20250 = vmatpush3.bf16.msra.mxu1 %v22378_v27 }
0x10dd   :  { %20252 = vmatprep.subr.bf16.mxu1 %v22388_v32 }
0x10e0   :  { %20254 = vmatpush3.bf16.msra.mxu1 %v22388_v32 }
0x10e1   :  { %20256 = vmatprep.subr.bf16.mxu1 %v22392_v34 }
0x10e4   :  { %20258 = vmatpush3.bf16.msra.mxu1 %v22392_v34 }
0x10e5   :  { %20260 = vmatprep.subr.bf16.mxu1 %v22411_v37 }
0x10e8   :  { %20262 = vmatpush3.bf16.msra.mxu1 %v22411_v37 }
0x119e   :  { %v17607_v6 = vpop.f32.mrb[32].mxu1 }
0x119f   :  { %v2689_v7 = vpop.f32.mrb[33].mxu1 }
0x11a0   :  { %v2708_v8 = vadd.f32 %v17607_v6, %v2689_v7 }
0x11a2   :  { %v17610_v10 = vpop.f32.mrb[34].mxu1 }
0x11a3   :  { %v2699_v16 = vpop.f32.mrb[35].mxu1 }
0x11a4   :  { %v2709_v17 = vadd.f32 %v2708_v8, %v2699_v16 }
0x11a6   :  { %v2710_v18 = vadd.f32 %v17610_v10, %v2709_v17 }
0x11a8   :  { %v2711_v20 = vrot.slane %v2710_v18, 4 }
0x11aa   :  { %v2712_v21 = vadd.f32 %v2711_v20, %v2710_v18 }
0x11ac   :  { %v2713_v22 = vrot.slane %v2712_v21, 2 }
0x11ae   :  { %v2714_v24 = vadd.f32 %v2713_v22, %v2712_v21  ;;  %v21513_v21 = vld [vmem:[#allocation5 + $0x300] sm:$0xff]   ;;  %v21514_v22 = vld [vmem:[#allocation5 + $0x308] sm:$0xff]  }
0x11af   :  { %17707 = vmatprep.subr.bf16.mxu1 %v21513_v21 }
0x11b0   :  { %v2715_v60 = vrot.slane %v2714_v24, 1 }
0x11b2   :  { %v2716_v62 = vadd.f32 %v2715_v60, %v2714_v24  ;;  %v21515_v24 = vld [vmem:[#allocation5 + $0x310] sm:$0xff]   ;;  %v21516_v60 = vld [vmem:[#allocation5 + $0x318] sm:$0xff]  }
0x11b4   :  { %v2717_v59 = vmul.f32 0.001953125, %v2716_v62  ;;  %v21517_v62 = vld [vmem:[#allocation5 + $0x320] sm:$0xff]  }
0x11b6   :  { %v2719_v61 = vadd.f32 1e-05, %v2717_v59  ;;  %v21518_v59 = vld [vmem:[#allocation5 + $0x328] sm:$0xff]  }
0x11b8   :  { %22067 = vrsqrt.f32 %v2719_v61  ;;  %v21519_v61 = vld [vmem:[#allocation5 + $0x330] sm:$0xff]  }
0x11c2   :  { %v22068_v26 = vpop.eup %22067 }
0x11c3   :  { %v2721_v28 = vmul.f32 %v22068_v26, %v2718_v25  ;;  %v21520_v25 = vld [vmem:[#allocation5 + $0x338] sm:$0xff]   ;;  %v21521_v26 = vld [vmem:[#allocation5 + $0x2c0] sm:$0xff]  }
0x11c5   :  { %v2723_v30 = vmul.f32 %v2721_v28, %v22747_v3  ;;  %v2728_v31 = vrot.slane %v2721_v28, %v22456_v33 }
0x11c7   :  { %v2724_v42 = vsub.f32 %v2722_v29, %v2723_v30  ;;  %v2729_v11 = vmul.f32 %v2728_v31, %v22737_v36  ;;  %v2730_v14 = vmul.f32 %v2728_v31, %v22742_v15  ;;  %v2731_v43 = vmul.f32 %v22735_v35, %v2728_v31 }
0x11c8   :  { %v2732_v44 = vmul.f32 %v22739_v13, %v2728_v31 }
0x11c9   :  { %v2736_v45 = vrot.slane %v2724_v42, %v22456_v33 }
0x11cb   :  { %v2737_v46 = vadd.f32 %v2736_v45, %v2729_v11  ;;  %v2738_v47 = vadd.f32 %v2736_v45, %v2730_v14  ;;  %v2739_v48 = vadd.f32 %v2736_v45, %v2731_v43  ;;  %v2740_v2 = vadd.f32 %v2736_v45, %v2732_v44 }
0x11cd   :  { %v2741_v4 = vmax.f32 %v2737_v46, 0.0  ;;  %v2742_v49 = vmax.f32 %v2738_v47, 0.0  ;;  %v2743_v1 = vmax.f32 %v2739_v48, 0.0  ;;  %v2744_v3 = vmax.f32 %v2740_v2, 0.0 }
0x11cf   :  { %v2745_v50 = vpack.c.bf16 %v2742_v49, %v2741_v4  ;;  %v2746_v51 = vpack.c.bf16 %v2744_v3, %v2743_v1  ;;  %v3059_v49 = vld [vmem:[#allocation10 + $0x6] sm:$0x1] }
0x11d1   :  { %17627 = vmatprep.mubr.bf16.mxu0 %v2745_v50  ;;  %v3063_v50 = vld [vmem:[#allocation12 + $0x6] sm:$0x1] }
0x11d2   :  { %17628 = vmatmul.mubr.bf16.vlgmr.msra.gmra.mrb[36].mxu0 %v2746_v51 }
0x11d3   :  { %20266 = vmatpush3.bf16.msra.mxu0 %v22363_v9 }
0x11d4   :  { %20268 = vmatprep.subr.bf16.mxu0 %v22365_v12 }
0x11d7   :  { %20270 = vmatpush3.bf16.msra.mxu0 %v22365_v12 }
0x11d8   :  { %20272 = vmatprep.subr.bf16.mxu0 %v22370_v19 }
0x11db   :  { %20274 = vmatpush3.bf16.msra.mxu0 %v22370_v19 }
0x11dc   :  { %20276 = vmatprep.subr.bf16.mxu0 %v22374_v23 }
0x11df   :  { %20278 = vmatpush3.bf16.msra.mxu0 %v22374_v23 }
0x11e0   :  { %20280 = vmatprep.subr.bf16.mxu0 %v22378_v27 }
0x11e3   :  { %20282 = vmatpush3.bf16.msra.mxu0 %v22378_v27 }
0x11e4   :  { %20284 = vmatprep.subr.bf16.mxu0 %v22388_v32 }
0x11e7   :  { %20286 = vmatpush3.bf16.msra.mxu0 %v22388_v32 }
0x11e8   :  { %20288 = vmatprep.subr.bf16.mxu0 %v22392_v34 }
0x11eb   :  { %20290 = vmatpush3.bf16.msra.mxu0 %v22392_v34 }
0x11ec   :  { %20292 = vmatprep.subr.bf16.mxu0 %v22411_v37 }
0x11ef   :  { %20294 = vmatpush3.bf16.msra.mxu0 %v22411_v37 }
0x11f0   :  { %20296 = vmatprep.subr.bf16.mxu0 %v22363_v9 }
0x12a5   :  { %v22796_v35 = vpop.f32.mrb[36].mxu0 }
0x12a6   :  { %v22798_v36 = vpop.f32.mrb[37].mxu0 }
0x12a7   :  { %v22800_v13 = vpop.f32.mrb[38].mxu0  ;;  %17663 = vmatprep.mubr.f32.mxu1 %v22798_v36 }
0x12a8   :  { %v22803_v15 = vpop.f32.mrb[39].mxu0 }
0x12a9   :  { %17664 = vmatmul.mubr.f32.vlgmr.msra.gmra.mrb[36].mxu1 %v22803_v15 }
0x12aa   :  { %17666 = vmatprep.mubr.f32.mxu1 %v22796_v35  ;;  %17708 = vmatpush3.bf16.msra.mxu1 %v21513_v21 }
0x12ab   :  { %17709 = vmatprep.subr.bf16.mxu1 %v21514_v22 }
0x12ad   :  { %17667 = vmatmul.mubr.f32.gmra.mrb[38].mxu1 %v22800_v13 }
0x12ae   :  { %17710 = vmatpush3.bf16.msra.mxu1 %v21514_v22  ;;  %v21523_v22 = vld [vmem:[#allocation5 + $0x2d0] sm:$0xff]  }
0x12af   :  { %17711 = vmatprep.subr.bf16.mxu1 %v21515_v24 }
0x12b2   :  { %17712 = vmatpush3.bf16.msra.mxu1 %v21515_v24  ;;  %v21524_v24 = vld [vmem:[#allocation5 + $0x2d8] sm:$0xff]  }
0x12b3   :  { %17713 = vmatprep.subr.bf16.mxu1 %v21516_v60 }
0x12b6   :  { %17714 = vmatpush3.bf16.msra.mxu1 %v21516_v60  ;;  %v21525_v60 = vld [vmem:[#allocation5 + $0x2e0] sm:$0xff]  }
0x12b7   :  { %17715 = vmatprep.subr.bf16.mxu1 %v21517_v62 }
0x12ba   :  { %17716 = vmatpush3.bf16.msra.mxu1 %v21517_v62  ;;  %v21526_v62 = vld [vmem:[#allocation5 + $0x2e8] sm:$0xff]  }
0x12bb   :  { %17717 = vmatprep.subr.bf16.mxu1 %v21518_v59 }
0x12be   :  { %17718 = vmatpush3.bf16.msra.mxu1 %v21518_v59  ;;  %v21527_v59 = vld [vmem:[#allocation5 + $0x2f0] sm:$0xff]  }
0x12bf   :  { %17719 = vmatprep.subr.bf16.mxu1 %v21519_v61 }
0x12c2   :  { %17720 = vmatpush3.bf16.msra.mxu1 %v21519_v61  ;;  %v21528_v61 = vld [vmem:[#allocation5 + $0x2f8] sm:$0xff]  }
0x12c3   :  { %17721 = vmatprep.subr.bf16.mxu1 %v21520_v25 }
0x12c6   :  { %17722 = vmatpush3.bf16.msra.mxu1 %v21520_v25  ;;  %v21529_v25 = vld [vmem:[#allocation5 + $0x340] sm:$0xff]  }
0x12c7   :  { %17727 = vmatprep.subr.bf16.mxu1 %v21521_v26 }
0x137c   :  { %v17665_v52 = vpop.f32.mrb[36].mxu1 }
0x137d   :  { %v2927_v53 = vpop.f32.mrb[37].mxu1 }
0x137e   :  { %v2946_v54 = vadd.f32 %v17665_v52, %v2927_v53 }
0x1380   :  { %v17668_v56 = vpop.f32.mrb[38].mxu1 }
0x1381   :  { %v2937_v57 = vpop.f32.mrb[39].mxu1 }
0x1382   :  { %v2947_v55 = vadd.f32 %v2946_v54, %v2937_v57 }
0x1384   :  { %v2948_v58 = vadd.f32 %v17668_v56, %v2947_v55 }
0x1386   :  { %v2949_v39 = vrot.slane %v2948_v58, 4 }
0x1388   :  { %v2950_v41 = vadd.f32 %v2949_v39, %v2948_v58 }
0x138a   :  { %v2951_v38 = vrot.slane %v2950_v41, 2 }
0x138c   :  { %v2952_v40 = vadd.f32 %v2951_v38, %v2950_v41 }
0x138e   :  { %v2953_v63 = vrot.slane %v2952_v40, 1 }
0x1390   :  { %v2954_v0 = vadd.f32 %v2953_v63, %v2952_v40 }
0x1392   :  { %v22808_v5 = vmul.f32 0.001953125, %v2954_v0 }
0x1394   :  { %v2956_v6 = vsub.f32 %v22798_v36, %v22808_v5  ;;  %v2957_v7 = vsub.f32 %v22803_v15, %v22808_v5  ;;  %v2958_v8 = vsub.f32 %v22796_v35, %v22808_v5  ;;  %v2959_v17 = vsub.f32 %v22800_v13, %v22808_v5 }
0x1396   :  { %v2960_v10 = vmul.f32 %v2956_v6, %v2956_v6  ;;  %v2961_v16 = vmul.f32 %v2957_v7, %v2957_v7  ;;  %v2962_v18 = vmul.f32 %v2958_v8, %v2958_v8  ;;  %v2963_v20 = vmul.f32 %v2959_v17, %v2959_v17 }
0x1398   :  { %17701 = vmatprep.mubr.f32.mxu0 %v2960_v10 }
0x1399   :  { %17702 = vmatmul.mubr.f32.vlgmr.msra.gmra.mrb[40].mxu0 %v2961_v16 }
0x139a   :  { %17704 = vmatprep.mubr.f32.mxu0 %v2962_v18  ;;  %20298 = vmatpush3.bf16.msra.mxu0 %v22363_v9 }
0x139b   :  { %20300 = vmatprep.subr.bf16.mxu0 %v22365_v12 }
0x139d   :  { %17705 = vmatmul.mubr.f32.gmra.mrb[42].mxu0 %v2963_v20  ;;  %v21522_v20 = vld [vmem:[#allocation5 + $0x2c8] sm:$0xff]  }
0x139e   :  { %20302 = vmatpush3.bf16.msra.mxu0 %v22365_v12 }
0x139f   :  { %20304 = vmatprep.subr.bf16.mxu0 %v22370_v19 }
0x13a2   :  { %20306 = vmatpush3.bf16.msra.mxu0 %v22370_v19 }
0x13a3   :  { %20308 = vmatprep.subr.bf16.mxu0 %v22374_v23 }
0x13a6   :  { %20310 = vmatpush3.bf16.msra.mxu0 %v22374_v23 }
0x13a7   :  { %20312 = vmatprep.subr.bf16.mxu0 %v22378_v27 }
0x13aa   :  { %20314 = vmatpush3.bf16.msra.mxu0 %v22378_v27 }
0x13ab   :  { %20316 = vmatprep.subr.bf16.mxu0 %v22388_v32 }
0x13ae   :  { %20318 = vmatpush3.bf16.msra.mxu0 %v22388_v32 }
0x13af   :  { %20320 = vmatprep.subr.bf16.mxu0 %v22392_v34 }
0x13b2   :  { %20322 = vmatpush3.bf16.msra.mxu0 %v22392_v34 }
0x13b3   :  { %20324 = vmatprep.subr.bf16.mxu0 %v22411_v37 }
0x13b6   :  { %20326 = vmatpush3.bf16.msra.mxu0 %v22411_v37 }
0x13b7   :  { %20328 = vmatprep.subr.bf16.mxu0 %v22363_v9 }
0x146c   :  { %v17703_v28 = vpop.f32.mrb[40].mxu0 }
0x146d   :  { %v3030_v29 = vpop.f32.mrb[41].mxu0 }
0x146e   :  { %v3049_v30 = vadd.f32 %v17703_v28, %v3030_v29 }
0x1470   :  { %v17706_v31 = vpop.f32.mrb[42].mxu0 }
0x1471   :  { %v3040_v42 = vpop.f32.mrb[43].mxu0 }
0x1472   :  { %v3050_v11 = vadd.f32 %v3049_v30, %v3040_v42  ;;  %v21530_v30 = vld [vmem:[#allocation5 + $0x348] sm:$0xff]   ;;  %v21532_v42 = vld [vmem:[#allocation5 + $0x358] sm:$0xff]  }
0x1474   :  { %v3051_v14 = vadd.f32 %v17706_v31, %v3050_v11  ;;  %v21531_v31 = vld [vmem:[#allocation5 + $0x350] sm:$0xff]   ;;  %v21533_v11 = vld [vmem:[#allocation5 + $0x360] sm:$0xff]  }
0x1476   :  { %v3052_v43 = vrot.slane %v3051_v14, 4 }
0x1478   :  { %v3053_v44 = vadd.f32 %v3052_v43, %v3051_v14  ;;  %v21534_v14 = vld [vmem:[#allocation5 + $0x368] sm:$0xff]   ;;  %v21535_v43 = vld [vmem:[#allocation5 + $0x370] sm:$0xff]  }
0x147a   :  { %v3054_v45 = vrot.slane %v3053_v44, 2 }
0x147c   :  { %v3055_v46 = vadd.f32 %v3054_v45, %v3053_v44  ;;  %v21536_v44 = vld [vmem:[#allocation5 + $0x378] sm:$0xff]   ;;  %v21537_v45 = vld [vmem:[#allocation5 + $0x380] sm:$0xff]  }
0x147e   :  { %v3056_v47 = vrot.slane %v3055_v46, 1 }
0x1480   :  { %v3057_v48 = vadd.f32 %v3056_v47, %v3055_v46 }
0x1482   :  { %v3058_v2 = vmul.f32 0.001953125, %v3057_v48  ;;  %v21538_v48 = vld [vmem:[#allocation5 + $0x388] sm:$0xff]  }
0x1484   :  { %v3060_v4 = vadd.f32 1e-05, %v3058_v2 }
0x1486   :  { %22069 = vrsqrt.f32 %v3060_v4  ;;  %v21539_v4 = vld [vmem:[#allocation5 + $0x390] sm:$0xff]  }
0x1490   :  { %v22070_v1 = vpop.eup %22069 }
0x1491   :  { %v3062_v3 = vmul.f32 %v22070_v1, %v3059_v49  ;;  %v21540_v49 = vld [vmem:[#allocation5 + $0x398] sm:$0xff]   ;;  %v21541_v1 = vld [vmem:[#allocation5 + $0x3a0] sm:$0xff]  }
0x1493   :  { %v3064_v51 = vmul.f32 %v3062_v3, %v22808_v5  ;;  %v3069_v52 = vrot.slane %v3062_v3, %v22456_v33  ;;  %v21542_v3 = vld [vmem:[#allocation5 + $0x3a8] sm:$0xff]  }
0x1495   :  { %v3065_v53 = vsub.f32 %v3063_v50, %v3064_v51  ;;  %v3070_v54 = vmul.f32 %v3069_v52, %v22798_v36  ;;  %v3071_v56 = vmul.f32 %v3069_v52, %v22803_v15  ;;  %v3072_v57 = vmul.f32 %v22796_v35, %v3069_v52  ;;  %v21543_v50 = vld [vmem:[#allocation5 + $0x3b0] sm:$0xff]   ;;  %v21544_v51 = vld [vmem:[#allocation5 + $0x3b8] sm:$0xff]  }
0x1496   :  { %v3073_v55 = vmul.f32 %v22800_v13, %v3069_v52  ;;  %v21545_v52 = vld [vmem:[#allocation5 + $0x3c0] sm:$0xff]  }
0x1497   :  { %v3077_v58 = vrot.slane %v3065_v53, %v22456_v33 }
0x1499   :  { %v3078_v39 = vadd.f32 %v3077_v58, %v3070_v54  ;;  %v3079_v41 = vadd.f32 %v3077_v58, %v3071_v56  ;;  %v3080_v38 = vadd.f32 %v3077_v58, %v3072_v57  ;;  %v3081_v40 = vadd.f32 %v3077_v58, %v3073_v55  ;;  %v21546_v58 = vld [vmem:[#allocation5 + $0x3c8] sm:$0xff]  }
0x149b   :  { %v3082_v63 = vmax.f32 %v3078_v39, 0.0  ;;  %v3083_v0 = vmax.f32 %v3079_v41, 0.0  ;;  %v3084_v5 = vmax.f32 %v3080_v38, 0.0  ;;  %v3085_v6 = vmax.f32 %v3081_v40, 0.0  ;;  %v21547_v41 = vld [vmem:[#allocation5 + $0x3d0] sm:$0xff]   ;;  %v21548_v38 = vld [vmem:[#allocation5 + $0x3d8] sm:$0xff]  }
0x149c   :  { %v21549_v40 = vld [vmem:[#allocation5 + $0x3e0] sm:$0xff]  }
0x149d   :  { %3086 = vst [vmem:[#allocation2 + $0x8] sm:$0xff] %v3082_v63  ;;  %3087 = vst [vmem:[#allocation2 + $0x10] sm:$0xff] %v3083_v0  ;;  %v3334_v36 = vpack.c.bf16 %v3083_v0, %v3082_v63  ;;  %v22841_v15 = vpack.c.bf16 %v3085_v6, %v3084_v5  ;;  %v21550_v63 = vld [vmem:[#allocation5 + $0x3e8] sm:$0xff]   ;;  %v21551_v0 = vld [vmem:[#allocation5 + $0x3f0] sm:$0xff]  }
0x149e   :  { %3088 = vst [vmem:[#allocation2 + $0x28] sm:$0xff] %v3084_v5  ;;  %3089 = vst [vmem:[#allocation2 + $0x30] sm:$0xff] %v3085_v6  ;;  %v21552_v5 = vld [vmem:[#allocation5 + $0x3f8] sm:$0xff]  }
0x14a4   :  { %v3113_v35 = vld [vmem:[#allocation2 + $0x7] sm:$0xff]  ;;  %v3114_v7 = vld [vmem:[#allocation2 + $0xf] sm:$0xff] }
0x14a5   :  { %v3115_v13 = vld [vmem:[#allocation2 + $0x27] sm:$0xff]  ;;  %v3117_v8 = vpack.c.bf16 %v3114_v7, %v3113_v35  ;;  %v3116_v10 = vld [vmem:[#allocation2 + $0x2f] sm:$0xff] }
0x14a6   :  { %v3090_v16 = vld [vmem:[#allocation2 + $0x6] sm:$0xff]  ;;  %v3091_v17 = vld [vmem:[#allocation2 + $0xe] sm:$0xff]  ;;  %v3118_v18 = vpack.c.bf16 %v3116_v10, %v3115_v13 }
0x14a7   :  { %17723 = vmatprep.mubr.bf16.mxu1 %v3117_v8  ;;  %v3094_v21 = vpack.c.bf16 %v3091_v17, %v3090_v16  ;;  %v3093_v28 = vld [vmem:[#allocation2 + $0x2e] sm:$0xff] }
0x14a8   :  { %17724 = vmatmul.mubr.bf16.vlgmr.msra.gmra.mrb[40].mxu1 %v3118_v18  ;;  %v3454_v46 = vld [vmem:[#allocation2 + $0x9] sm:$0xff]  ;;  %v3455_v47 = vld [vmem:[#allocation2 + $0x11] sm:$0xff] }
0x14a9   :  { %17728 = vmatpush3.bf16.msra.mxu1 %v21521_v26  ;;  %17743 = vmatprep.mubr.bf16.mxu1 %v3094_v21  ;;  %v3092_v26 = vld [vmem:[#allocation2 + $0x26] sm:$0xff]  ;;  %v3458_v2 = vpack.c.bf16 %v3455_v47, %v3454_v46  ;;  %v3457_v54 = vld [vmem:[#allocation2 + $0x31] sm:$0xff] }
0x14aa   :  { %17729 = vmatprep.subr.bf16.mxu1 %v21522_v20  ;;  %v3095_v29 = vpack.c.bf16 %v3093_v28, %v3092_v26  ;;  %v3456_v53 = vld [vmem:[#allocation2 + $0x29] sm:$0xff]  ;;  %v3579_v57 = vld [vmem:[#allocation2 + $0x12] sm:$0xff] }
0x14ab   :  { %v3578_v56 = vld [vmem:[#allocation2 + $0xa] sm:$0xff]  ;;  %v3459_v55 = vpack.c.bf16 %v3457_v54, %v3456_v53  ;;  %v21556_v47 = vld [vmem:[#allocation5 + $0x458] sm:$0xff]  }
0x14ac   :  { %v3582_v39 = vpack.c.bf16 %v3579_v57, %v3578_v56  ;;  %v3580_v6 = vld [vmem:[#allocation2 + $0x2a] sm:$0xff] }
0x14ad   :  { %17730 = vmatpush3.bf16.msra.mxu1 %v21522_v20  ;;  %v21555_v46 = vld [vmem:[#allocation5 + $0x450] sm:$0xff]  }
0x14ae   :  { %17731 = vmatprep.subr.bf16.mxu1 %v21523_v22 }
0x14b1   :  { %17732 = vmatpush3.bf16.msra.mxu1 %v21523_v22 }
0x14b2   :  { %17733 = vmatprep.subr.bf16.mxu1 %v21524_v24 }
0x14b5   :  { %17734 = vmatpush3.bf16.msra.mxu1 %v21524_v24 }
0x14b6   :  { %17735 = vmatprep.subr.bf16.mxu1 %v21525_v60 }
0x14b9   :  { %17736 = vmatpush3.bf16.msra.mxu1 %v21525_v60 }
0x14ba   :  { %17737 = vmatprep.subr.bf16.mxu1 %v21526_v62 }
0x14bd   :  { %17738 = vmatpush3.bf16.msra.mxu1 %v21526_v62 }
0x14be   :  { %17739 = vmatprep.subr.bf16.mxu1 %v21527_v59 }
0x14c1   :  { %17740 = vmatpush3.bf16.msra.mxu1 %v21527_v59 }
0x14c2   :  { %17741 = vmatprep.subr.bf16.mxu1 %v21528_v61 }
0x14c5   :  { %17742 = vmatpush3.bf16.msra.mxu1 %v21528_v61 }
0x14c6   :  { %17747 = vmatprep.subr.bf16.mxu1 %v21529_v25 }
0x14c8   :  { %17744 = vmatmul.mubr.bf16.vlgmr.msra.gmra.mrb[40].mxu1 %v3095_v29 }
0x14c9   :  { %17748 = vmatpush3.bf16.msra.mxu1 %v21529_v25  ;;  %17763 = vmatprep.mubr.bf16.mxu1 %v3334_v36  ;;  %v3581_v36 = vld [vmem:[#allocation2 + $0x32] sm:$0xff] }
0x14ca   :  { %17749 = vmatprep.subr.bf16.mxu1 %v21530_v30 }
0x14cd   :  { %17750 = vmatpush3.bf16.msra.mxu1 %v21530_v30 }
0x14ce   :  { %17751 = vmatprep.subr.bf16.mxu1 %v21531_v31 }
0x14d1   :  { %17752 = vmatpush3.bf16.msra.mxu1 %v21531_v31 }
0x14d2   :  { %17753 = vmatprep.subr.bf16.mxu1 %v21532_v42 }
0x14d5   :  { %17754 = vmatpush3.bf16.msra.mxu1 %v21532_v42 }
0x14d6   :  { %17755 = vmatprep.subr.bf16.mxu1 %v21533_v11 }
0x14d9   :  { %17756 = vmatpush3.bf16.msra.mxu1 %v21533_v11 }
0x14da   :  { %17757 = vmatprep.subr.bf16.mxu1 %v21534_v14 }
0x14dd   :  { %17758 = vmatpush3.bf16.msra.mxu1 %v21534_v14 }
0x14de   :  { %17759 = vmatprep.subr.bf16.mxu1 %v21535_v43 }
0x14e1   :  { %17760 = vmatpush3.bf16.msra.mxu1 %v21535_v43 }
0x14e2   :  { %17761 = vmatprep.subr.bf16.mxu1 %v21536_v44 }
0x14e5   :  { %17762 = vmatpush3.bf16.msra.mxu1 %v21536_v44  ;;  %v21553_v44 = vld [vmem:[#allocation5 + $0x440] sm:$0xff]  }
0x14e6   :  { %17767 = vmatprep.subr.bf16.mxu1 %v21537_v45 }
0x14e8   :  { %17764 = vmatmul.mubr.bf16.vlgmr.msra.gmra.mrb[40].mxu1 %v22841_v15  ;;  %v3583_v15 = vpack.c.bf16 %v3581_v36, %v3580_v6  ;;  %v3904_v36 = vld [vmem:[#allocation12 + $0x7] sm:$0x1] }
0x14e9   :  { %17768 = vmatpush3.bf16.msra.mxu1 %v21537_v45  ;;  %17783 = vmatprep.mubr.bf16.mxu1 %v3458_v2  ;;  %v21554_v45 = vld [vmem:[#allocation5 + $0x448] sm:$0xff]  }
0x14ea   :  { %17769 = vmatprep.subr.bf16.mxu1 %v21538_v48  ;;  %v21558_v2 = vld [vmem:[#allocation5 + $0x468] sm:$0xff]  }
0x14ed   :  { %17770 = vmatpush3.bf16.msra.mxu1 %v21538_v48  ;;  %v21557_v48 = vld [vmem:[#allocation5 + $0x460] sm:$0xff]  }
0x14ee   :  { %17771 = vmatprep.subr.bf16.mxu1 %v21539_v4 }
0x14f1   :  { %17772 = vmatpush3.bf16.msra.mxu1 %v21539_v4  ;;  %v21559_v4 = vld [vmem:[#allocation5 + $0x470] sm:$0xff]  }
0x14f2   :  { %17773 = vmatprep.subr.bf16.mxu1 %v21540_v49 }
0x14f5   :  { %17774 = vmatpush3.bf16.msra.mxu1 %v21540_v49  ;;  %v21560_v49 = vld [vmem:[#allocation5 + $0x478] sm:$0xff]  }
0x14f6   :  { %17775 = vmatprep.subr.bf16.mxu1 %v21541_v1 }
0x14f9   :  { %17776 = vmatpush3.bf16.msra.mxu1 %v21541_v1  ;;  %v21561_v1 = vld [vmem:[#allocation5 + $0x400] sm:$0xff]  }
0x14fa   :  { %17777 = vmatprep.subr.bf16.mxu1 %v21542_v3 }
0x14fd   :  { %17778 = vmatpush3.bf16.msra.mxu1 %v21542_v3 }
0x14fe   :  { %17779 = vmatprep.subr.bf16.mxu1 %v21543_v50 }
0x1501   :  { %17780 = vmatpush3.bf16.msra.mxu1 %v21543_v50 }
0x1502   :  { %17781 = vmatprep.subr.bf16.mxu1 %v21544_v51 }
0x1505   :  { %17782 = vmatpush3.bf16.msra.mxu1 %v21544_v51 }
0x1506   :  { %17787 = vmatprep.subr.bf16.mxu1 %v21545_v52 }
0x1508   :  { %17784 = vmatmul.mubr.bf16.vlgmr.msra.gmra.mrb[40].mxu1 %v3459_v55 }
0x1509   :  { %17788 = vmatpush3.bf16.msra.mxu1 %v21545_v52  ;;  %17803 = vmatprep.mubr.bf16.mxu1 %v3582_v39 }
0x150a   :  { %17789 = vmatprep.subr.bf16.mxu1 %v21546_v58 }
0x150d   :  { %17790 = vmatpush3.bf16.msra.mxu1 %v21546_v58 }
0x150e   :  { %17791 = vmatprep.subr.bf16.mxu1 %v21547_v41 }
0x1511   :  { %17792 = vmatpush3.bf16.msra.mxu1 %v21547_v41 }
0x1512   :  { %17793 = vmatprep.subr.bf16.mxu1 %v21548_v38 }
0x1515   :  { %17794 = vmatpush3.bf16.msra.mxu1 %v21548_v38 }
0x1516   :  { %17795 = vmatprep.subr.bf16.mxu1 %v21549_v40 }
0x1519   :  { %17796 = vmatpush3.bf16.msra.mxu1 %v21549_v40 }
0x151a   :  { %17797 = vmatprep.subr.bf16.mxu1 %v21550_v63 }
0x151d   :  { %17798 = vmatpush3.bf16.msra.mxu1 %v21550_v63 }
0x151e   :  { %17799 = vmatprep.subr.bf16.mxu1 %v21551_v0 }
0x1521   :  { %17800 = vmatpush3.bf16.msra.mxu1 %v21551_v0  ;;  %v3900_v0 = vld [vmem:[#allocation10 + $0x7] sm:$0x1] }
0x1522   :  { %17801 = vmatprep.subr.bf16.mxu1 %v21552_v5 }
0x1525   :  { %17802 = vmatpush3.bf16.msra.mxu1 %v21552_v5 }
0x1526   :  { %20360 = vmatprep.subr.bf16.mxu1 %v22363_v9 }
0x1528   :  { %17804 = vmatmul.mubr.bf16.vlgmr.msra.gmra.mrb[40].mxu1 %v3583_v15 }
0x1529   :  { %20362 = vmatpush3.bf16.msra.mxu1 %v22363_v9 }
0x152a   :  { %20364 = vmatprep.subr.bf16.mxu1 %v22365_v12 }
0x152d   :  { %20366 = vmatpush3.bf16.msra.mxu1 %v22365_v12 }
0x152e   :  { %20368 = vmatprep.subr.bf16.mxu1 %v22370_v19 }
0x1531   :  { %20370 = vmatpush3.bf16.msra.mxu1 %v22370_v19 }
0x1532   :  { %20372 = vmatprep.subr.bf16.mxu1 %v22374_v23 }
0x1535   :  { %20374 = vmatpush3.bf16.msra.mxu1 %v22374_v23 }
0x1536   :  { %20376 = vmatprep.subr.bf16.mxu1 %v22378_v27 }
0x1539   :  { %20378 = vmatpush3.bf16.msra.mxu1 %v22378_v27 }
0x153a   :  { %20380 = vmatprep.subr.bf16.mxu1 %v22388_v32 }
0x153d   :  { %20382 = vmatpush3.bf16.msra.mxu1 %v22388_v32 }
0x153e   :  { %20384 = vmatprep.subr.bf16.mxu1 %v22392_v34 }
0x1541   :  { %20386 = vmatpush3.bf16.msra.mxu1 %v22392_v34 }
0x1542   :  { %20388 = vmatprep.subr.bf16.mxu1 %v22411_v37 }
0x1545   :  { %20390 = vmatpush3.bf16.msra.mxu1 %v22411_v37 }
0x15fb   :  { %v22860_v35 = vpop.f32.mrb[40].mxu1 }
0x15fc   :  { %v22862_v7 = vpop.f32.mrb[41].mxu1 }
0x15fd   :  { %v22864_v13 = vpop.f32.mrb[42].mxu1  ;;  %17839 = vmatprep.mubr.f32.mxu0 %v22862_v7 }
0x15fe   :  { %v22867_v8 = vpop.f32.mrb[43].mxu1 }
0x15ff   :  { %17840 = vmatmul.mubr.f32.vlgmr.msra.gmra.mrb[44].mxu0 %v22867_v8 }
0x1600   :  { %17842 = vmatprep.mubr.f32.mxu0 %v22860_v35  ;;  %20330 = vmatpush3.bf16.msra.mxu0 %v22363_v9 }
0x1601   :  { %20332 = vmatprep.subr.bf16.mxu0 %v22365_v12 }
0x1603   :  { %17843 = vmatmul.mubr.f32.gmra.mrb[46].mxu0 %v22864_v13 }
0x1604   :  { %20334 = vmatpush3.bf16.msra.mxu0 %v22365_v12 }
0x1605   :  { %20336 = vmatprep.subr.bf16.mxu0 %v22370_v19 }
0x1608   :  { %20338 = vmatpush3.bf16.msra.mxu0 %v22370_v19 }
0x1609   :  { %20340 = vmatprep.subr.bf16.mxu0 %v22374_v23 }
0x160c   :  { %20342 = vmatpush3.bf16.msra.mxu0 %v22374_v23 }
0x160d   :  { %20344 = vmatprep.subr.bf16.mxu0 %v22378_v27 }
0x1610   :  { %20346 = vmatpush3.bf16.msra.mxu0 %v22378_v27 }
0x1611   :  { %20348 = vmatprep.subr.bf16.mxu0 %v22388_v32 }
0x1614   :  { %20350 = vmatpush3.bf16.msra.mxu0 %v22388_v32 }
0x1615   :  { %20352 = vmatprep.subr.bf16.mxu0 %v22392_v34 }
0x1618   :  { %20354 = vmatpush3.bf16.msra.mxu0 %v22392_v34 }
0x1619   :  { %20356 = vmatprep.subr.bf16.mxu0 %v22411_v37 }
0x161c   :  { %20358 = vmatpush3.bf16.msra.mxu0 %v22411_v37 }
0x161d   :  { %17883 = vmatprep.subr.bf16.mxu0 %v21553_v44 }
0x16d2   :  { %v17841_v10 = vpop.f32.mrb[44].mxu0 }
0x16d3   :  { %v3768_v16 = vpop.f32.mrb[45].mxu0 }
0x16d4   :  { %v3787_v17 = vadd.f32 %v17841_v10, %v3768_v16 }
0x16d6   :  { %v17844_v18 = vpop.f32.mrb[46].mxu0 }
0x16d7   :  { %v3778_v20 = vpop.f32.mrb[47].mxu0 }
0x16d8   :  { %v3788_v21 = vadd.f32 %v3787_v17, %v3778_v20 }
0x16da   :  { %v3789_v22 = vadd.f32 %v17844_v18, %v3788_v21 }
0x16dc   :  { %v3790_v24 = vrot.slane %v3789_v22, 4 }
0x16de   :  { %v3791_v60 = vadd.f32 %v3790_v24, %v3789_v22 }
0x16e0   :  { %v3792_v62 = vrot.slane %v3791_v60, 2 }
0x16e2   :  { %v3793_v59 = vadd.f32 %v3792_v62, %v3791_v60 }
0x16e4   :  { %v3794_v61 = vrot.slane %v3793_v59, 1 }
0x16e6   :  { %v3795_v25 = vadd.f32 %v3794_v61, %v3793_v59 }
0x16e8   :  { %v3796_v26 = vmul.f32 0.001953125, %v3795_v25 }
0x16ea   :  { %v3797_v28 = vsub.f32 %v22862_v7, %v3796_v26  ;;  %v3798_v29 = vsub.f32 %v22867_v8, %v3796_v26  ;;  %v3799_v30 = vsub.f32 %v22860_v35, %v3796_v26  ;;  %v3800_v11 = vsub.f32 %v22864_v13, %v3796_v26 }
0x16ec   :  { %v3801_v31 = vmul.f32 %v3797_v28, %v3797_v28  ;;  %v3802_v42 = vmul.f32 %v3798_v29, %v3798_v29  ;;  %v3803_v14 = vmul.f32 %v3799_v30, %v3799_v30  ;;  %v3804_v43 = vmul.f32 %v3800_v11, %v3800_v11  ;;  %v21562_v29 = vld [vmem:[#allocation5 + $0x408] sm:$0xff]   ;;  %v21565_v11 = vld [vmem:[#allocation5 + $0x420] sm:$0xff]  }
0x16ee   :  { %17877 = vmatprep.mubr.f32.mxu0 %v3801_v31 }
0x16ef   :  { %17878 = vmatmul.mubr.f32.vlgmr.msra.gmra.mrb[48].mxu0 %v3802_v42  ;;  %v21564_v42 = vld [vmem:[#allocation5 + $0x418] sm:$0xff]  }
0x16f0   :  { %17880 = vmatprep.mubr.f32.mxu0 %v3803_v14  ;;  %17884 = vmatpush3.bf16.msra.mxu0 %v21553_v44  ;;  %v21566_v14 = vld [vmem:[#allocation5 + $0x428] sm:$0xff]   ;;  %v21568_v44 = vld [vmem:[#allocation5 + $0x438] sm:$0xff]  }
0x16f1   :  { %17885 = vmatprep.subr.bf16.mxu0 %v21554_v45 }
0x16f3   :  { %17881 = vmatmul.mubr.f32.gmra.mrb[50].mxu0 %v3804_v43  ;;  %v21567_v43 = vld [vmem:[#allocation5 + $0x430] sm:$0xff]  }
0x16f4   :  { %17886 = vmatpush3.bf16.msra.mxu0 %v21554_v45  ;;  %v21569_v45 = vld [vmem:[#allocation5 + $0x480] sm:$0xff]  }
0x16f5   :  { %17887 = vmatprep.subr.bf16.mxu0 %v21555_v46 }
0x16f8   :  { %17888 = vmatpush3.bf16.msra.mxu0 %v21555_v46 }
0x16f9   :  { %17889 = vmatprep.subr.bf16.mxu0 %v21556_v47 }
0x16fc   :  { %17890 = vmatpush3.bf16.msra.mxu0 %v21556_v47 }
0x16fd   :  { %17891 = vmatprep.subr.bf16.mxu0 %v21557_v48 }
0x1700   :  { %17892 = vmatpush3.bf16.msra.mxu0 %v21557_v48 }
0x1701   :  { %17893 = vmatprep.subr.bf16.mxu0 %v21558_v2 }
0x1704   :  { %17894 = vmatpush3.bf16.msra.mxu0 %v21558_v2 }
0x1705   :  { %17895 = vmatprep.subr.bf16.mxu0 %v21559_v4 }
0x1708   :  { %17896 = vmatpush3.bf16.msra.mxu0 %v21559_v4 }
0x1709   :  { %17897 = vmatprep.subr.bf16.mxu0 %v21560_v49 }
0x170c   :  { %17898 = vmatpush3.bf16.msra.mxu0 %v21560_v49  ;;  %v21570_v49 = vld [vmem:[#allocation5 + $0x488] sm:$0xff]  }
0x170d   :  { %17903 = vmatprep.subr.bf16.mxu0 %v21561_v1 }
0x17c2   :  { %v17879_v3 = vpop.f32.mrb[48].mxu0 }
0x17c3   :  { %v3871_v50 = vpop.f32.mrb[49].mxu0 }
0x17c4   :  { %v3890_v51 = vadd.f32 %v17879_v3, %v3871_v50  ;;  %v21571_v3 = vld [vmem:[#allocation5 + $0x490] sm:$0xff]   ;;  %v21572_v50 = vld [vmem:[#allocation5 + $0x498] sm:$0xff]  }
0x17c6   :  { %v17882_v52 = vpop.f32.mrb[50].mxu0 }
0x17c7   :  { %v3881_v53 = vpop.f32.mrb[51].mxu0 }
0x17c8   :  { %v3891_v54 = vadd.f32 %v3890_v51, %v3881_v53  ;;  %v21573_v51 = vld [vmem:[#allocation5 + $0x4a0] sm:$0xff]   ;;  %v21575_v53 = vld [vmem:[#allocation5 + $0x4b0] sm:$0xff]  }
0x17ca   :  { %v3892_v56 = vadd.f32 %v17882_v52, %v3891_v54  ;;  %v21574_v52 = vld [vmem:[#allocation5 + $0x4a8] sm:$0xff]   ;;  %v21576_v54 = vld [vmem:[#allocation5 + $0x4b8] sm:$0xff]  }
0x17cc   :  { %v3893_v57 = vrot.slane %v3892_v56, 4 }
0x17ce   :  { %v3894_v55 = vadd.f32 %v3893_v57, %v3892_v56 }
0x17d0   :  { %v3895_v58 = vrot.slane %v3894_v55, 2 }
0x17d2   :  { %v3896_v39 = vadd.f32 %v3895_v58, %v3894_v55 }
0x17d4   :  { %v3897_v41 = vrot.slane %v3896_v39, 1 }
0x17d6   :  { %v3898_v38 = vadd.f32 %v3897_v41, %v3896_v39 }
0x17d8   :  { %v3899_v40 = vmul.f32 0.001953125, %v3898_v38 }
0x17da   :  { %v3901_v63 = vadd.f32 1e-05, %v3899_v40 }
0x17dc   :  { %22071 = vrsqrt.f32 %v3901_v63 }
0x17e6   :  { %v22072_v5 = vpop.eup %22071 }
0x17e7   :  { %v3903_v6 = vmul.f32 %v22072_v5, %v3900_v0 }
0x17e9   :  { %v3905_v15 = vmul.f32 %v3903_v6, %v3796_v26  ;;  %v3910_v10 = vrot.slane %v3903_v6, %v22456_v33 }
0x17eb   :  { %v3906_v16 = vsub.f32 %v3904_v36, %v3905_v15  ;;  %v3911_v17 = vmul.f32 %v3910_v10, %v22862_v7  ;;  %v3912_v18 = vmul.f32 %v3910_v10, %v22867_v8  ;;  %v3913_v20 = vmul.f32 %v22860_v35, %v3910_v10  ;;  %v21563_v35 = vld [vmem:[#allocation5 + $0x410] sm:$0xff]  }
0x17ec   :  { %v3914_v21 = vmul.f32 %v22864_v13, %v3910_v10 }
0x17ed   :  { %v3918_v22 = vrot.slane %v3906_v16, %v22456_v33 }
0x17ef   :  { %v3919_v24 = vadd.f32 %v3918_v22, %v3911_v17  ;;  %v3920_v60 = vadd.f32 %v3918_v22, %v3912_v18  ;;  %v3921_v62 = vadd.f32 %v3918_v22, %v3913_v20  ;;  %v3922_v59 = vadd.f32 %v3918_v22, %v3914_v21 }
0x17f1   :  { %v3923_v61 = vmax.f32 %v3919_v24, 0.0  ;;  %v3924_v25 = vmax.f32 %v3920_v60, 0.0  ;;  %v3925_v26 = vmax.f32 %v3921_v62, 0.0  ;;  %v3926_v28 = vmax.f32 %v3922_v59, 0.0 }
0x17f3   :  { %3927 = vst [vmem:[#allocation3 + $0x10] sm:$0xff] %v3923_v61  ;;  %3928 = vst [vmem:[#allocation3 + $0x18] sm:$0xff] %v3924_v25  ;;  %v3958_v7 = vpack.c.bf16 %v3924_v25, %v3923_v61  ;;  %v3959_v8 = vpack.c.bf16 %v3926_v28, %v3925_v26 }
0x17f4   :  { %3929 = vst [vmem:[#allocation3 + $0x40] sm:$0xff] %v3925_v26  ;;  %3930 = vst [vmem:[#allocation3 + $0x48] sm:$0xff] %v3926_v28 }
0x17f5   :  { %17899 = vmatprep.mubr.bf16.mxu0 %v3958_v7  ;;  %v21577_v7 = vld [vmem:[#allocation5 + $0x4c0] sm:$0xff]  }
0x17f6   :  { %17900 = vmatmul.mubr.bf16.vlgmr.msra.gmra.mrb[52].mxu0 %v3959_v8  ;;  %18019 = vmatprep.subr.bf16.mxu1 %v21577_v7  ;;  %v21578_v8 = vld [vmem:[#allocation5 + $0x4c8] sm:$0xff]  }
0x17f7   :  { %17904 = vmatpush3.bf16.msra.mxu0 %v21561_v1 }
0x17f8   :  { %17905 = vmatprep.subr.bf16.mxu0 %v21562_v29 }
0x17fa   :  { %v3931_v13 = vld [vmem:[#allocation3 + $0xb] sm:$0xff]  ;;  %v3932_v30 = vld [vmem:[#allocation3 + $0x13] sm:$0xff]  ;;  %v4172_v2 = vld [vmem:[#allocation3 + $0x1d] sm:$0xff] }
0x17fb   :  { %v3935_v31 = vpack.c.bf16 %v3932_v30, %v3931_v13  ;;  %17906 = vmatpush3.bf16.msra.mxu0 %v21562_v29  ;;  %v3933_v46 = vld [vmem:[#allocation3 + $0x3b] sm:$0xff]  ;;  %v3934_v47 = vld [vmem:[#allocation3 + $0x43] sm:$0xff]  ;;  %v4174_v57 = vld [vmem:[#allocation3 + $0x4d] sm:$0xff] }
0x17fc   :  { %17907 = vmatprep.subr.bf16.mxu0 %v21563_v35  ;;  %v4171_v48 = vld [vmem:[#allocation3 + $0x15] sm:$0xff]  ;;  %v3936_v4 = vpack.c.bf16 %v3934_v47, %v3933_v46  ;;  %v4173_v56 = vld [vmem:[#allocation3 + $0x45] sm:$0xff] }
0x17fd   :  { %17919 = vmatprep.mubr.bf16.mxu0 %v3935_v31  ;;  %v4175_v1 = vpack.c.bf16 %v4172_v2, %v4171_v48  ;;  %v4176_v55 = vpack.c.bf16 %v4174_v57, %v4173_v56  ;;  %v21579_v29 = vld [vmem:[#allocation5 + $0x4d0] sm:$0xff]   ;;  %v21581_v13 = vld [vmem:[#allocation5 + $0x4e0] sm:$0xff]   ;;  %v21582_v30 = vld [vmem:[#allocation5 + $0x4e8] sm:$0xff]  }
0x17fe   :  { %v21583_v31 = vld [vmem:[#allocation5 + $0x4f0] sm:$0xff]   ;;  %v4497_v56 = vld [vmem:[#allocation12 + $0x8] sm:$0x1] }
0x17ff   :  { %17908 = vmatpush3.bf16.msra.mxu0 %v21563_v35  ;;  %v21580_v35 = vld [vmem:[#allocation5 + $0x4d8] sm:$0xff]  }
0x1800   :  { %17909 = vmatprep.subr.bf16.mxu0 %v21564_v42 }
0x1803   :  { %17910 = vmatpush3.bf16.msra.mxu0 %v21564_v42  ;;  %v21584_v42 = vld [vmem:[#allocation5 + $0x4f8] sm:$0xff]  }
0x1804   :  { %17911 = vmatprep.subr.bf16.mxu0 %v21565_v11 }
0x1807   :  { %17912 = vmatpush3.bf16.msra.mxu0 %v21565_v11 }
0x1808   :  { %17913 = vmatprep.subr.bf16.mxu0 %v21566_v14 }
0x180b   :  { %17914 = vmatpush3.bf16.msra.mxu0 %v21566_v14 }
0x180c   :  { %17915 = vmatprep.subr.bf16.mxu0 %v21567_v43 }
0x180f   :  { %17916 = vmatpush3.bf16.msra.mxu0 %v21567_v43 }
0x1810   :  { %17917 = vmatprep.subr.bf16.mxu0 %v21568_v44 }
0x1813   :  { %17918 = vmatpush3.bf16.msra.mxu0 %v21568_v44 }
0x1814   :  { %17923 = vmatprep.subr.bf16.mxu0 %v21569_v45 }
0x1816   :  { %17920 = vmatmul.mubr.bf16.vlgmr.msra.gmra.mrb[52].mxu0 %v3936_v4 }
0x1817   :  { %17924 = vmatpush3.bf16.msra.mxu0 %v21569_v45  ;;  %17939 = vmatprep.mubr.bf16.mxu0 %v4175_v1 }
0x1818   :  { %17925 = vmatprep.subr.bf16.mxu0 %v21570_v49 }
0x181b   :  { %17926 = vmatpush3.bf16.msra.mxu0 %v21570_v49 }
0x181c   :  { %17927 = vmatprep.subr.bf16.mxu0 %v21571_v3 }
0x181f   :  { %17928 = vmatpush3.bf16.msra.mxu0 %v21571_v3 }
0x1820   :  { %17929 = vmatprep.subr.bf16.mxu0 %v21572_v50 }
0x1823   :  { %17930 = vmatpush3.bf16.msra.mxu0 %v21572_v50 }
0x1824   :  { %17931 = vmatprep.subr.bf16.mxu0 %v21573_v51 }
0x1827   :  { %17932 = vmatpush3.bf16.msra.mxu0 %v21573_v51 }
0x1828   :  { %17933 = vmatprep.subr.bf16.mxu0 %v21574_v52 }
0x182b   :  { %17934 = vmatpush3.bf16.msra.mxu0 %v21574_v52  ;;  %v4493_v52 = vld [vmem:[#allocation10 + $0x8] sm:$0x1] }
0x182c   :  { %17935 = vmatprep.subr.bf16.mxu0 %v21575_v53 }
0x182f   :  { %17936 = vmatpush3.bf16.msra.mxu0 %v21575_v53 }
0x1830   :  { %17937 = vmatprep.subr.bf16.mxu0 %v21576_v54 }
0x1833   :  { %17938 = vmatpush3.bf16.msra.mxu0 %v21576_v54 }
0x1834   :  { %20392 = vmatprep.subr.bf16.mxu0 %v22363_v9 }
0x1836   :  { %17940 = vmatmul.mubr.bf16.vlgmr.msra.gmra.mrb[52].mxu0 %v4176_v55 }
0x1837   :  { %20394 = vmatpush3.bf16.msra.mxu0 %v22363_v9 }
0x1838   :  { %20396 = vmatprep.subr.bf16.mxu0 %v22365_v12 }
0x183b   :  { %20398 = vmatpush3.bf16.msra.mxu0 %v22365_v12 }
0x183c   :  { %20400 = vmatprep.subr.bf16.mxu0 %v22370_v19 }
0x183f   :  { %20402 = vmatpush3.bf16.msra.mxu0 %v22370_v19 }
0x1840   :  { %20404 = vmatprep.subr.bf16.mxu0 %v22374_v23 }
0x1843   :  { %20406 = vmatpush3.bf16.msra.mxu0 %v22374_v23 }
0x1844   :  { %20408 = vmatprep.subr.bf16.mxu0 %v22378_v27 }
0x1847   :  { %20410 = vmatpush3.bf16.msra.mxu0 %v22378_v27 }
0x1848   :  { %20412 = vmatprep.subr.bf16.mxu0 %v22388_v32 }
0x184b   :  { %20414 = vmatpush3.bf16.msra.mxu0 %v22388_v32 }
0x184c   :  { %20416 = vmatprep.subr.bf16.mxu0 %v22392_v34 }
0x184f   :  { %20418 = vmatpush3.bf16.msra.mxu0 %v22392_v34 }
0x1850   :  { %20420 = vmatprep.subr.bf16.mxu0 %v22411_v37 }
0x1853   :  { %20422 = vmatpush3.bf16.msra.mxu0 %v22411_v37 }
0x1854   :  { %20424 = vmatprep.subr.bf16.mxu0 %v22363_v9 }
0x1909   :  { %v22914_v58 = vpop.f32.mrb[52].mxu0 }
0x190a   :  { %v22916_v39 = vpop.f32.mrb[53].mxu0 }
0x190b   :  { %v22918_v41 = vpop.f32.mrb[54].mxu0  ;;  %17975 = vmatprep.mubr.f32.mxu1 %v22916_v39 }
0x190c   :  { %v22921_v38 = vpop.f32.mrb[55].mxu0 }
0x190d   :  { %17976 = vmatmul.mubr.f32.vlgmr.msra.gmra.mrb[44].mxu1 %v22921_v38 }
0x190e   :  { %17978 = vmatprep.mubr.f32.mxu1 %v22914_v58  ;;  %18020 = vmatpush3.bf16.msra.mxu1 %v21577_v7 }
0x190f   :  { %18021 = vmatprep.subr.bf16.mxu1 %v21578_v8 }
0x1911   :  { %17979 = vmatmul.mubr.f32.gmra.mrb[46].mxu1 %v22918_v41 }
0x1912   :  { %18022 = vmatpush3.bf16.msra.mxu1 %v21578_v8 }
0x1913   :  { %18023 = vmatprep.subr.bf16.mxu1 %v21579_v29 }
0x1916   :  { %18024 = vmatpush3.bf16.msra.mxu1 %v21579_v29 }
0x1917   :  { %18025 = vmatprep.subr.bf16.mxu1 %v21580_v35 }
0x191a   :  { %18026 = vmatpush3.bf16.msra.mxu1 %v21580_v35 }
0x191b   :  { %18027 = vmatprep.subr.bf16.mxu1 %v21581_v13 }
0x191e   :  { %18028 = vmatpush3.bf16.msra.mxu1 %v21581_v13 }
0x191f   :  { %18029 = vmatprep.subr.bf16.mxu1 %v21582_v30 }
0x1922   :  { %18030 = vmatpush3.bf16.msra.mxu1 %v21582_v30 }
0x1923   :  { %18031 = vmatprep.subr.bf16.mxu1 %v21583_v31 }
0x1926   :  { %18032 = vmatpush3.bf16.msra.mxu1 %v21583_v31 }
0x1927   :  { %18033 = vmatprep.subr.bf16.mxu1 %v21584_v42 }
0x192a   :  { %18034 = vmatpush3.bf16.msra.mxu1 %v21584_v42 }
0x192b   :  { %20456 = vmatprep.subr.bf16.mxu1 %v22363_v9 }
0x19e0   :  { %v17977_v40 = vpop.f32.mrb[44].mxu1 }
0x19e1   :  { %v4361_v63 = vpop.f32.mrb[45].mxu1 }
0x19e2   :  { %v4380_v0 = vadd.f32 %v17977_v40, %v4361_v63 }
0x19e4   :  { %v17980_v5 = vpop.f32.mrb[46].mxu1 }
0x19e5   :  { %v4371_v6 = vpop.f32.mrb[47].mxu1 }
0x19e6   :  { %v4381_v36 = vadd.f32 %v4380_v0, %v4371_v6 }
0x19e8   :  { %v4382_v15 = vadd.f32 %v17980_v5, %v4381_v36 }
0x19ea   :  { %v4383_v10 = vrot.slane %v4382_v15, 4 }
0x19ec   :  { %v4384_v16 = vadd.f32 %v4383_v10, %v4382_v15 }
0x19ee   :  { %v4385_v17 = vrot.slane %v4384_v16, 2 }
0x19f0   :  { %v4386_v18 = vadd.f32 %v4385_v17, %v4384_v16 }
0x19f2   :  { %v4387_v20 = vrot.slane %v4386_v18, 1 }
0x19f4   :  { %v4388_v21 = vadd.f32 %v4387_v20, %v4386_v18 }
0x19f6   :  { %v22926_v22 = vmul.f32 0.001953125, %v4388_v21 }
0x19f8   :  { %v4390_v24 = vsub.f32 %v22916_v39, %v22926_v22  ;;  %v4391_v60 = vsub.f32 %v22921_v38, %v22926_v22  ;;  %v4392_v62 = vsub.f32 %v22914_v58, %v22926_v22  ;;  %v4393_v25 = vsub.f32 %v22918_v41, %v22926_v22 }
0x19fa   :  { %v4394_v59 = vmul.f32 %v4390_v24, %v4390_v24  ;;  %v4395_v61 = vmul.f32 %v4391_v60, %v4391_v60  ;;  %v4396_v26 = vmul.f32 %v4392_v62, %v4392_v62  ;;  %v4397_v28 = vmul.f32 %v4393_v25, %v4393_v25  ;;  %v22111_v24 = vld [vmem:[%s23950_s0 + $0x10] sm:$0xff]  ;;  %v22112_v62 = vld [vmem:[%s23950_s0 + $0x18] sm:$0xff] }
0x19fc   :  { %18013 = vmatprep.mubr.f32.mxu0 %v4394_v59 }
0x19fd   :  { %18014 = vmatmul.mubr.f32.vlgmr.msra.gmra.mrb[56].mxu0 %v4395_v61 }
0x19fe   :  { %18016 = vmatprep.mubr.f32.mxu0 %v4396_v26  ;;  %20426 = vmatpush3.bf16.msra.mxu0 %v22363_v9 }
0x19ff   :  { %20428 = vmatprep.subr.bf16.mxu0 %v22365_v12 }
0x1a01   :  { %18017 = vmatmul.mubr.f32.gmra.mrb[58].mxu0 %v4397_v28 }
0x1a02   :  { %20430 = vmatpush3.bf16.msra.mxu0 %v22365_v12 }
0x1a03   :  { %20432 = vmatprep.subr.bf16.mxu0 %v22370_v19 }
0x1a06   :  { %20434 = vmatpush3.bf16.msra.mxu0 %v22370_v19 }
0x1a07   :  { %20436 = vmatprep.subr.bf16.mxu0 %v22374_v23 }
0x1a0a   :  { %20438 = vmatpush3.bf16.msra.mxu0 %v22374_v23 }
0x1a0b   :  { %20440 = vmatprep.subr.bf16.mxu0 %v22378_v27 }
0x1a0e   :  { %20442 = vmatpush3.bf16.msra.mxu0 %v22378_v27 }
0x1a0f   :  { %20444 = vmatprep.subr.bf16.mxu0 %v22388_v32 }
0x1a12   :  { %20446 = vmatpush3.bf16.msra.mxu0 %v22388_v32 }
0x1a13   :  { %20448 = vmatprep.subr.bf16.mxu0 %v22392_v34 }
0x1a16   :  { %20450 = vmatpush3.bf16.msra.mxu0 %v22392_v34 }
0x1a17   :  { %20452 = vmatprep.subr.bf16.mxu0 %v22411_v37 }
0x1a1a   :  { %20454 = vmatpush3.bf16.msra.mxu0 %v22411_v37 }
0x1ad0   :  { %v18015_v11 = vpop.f32.mrb[56].mxu0 }
0x1ad1   :  { %v4464_v14 = vpop.f32.mrb[57].mxu0 }
0x1ad2   :  { %v4483_v43 = vadd.f32 %v18015_v11, %v4464_v14 }
0x1ad4   :  { %v18018_v44 = vpop.f32.mrb[58].mxu0 }
0x1ad5   :  { %v4474_v45 = vpop.f32.mrb[59].mxu0 }
0x1ad6   :  { %v4484_v46 = vadd.f32 %v4483_v43, %v4474_v45 }
0x1ad8   :  { %v4485_v47 = vadd.f32 %v18018_v44, %v4484_v46 }
0x1ada   :  { %v4486_v48 = vrot.slane %v4485_v47, 4 }
0x1adc   :  { %v4487_v2 = vadd.f32 %v4486_v48, %v4485_v47 }
0x1ade   :  { %v4488_v4 = vrot.slane %v4487_v2, 2 }
0x1ae0   :  { %v4489_v49 = vadd.f32 %v4488_v4, %v4487_v2 }
0x1ae2   :  { %v4490_v1 = vrot.slane %v4489_v49, 1 }
0x1ae4   :  { %v4491_v3 = vadd.f32 %v4490_v1, %v4489_v49 }
0x1ae6   :  { %v4492_v50 = vmul.f32 0.001953125, %v4491_v3 }
0x1ae8   :  { %v4494_v51 = vadd.f32 1e-05, %v4492_v50 }
0x1aea   :  { %22073 = vrsqrt.f32 %v4494_v51 }
0x1af4   :  { %v22074_v53 = vpop.eup %22073 }
0x1af5   :  { %v4496_v54 = vmul.f32 %v22074_v53, %v4493_v52  ;;  %v21585_v53 = vld [vmem:[#allocation5 + $0x500] sm:$0xff]  }
0x1af6   :  { %18115 = vmatprep.subr.bf16.mxu0 %v21585_v53 }
0x1af7   :  { %v4498_v57 = vmul.f32 %v4496_v54, %v22926_v22  ;;  %v4503_v55 = vrot.slane %v4496_v54, %v22456_v33  ;;  %v21586_v54 = vld [vmem:[#allocation5 + $0x508] sm:$0xff]  }
0x1af9   :  { %v4499_v40 = vsub.f32 %v4497_v56, %v4498_v57  ;;  %v4504_v63 = vmul.f32 %v4503_v55, %v22916_v39  ;;  %v4505_v0 = vmul.f32 %v4503_v55, %v22921_v38  ;;  %v4506_v5 = vmul.f32 %v22914_v58, %v4503_v55  ;;  %v22109_v39 = vld [vmem:[%s23950_s0] sm:$0xff]  ;;  %v22110_v58 = vld [vmem:[%s23950_s0 + $0x8] sm:$0xff]  ;;  %v21587_v56 = vld [vmem:[#allocation5 + $0x510] sm:$0xff]  }
0x1afa   :  { %v4507_v6 = vmul.f32 %v22918_v41, %v4503_v55  ;;  %v21588_v57 = vld [vmem:[#allocation5 + $0x518] sm:$0xff]   ;;  %v21589_v55 = vld [vmem:[#allocation5 + $0x520] sm:$0xff]  }
0x1afb   :  { %v4511_v36 = vrot.slane %v4499_v40, %v22456_v33  ;;  %v21590_v40 = vld [vmem:[#allocation5 + $0x528] sm:$0xff]  }
0x1afd   :  { %v4512_v15 = vadd.f32 %v4511_v36, %v4504_v63  ;;  %v4513_v10 = vadd.f32 %v4511_v36, %v4505_v0  ;;  %v4514_v16 = vadd.f32 %v4511_v36, %v4506_v5  ;;  %v4515_v17 = vadd.f32 %v4511_v36, %v4507_v6  ;;  %v21591_v63 = vld [vmem:[#allocation5 + $0x530] sm:$0xff]   ;;  %v21592_v0 = vld [vmem:[#allocation5 + $0x538] sm:$0xff]  }
0x1aff   :  { %v4516_v18 = vmax.f32 %v4512_v15, 0.0  ;;  %v4517_v20 = vmax.f32 %v4513_v10, 0.0  ;;  %v4518_v21 = vmax.f32 %v4514_v16, 0.0  ;;  %v4519_v22 = vmax.f32 %v4515_v17, 0.0 }
0x1b01   :  { %4520 = vst [vmem:[#allocation4 + $0x40] sm:$0xff] %v4516_v18  ;;  %4521 = vst [vmem:[#allocation4 + $0x70] sm:$0xff] %v4517_v20  ;;  %v4524_v38 = vadd.f32 %v22109_v39, %v4516_v18  ;;  %v4525_v41 = vadd.f32 %v22110_v58, %v4517_v20  ;;  %v4526_v60 = vadd.f32 %v22111_v24, %v4518_v21  ;;  %v4842_v24 = vld [vmem:[#allocation10 + $0x9] sm:$0x1] }
0x1b02   :  { %4522 = vst [vmem:[#allocation4 + $0x100] sm:$0xff] %v4518_v21  ;;  %4523 = vst [vmem:[#allocation4 + $0x130] sm:$0xff] %v4519_v22  ;;  %v4527_v59 = vadd.f32 %v22112_v62, %v4519_v22 }
0x1b03   :  { %v4528_v61 = vpack.c.bf16 %v4525_v41, %v4524_v38 }
0x1b04   :  { %v4529_v25 = vpack.c.bf16 %v4527_v59, %v4526_v60  ;;  %v4846_v59 = vld [vmem:[#allocation12 + $0x9] sm:$0x1] }
0x1b05   :  { %18035 = vmatprep.mubr.bf16.mxu1 %v4528_v61 }
0x1b06   :  { %18036 = vmatmul.mubr.bf16.vlgmr.msra.gmra.mrb[48].mxu1 %v4529_v25 }
0x1b07   :  { %20458 = vmatpush3.bf16.msra.mxu1 %v22363_v9 }
0x1b08   :  { %20460 = vmatprep.subr.bf16.mxu1 %v22365_v12 }
0x1b0b   :  { %20462 = vmatpush3.bf16.msra.mxu1 %v22365_v12 }
0x1b0c   :  { %20464 = vmatprep.subr.bf16.mxu1 %v22370_v19 }
0x1b0f   :  { %20466 = vmatpush3.bf16.msra.mxu1 %v22370_v19 }
0x1b10   :  { %20468 = vmatprep.subr.bf16.mxu1 %v22374_v23 }
0x1b13   :  { %20470 = vmatpush3.bf16.msra.mxu1 %v22374_v23 }
0x1b14   :  { %20472 = vmatprep.subr.bf16.mxu1 %v22378_v27 }
0x1b17   :  { %20474 = vmatpush3.bf16.msra.mxu1 %v22378_v27 }
0x1b18   :  { %20476 = vmatprep.subr.bf16.mxu1 %v22388_v32 }
0x1b1b   :  { %20478 = vmatpush3.bf16.msra.mxu1 %v22388_v32 }
0x1b1c   :  { %20480 = vmatprep.subr.bf16.mxu1 %v22392_v34 }
0x1b1f   :  { %20482 = vmatpush3.bf16.msra.mxu1 %v22392_v34 }
0x1b20   :  { %20484 = vmatprep.subr.bf16.mxu1 %v22411_v37 }
0x1b23   :  { %20486 = vmatpush3.bf16.msra.mxu1 %v22411_v37 }
0x1b24   :  { %20488 = vmatprep.subr.bf16.mxu1 %v22363_v9 }
0x1bd9   :  { %v22987_v26 = vpop.f32.mrb[48].mxu1 }
0x1bda   :  { %v22989_v28 = vpop.f32.mrb[49].mxu1 }
0x1bdb   :  { %v22991_v7 = vpop.f32.mrb[50].mxu1  ;;  %18071 = vmatprep.mubr.f32.mxu0 %v22989_v28 }
0x1bdc   :  { %v22994_v8 = vpop.f32.mrb[51].mxu1 }
0x1bdd   :  { %18072 = vmatmul.mubr.f32.vlgmr.msra.gmra.mrb[60].mxu0 %v22994_v8 }
0x1bde   :  { %18074 = vmatprep.mubr.f32.mxu0 %v22987_v26  ;;  %18116 = vmatpush3.bf16.msra.mxu0 %v21585_v53 }
0x1bdf   :  { %18117 = vmatprep.subr.bf16.mxu0 %v21586_v54 }
0x1be1   :  { %18075 = vmatmul.mubr.f32.gmra.mrb[62].mxu0 %v22991_v7 }
0x1be2   :  { %18118 = vmatpush3.bf16.msra.mxu0 %v21586_v54 }
0x1be3   :  { %18119 = vmatprep.subr.bf16.mxu0 %v21587_v56 }
0x1be6   :  { %18120 = vmatpush3.bf16.msra.mxu0 %v21587_v56 }
0x1be7   :  { %18121 = vmatprep.subr.bf16.mxu0 %v21588_v57 }
0x1bea   :  { %18122 = vmatpush3.bf16.msra.mxu0 %v21588_v57 }
0x1beb   :  { %18123 = vmatprep.subr.bf16.mxu0 %v21589_v55 }
0x1bee   :  { %18124 = vmatpush3.bf16.msra.mxu0 %v21589_v55 }
0x1bef   :  { %18125 = vmatprep.subr.bf16.mxu0 %v21590_v40 }
0x1bf2   :  { %18126 = vmatpush3.bf16.msra.mxu0 %v21590_v40 }
0x1bf3   :  { %18127 = vmatprep.subr.bf16.mxu0 %v21591_v63 }
0x1bf6   :  { %18128 = vmatpush3.bf16.msra.mxu0 %v21591_v63 }
0x1bf7   :  { %18129 = vmatprep.subr.bf16.mxu0 %v21592_v0 }
0x1bfa   :  { %18130 = vmatpush3.bf16.msra.mxu0 %v21592_v0 }
0x1bfb   :  { %20520 = vmatprep.subr.bf16.mxu0 %v22363_v9 }
0x1cb0   :  { %v18073_v29 = vpop.f32.mrb[60].mxu0 }
0x1cb1   :  { %v4710_v35 = vpop.f32.mrb[61].mxu0 }
0x1cb2   :  { %v4729_v13 = vadd.f32 %v18073_v29, %v4710_v35 }
0x1cb4   :  { %v18076_v30 = vpop.f32.mrb[62].mxu0 }
0x1cb5   :  { %v4720_v31 = vpop.f32.mrb[63].mxu0 }
0x1cb6   :  { %v4730_v42 = vadd.f32 %v4729_v13, %v4720_v31 }
0x1cb8   :  { %v4731_v11 = vadd.f32 %v18076_v30, %v4730_v42 }
0x1cba   :  { %v4732_v14 = vrot.slane %v4731_v11, 4 }
0x1cbc   :  { %v4733_v43 = vadd.f32 %v4732_v14, %v4731_v11 }
0x1cbe   :  { %v4734_v44 = vrot.slane %v4733_v43, 2 }
0x1cc0   :  { %v4735_v45 = vadd.f32 %v4734_v44, %v4733_v43 }
0x1cc2   :  { %v4736_v46 = vrot.slane %v4735_v45, 1 }
0x1cc4   :  { %v4737_v47 = vadd.f32 %v4736_v46, %v4735_v45 }
0x1cc6   :  { %v22999_v48 = vmul.f32 0.001953125, %v4737_v47 }
0x1cc8   :  { %v4739_v2 = vsub.f32 %v22989_v28, %v22999_v48  ;;  %v4740_v4 = vsub.f32 %v22994_v8, %v22999_v48  ;;  %v4741_v49 = vsub.f32 %v22987_v26, %v22999_v48  ;;  %v4742_v50 = vsub.f32 %v22991_v7, %v22999_v48 }
0x1cca   :  { %v4743_v1 = vmul.f32 %v4739_v2, %v4739_v2  ;;  %v4744_v3 = vmul.f32 %v4740_v4, %v4740_v4  ;;  %v4745_v51 = vmul.f32 %v4741_v49, %v4741_v49  ;;  %v4746_v52 = vmul.f32 %v4742_v50, %v4742_v50 }
0x1ccc   :  { %18109 = vmatprep.mubr.f32.mxu1 %v4743_v1 }
0x1ccd   :  { %18110 = vmatmul.mubr.f32.vlgmr.msra.gmra.mrb[52].mxu1 %v4744_v3 }
0x1cce   :  { %18112 = vmatprep.mubr.f32.mxu1 %v4745_v51  ;;  %20490 = vmatpush3.bf16.msra.mxu1 %v22363_v9 }
0x1ccf   :  { %20492 = vmatprep.subr.bf16.mxu1 %v22365_v12 }
0x1cd1   :  { %18113 = vmatmul.mubr.f32.gmra.mrb[54].mxu1 %v4746_v52 }
0x1cd2   :  { %20494 = vmatpush3.bf16.msra.mxu1 %v22365_v12 }
0x1cd3   :  { %20496 = vmatprep.subr.bf16.mxu1 %v22370_v19 }
0x1cd6   :  { %20498 = vmatpush3.bf16.msra.mxu1 %v22370_v19 }
0x1cd7   :  { %20500 = vmatprep.subr.bf16.mxu1 %v22374_v23 }
0x1cda   :  { %20502 = vmatpush3.bf16.msra.mxu1 %v22374_v23 }
0x1cdb   :  { %20504 = vmatprep.subr.bf16.mxu1 %v22378_v27 }
0x1cde   :  { %20506 = vmatpush3.bf16.msra.mxu1 %v22378_v27 }
0x1cdf   :  { %20508 = vmatprep.subr.bf16.mxu1 %v22388_v32 }
0x1ce2   :  { %20510 = vmatpush3.bf16.msra.mxu1 %v22388_v32 }
0x1ce3   :  { %20512 = vmatprep.subr.bf16.mxu1 %v22392_v34 }
0x1ce6   :  { %20514 = vmatpush3.bf16.msra.mxu1 %v22392_v34 }
0x1ce7   :  { %20516 = vmatprep.subr.bf16.mxu1 %v22411_v37 }
0x1cea   :  { %20518 = vmatpush3.bf16.msra.mxu1 %v22411_v37 }
0x1da0   :  { %v18111_v5 = vpop.f32.mrb[52].mxu1 }
0x1da1   :  { %v4813_v6 = vpop.f32.mrb[53].mxu1 }
0x1da2   :  { %v4832_v36 = vadd.f32 %v18111_v5, %v4813_v6 }
0x1da4   :  { %v18114_v15 = vpop.f32.mrb[54].mxu1 }
0x1da5   :  { %v4823_v10 = vpop.f32.mrb[55].mxu1 }
0x1da6   :  { %v4833_v16 = vadd.f32 %v4832_v36, %v4823_v10 }
0x1da8   :  { %v4834_v17 = vadd.f32 %v18114_v15, %v4833_v16 }
0x1daa   :  { %v4835_v18 = vrot.slane %v4834_v17, 4 }
0x1dac   :  { %v4836_v20 = vadd.f32 %v4835_v18, %v4834_v17 }
0x1dae   :  { %v4837_v21 = vrot.slane %v4836_v20, 2 }
0x1db0   :  { %v4838_v22 = vadd.f32 %v4837_v21, %v4836_v20  ;;  %v21593_v20 = vld [vmem:[#allocation5 + $0x580] sm:$0xff]   ;;  %v21594_v21 = vld [vmem:[#allocation5 + $0x588] sm:$0xff]  }
0x1db1   :  { %18211 = vmatprep.subr.bf16.mxu1 %v21593_v20 }
0x1db2   :  { %v4839_v39 = vrot.slane %v4838_v22, 1 }
0x1db4   :  { %v4840_v38 = vadd.f32 %v4839_v39, %v4838_v22  ;;  %v21595_v22 = vld [vmem:[#allocation5 + $0x590] sm:$0xff]   ;;  %v21596_v39 = vld [vmem:[#allocation5 + $0x598] sm:$0xff]  }
0x1db6   :  { %v4841_v58 = vmul.f32 0.001953125, %v4840_v38  ;;  %v21597_v38 = vld [vmem:[#allocation5 + $0x5a0] sm:$0xff]  }
0x1db8   :  { %v4843_v41 = vadd.f32 1e-05, %v4841_v58  ;;  %v21598_v58 = vld [vmem:[#allocation5 + $0x5a8] sm:$0xff]  }
0x1dba   :  { %22075 = vrsqrt.f32 %v4843_v41  ;;  %v21599_v41 = vld [vmem:[#allocation5 + $0x5b0] sm:$0xff]  }
0x1dc4   :  { %v22076_v60 = vpop.eup %22075 }
0x1dc5   :  { %v4845_v62 = vmul.f32 %v22076_v60, %v4842_v24  ;;  %v21600_v24 = vld [vmem:[#allocation5 + $0x5b8] sm:$0xff]   ;;  %v21601_v60 = vld [vmem:[#allocation5 + $0x540] sm:$0xff]  }
0x1dc7   :  { %v4847_v61 = vmul.f32 %v4845_v62, %v22999_v48  ;;  %v4852_v25 = vrot.slane %v4845_v62, %v22456_v33 }
0x1dc9   :  { %v4848_v29 = vsub.f32 %v4846_v59, %v4847_v61  ;;  %v4853_v35 = vmul.f32 %v4852_v25, %v22989_v28  ;;  %v4854_v13 = vmul.f32 %v4852_v25, %v22994_v8  ;;  %v4855_v30 = vmul.f32 %v22987_v26, %v4852_v25 }
0x1dca   :  { %v4856_v31 = vmul.f32 %v22991_v7, %v4852_v25 }
0x1dcb   :  { %v4860_v42 = vrot.slane %v4848_v29, %v22456_v33 }
0x1dcd   :  { %v4861_v11 = vadd.f32 %v4860_v42, %v4853_v35  ;;  %v4862_v14 = vadd.f32 %v4860_v42, %v4854_v13  ;;  %v4863_v43 = vadd.f32 %v4860_v42, %v4855_v30  ;;  %v4864_v44 = vadd.f32 %v4860_v42, %v4856_v31 }
0x1dcf   :  { %v4865_v45 = vmax.f32 %v4861_v11, 0.0  ;;  %v4866_v46 = vmax.f32 %v4862_v14, 0.0  ;;  %v4867_v47 = vmax.f32 %v4863_v43, 0.0  ;;  %v4868_v48 = vmax.f32 %v4864_v44, 0.0 }
0x1dd1   :  { %v4869_v2 = vpack.c.bf16 %v4866_v46, %v4865_v45  ;;  %v4870_v4 = vpack.c.bf16 %v4868_v48, %v4867_v47  ;;  %v5183_v46 = vld [vmem:[#allocation10 + $0xa] sm:$0x1] }
0x1dd3   :  { %18131 = vmatprep.mubr.bf16.mxu0 %v4869_v2  ;;  %v5187_v2 = vld [vmem:[#allocation12 + $0xa] sm:$0x1] }
0x1dd4   :  { %18132 = vmatmul.mubr.bf16.vlgmr.msra.gmra.mrb[64].mxu0 %v4870_v4 }
0x1dd5   :  { %20522 = vmatpush3.bf16.msra.mxu0 %v22363_v9 }
0x1dd6   :  { %20524 = vmatprep.subr.bf16.mxu0 %v22365_v12 }
0x1dd9   :  { %20526 = vmatpush3.bf16.msra.mxu0 %v22365_v12 }
0x1dda   :  { %20528 = vmatprep.subr.bf16.mxu0 %v22370_v19 }
0x1ddd   :  { %20530 = vmatpush3.bf16.msra.mxu0 %v22370_v19 }
0x1dde   :  { %20532 = vmatprep.subr.bf16.mxu0 %v22374_v23 }
0x1de1   :  { %20534 = vmatpush3.bf16.msra.mxu0 %v22374_v23 }
0x1de2   :  { %20536 = vmatprep.subr.bf16.mxu0 %v22378_v27 }
0x1de5   :  { %20538 = vmatpush3.bf16.msra.mxu0 %v22378_v27 }
0x1de6   :  { %20540 = vmatprep.subr.bf16.mxu0 %v22388_v32 }
0x1de9   :  { %20542 = vmatpush3.bf16.msra.mxu0 %v22388_v32 }
0x1dea   :  { %20544 = vmatprep.subr.bf16.mxu0 %v22392_v34 }
0x1ded   :  { %20546 = vmatpush3.bf16.msra.mxu0 %v22392_v34 }
0x1dee   :  { %20548 = vmatprep.subr.bf16.mxu0 %v22411_v37 }
0x1df1   :  { %20550 = vmatpush3.bf16.msra.mxu0 %v22411_v37 }
0x1df2   :  { %20552 = vmatprep.subr.bf16.mxu0 %v22363_v9 }
0x1ea7   :  { %v23048_v26 = vpop.f32.mrb[64].mxu0 }
0x1ea8   :  { %v23050_v28 = vpop.f32.mrb[65].mxu0 }
0x1ea9   :  { %v23052_v7 = vpop.f32.mrb[66].mxu0  ;;  %18167 = vmatprep.mubr.f32.mxu1 %v23050_v28 }
0x1eaa   :  { %v23055_v8 = vpop.f32.mrb[67].mxu0 }
0x1eab   :  { %18168 = vmatmul.mubr.f32.vlgmr.msra.gmra.mrb[56].mxu1 %v23055_v8 }
0x1eac   :  { %18170 = vmatprep.mubr.f32.mxu1 %v23048_v26  ;;  %18212 = vmatpush3.bf16.msra.mxu1 %v21593_v20 }
0x1ead   :  { %18213 = vmatprep.subr.bf16.mxu1 %v21594_v21 }
0x1eaf   :  { %18171 = vmatmul.mubr.f32.gmra.mrb[58].mxu1 %v23052_v7 }
0x1eb0   :  { %18214 = vmatpush3.bf16.msra.mxu1 %v21594_v21  ;;  %v21603_v21 = vld [vmem:[#allocation5 + $0x550] sm:$0xff]  }
0x1eb1   :  { %18215 = vmatprep.subr.bf16.mxu1 %v21595_v22 }
0x1eb4   :  { %18216 = vmatpush3.bf16.msra.mxu1 %v21595_v22  ;;  %v21604_v22 = vld [vmem:[#allocation5 + $0x558] sm:$0xff]  }
0x1eb5   :  { %18217 = vmatprep.subr.bf16.mxu1 %v21596_v39 }
0x1eb8   :  { %18218 = vmatpush3.bf16.msra.mxu1 %v21596_v39  ;;  %v21605_v39 = vld [vmem:[#allocation5 + $0x560] sm:$0xff]  }
0x1eb9   :  { %18219 = vmatprep.subr.bf16.mxu1 %v21597_v38 }
0x1ebc   :  { %18220 = vmatpush3.bf16.msra.mxu1 %v21597_v38  ;;  %v21606_v38 = vld [vmem:[#allocation5 + $0x568] sm:$0xff]  }
0x1ebd   :  { %18221 = vmatprep.subr.bf16.mxu1 %v21598_v58 }
0x1ec0   :  { %18222 = vmatpush3.bf16.msra.mxu1 %v21598_v58  ;;  %v21607_v58 = vld [vmem:[#allocation5 + $0x570] sm:$0xff]  }
0x1ec1   :  { %18223 = vmatprep.subr.bf16.mxu1 %v21599_v41 }
0x1ec4   :  { %18224 = vmatpush3.bf16.msra.mxu1 %v21599_v41  ;;  %v21608_v41 = vld [vmem:[#allocation5 + $0x578] sm:$0xff]  }
0x1ec5   :  { %18225 = vmatprep.subr.bf16.mxu1 %v21600_v24 }
0x1ec8   :  { %18226 = vmatpush3.bf16.msra.mxu1 %v21600_v24  ;;  %v21609_v24 = vld [vmem:[#allocation5 + $0x5c0] sm:$0xff]  }
0x1ec9   :  { %18231 = vmatprep.subr.bf16.mxu1 %v21601_v60 }
0x1f7e   :  { %v18169_v49 = vpop.f32.mrb[56].mxu1 }
0x1f7f   :  { %v5051_v1 = vpop.f32.mrb[57].mxu1 }
0x1f80   :  { %v5070_v3 = vadd.f32 %v18169_v49, %v5051_v1 }
0x1f82   :  { %v18172_v50 = vpop.f32.mrb[58].mxu1 }
0x1f83   :  { %v5061_v51 = vpop.f32.mrb[59].mxu1 }
0x1f84   :  { %v5071_v52 = vadd.f32 %v5070_v3, %v5061_v51 }
0x1f86   :  { %v5072_v53 = vadd.f32 %v18172_v50, %v5071_v52 }
0x1f88   :  { %v5073_v54 = vrot.slane %v5072_v53, 4 }
0x1f8a   :  { %v5074_v56 = vadd.f32 %v5073_v54, %v5072_v53 }
0x1f8c   :  { %v5075_v57 = vrot.slane %v5074_v56, 2 }
0x1f8e   :  { %v5076_v55 = vadd.f32 %v5075_v57, %v5074_v56 }
0x1f90   :  { %v5077_v40 = vrot.slane %v5076_v55, 1 }
0x1f92   :  { %v5078_v63 = vadd.f32 %v5077_v40, %v5076_v55 }
0x1f94   :  { %v23060_v0 = vmul.f32 0.001953125, %v5078_v63 }
0x1f96   :  { %v5080_v5 = vsub.f32 %v23050_v28, %v23060_v0  ;;  %v5081_v6 = vsub.f32 %v23055_v8, %v23060_v0  ;;  %v5082_v36 = vsub.f32 %v23048_v26, %v23060_v0  ;;  %v5083_v16 = vsub.f32 %v23052_v7, %v23060_v0 }
0x1f98   :  { %v5084_v15 = vmul.f32 %v5080_v5, %v5080_v5  ;;  %v5085_v10 = vmul.f32 %v5081_v6, %v5081_v6  ;;  %v5086_v17 = vmul.f32 %v5082_v36, %v5082_v36  ;;  %v5087_v18 = vmul.f32 %v5083_v16, %v5083_v16 }
0x1f9a   :  { %18205 = vmatprep.mubr.f32.mxu0 %v5084_v15 }
0x1f9b   :  { %18206 = vmatmul.mubr.f32.vlgmr.msra.gmra.mrb[68].mxu0 %v5085_v10 }
0x1f9c   :  { %18208 = vmatprep.mubr.f32.mxu0 %v5086_v17  ;;  %20554 = vmatpush3.bf16.msra.mxu0 %v22363_v9 }
0x1f9d   :  { %20556 = vmatprep.subr.bf16.mxu0 %v22365_v12 }
0x1f9f   :  { %18209 = vmatmul.mubr.f32.gmra.mrb[70].mxu0 %v5087_v18  ;;  %v21602_v18 = vld [vmem:[#allocation5 + $0x548] sm:$0xff]  }
0x1fa0   :  { %20558 = vmatpush3.bf16.msra.mxu0 %v22365_v12 }
0x1fa1   :  { %20560 = vmatprep.subr.bf16.mxu0 %v22370_v19 }
0x1fa4   :  { %20562 = vmatpush3.bf16.msra.mxu0 %v22370_v19 }
0x1fa5   :  { %20564 = vmatprep.subr.bf16.mxu0 %v22374_v23 }
0x1fa8   :  { %20566 = vmatpush3.bf16.msra.mxu0 %v22374_v23 }
0x1fa9   :  { %20568 = vmatprep.subr.bf16.mxu0 %v22378_v27 }
0x1fac   :  { %20570 = vmatpush3.bf16.msra.mxu0 %v22378_v27 }
0x1fad   :  { %20572 = vmatprep.subr.bf16.mxu0 %v22388_v32 }
0x1fb0   :  { %20574 = vmatpush3.bf16.msra.mxu0 %v22388_v32 }
0x1fb1   :  { %20576 = vmatprep.subr.bf16.mxu0 %v22392_v34 }
0x1fb4   :  { %20578 = vmatpush3.bf16.msra.mxu0 %v22392_v34 }
0x1fb5   :  { %20580 = vmatprep.subr.bf16.mxu0 %v22411_v37 }
0x1fb8   :  { %20582 = vmatpush3.bf16.msra.mxu0 %v22411_v37 }
0x1fb9   :  { %20584 = vmatprep.subr.bf16.mxu0 %v22363_v9 }
0x206e   :  { %v18207_v62 = vpop.f32.mrb[68].mxu0 }
0x206f   :  { %v5154_v59 = vpop.f32.mrb[69].mxu0 }
0x2070   :  { %v5173_v61 = vadd.f32 %v18207_v62, %v5154_v59 }
0x2072   :  { %v18210_v25 = vpop.f32.mrb[70].mxu0 }
0x2073   :  { %v5164_v29 = vpop.f32.mrb[71].mxu0 }
0x2074   :  { %v5174_v35 = vadd.f32 %v5173_v61, %v5164_v29  ;;  %v21610_v29 = vld [vmem:[#allocation5 + $0x5c8] sm:$0xff]  }
0x2076   :  { %v5175_v13 = vadd.f32 %v18210_v25, %v5174_v35 }
0x2078   :  { %v5176_v30 = vrot.slane %v5175_v13, 4 }
0x207a   :  { %v5177_v31 = vadd.f32 %v5176_v30, %v5175_v13  ;;  %v21611_v13 = vld [vmem:[#allocation5 + $0x5d0] sm:$0xff]   ;;  %v21612_v30 = vld [vmem:[#allocation5 + $0x5d8] sm:$0xff]  }
0x207c   :  { %v5178_v42 = vrot.slane %v5177_v31, 2 }
0x207e   :  { %v5179_v11 = vadd.f32 %v5178_v42, %v5177_v31  ;;  %v21613_v31 = vld [vmem:[#allocation5 + $0x5e0] sm:$0xff]   ;;  %v21614_v42 = vld [vmem:[#allocation5 + $0x5e8] sm:$0xff]  }
0x2080   :  { %v5180_v14 = vrot.slane %v5179_v11, 1 }
0x2082   :  { %v5181_v43 = vadd.f32 %v5180_v14, %v5179_v11  ;;  %v21615_v11 = vld [vmem:[#allocation5 + $0x5f0] sm:$0xff]   ;;  %v21616_v14 = vld [vmem:[#allocation5 + $0x5f8] sm:$0xff]  }
0x2084   :  { %v5182_v44 = vmul.f32 0.001953125, %v5181_v43  ;;  %v21617_v43 = vld [vmem:[#allocation5 + $0x600] sm:$0xff]  }
0x2086   :  { %v5184_v45 = vadd.f32 1e-05, %v5182_v44 }
0x2088   :  { %22077 = vrsqrt.f32 %v5184_v45 }
0x2092   :  { %v22078_v47 = vpop.eup %22077 }
0x2093   :  { %v5186_v48 = vmul.f32 %v22078_v47, %v5183_v46  ;;  %v21618_v47 = vld [vmem:[#allocation5 + $0x608] sm:$0xff]  }
0x2095   :  { %v5188_v4 = vmul.f32 %v5186_v48, %v23060_v0  ;;  %v5193_v49 = vrot.slane %v5186_v48, %v22456_v33  ;;  %v21619_v48 = vld [vmem:[#allocation5 + $0x610] sm:$0xff]  }
0x2097   :  { %v5189_v1 = vsub.f32 %v5187_v2, %v5188_v4  ;;  %v5194_v3 = vmul.f32 %v5193_v49, %v23050_v28  ;;  %v5195_v50 = vmul.f32 %v5193_v49, %v23055_v8  ;;  %v5196_v51 = vmul.f32 %v23048_v26, %v5193_v49  ;;  %v21620_v2 = vld [vmem:[#allocation5 + $0x618] sm:$0xff]   ;;  %v21621_v4 = vld [vmem:[#allocation5 + $0x620] sm:$0xff]  }
0x2098   :  { %v5197_v52 = vmul.f32 %v23052_v7, %v5193_v49  ;;  %v21622_v49 = vld [vmem:[#allocation5 + $0x628] sm:$0xff]  }
0x2099   :  { %v5201_v53 = vrot.slane %v5189_v1, %v22456_v33  ;;  %v21623_v1 = vld [vmem:[#allocation5 + $0x630] sm:$0xff]  }
0x209b   :  { %v5202_v54 = vadd.f32 %v5201_v53, %v5194_v3  ;;  %v5203_v56 = vadd.f32 %v5201_v53, %v5195_v50  ;;  %v5204_v57 = vadd.f32 %v5201_v53, %v5196_v51  ;;  %v5205_v55 = vadd.f32 %v5201_v53, %v5197_v52  ;;  %v21624_v3 = vld [vmem:[#allocation5 + $0x638] sm:$0xff]   ;;  %v21625_v50 = vld [vmem:[#allocation5 + $0x640] sm:$0xff]   ;;  %v21626_v53 = vld [vmem:[#allocation5 + $0x648] sm:$0xff]  }
0x209d   :  { %v5206_v40 = vmax.f32 %v5202_v54, 0.0  ;;  %v5207_v63 = vmax.f32 %v5203_v56, 0.0  ;;  %v5208_v0 = vmax.f32 %v5204_v57, 0.0  ;;  %v5209_v5 = vmax.f32 %v5205_v55, 0.0  ;;  %v21627_v56 = vld [vmem:[#allocation5 + $0x650] sm:$0xff]   ;;  %v21628_v57 = vld [vmem:[#allocation5 + $0x658] sm:$0xff]  }
0x209e   :  { %v21629_v55 = vld [vmem:[#allocation5 + $0x660] sm:$0xff]  }
0x209f   :  { %5210 = vst [vmem:[#allocation2 + $0x8] sm:$0xff] %v5206_v40  ;;  %5211 = vst [vmem:[#allocation2 + $0x10] sm:$0xff] %v5207_v63  ;;  %v23093_v28 = vpack.c.bf16 %v5207_v63, %v5206_v40  ;;  %v23095_v8 = vpack.c.bf16 %v5209_v5, %v5208_v0  ;;  %v21630_v40 = vld [vmem:[#allocation5 + $0x668] sm:$0xff]   ;;  %v21631_v63 = vld [vmem:[#allocation5 + $0x670] sm:$0xff]  }
0x20a0   :  { %5212 = vst [vmem:[#allocation2 + $0x28] sm:$0xff] %v5208_v0  ;;  %5213 = vst [vmem:[#allocation2 + $0x30] sm:$0xff] %v5209_v5  ;;  %v21632_v0 = vld [vmem:[#allocation5 + $0x678] sm:$0xff]   ;;  %v21633_v5 = vld [vmem:[#allocation5 + $0x680] sm:$0xff]  }
0x20a6   :  { %v5237_v26 = vld [vmem:[#allocation2 + $0x6] sm:$0xff]  ;;  %v5238_v7 = vld [vmem:[#allocation2 + $0xe] sm:$0xff] }
0x20a7   :  { %v5239_v6 = vld [vmem:[#allocation2 + $0x26] sm:$0xff]  ;;  %v5241_v36 = vpack.c.bf16 %v5238_v7, %v5237_v26  ;;  %v5240_v15 = vld [vmem:[#allocation2 + $0x2e] sm:$0xff] }
0x20a8   :  { %v5214_v10 = vld [vmem:[#allocation2 + $0x5] sm:$0xff]  ;;  %v5215_v16 = vld [vmem:[#allocation2 + $0xd] sm:$0xff]  ;;  %v5242_v17 = vpack.c.bf16 %v5240_v15, %v5239_v6 }
0x20a9   :  { %18227 = vmatprep.mubr.bf16.mxu1 %v5241_v36  ;;  %v5218_v20 = vpack.c.bf16 %v5215_v16, %v5214_v10  ;;  %v5217_v62 = vld [vmem:[#allocation2 + $0x2d] sm:$0xff]  ;;  %v21636_v16 = vld [vmem:[#allocation5 + $0x698] sm:$0xff]  }
0x20aa   :  { %18228 = vmatmul.mubr.bf16.vlgmr.msra.gmra.mrb[60].mxu1 %v5242_v17  ;;  %v5454_v59 = vld [vmem:[#allocation2 + $0x7] sm:$0xff]  ;;  %v5455_v61 = vld [vmem:[#allocation2 + $0xf] sm:$0xff] }
0x20ab   :  { %18232 = vmatpush3.bf16.msra.mxu1 %v21601_v60  ;;  %18247 = vmatprep.mubr.bf16.mxu1 %v5218_v20  ;;  %v5216_v60 = vld [vmem:[#allocation2 + $0x25] sm:$0xff]  ;;  %v5458_v35 = vpack.c.bf16 %v5455_v61, %v5454_v59  ;;  %v5457_v45 = vld [vmem:[#allocation2 + $0x2f] sm:$0xff]  ;;  %v21644_v61 = vld [vmem:[#allocation5 + $0x6d8] sm:$0xff]  }
0x20ac   :  { %18233 = vmatprep.subr.bf16.mxu1 %v21602_v18  ;;  %v5219_v25 = vpack.c.bf16 %v5217_v62, %v5216_v60  ;;  %v5456_v44 = vld [vmem:[#allocation2 + $0x27] sm:$0xff]  ;;  %v5703_v52 = vld [vmem:[#allocation2 + $0x11] sm:$0xff] }
0x20ad   :  { %v5459_v46 = vpack.c.bf16 %v5457_v45, %v5456_v44  ;;  %v5702_v51 = vld [vmem:[#allocation2 + $0x9] sm:$0xff]  ;;  %v5827_v7 = vld [vmem:[#allocation2 + $0x12] sm:$0xff]  ;;  %v21637_v17 = vld [vmem:[#allocation5 + $0x6a0] sm:$0xff]  }
0x20ae   :  { %v5706_v54 = vpack.c.bf16 %v5703_v52, %v5702_v51  ;;  %v5826_v26 = vld [vmem:[#allocation2 + $0xa] sm:$0xff] }
0x20af   :  { %18234 = vmatpush3.bf16.msra.mxu1 %v21602_v18  ;;  %v21634_v36 = vld [vmem:[#allocation5 + $0x688] sm:$0xff]   ;;  %v5830_v15 = vpack.c.bf16 %v5827_v7, %v5826_v26  ;;  %v21635_v10 = vld [vmem:[#allocation5 + $0x690] sm:$0xff]  }
0x20b0   :  { %18235 = vmatprep.subr.bf16.mxu1 %v21603_v21  ;;  %v21638_v18 = vld [vmem:[#allocation5 + $0x6a8] sm:$0xff]   ;;  %v21639_v20 = vld [vmem:[#allocation5 + $0x6b0] sm:$0xff]  }
0x20b1   :  { %v21642_v60 = vld [vmem:[#allocation5 + $0x6c8] sm:$0xff]   ;;  %v21643_v59 = vld [vmem:[#allocation5 + $0x6d0] sm:$0xff]  }
0x20b2   :  { %v21650_v26 = vld [vmem:[#allocation5 + $0x748] sm:$0xff]   ;;  %v21651_v7 = vld [vmem:[#allocation5 + $0x750] sm:$0xff]  }
0x20b3   :  { %18236 = vmatpush3.bf16.msra.mxu1 %v21603_v21  ;;  %v21640_v21 = vld [vmem:[#allocation5 + $0x6b8] sm:$0xff]  }
0x20b4   :  { %18237 = vmatprep.subr.bf16.mxu1 %v21604_v22 }
0x20b7   :  { %18238 = vmatpush3.bf16.msra.mxu1 %v21604_v22  ;;  %v21641_v22 = vld [vmem:[#allocation5 + $0x6c0] sm:$0xff]  }
0x20b8   :  { %18239 = vmatprep.subr.bf16.mxu1 %v21605_v39 }
0x20bb   :  { %18240 = vmatpush3.bf16.msra.mxu1 %v21605_v39  ;;  %v5828_v39 = vld [vmem:[#allocation2 + $0x2a] sm:$0xff] }
0x20bc   :  { %18241 = vmatprep.subr.bf16.mxu1 %v21606_v38 }
0x20bf   :  { %18242 = vmatpush3.bf16.msra.mxu1 %v21606_v38  ;;  %v5829_v38 = vld [vmem:[#allocation2 + $0x32] sm:$0xff] }
0x20c0   :  { %18243 = vmatprep.subr.bf16.mxu1 %v21607_v58 }
0x20c3   :  { %18244 = vmatpush3.bf16.msra.mxu1 %v21607_v58  ;;  %v5950_v58 = vld [vmem:[#allocation2 + $0xb] sm:$0xff] }
0x20c4   :  { %18245 = vmatprep.subr.bf16.mxu1 %v21608_v41 }
0x20c7   :  { %18246 = vmatpush3.bf16.msra.mxu1 %v21608_v41  ;;  %v5951_v41 = vld [vmem:[#allocation2 + $0x13] sm:$0xff] }
0x20c8   :  { %18251 = vmatprep.subr.bf16.mxu1 %v21609_v24  ;;  %v5954_v62 = vpack.c.bf16 %v5951_v41, %v5950_v58 }
0x20ca   :  { %18248 = vmatmul.mubr.bf16.vlgmr.msra.gmra.mrb[60].mxu1 %v5219_v25  ;;  %v21645_v25 = vld [vmem:[#allocation5 + $0x6e0] sm:$0xff]  }
0x20cb   :  { %18252 = vmatpush3.bf16.msra.mxu1 %v21609_v24  ;;  %18267 = vmatprep.mubr.bf16.mxu1 %v5458_v35  ;;  %v5831_v24 = vpack.c.bf16 %v5829_v38, %v5828_v39  ;;  %v21647_v35 = vld [vmem:[#allocation5 + $0x6f0] sm:$0xff]  }
0x20cc   :  { %18253 = vmatprep.subr.bf16.mxu1 %v21610_v29 }
0x20cf   :  { %18254 = vmatpush3.bf16.msra.mxu1 %v21610_v29  ;;  %v21646_v29 = vld [vmem:[#allocation5 + $0x6e8] sm:$0xff]  }
0x20d0   :  { %18255 = vmatprep.subr.bf16.mxu1 %v21611_v13 }
0x20d3   :  { %18256 = vmatpush3.bf16.msra.mxu1 %v21611_v13  ;;  %v21648_v13 = vld [vmem:[#allocation5 + $0x6f8] sm:$0xff]  }
0x20d4   :  { %18257 = vmatprep.subr.bf16.mxu1 %v21612_v30 }
0x20d7   :  { %18258 = vmatpush3.bf16.msra.mxu1 %v21612_v30  ;;  %v5952_v30 = vld [vmem:[#allocation2 + $0x2b] sm:$0xff] }
0x20d8   :  { %18259 = vmatprep.subr.bf16.mxu1 %v21613_v31 }
0x20db   :  { %18260 = vmatpush3.bf16.msra.mxu1 %v21613_v31  ;;  %v5953_v31 = vld [vmem:[#allocation2 + $0x33] sm:$0xff] }
0x20dc   :  { %18261 = vmatprep.subr.bf16.mxu1 %v21614_v42 }
0x20df   :  { %18262 = vmatpush3.bf16.msra.mxu1 %v21614_v42  ;;  %v5955_v42 = vpack.c.bf16 %v5953_v31, %v5952_v30  ;;  %v6276_v31 = vld [vmem:[#allocation12 + $0xb] sm:$0x1] }
0x20e0   :  { %18263 = vmatprep.subr.bf16.mxu1 %v21615_v11 }
0x20e3   :  { %18264 = vmatpush3.bf16.msra.mxu1 %v21615_v11 }
0x20e4   :  { %18265 = vmatprep.subr.bf16.mxu1 %v21616_v14 }
0x20e7   :  { %18266 = vmatpush3.bf16.msra.mxu1 %v21616_v14 }
0x20e8   :  { %18271 = vmatprep.subr.bf16.mxu1 %v21617_v43 }
0x20ea   :  { %18268 = vmatmul.mubr.bf16.vlgmr.msra.gmra.mrb[60].mxu1 %v5459_v46 }
0x20eb   :  { %18272 = vmatpush3.bf16.msra.mxu1 %v21617_v43  ;;  %18287 = vmatprep.mubr.bf16.mxu1 %v23093_v28  ;;  %v5704_v28 = vld [vmem:[#allocation2 + $0x29] sm:$0xff] }
0x20ec   :  { %18273 = vmatprep.subr.bf16.mxu1 %v21618_v47 }
0x20ef   :  { %18274 = vmatpush3.bf16.msra.mxu1 %v21618_v47 }
0x20f0   :  { %18275 = vmatprep.subr.bf16.mxu1 %v21619_v48 }
0x20f3   :  { %18276 = vmatpush3.bf16.msra.mxu1 %v21619_v48 }
0x20f4   :  { %18277 = vmatprep.subr.bf16.mxu1 %v21620_v2 }
0x20f7   :  { %18278 = vmatpush3.bf16.msra.mxu1 %v21620_v2 }
0x20f8   :  { %18279 = vmatprep.subr.bf16.mxu1 %v21621_v4 }
0x20fb   :  { %18280 = vmatpush3.bf16.msra.mxu1 %v21621_v4 }
0x20fc   :  { %18281 = vmatprep.subr.bf16.mxu1 %v21622_v49 }
0x20ff   :  { %18282 = vmatpush3.bf16.msra.mxu1 %v21622_v49 }
0x2100   :  { %18283 = vmatprep.subr.bf16.mxu1 %v21623_v1 }
0x2103   :  { %18284 = vmatpush3.bf16.msra.mxu1 %v21623_v1 }
0x2104   :  { %18285 = vmatprep.subr.bf16.mxu1 %v21624_v3 }
0x2107   :  { %18286 = vmatpush3.bf16.msra.mxu1 %v21624_v3 }
0x2108   :  { %18291 = vmatprep.subr.bf16.mxu1 %v21625_v50 }
0x210a   :  { %18288 = vmatmul.mubr.bf16.vlgmr.msra.gmra.mrb[60].mxu1 %v23095_v8  ;;  %v5705_v8 = vld [vmem:[#allocation2 + $0x31] sm:$0xff] }
0x210b   :  { %18292 = vmatpush3.bf16.msra.mxu1 %v21625_v50  ;;  %18307 = vmatprep.mubr.bf16.mxu1 %v5706_v54  ;;  %v5707_v6 = vpack.c.bf16 %v5705_v8, %v5704_v28  ;;  %v21649_v8 = vld [vmem:[#allocation5 + $0x740] sm:$0xff]  }
0x210c   :  { %18293 = vmatprep.subr.bf16.mxu1 %v21626_v53 }
0x210f   :  { %18294 = vmatpush3.bf16.msra.mxu1 %v21626_v53 }
0x2110   :  { %18295 = vmatprep.subr.bf16.mxu1 %v21627_v56 }
0x2113   :  { %18296 = vmatpush3.bf16.msra.mxu1 %v21627_v56 }
0x2114   :  { %18297 = vmatprep.subr.bf16.mxu1 %v21628_v57 }
0x2117   :  { %18298 = vmatpush3.bf16.msra.mxu1 %v21628_v57 }
0x2118   :  { %18299 = vmatprep.subr.bf16.mxu1 %v21629_v55 }
0x211b   :  { %18300 = vmatpush3.bf16.msra.mxu1 %v21629_v55 }
0x211c   :  { %18301 = vmatprep.subr.bf16.mxu1 %v21630_v40 }
0x211f   :  { %18302 = vmatpush3.bf16.msra.mxu1 %v21630_v40 }
0x2120   :  { %18303 = vmatprep.subr.bf16.mxu1 %v21631_v63 }
0x2123   :  { %18304 = vmatpush3.bf16.msra.mxu1 %v21631_v63 }
0x2124   :  { %18305 = vmatprep.subr.bf16.mxu1 %v21632_v0 }
0x2127   :  { %18306 = vmatpush3.bf16.msra.mxu1 %v21632_v0 }
0x2128   :  { %18311 = vmatprep.subr.bf16.mxu1 %v21633_v5 }
0x212a   :  { %18308 = vmatmul.mubr.bf16.vlgmr.msra.gmra.mrb[60].mxu1 %v5707_v6  ;;  %v21652_v6 = vld [vmem:[#allocation5 + $0x758] sm:$0xff]  }
0x212b   :  { %18312 = vmatpush3.bf16.msra.mxu1 %v21633_v5  ;;  %18327 = vmatprep.mubr.bf16.mxu1 %v5830_v15  ;;  %v21654_v15 = vld [vmem:[#allocation5 + $0x768] sm:$0xff]  }
0x212c   :  { %18313 = vmatprep.subr.bf16.mxu1 %v21634_v36 }
0x212f   :  { %18314 = vmatpush3.bf16.msra.mxu1 %v21634_v36  ;;  %v21653_v36 = vld [vmem:[#allocation5 + $0x760] sm:$0xff]  }
0x2130   :  { %18315 = vmatprep.subr.bf16.mxu1 %v21635_v10 }
0x2133   :  { %18316 = vmatpush3.bf16.msra.mxu1 %v21635_v10  ;;  %v21655_v10 = vld [vmem:[#allocation5 + $0x770] sm:$0xff]  }
0x2134   :  { %18317 = vmatprep.subr.bf16.mxu1 %v21636_v16 }
0x2137   :  { %18318 = vmatpush3.bf16.msra.mxu1 %v21636_v16  ;;  %v21656_v16 = vld [vmem:[#allocation5 + $0x778] sm:$0xff]  }
0x2138   :  { %18319 = vmatprep.subr.bf16.mxu1 %v21637_v17 }
0x213b   :  { %18320 = vmatpush3.bf16.msra.mxu1 %v21637_v17  ;;  %v21657_v17 = vld [vmem:[#allocation5 + $0x700] sm:$0xff]  }
0x213c   :  { %18321 = vmatprep.subr.bf16.mxu1 %v21638_v18 }
0x213f   :  { %18322 = vmatpush3.bf16.msra.mxu1 %v21638_v18 }
0x2140   :  { %18323 = vmatprep.subr.bf16.mxu1 %v21639_v20 }
0x2143   :  { %18324 = vmatpush3.bf16.msra.mxu1 %v21639_v20 }
0x2144   :  { %18325 = vmatprep.subr.bf16.mxu1 %v21640_v21 }
0x2147   :  { %18326 = vmatpush3.bf16.msra.mxu1 %v21640_v21 }
0x2148   :  { %18331 = vmatprep.subr.bf16.mxu1 %v21641_v22 }
0x214a   :  { %18328 = vmatmul.mubr.bf16.vlgmr.msra.gmra.mrb[60].mxu1 %v5831_v24 }
0x214b   :  { %18332 = vmatpush3.bf16.msra.mxu1 %v21641_v22  ;;  %18347 = vmatprep.mubr.bf16.mxu1 %v5954_v62 }
0x214c   :  { %18333 = vmatprep.subr.bf16.mxu1 %v21642_v60 }
0x214f   :  { %18334 = vmatpush3.bf16.msra.mxu1 %v21642_v60 }
0x2150   :  { %18335 = vmatprep.subr.bf16.mxu1 %v21643_v59 }
0x2153   :  { %18336 = vmatpush3.bf16.msra.mxu1 %v21643_v59 }
0x2154   :  { %18337 = vmatprep.subr.bf16.mxu1 %v21644_v61 }
0x2157   :  { %18338 = vmatpush3.bf16.msra.mxu1 %v21644_v61 }
0x2158   :  { %18339 = vmatprep.subr.bf16.mxu1 %v21645_v25 }
0x215b   :  { %18340 = vmatpush3.bf16.msra.mxu1 %v21645_v25 }
0x215c   :  { %18341 = vmatprep.subr.bf16.mxu1 %v21646_v29 }
0x215f   :  { %18342 = vmatpush3.bf16.msra.mxu1 %v21646_v29 }
0x2160   :  { %18343 = vmatprep.subr.bf16.mxu1 %v21647_v35 }
0x2163   :  { %18344 = vmatpush3.bf16.msra.mxu1 %v21647_v35  ;;  %v6272_v35 = vld [vmem:[#allocation10 + $0xb] sm:$0x1] }
0x2164   :  { %18345 = vmatprep.subr.bf16.mxu1 %v21648_v13 }
0x2167   :  { %18346 = vmatpush3.bf16.msra.mxu1 %v21648_v13 }
0x216a   :  { %18348 = vmatmul.mubr.bf16.vlgmr.msra.gmra.mrb[60].mxu1 %v5955_v42 }
0x223d   :  { %v23099_v11 = vpop.f32.mrb[60].mxu1 }
0x223e   :  { %v23101_v14 = vpop.f32.mrb[61].mxu1 }
0x223f   :  { %v23103_v43 = vpop.f32.mrb[62].mxu1  ;;  %18383 = vmatprep.mubr.f32.mxu0 %v23101_v14 }
0x2240   :  { %v23106_v44 = vpop.f32.mrb[63].mxu1 }
0x2241   :  { %18384 = vmatmul.mubr.f32.vlgmr.msra.gmra.mrb[72].mxu0 %v23106_v44 }
0x2242   :  { %18386 = vmatprep.mubr.f32.mxu0 %v23099_v11  ;;  %20586 = vmatpush3.bf16.msra.mxu0 %v22363_v9 }
0x2243   :  { %20588 = vmatprep.subr.bf16.mxu0 %v22365_v12 }
0x2245   :  { %18387 = vmatmul.mubr.f32.gmra.mrb[74].mxu0 %v23103_v43 }
0x2246   :  { %20590 = vmatpush3.bf16.msra.mxu0 %v22365_v12 }
0x2247   :  { %20592 = vmatprep.subr.bf16.mxu0 %v22370_v19 }
0x224a   :  { %20594 = vmatpush3.bf16.msra.mxu0 %v22370_v19 }
0x224b   :  { %20596 = vmatprep.subr.bf16.mxu0 %v22374_v23 }
0x224e   :  { %20598 = vmatpush3.bf16.msra.mxu0 %v22374_v23 }
0x224f   :  { %20600 = vmatprep.subr.bf16.mxu0 %v22378_v27 }
0x2252   :  { %20602 = vmatpush3.bf16.msra.mxu0 %v22378_v27 }
0x2253   :  { %20604 = vmatprep.subr.bf16.mxu0 %v22388_v32 }
0x2256   :  { %20606 = vmatpush3.bf16.msra.mxu0 %v22388_v32 }
0x2257   :  { %20608 = vmatprep.subr.bf16.mxu0 %v22392_v34 }
0x225a   :  { %20610 = vmatpush3.bf16.msra.mxu0 %v22392_v34 }
0x225b   :  { %20612 = vmatprep.subr.bf16.mxu0 %v22411_v37 }
0x225e   :  { %20614 = vmatpush3.bf16.msra.mxu0 %v22411_v37 }
0x225f   :  { %18427 = vmatprep.subr.bf16.mxu0 %v21649_v8 }
0x2314   :  { %v18385_v45 = vpop.f32.mrb[72].mxu0 }
0x2315   :  { %v6140_v46 = vpop.f32.mrb[73].mxu0 }
0x2316   :  { %v6159_v47 = vadd.f32 %v18385_v45, %v6140_v46 }
0x2318   :  { %v18388_v48 = vpop.f32.mrb[74].mxu0 }
0x2319   :  { %v6150_v2 = vpop.f32.mrb[75].mxu0 }
0x231a   :  { %v6160_v4 = vadd.f32 %v6159_v47, %v6150_v2 }
0x231c   :  { %v6161_v49 = vadd.f32 %v18388_v48, %v6160_v4 }
0x231e   :  { %v6162_v1 = vrot.slane %v6161_v49, 4 }
0x2320   :  { %v6163_v3 = vadd.f32 %v6162_v1, %v6161_v49 }
0x2322   :  { %v6164_v50 = vrot.slane %v6163_v3, 2 }
0x2324   :  { %v6165_v51 = vadd.f32 %v6164_v50, %v6163_v3 }
0x2326   :  { %v6166_v52 = vrot.slane %v6165_v51, 1 }
0x2328   :  { %v6167_v53 = vadd.f32 %v6166_v52, %v6165_v51 }
0x232a   :  { %v6168_v54 = vmul.f32 0.001953125, %v6167_v53 }
0x232c   :  { %v6169_v56 = vsub.f32 %v23101_v14, %v6168_v54  ;;  %v6170_v57 = vsub.f32 %v23106_v44, %v6168_v54  ;;  %v6171_v55 = vsub.f32 %v23099_v11, %v6168_v54  ;;  %v6172_v0 = vsub.f32 %v23103_v43, %v6168_v54 }
0x232e   :  { %v6173_v40 = vmul.f32 %v6169_v56, %v6169_v56  ;;  %v6174_v63 = vmul.f32 %v6170_v57, %v6170_v57  ;;  %v6175_v5 = vmul.f32 %v6171_v55, %v6171_v55  ;;  %v6176_v28 = vmul.f32 %v6172_v0, %v6172_v0  ;;  %v21658_v57 = vld [vmem:[#allocation5 + $0x708] sm:$0xff]   ;;  %v21661_v0 = vld [vmem:[#allocation5 + $0x720] sm:$0xff]  }
0x2330   :  { %18421 = vmatprep.mubr.f32.mxu0 %v6173_v40 }
0x2331   :  { %18422 = vmatmul.mubr.f32.vlgmr.msra.gmra.mrb[76].mxu0 %v6174_v63  ;;  %v21660_v63 = vld [vmem:[#allocation5 + $0x718] sm:$0xff]  }
0x2332   :  { %18424 = vmatprep.mubr.f32.mxu0 %v6175_v5  ;;  %18428 = vmatpush3.bf16.msra.mxu0 %v21649_v8  ;;  %v21662_v5 = vld [vmem:[#allocation5 + $0x728] sm:$0xff]   ;;  %v21664_v8 = vld [vmem:[#allocation5 + $0x738] sm:$0xff]  }
0x2333   :  { %18429 = vmatprep.subr.bf16.mxu0 %v21650_v26 }
0x2335   :  { %18425 = vmatmul.mubr.f32.gmra.mrb[78].mxu0 %v6176_v28  ;;  %v21663_v28 = vld [vmem:[#allocation5 + $0x730] sm:$0xff]  }
0x2336   :  { %18430 = vmatpush3.bf16.msra.mxu0 %v21650_v26  ;;  %v21665_v26 = vld [vmem:[#allocation5 + $0x780] sm:$0xff]  }
0x2337   :  { %18431 = vmatprep.subr.bf16.mxu0 %v21651_v7 }
0x233a   :  { %18432 = vmatpush3.bf16.msra.mxu0 %v21651_v7 }
0x233b   :  { %18433 = vmatprep.subr.bf16.mxu0 %v21652_v6 }
0x233e   :  { %18434 = vmatpush3.bf16.msra.mxu0 %v21652_v6 }
0x233f   :  { %18435 = vmatprep.subr.bf16.mxu0 %v21653_v36 }
0x2342   :  { %18436 = vmatpush3.bf16.msra.mxu0 %v21653_v36 }
0x2343   :  { %18437 = vmatprep.subr.bf16.mxu0 %v21654_v15 }
0x2346   :  { %18438 = vmatpush3.bf16.msra.mxu0 %v21654_v15 }
0x2347   :  { %18439 = vmatprep.subr.bf16.mxu0 %v21655_v10 }
0x234a   :  { %18440 = vmatpush3.bf16.msra.mxu0 %v21655_v10 }
0x234b   :  { %18441 = vmatprep.subr.bf16.mxu0 %v21656_v16 }
0x234e   :  { %18442 = vmatpush3.bf16.msra.mxu0 %v21656_v16  ;;  %v21666_v16 = vld [vmem:[#allocation5 + $0x788] sm:$0xff]  }
0x234f   :  { %18447 = vmatprep.subr.bf16.mxu0 %v21657_v17 }
0x2404   :  { %v18423_v18 = vpop.f32.mrb[76].mxu0 }
0x2405   :  { %v6243_v20 = vpop.f32.mrb[77].mxu0 }
0x2406   :  { %v6262_v21 = vadd.f32 %v18423_v18, %v6243_v20  ;;  %v21667_v18 = vld [vmem:[#allocation5 + $0x790] sm:$0xff]   ;;  %v21668_v20 = vld [vmem:[#allocation5 + $0x798] sm:$0xff]  }
0x2408   :  { %v18426_v22 = vpop.f32.mrb[78].mxu0 }
0x2409   :  { %v6253_v39 = vpop.f32.mrb[79].mxu0 }
0x240a   :  { %v6263_v38 = vadd.f32 %v6262_v21, %v6253_v39  ;;  %v21669_v21 = vld [vmem:[#allocation5 + $0x7a0] sm:$0xff]   ;;  %v21671_v39 = vld [vmem:[#allocation5 + $0x7b0] sm:$0xff]  }
0x240c   :  { %v6264_v58 = vadd.f32 %v18426_v22, %v6263_v38  ;;  %v21670_v22 = vld [vmem:[#allocation5 + $0x7a8] sm:$0xff]   ;;  %v21672_v38 = vld [vmem:[#allocation5 + $0x7b8] sm:$0xff]  }
0x240e   :  { %v6265_v41 = vrot.slane %v6264_v58, 4 }
0x2410   :  { %v6266_v24 = vadd.f32 %v6265_v41, %v6264_v58 }
0x2412   :  { %v6267_v60 = vrot.slane %v6266_v24, 2 }
0x2414   :  { %v6268_v62 = vadd.f32 %v6267_v60, %v6266_v24 }
0x2416   :  { %v6269_v59 = vrot.slane %v6268_v62, 1 }
0x2418   :  { %v6270_v61 = vadd.f32 %v6269_v59, %v6268_v62 }
0x241a   :  { %v6271_v25 = vmul.f32 0.001953125, %v6270_v61 }
0x241c   :  { %v6273_v29 = vadd.f32 1e-05, %v6271_v25 }
0x241e   :  { %22079 = vrsqrt.f32 %v6273_v29 }
0x2428   :  { %v22080_v13 = vpop.eup %22079 }
0x2429   :  { %v6275_v30 = vmul.f32 %v22080_v13, %v6272_v35 }
0x242b   :  { %v6277_v42 = vmul.f32 %v6275_v30, %v6168_v54  ;;  %v6282_v45 = vrot.slane %v6275_v30, %v22456_v33 }
0x242d   :  { %v6278_v46 = vsub.f32 %v6276_v31, %v6277_v42  ;;  %v6283_v47 = vmul.f32 %v6282_v45, %v23101_v14  ;;  %v6284_v48 = vmul.f32 %v6282_v45, %v23106_v44  ;;  %v6285_v2 = vmul.f32 %v23099_v11, %v6282_v45  ;;  %v21659_v11 = vld [vmem:[#allocation5 + $0x710] sm:$0xff]  }
0x242e   :  { %v6286_v4 = vmul.f32 %v23103_v43, %v6282_v45 }
0x242f   :  { %v6290_v49 = vrot.slane %v6278_v46, %v22456_v33 }
0x2431   :  { %v6291_v1 = vadd.f32 %v6290_v49, %v6283_v47  ;;  %v6292_v3 = vadd.f32 %v6290_v49, %v6284_v48  ;;  %v6293_v50 = vadd.f32 %v6290_v49, %v6285_v2  ;;  %v6294_v51 = vadd.f32 %v6290_v49, %v6286_v4 }
0x2433   :  { %v6295_v52 = vmax.f32 %v6291_v1, 0.0  ;;  %v6296_v53 = vmax.f32 %v6292_v3, 0.0  ;;  %v6297_v54 = vmax.f32 %v6293_v50, 0.0  ;;  %v6298_v56 = vmax.f32 %v6294_v51, 0.0 }
0x2435   :  { %6299 = vst [vmem:[#allocation3 + $0x10] sm:$0xff] %v6295_v52  ;;  %6300 = vst [vmem:[#allocation3 + $0x18] sm:$0xff] %v6296_v53  ;;  %v6330_v14 = vpack.c.bf16 %v6296_v53, %v6295_v52  ;;  %v6331_v44 = vpack.c.bf16 %v6298_v56, %v6297_v54 }
0x2436   :  { %6301 = vst [vmem:[#allocation3 + $0x40] sm:$0xff] %v6297_v54  ;;  %6302 = vst [vmem:[#allocation3 + $0x48] sm:$0xff] %v6298_v56 }
0x2437   :  { %18443 = vmatprep.mubr.bf16.mxu0 %v6330_v14  ;;  %v21673_v14 = vld [vmem:[#allocation5 + $0x7c0] sm:$0xff]  }
0x2438   :  { %18444 = vmatmul.mubr.bf16.vlgmr.msra.gmra.mrb[80].mxu0 %v6331_v44  ;;  %v21674_v44 = vld [vmem:[#allocation5 + $0x7c8] sm:$0xff]   ;;  %18563 = vmatprep.subr.bf16.mxu1 %v21673_v14 }
0x2439   :  { %18448 = vmatpush3.bf16.msra.mxu0 %v21657_v17  ;;  %18564 = vmatpush3.bf16.msra.mxu1 %v21673_v14 }
0x243a   :  { %18449 = vmatprep.subr.bf16.mxu0 %v21658_v57  ;;  %18565 = vmatprep.subr.bf16.mxu1 %v21674_v44 }
0x243c   :  { %v6303_v43 = vld [vmem:[#allocation3 + $0x9] sm:$0xff]  ;;  %v6304_v55 = vld [vmem:[#allocation3 + $0x11] sm:$0xff]  ;;  %v6544_v15 = vld [vmem:[#allocation3 + $0x1f] sm:$0xff] }
0x243d   :  { %v6307_v40 = vpack.c.bf16 %v6304_v55, %v6303_v43  ;;  %18450 = vmatpush3.bf16.msra.mxu0 %v21658_v57  ;;  %v6305_v7 = vld [vmem:[#allocation3 + $0x39] sm:$0xff]  ;;  %v6306_v6 = vld [vmem:[#allocation3 + $0x41] sm:$0xff]  ;;  %v6546_v41 = vld [vmem:[#allocation3 + $0x4f] sm:$0xff]  ;;  %18566 = vmatpush3.bf16.msra.mxu1 %v21674_v44 }
0x243e   :  { %18451 = vmatprep.subr.bf16.mxu0 %v21659_v11  ;;  %v6543_v36 = vld [vmem:[#allocation3 + $0x17] sm:$0xff]  ;;  %v6308_v10 = vpack.c.bf16 %v6306_v6, %v6305_v7  ;;  %v6545_v58 = vld [vmem:[#allocation3 + $0x47] sm:$0xff] }
0x243f   :  { %18463 = vmatprep.mubr.bf16.mxu0 %v6307_v40  ;;  %v6547_v17 = vpack.c.bf16 %v6544_v15, %v6543_v36  ;;  %v6548_v24 = vpack.c.bf16 %v6546_v41, %v6545_v58  ;;  %v21675_v57 = vld [vmem:[#allocation5 + $0x7d0] sm:$0xff]   ;;  %v21677_v43 = vld [vmem:[#allocation5 + $0x7e0] sm:$0xff]   ;;  %v21678_v55 = vld [vmem:[#allocation5 + $0x7e8] sm:$0xff]  }
0x2440   :  { %18567 = vmatprep.subr.bf16.mxu1 %v21675_v57  ;;  %v21679_v40 = vld [vmem:[#allocation5 + $0x7f0] sm:$0xff]   ;;  %v6869_v58 = vld [vmem:[#allocation12 + $0xc] sm:$0x1] }
0x2441   :  { %18452 = vmatpush3.bf16.msra.mxu0 %v21659_v11  ;;  %v21676_v11 = vld [vmem:[#allocation5 + $0x7d8] sm:$0xff]   ;;  %18568 = vmatpush3.bf16.msra.mxu1 %v21675_v57 }
0x2442   :  { %18453 = vmatprep.subr.bf16.mxu0 %v21660_v63  ;;  %18569 = vmatprep.subr.bf16.mxu1 %v21676_v11 }
0x2445   :  { %18454 = vmatpush3.bf16.msra.mxu0 %v21660_v63  ;;  %18570 = vmatpush3.bf16.msra.mxu1 %v21676_v11  ;;  %v21680_v63 = vld [vmem:[#allocation5 + $0x7f8] sm:$0xff]  }
0x2446   :  { %18455 = vmatprep.subr.bf16.mxu0 %v21661_v0  ;;  %18571 = vmatprep.subr.bf16.mxu1 %v21677_v43 }
0x2449   :  { %18456 = vmatpush3.bf16.msra.mxu0 %v21661_v0  ;;  %18572 = vmatpush3.bf16.msra.mxu1 %v21677_v43 }
0x244a   :  { %18457 = vmatprep.subr.bf16.mxu0 %v21662_v5  ;;  %18573 = vmatprep.subr.bf16.mxu1 %v21678_v55 }
0x244d   :  { %18458 = vmatpush3.bf16.msra.mxu0 %v21662_v5  ;;  %18574 = vmatpush3.bf16.msra.mxu1 %v21678_v55 }
0x244e   :  { %18459 = vmatprep.subr.bf16.mxu0 %v21663_v28  ;;  %18575 = vmatprep.subr.bf16.mxu1 %v21679_v40 }
0x2451   :  { %18460 = vmatpush3.bf16.msra.mxu0 %v21663_v28  ;;  %18576 = vmatpush3.bf16.msra.mxu1 %v21679_v40 }
0x2452   :  { %18461 = vmatprep.subr.bf16.mxu0 %v21664_v8  ;;  %18577 = vmatprep.subr.bf16.mxu1 %v21680_v63 }
0x2455   :  { %18462 = vmatpush3.bf16.msra.mxu0 %v21664_v8  ;;  %18578 = vmatpush3.bf16.msra.mxu1 %v21680_v63 }
0x2456   :  { %18467 = vmatprep.subr.bf16.mxu0 %v21665_v26  ;;  %20712 = vmatprep.subr.bf16.mxu1 %v22363_v9 }
0x2458   :  { %18464 = vmatmul.mubr.bf16.vlgmr.msra.gmra.mrb[80].mxu0 %v6308_v10 }
0x2459   :  { %18468 = vmatpush3.bf16.msra.mxu0 %v21665_v26  ;;  %18483 = vmatprep.mubr.bf16.mxu0 %v6547_v17 }
0x245a   :  { %18469 = vmatprep.subr.bf16.mxu0 %v21666_v16 }
0x245d   :  { %18470 = vmatpush3.bf16.msra.mxu0 %v21666_v16 }
0x245e   :  { %18471 = vmatprep.subr.bf16.mxu0 %v21667_v18 }
0x2461   :  { %18472 = vmatpush3.bf16.msra.mxu0 %v21667_v18 }
0x2462   :  { %18473 = vmatprep.subr.bf16.mxu0 %v21668_v20 }
0x2465   :  { %18474 = vmatpush3.bf16.msra.mxu0 %v21668_v20 }
0x2466   :  { %18475 = vmatprep.subr.bf16.mxu0 %v21669_v21 }
0x2469   :  { %18476 = vmatpush3.bf16.msra.mxu0 %v21669_v21 }
0x246a   :  { %18477 = vmatprep.subr.bf16.mxu0 %v21670_v22 }
0x246d   :  { %18478 = vmatpush3.bf16.msra.mxu0 %v21670_v22  ;;  %v6865_v22 = vld [vmem:[#allocation10 + $0xc] sm:$0x1] }
0x246e   :  { %18479 = vmatprep.subr.bf16.mxu0 %v21671_v39 }
0x2471   :  { %18480 = vmatpush3.bf16.msra.mxu0 %v21671_v39 }
0x2472   :  { %18481 = vmatprep.subr.bf16.mxu0 %v21672_v38 }
0x2475   :  { %18482 = vmatpush3.bf16.msra.mxu0 %v21672_v38 }
0x2476   :  { %20616 = vmatprep.subr.bf16.mxu0 %v22363_v9 }
0x2478   :  { %18484 = vmatmul.mubr.bf16.vlgmr.msra.gmra.mrb[80].mxu0 %v6548_v24 }
0x2479   :  { %20618 = vmatpush3.bf16.msra.mxu0 %v22363_v9 }
0x247a   :  { %20620 = vmatprep.subr.bf16.mxu0 %v22365_v12 }
0x247d   :  { %20622 = vmatpush3.bf16.msra.mxu0 %v22365_v12 }
0x247e   :  { %20624 = vmatprep.subr.bf16.mxu0 %v22370_v19 }
0x2481   :  { %20626 = vmatpush3.bf16.msra.mxu0 %v22370_v19 }
0x2482   :  { %20628 = vmatprep.subr.bf16.mxu0 %v22374_v23 }
0x2485   :  { %20630 = vmatpush3.bf16.msra.mxu0 %v22374_v23 }
0x2486   :  { %20632 = vmatprep.subr.bf16.mxu0 %v22378_v27 }
0x2489   :  { %20634 = vmatpush3.bf16.msra.mxu0 %v22378_v27 }
0x248a   :  { %20636 = vmatprep.subr.bf16.mxu0 %v22388_v32 }
0x248d   :  { %20638 = vmatpush3.bf16.msra.mxu0 %v22388_v32 }
0x248e   :  { %20640 = vmatprep.subr.bf16.mxu0 %v22392_v34 }
0x2491   :  { %20642 = vmatpush3.bf16.msra.mxu0 %v22392_v34 }
0x2492   :  { %20644 = vmatprep.subr.bf16.mxu0 %v22411_v37 }
0x2495   :  { %20646 = vmatpush3.bf16.msra.mxu0 %v22411_v37 }
0x2496   :  { %20648 = vmatprep.subr.bf16.mxu0 %v22363_v9 }
0x254b   :  { %v23153_v60 = vpop.f32.mrb[80].mxu0 }
0x254c   :  { %v23155_v62 = vpop.f32.mrb[81].mxu0 }
0x254d   :  { %v23157_v59 = vpop.f32.mrb[82].mxu0  ;;  %18519 = vmatprep.mubr.f32.mxu0 %v23155_v62 }
0x254e   :  { %v23160_v61 = vpop.f32.mrb[83].mxu0 }
0x254f   :  { %18520 = vmatmul.mubr.f32.vlgmr.msra.gmra.mrb[84].mxu0 %v23160_v61 }
0x2550   :  { %18522 = vmatprep.mubr.f32.mxu0 %v23153_v60  ;;  %20650 = vmatpush3.bf16.msra.mxu0 %v22363_v9 }
0x2551   :  { %20652 = vmatprep.subr.bf16.mxu0 %v22365_v12 }
0x2553   :  { %18523 = vmatmul.mubr.f32.gmra.mrb[86].mxu0 %v23157_v59 }
0x2554   :  { %20654 = vmatpush3.bf16.msra.mxu0 %v22365_v12 }
0x2555   :  { %20656 = vmatprep.subr.bf16.mxu0 %v22370_v19 }
0x2558   :  { %20658 = vmatpush3.bf16.msra.mxu0 %v22370_v19 }
0x2559   :  { %20660 = vmatprep.subr.bf16.mxu0 %v22374_v23 }
0x255c   :  { %20662 = vmatpush3.bf16.msra.mxu0 %v22374_v23 }
0x255d   :  { %20664 = vmatprep.subr.bf16.mxu0 %v22378_v27 }
0x2560   :  { %20666 = vmatpush3.bf16.msra.mxu0 %v22378_v27 }
0x2561   :  { %20668 = vmatprep.subr.bf16.mxu0 %v22388_v32 }
0x2564   :  { %20670 = vmatpush3.bf16.msra.mxu0 %v22388_v32 }
0x2565   :  { %20672 = vmatprep.subr.bf16.mxu0 %v22392_v34 }
0x2568   :  { %20674 = vmatpush3.bf16.msra.mxu0 %v22392_v34 }
0x2569   :  { %20676 = vmatprep.subr.bf16.mxu0 %v22411_v37 }
0x256c   :  { %20678 = vmatpush3.bf16.msra.mxu0 %v22411_v37 }
0x256d   :  { %20680 = vmatprep.subr.bf16.mxu0 %v22363_v9 }
0x2622   :  { %v18521_v25 = vpop.f32.mrb[84].mxu0 }
0x2623   :  { %v6733_v29 = vpop.f32.mrb[85].mxu0 }
0x2624   :  { %v6752_v35 = vadd.f32 %v18521_v25, %v6733_v29 }
0x2626   :  { %v18524_v13 = vpop.f32.mrb[86].mxu0 }
0x2627   :  { %v6743_v30 = vpop.f32.mrb[87].mxu0 }
0x2628   :  { %v6753_v31 = vadd.f32 %v6752_v35, %v6743_v30 }
0x262a   :  { %v6754_v42 = vadd.f32 %v18524_v13, %v6753_v31 }
0x262c   :  { %v6755_v45 = vrot.slane %v6754_v42, 4 }
0x262e   :  { %v6756_v46 = vadd.f32 %v6755_v45, %v6754_v42 }
0x2630   :  { %v6757_v47 = vrot.slane %v6756_v46, 2 }
0x2632   :  { %v6758_v48 = vadd.f32 %v6757_v47, %v6756_v46 }
0x2634   :  { %v6759_v2 = vrot.slane %v6758_v48, 1 }
0x2636   :  { %v6760_v4 = vadd.f32 %v6759_v2, %v6758_v48 }
0x2638   :  { %v23181_v49 = vmul.f32 0.001953125, %v6760_v4 }
0x263a   :  { %v6762_v1 = vsub.f32 %v23155_v62, %v23181_v49  ;;  %v6763_v3 = vsub.f32 %v23160_v61, %v23181_v49  ;;  %v6764_v50 = vsub.f32 %v23153_v60, %v23181_v49  ;;  %v6765_v53 = vsub.f32 %v23157_v59, %v23181_v49 }
0x263c   :  { %v6766_v51 = vmul.f32 %v6762_v1, %v6762_v1  ;;  %v6767_v52 = vmul.f32 %v6763_v3, %v6763_v3  ;;  %v6768_v54 = vmul.f32 %v6764_v50, %v6764_v50  ;;  %v6769_v56 = vmul.f32 %v6765_v53, %v6765_v53  ;;  %v22115_v1 = vld [vmem:[%s23950_s0 + $0x10] sm:$0xff]  ;;  %v22116_v50 = vld [vmem:[%s23950_s0 + $0x18] sm:$0xff] }
0x263e   :  { %18557 = vmatprep.mubr.f32.mxu0 %v6766_v51 }
0x263f   :  { %18558 = vmatmul.mubr.f32.vlgmr.msra.gmra.mrb[88].mxu0 %v6767_v52 }
0x2640   :  { %18560 = vmatprep.mubr.f32.mxu0 %v6768_v54  ;;  %20682 = vmatpush3.bf16.msra.mxu0 %v22363_v9 }
0x2641   :  { %20684 = vmatprep.subr.bf16.mxu0 %v22365_v12 }
0x2643   :  { %18561 = vmatmul.mubr.f32.gmra.mrb[90].mxu0 %v6769_v56 }
0x2644   :  { %20686 = vmatpush3.bf16.msra.mxu0 %v22365_v12 }
0x2645   :  { %20688 = vmatprep.subr.bf16.mxu0 %v22370_v19 }
0x2648   :  { %20690 = vmatpush3.bf16.msra.mxu0 %v22370_v19 }
0x2649   :  { %20692 = vmatprep.subr.bf16.mxu0 %v22374_v23 }
0x264c   :  { %20694 = vmatpush3.bf16.msra.mxu0 %v22374_v23 }
0x264d   :  { %20696 = vmatprep.subr.bf16.mxu0 %v22378_v27 }
0x2650   :  { %20698 = vmatpush3.bf16.msra.mxu0 %v22378_v27 }
0x2651   :  { %20700 = vmatprep.subr.bf16.mxu0 %v22388_v32 }
0x2654   :  { %20702 = vmatpush3.bf16.msra.mxu0 %v22388_v32 }
0x2655   :  { %20704 = vmatprep.subr.bf16.mxu0 %v22392_v34 }
0x2658   :  { %20706 = vmatpush3.bf16.msra.mxu0 %v22392_v34 }
0x2659   :  { %20708 = vmatprep.subr.bf16.mxu0 %v22411_v37 }
0x265c   :  { %20710 = vmatpush3.bf16.msra.mxu0 %v22411_v37 }
0x2712   :  { %v18559_v0 = vpop.f32.mrb[88].mxu0 }
0x2713   :  { %v6836_v5 = vpop.f32.mrb[89].mxu0 }
0x2714   :  { %v6855_v28 = vadd.f32 %v18559_v0, %v6836_v5 }
0x2716   :  { %v18562_v8 = vpop.f32.mrb[90].mxu0 }
0x2717   :  { %v6846_v26 = vpop.f32.mrb[91].mxu0 }
0x2718   :  { %v6856_v7 = vadd.f32 %v6855_v28, %v6846_v26 }
0x271a   :  { %v6857_v6 = vadd.f32 %v18562_v8, %v6856_v7 }
0x271c   :  { %v6858_v36 = vrot.slane %v6857_v6, 4 }
0x271e   :  { %v6859_v15 = vadd.f32 %v6858_v36, %v6857_v6 }
0x2720   :  { %v6860_v10 = vrot.slane %v6859_v15, 2 }
0x2722   :  { %v6861_v16 = vadd.f32 %v6860_v10, %v6859_v15 }
0x2724   :  { %v6862_v17 = vrot.slane %v6861_v16, 1 }
0x2726   :  { %v6863_v18 = vadd.f32 %v6862_v17, %v6861_v16 }
0x2728   :  { %v6864_v20 = vmul.f32 0.001953125, %v6863_v18 }
0x272a   :  { %v6866_v21 = vadd.f32 1e-05, %v6864_v20 }
0x272c   :  { %22081 = vrsqrt.f32 %v6866_v21 }
0x2736   :  { %v22082_v39 = vpop.eup %22081 }
0x2737   :  { %v6868_v38 = vmul.f32 %v22082_v39, %v6865_v22  ;;  %v21681_v39 = vld [vmem:[#allocation5 + $0x800] sm:$0xff]  }
0x2738   :  { %18659 = vmatprep.subr.bf16.mxu0 %v21681_v39 }
0x2739   :  { %v6870_v41 = vmul.f32 %v6868_v38, %v23181_v49  ;;  %v6875_v24 = vrot.slane %v6868_v38, %v22456_v33  ;;  %v21682_v38 = vld [vmem:[#allocation5 + $0x808] sm:$0xff]  }
0x273b   :  { %v6871_v25 = vsub.f32 %v6869_v58, %v6870_v41  ;;  %v6876_v29 = vmul.f32 %v6875_v24, %v23155_v62  ;;  %v6877_v35 = vmul.f32 %v6875_v24, %v23160_v61  ;;  %v6878_v13 = vmul.f32 %v23153_v60, %v6875_v24  ;;  %v22113_v62 = vld [vmem:[%s23950_s0] sm:$0xff]  ;;  %v22114_v60 = vld [vmem:[%s23950_s0 + $0x8] sm:$0xff]  ;;  %v21683_v58 = vld [vmem:[#allocation5 + $0x810] sm:$0xff]  }
0x273c   :  { %v6879_v30 = vmul.f32 %v23157_v59, %v6875_v24  ;;  %v21684_v41 = vld [vmem:[#allocation5 + $0x818] sm:$0xff]   ;;  %v21685_v24 = vld [vmem:[#allocation5 + $0x820] sm:$0xff]  }
0x273d   :  { %v6883_v31 = vrot.slane %v6871_v25, %v22456_v33  ;;  %v21686_v25 = vld [vmem:[#allocation5 + $0x828] sm:$0xff]  }
0x273f   :  { %v6884_v42 = vadd.f32 %v6883_v31, %v6876_v29  ;;  %v6885_v45 = vadd.f32 %v6883_v31, %v6877_v35  ;;  %v6886_v46 = vadd.f32 %v6883_v31, %v6878_v13  ;;  %v6887_v47 = vadd.f32 %v6883_v31, %v6879_v30  ;;  %v21687_v29 = vld [vmem:[#allocation5 + $0x830] sm:$0xff]   ;;  %v21688_v35 = vld [vmem:[#allocation5 + $0x838] sm:$0xff]  }
0x2741   :  { %v6888_v48 = vmax.f32 %v6884_v42, 0.0  ;;  %v6889_v2 = vmax.f32 %v6885_v45, 0.0  ;;  %v6890_v4 = vmax.f32 %v6886_v46, 0.0  ;;  %v6891_v49 = vmax.f32 %v6887_v47, 0.0 }
0x2743   :  { %6892 = vst [vmem:[#allocation4 + $0x48] sm:$0xff] %v6888_v48  ;;  %6893 = vst [vmem:[#allocation4 + $0x78] sm:$0xff] %v6889_v2  ;;  %v6896_v61 = vadd.f32 %v22113_v62, %v6888_v48  ;;  %v6897_v59 = vadd.f32 %v22114_v60, %v6889_v2  ;;  %v6898_v3 = vadd.f32 %v22115_v1, %v6890_v4  ;;  %v7214_v1 = vld [vmem:[#allocation10 + $0xd] sm:$0x1] }
0x2744   :  { %6894 = vst [vmem:[#allocation4 + $0x108] sm:$0xff] %v6890_v4  ;;  %6895 = vst [vmem:[#allocation4 + $0x138] sm:$0xff] %v6891_v49  ;;  %v6899_v51 = vadd.f32 %v22116_v50, %v6891_v49 }
0x2745   :  { %v6900_v52 = vpack.c.bf16 %v6897_v59, %v6896_v61 }
0x2746   :  { %v6901_v53 = vpack.c.bf16 %v6899_v51, %v6898_v3  ;;  %v7218_v51 = vld [vmem:[#allocation12 + $0xd] sm:$0x1] }
0x2747   :  { %18579 = vmatprep.mubr.bf16.mxu1 %v6900_v52 }
0x2748   :  { %18580 = vmatmul.mubr.bf16.vlgmr.msra.gmra.mrb[64].mxu1 %v6901_v53 }
0x2749   :  { %20714 = vmatpush3.bf16.msra.mxu1 %v22363_v9 }
0x274a   :  { %20716 = vmatprep.subr.bf16.mxu1 %v22365_v12 }
0x274d   :  { %20718 = vmatpush3.bf16.msra.mxu1 %v22365_v12 }
0x274e   :  { %20720 = vmatprep.subr.bf16.mxu1 %v22370_v19 }
0x2751   :  { %20722 = vmatpush3.bf16.msra.mxu1 %v22370_v19 }
0x2752   :  { %20724 = vmatprep.subr.bf16.mxu1 %v22374_v23 }
0x2755   :  { %20726 = vmatpush3.bf16.msra.mxu1 %v22374_v23 }
0x2756   :  { %20728 = vmatprep.subr.bf16.mxu1 %v22378_v27 }
0x2759   :  { %20730 = vmatpush3.bf16.msra.mxu1 %v22378_v27 }
0x275a   :  { %20732 = vmatprep.subr.bf16.mxu1 %v22388_v32 }
0x275d   :  { %20734 = vmatpush3.bf16.msra.mxu1 %v22388_v32 }
0x275e   :  { %20736 = vmatprep.subr.bf16.mxu1 %v22392_v34 }
0x2761   :  { %20738 = vmatpush3.bf16.msra.mxu1 %v22392_v34 }
0x2762   :  { %20740 = vmatprep.subr.bf16.mxu1 %v22411_v37 }
0x2765   :  { %20742 = vmatpush3.bf16.msra.mxu1 %v22411_v37 }
0x2766   :  { %20744 = vmatprep.subr.bf16.mxu1 %v22363_v9 }
0x281b   :  { %v23242_v54 = vpop.f32.mrb[64].mxu1 }
0x281c   :  { %v23244_v56 = vpop.f32.mrb[65].mxu1 }
0x281d   :  { %v23246_v14 = vpop.f32.mrb[66].mxu1  ;;  %18615 = vmatprep.mubr.f32.mxu0 %v23244_v56 }
0x281e   :  { %v23249_v44 = vpop.f32.mrb[67].mxu1 }
0x281f   :  { %18616 = vmatmul.mubr.f32.vlgmr.msra.gmra.mrb[92].mxu0 %v23249_v44 }
0x2820   :  { %18618 = vmatprep.mubr.f32.mxu0 %v23242_v54  ;;  %18660 = vmatpush3.bf16.msra.mxu0 %v21681_v39 }
0x2821   :  { %18661 = vmatprep.subr.bf16.mxu0 %v21682_v38 }
0x2823   :  { %18619 = vmatmul.mubr.f32.gmra.mrb[94].mxu0 %v23246_v14 }
0x2824   :  { %18662 = vmatpush3.bf16.msra.mxu0 %v21682_v38 }
0x2825   :  { %18663 = vmatprep.subr.bf16.mxu0 %v21683_v58 }
0x2828   :  { %18664 = vmatpush3.bf16.msra.mxu0 %v21683_v58 }
0x2829   :  { %18665 = vmatprep.subr.bf16.mxu0 %v21684_v41 }
0x282c   :  { %18666 = vmatpush3.bf16.msra.mxu0 %v21684_v41 }
0x282d   :  { %18667 = vmatprep.subr.bf16.mxu0 %v21685_v24 }
0x2830   :  { %18668 = vmatpush3.bf16.msra.mxu0 %v21685_v24 }
0x2831   :  { %18669 = vmatprep.subr.bf16.mxu0 %v21686_v25 }
0x2834   :  { %18670 = vmatpush3.bf16.msra.mxu0 %v21686_v25 }
0x2835   :  { %18671 = vmatprep.subr.bf16.mxu0 %v21687_v29 }
0x2838   :  { %18672 = vmatpush3.bf16.msra.mxu0 %v21687_v29 }
0x2839   :  { %18673 = vmatprep.subr.bf16.mxu0 %v21688_v35 }
0x283c   :  { %18674 = vmatpush3.bf16.msra.mxu0 %v21688_v35 }
0x283d   :  { %20776 = vmatprep.subr.bf16.mxu0 %v22363_v9 }
0x28f2   :  { %v18617_v57 = vpop.f32.mrb[92].mxu0 }
0x28f3   :  { %v7082_v11 = vpop.f32.mrb[93].mxu0 }
0x28f4   :  { %v7101_v43 = vadd.f32 %v18617_v57, %v7082_v11 }
0x28f6   :  { %v18620_v55 = vpop.f32.mrb[94].mxu0 }
0x28f7   :  { %v7092_v40 = vpop.f32.mrb[95].mxu0 }
0x28f8   :  { %v7102_v63 = vadd.f32 %v7101_v43, %v7092_v40 }
0x28fa   :  { %v7103_v0 = vadd.f32 %v18620_v55, %v7102_v63 }
0x28fc   :  { %v7104_v5 = vrot.slane %v7103_v0, 4 }
0x28fe   :  { %v7105_v28 = vadd.f32 %v7104_v5, %v7103_v0 }
0x2900   :  { %v7106_v8 = vrot.slane %v7105_v28, 2 }
0x2902   :  { %v7107_v26 = vadd.f32 %v7106_v8, %v7105_v28 }
0x2904   :  { %v7108_v7 = vrot.slane %v7107_v26, 1 }
0x2906   :  { %v7109_v6 = vadd.f32 %v7108_v7, %v7107_v26 }
0x2908   :  { %v23254_v36 = vmul.f32 0.001953125, %v7109_v6 }
0x290a   :  { %v7111_v15 = vsub.f32 %v23244_v56, %v23254_v36  ;;  %v7112_v10 = vsub.f32 %v23249_v44, %v23254_v36  ;;  %v7113_v16 = vsub.f32 %v23242_v54, %v23254_v36  ;;  %v7114_v20 = vsub.f32 %v23246_v14, %v23254_v36 }
0x290c   :  { %v7115_v17 = vmul.f32 %v7111_v15, %v7111_v15  ;;  %v7116_v18 = vmul.f32 %v7112_v10, %v7112_v10  ;;  %v7117_v21 = vmul.f32 %v7113_v16, %v7113_v16  ;;  %v7118_v22 = vmul.f32 %v7114_v20, %v7114_v20 }
0x290e   :  { %18653 = vmatprep.mubr.f32.mxu1 %v7115_v17 }
0x290f   :  { %18654 = vmatmul.mubr.f32.vlgmr.msra.gmra.mrb[68].mxu1 %v7116_v18 }
0x2910   :  { %18656 = vmatprep.mubr.f32.mxu1 %v7117_v21  ;;  %20746 = vmatpush3.bf16.msra.mxu1 %v22363_v9 }
0x2911   :  { %20748 = vmatprep.subr.bf16.mxu1 %v22365_v12 }
0x2913   :  { %18657 = vmatmul.mubr.f32.gmra.mrb[70].mxu1 %v7118_v22 }
0x2914   :  { %20750 = vmatpush3.bf16.msra.mxu1 %v22365_v12 }
0x2915   :  { %20752 = vmatprep.subr.bf16.mxu1 %v22370_v19 }
0x2918   :  { %20754 = vmatpush3.bf16.msra.mxu1 %v22370_v19 }
0x2919   :  { %20756 = vmatprep.subr.bf16.mxu1 %v22374_v23 }
0x291c   :  { %20758 = vmatpush3.bf16.msra.mxu1 %v22374_v23 }
0x291d   :  { %20760 = vmatprep.subr.bf16.mxu1 %v22378_v27 }
0x2920   :  { %20762 = vmatpush3.bf16.msra.mxu1 %v22378_v27 }
0x2921   :  { %20764 = vmatprep.subr.bf16.mxu1 %v22388_v32 }
0x2924   :  { %20766 = vmatpush3.bf16.msra.mxu1 %v22388_v32 }
0x2925   :  { %20768 = vmatprep.subr.bf16.mxu1 %v22392_v34 }
0x2928   :  { %20770 = vmatpush3.bf16.msra.mxu1 %v22392_v34 }
0x2929   :  { %20772 = vmatprep.subr.bf16.mxu1 %v22411_v37 }
0x292c   :  { %20774 = vmatpush3.bf16.msra.mxu1 %v22411_v37 }
0x29e2   :  { %v18655_v13 = vpop.f32.mrb[68].mxu1 }
0x29e3   :  { %v7185_v30 = vpop.f32.mrb[69].mxu1 }
0x29e4   :  { %v7204_v31 = vadd.f32 %v18655_v13, %v7185_v30 }
0x29e6   :  { %v18658_v42 = vpop.f32.mrb[70].mxu1 }
0x29e7   :  { %v7195_v45 = vpop.f32.mrb[71].mxu1 }
0x29e8   :  { %v7205_v46 = vadd.f32 %v7204_v31, %v7195_v45 }
0x29ea   :  { %v7206_v47 = vadd.f32 %v18658_v42, %v7205_v46 }
0x29ec   :  { %v7207_v48 = vrot.slane %v7206_v47, 4 }
0x29ee   :  { %v7208_v2 = vadd.f32 %v7207_v48, %v7206_v47 }
0x29f0   :  { %v7209_v4 = vrot.slane %v7208_v2, 2 }
0x29f2   :  { %v7210_v49 = vadd.f32 %v7209_v4, %v7208_v2  ;;  %v21689_v2 = vld [vmem:[#allocation5 + $0x880] sm:$0xff]   ;;  %v21690_v4 = vld [vmem:[#allocation5 + $0x888] sm:$0xff]  }
0x29f3   :  { %18755 = vmatprep.subr.bf16.mxu1 %v21689_v2 }
0x29f4   :  { %v7211_v62 = vrot.slane %v7210_v49, 1 }
0x29f6   :  { %v7212_v61 = vadd.f32 %v7211_v62, %v7210_v49  ;;  %v21691_v49 = vld [vmem:[#allocation5 + $0x890] sm:$0xff]   ;;  %v21692_v62 = vld [vmem:[#allocation5 + $0x898] sm:$0xff]  }
0x29f8   :  { %v7213_v60 = vmul.f32 0.001953125, %v7212_v61  ;;  %v21693_v61 = vld [vmem:[#allocation5 + $0x8a0] sm:$0xff]  }
0x29fa   :  { %v7215_v59 = vadd.f32 1e-05, %v7213_v60  ;;  %v21694_v60 = vld [vmem:[#allocation5 + $0x8a8] sm:$0xff]  }
0x29fc   :  { %22083 = vrsqrt.f32 %v7215_v59  ;;  %v21695_v59 = vld [vmem:[#allocation5 + $0x8b0] sm:$0xff]  }
0x2a06   :  { %v22084_v3 = vpop.eup %22083 }
0x2a07   :  { %v7217_v50 = vmul.f32 %v22084_v3, %v7214_v1  ;;  %v21696_v1 = vld [vmem:[#allocation5 + $0x8b8] sm:$0xff]   ;;  %v21697_v3 = vld [vmem:[#allocation5 + $0x840] sm:$0xff]  }
0x2a09   :  { %v7219_v52 = vmul.f32 %v7217_v50, %v23254_v36  ;;  %v7224_v53 = vrot.slane %v7217_v50, %v22456_v33 }
0x2a0b   :  { %v7220_v57 = vsub.f32 %v7218_v51, %v7219_v52  ;;  %v7225_v11 = vmul.f32 %v7224_v53, %v23244_v56  ;;  %v7226_v43 = vmul.f32 %v7224_v53, %v23249_v44  ;;  %v7227_v55 = vmul.f32 %v23242_v54, %v7224_v53 }
0x2a0c   :  { %v7228_v40 = vmul.f32 %v23246_v14, %v7224_v53 }
0x2a0d   :  { %v7232_v63 = vrot.slane %v7220_v57, %v22456_v33 }
0x2a0f   :  { %v7233_v0 = vadd.f32 %v7232_v63, %v7225_v11  ;;  %v7234_v5 = vadd.f32 %v7232_v63, %v7226_v43  ;;  %v7235_v28 = vadd.f32 %v7232_v63, %v7227_v55  ;;  %v7236_v8 = vadd.f32 %v7232_v63, %v7228_v40 }
0x2a11   :  { %v7237_v26 = vmax.f32 %v7233_v0, 0.0  ;;  %v7238_v7 = vmax.f32 %v7234_v5, 0.0  ;;  %v7239_v6 = vmax.f32 %v7235_v28, 0.0  ;;  %v7240_v36 = vmax.f32 %v7236_v8, 0.0 }
0x2a13   :  { %v7241_v15 = vpack.c.bf16 %v7238_v7, %v7237_v26  ;;  %v7242_v10 = vpack.c.bf16 %v7240_v36, %v7239_v6  ;;  %v7555_v7 = vld [vmem:[#allocation10 + $0xe] sm:$0x1] }
0x2a15   :  { %18675 = vmatprep.mubr.bf16.mxu0 %v7241_v15  ;;  %v7559_v15 = vld [vmem:[#allocation12 + $0xe] sm:$0x1] }
0x2a16   :  { %18676 = vmatmul.mubr.bf16.vlgmr.msra.gmra.mrb[96].mxu0 %v7242_v10 }
0x2a17   :  { %20778 = vmatpush3.bf16.msra.mxu0 %v22363_v9 }
0x2a18   :  { %20780 = vmatprep.subr.bf16.mxu0 %v22365_v12 }
0x2a1b   :  { %20782 = vmatpush3.bf16.msra.mxu0 %v22365_v12 }
0x2a1c   :  { %20784 = vmatprep.subr.bf16.mxu0 %v22370_v19 }
0x2a1f   :  { %20786 = vmatpush3.bf16.msra.mxu0 %v22370_v19 }
0x2a20   :  { %20788 = vmatprep.subr.bf16.mxu0 %v22374_v23 }
0x2a23   :  { %20790 = vmatpush3.bf16.msra.mxu0 %v22374_v23 }
0x2a24   :  { %20792 = vmatprep.subr.bf16.mxu0 %v22378_v27 }
0x2a27   :  { %20794 = vmatpush3.bf16.msra.mxu0 %v22378_v27 }
0x2a28   :  { %20796 = vmatprep.subr.bf16.mxu0 %v22388_v32 }
0x2a2b   :  { %20798 = vmatpush3.bf16.msra.mxu0 %v22388_v32 }
0x2a2c   :  { %20800 = vmatprep.subr.bf16.mxu0 %v22392_v34 }
0x2a2f   :  { %20802 = vmatpush3.bf16.msra.mxu0 %v22392_v34 }
0x2a30   :  { %20804 = vmatprep.subr.bf16.mxu0 %v22411_v37 }
0x2a33   :  { %20806 = vmatpush3.bf16.msra.mxu0 %v22411_v37 }
0x2a34   :  { %20808 = vmatprep.subr.bf16.mxu0 %v22363_v9 }
0x2ae9   :  { %v23303_v54 = vpop.f32.mrb[96].mxu0 }
0x2aea   :  { %v23305_v56 = vpop.f32.mrb[97].mxu0 }
0x2aeb   :  { %v23307_v14 = vpop.f32.mrb[98].mxu0  ;;  %18711 = vmatprep.mubr.f32.mxu1 %v23305_v56 }
0x2aec   :  { %v23310_v44 = vpop.f32.mrb[99].mxu0 }
0x2aed   :  { %18712 = vmatmul.mubr.f32.vlgmr.msra.gmra.mrb[72].mxu1 %v23310_v44 }
0x2aee   :  { %18714 = vmatprep.mubr.f32.mxu1 %v23303_v54  ;;  %18756 = vmatpush3.bf16.msra.mxu1 %v21689_v2 }
0x2aef   :  { %18757 = vmatprep.subr.bf16.mxu1 %v21690_v4 }
0x2af1   :  { %18715 = vmatmul.mubr.f32.gmra.mrb[74].mxu1 %v23307_v14 }
0x2af2   :  { %18758 = vmatpush3.bf16.msra.mxu1 %v21690_v4  ;;  %v21699_v4 = vld [vmem:[#allocation5 + $0x850] sm:$0xff]  }
0x2af3   :  { %18759 = vmatprep.subr.bf16.mxu1 %v21691_v49 }
0x2af6   :  { %18760 = vmatpush3.bf16.msra.mxu1 %v21691_v49  ;;  %v21700_v49 = vld [vmem:[#allocation5 + $0x858] sm:$0xff]  }
0x2af7   :  { %18761 = vmatprep.subr.bf16.mxu1 %v21692_v62 }
0x2afa   :  { %18762 = vmatpush3.bf16.msra.mxu1 %v21692_v62  ;;  %v21701_v62 = vld [vmem:[#allocation5 + $0x860] sm:$0xff]  }
0x2afb   :  { %18763 = vmatprep.subr.bf16.mxu1 %v21693_v61 }
0x2afe   :  { %18764 = vmatpush3.bf16.msra.mxu1 %v21693_v61  ;;  %v21702_v61 = vld [vmem:[#allocation5 + $0x868] sm:$0xff]  }
0x2aff   :  { %18765 = vmatprep.subr.bf16.mxu1 %v21694_v60 }
0x2b02   :  { %18766 = vmatpush3.bf16.msra.mxu1 %v21694_v60  ;;  %v21703_v60 = vld [vmem:[#allocation5 + $0x870] sm:$0xff]  }
0x2b03   :  { %18767 = vmatprep.subr.bf16.mxu1 %v21695_v59 }
0x2b06   :  { %18768 = vmatpush3.bf16.msra.mxu1 %v21695_v59  ;;  %v21704_v59 = vld [vmem:[#allocation5 + $0x878] sm:$0xff]  }
0x2b07   :  { %18769 = vmatprep.subr.bf16.mxu1 %v21696_v1 }
0x2b0a   :  { %18770 = vmatpush3.bf16.msra.mxu1 %v21696_v1  ;;  %v21705_v1 = vld [vmem:[#allocation5 + $0x8c0] sm:$0xff]  }
0x2b0b   :  { %18775 = vmatprep.subr.bf16.mxu1 %v21697_v3 }
0x2bc0   :  { %v18713_v16 = vpop.f32.mrb[72].mxu1 }
0x2bc1   :  { %v7423_v17 = vpop.f32.mrb[73].mxu1 }
0x2bc2   :  { %v7442_v18 = vadd.f32 %v18713_v16, %v7423_v17 }
0x2bc4   :  { %v18716_v20 = vpop.f32.mrb[74].mxu1 }
0x2bc5   :  { %v7433_v21 = vpop.f32.mrb[75].mxu1 }
0x2bc6   :  { %v7443_v22 = vadd.f32 %v7442_v18, %v7433_v21 }
0x2bc8   :  { %v7444_v39 = vadd.f32 %v18716_v20, %v7443_v22 }
0x2bca   :  { %v7445_v38 = vrot.slane %v7444_v39, 4 }
0x2bcc   :  { %v7446_v58 = vadd.f32 %v7445_v38, %v7444_v39 }
0x2bce   :  { %v7447_v41 = vrot.slane %v7446_v58, 2 }
0x2bd0   :  { %v7448_v24 = vadd.f32 %v7447_v41, %v7446_v58 }
0x2bd2   :  { %v7449_v25 = vrot.slane %v7448_v24, 1 }
0x2bd4   :  { %v7450_v29 = vadd.f32 %v7449_v25, %v7448_v24 }
0x2bd6   :  { %v23315_v35 = vmul.f32 0.001953125, %v7450_v29 }
0x2bd8   :  { %v7452_v13 = vsub.f32 %v23305_v56, %v23315_v35  ;;  %v7453_v30 = vsub.f32 %v23310_v44, %v23315_v35  ;;  %v7454_v31 = vsub.f32 %v23303_v54, %v23315_v35  ;;  %v7455_v46 = vsub.f32 %v23307_v14, %v23315_v35 }
0x2bda   :  { %v7456_v42 = vmul.f32 %v7452_v13, %v7452_v13  ;;  %v7457_v45 = vmul.f32 %v7453_v30, %v7453_v30  ;;  %v7458_v47 = vmul.f32 %v7454_v31, %v7454_v31  ;;  %v7459_v48 = vmul.f32 %v7455_v46, %v7455_v46 }
0x2bdc   :  { %18749 = vmatprep.mubr.f32.mxu0 %v7456_v42 }
0x2bdd   :  { %18750 = vmatmul.mubr.f32.vlgmr.msra.gmra.mrb[100].mxu0 %v7457_v45 }
0x2bde   :  { %18752 = vmatprep.mubr.f32.mxu0 %v7458_v47  ;;  %20810 = vmatpush3.bf16.msra.mxu0 %v22363_v9 }
0x2bdf   :  { %20812 = vmatprep.subr.bf16.mxu0 %v22365_v12 }
0x2be1   :  { %18753 = vmatmul.mubr.f32.gmra.mrb[102].mxu0 %v7459_v48  ;;  %v21698_v48 = vld [vmem:[#allocation5 + $0x848] sm:$0xff]  }
0x2be2   :  { %20814 = vmatpush3.bf16.msra.mxu0 %v22365_v12 }
0x2be3   :  { %20816 = vmatprep.subr.bf16.mxu0 %v22370_v19 }
0x2be6   :  { %20818 = vmatpush3.bf16.msra.mxu0 %v22370_v19 }
0x2be7   :  { %20820 = vmatprep.subr.bf16.mxu0 %v22374_v23 }
0x2bea   :  { %20822 = vmatpush3.bf16.msra.mxu0 %v22374_v23 }
0x2beb   :  { %20824 = vmatprep.subr.bf16.mxu0 %v22378_v27 }
0x2bee   :  { %20826 = vmatpush3.bf16.msra.mxu0 %v22378_v27 }
0x2bef   :  { %20828 = vmatprep.subr.bf16.mxu0 %v22388_v32 }
0x2bf2   :  { %20830 = vmatpush3.bf16.msra.mxu0 %v22388_v32 }
0x2bf3   :  { %20832 = vmatprep.subr.bf16.mxu0 %v22392_v34 }
0x2bf6   :  { %20834 = vmatpush3.bf16.msra.mxu0 %v22392_v34 }
0x2bf7   :  { %20836 = vmatprep.subr.bf16.mxu0 %v22411_v37 }
0x2bfa   :  { %20838 = vmatpush3.bf16.msra.mxu0 %v22411_v37 }
0x2bfb   :  { %20840 = vmatprep.subr.bf16.mxu0 %v22363_v9 }
0x2cb0   :  { %v18751_v50 = vpop.f32.mrb[100].mxu0 }
0x2cb1   :  { %v7526_v51 = vpop.f32.mrb[101].mxu0 }
0x2cb2   :  { %v7545_v52 = vadd.f32 %v18751_v50, %v7526_v51 }
0x2cb4   :  { %v18754_v53 = vpop.f32.mrb[102].mxu0 }
0x2cb5   :  { %v7536_v57 = vpop.f32.mrb[103].mxu0 }
0x2cb6   :  { %v7546_v11 = vadd.f32 %v7545_v52, %v7536_v57  ;;  %v21706_v57 = vld [vmem:[#allocation5 + $0x8c8] sm:$0xff]  }
0x2cb8   :  { %v7547_v43 = vadd.f32 %v18754_v53, %v7546_v11 }
0x2cba   :  { %v7548_v55 = vrot.slane %v7547_v43, 4 }
0x2cbc   :  { %v7549_v40 = vadd.f32 %v7548_v55, %v7547_v43  ;;  %v21707_v43 = vld [vmem:[#allocation5 + $0x8d0] sm:$0xff]   ;;  %v21708_v55 = vld [vmem:[#allocation5 + $0x8d8] sm:$0xff]  }
0x2cbe   :  { %v7550_v63 = vrot.slane %v7549_v40, 2 }
0x2cc0   :  { %v7551_v0 = vadd.f32 %v7550_v63, %v7549_v40  ;;  %v21709_v40 = vld [vmem:[#allocation5 + $0x8e0] sm:$0xff]   ;;  %v21710_v63 = vld [vmem:[#allocation5 + $0x8e8] sm:$0xff]  }
0x2cc2   :  { %v7552_v5 = vrot.slane %v7551_v0, 1 }
0x2cc4   :  { %v7553_v28 = vadd.f32 %v7552_v5, %v7551_v0  ;;  %v21711_v0 = vld [vmem:[#allocation5 + $0x8f0] sm:$0xff]   ;;  %v21712_v5 = vld [vmem:[#allocation5 + $0x8f8] sm:$0xff]  }
0x2cc6   :  { %v7554_v8 = vmul.f32 0.001953125, %v7553_v28  ;;  %v21713_v28 = vld [vmem:[#allocation5 + $0x900] sm:$0xff]  }
0x2cc8   :  { %v7556_v26 = vadd.f32 1e-05, %v7554_v8 }
0x2cca   :  { %22085 = vrsqrt.f32 %v7556_v26 }
0x2cd4   :  { %v22086_v6 = vpop.eup %22085 }
0x2cd5   :  { %v7558_v36 = vmul.f32 %v22086_v6, %v7555_v7 }
0x2cd7   :  { %v7560_v10 = vmul.f32 %v7558_v36, %v23315_v35  ;;  %v7565_v16 = vrot.slane %v7558_v36, %v22456_v33 }
0x2cd9   :  { %v7561_v17 = vsub.f32 %v7559_v15, %v7560_v10  ;;  %v7566_v18 = vmul.f32 %v7565_v16, %v23305_v56  ;;  %v7567_v20 = vmul.f32 %v7565_v16, %v23310_v44  ;;  %v7568_v21 = vmul.f32 %v23303_v54, %v7565_v16  ;;  %v21714_v15 = vld [vmem:[#allocation5 + $0x908] sm:$0xff]  }
0x2cda   :  { %v7569_v22 = vmul.f32 %v23307_v14, %v7565_v16  ;;  %v21715_v16 = vld [vmem:[#allocation5 + $0x910] sm:$0xff]  }
0x2cdb   :  { %v7573_v39 = vrot.slane %v7561_v17, %v22456_v33  ;;  %v21716_v17 = vld [vmem:[#allocation5 + $0x918] sm:$0xff]  }
0x2cdd   :  { %v7574_v38 = vadd.f32 %v7573_v39, %v7566_v18  ;;  %v7575_v58 = vadd.f32 %v7573_v39, %v7567_v20  ;;  %v7576_v41 = vadd.f32 %v7573_v39, %v7568_v21  ;;  %v7577_v24 = vadd.f32 %v7573_v39, %v7569_v22  ;;  %v21717_v18 = vld [vmem:[#allocation5 + $0x920] sm:$0xff]   ;;  %v21718_v20 = vld [vmem:[#allocation5 + $0x928] sm:$0xff]   ;;  %v21719_v21 = vld [vmem:[#allocation5 + $0x930] sm:$0xff]  }
0x2cde   :  { %v21720_v22 = vld [vmem:[#allocation5 + $0x938] sm:$0xff]   ;;  %v21721_v39 = vld [vmem:[#allocation5 + $0x940] sm:$0xff]  }
0x2cdf   :  { %v7578_v25 = vmax.f32 %v7574_v38, 0.0  ;;  %v7579_v29 = vmax.f32 %v7575_v58, 0.0  ;;  %v7580_v35 = vmax.f32 %v7576_v41, 0.0  ;;  %v7581_v13 = vmax.f32 %v7577_v24, 0.0  ;;  %v21722_v24 = vld [vmem:[#allocation5 + $0x948] sm:$0xff]  }
0x2ce1   :  { %7582 = vst [vmem:[#allocation2 + $0x8] sm:$0xff] %v7578_v25  ;;  %7583 = vst [vmem:[#allocation2 + $0x10] sm:$0xff] %v7579_v29  ;;  %v23348_v56 = vpack.c.bf16 %v7579_v29, %v7578_v25  ;;  %v23350_v44 = vpack.c.bf16 %v7581_v13, %v7580_v35  ;;  %v21723_v25 = vld [vmem:[#allocation5 + $0x950] sm:$0xff]   ;;  %v21724_v29 = vld [vmem:[#allocation5 + $0x958] sm:$0xff]  }
0x2ce2   :  { %7584 = vst [vmem:[#allocation2 + $0x28] sm:$0xff] %v7580_v35  ;;  %7585 = vst [vmem:[#allocation2 + $0x30] sm:$0xff] %v7581_v13  ;;  %v21725_v35 = vld [vmem:[#allocation5 + $0x960] sm:$0xff]   ;;  %v21726_v13 = vld [vmem:[#allocation5 + $0x968] sm:$0xff]  }
0x2ce8   :  { %v7609_v54 = vld [vmem:[#allocation2 + $0x5] sm:$0xff]  ;;  %v7610_v14 = vld [vmem:[#allocation2 + $0xd] sm:$0xff] }
0x2ce9   :  { %v7611_v30 = vld [vmem:[#allocation2 + $0x25] sm:$0xff]  ;;  %v7613_v31 = vpack.c.bf16 %v7610_v14, %v7609_v54  ;;  %v7612_v42 = vld [vmem:[#allocation2 + $0x2d] sm:$0xff]  ;;  %v21728_v14 = vld [vmem:[#allocation5 + $0x978] sm:$0xff]  }
0x2cea   :  { %v7586_v45 = vld [vmem:[#allocation2 + $0x4] sm:$0xff]  ;;  %v23352_v46 = vld [vmem:[#allocation2 + $0xc] sm:$0xff]  ;;  %v7614_v47 = vpack.c.bf16 %v7612_v42, %v7611_v30 }
0x2ceb   :  { %18771 = vmatprep.mubr.bf16.mxu1 %v7613_v31  ;;  %v7590_v2 = vpack.c.bf16 %v23352_v46, %v7586_v45  ;;  %v23355_v50 = vld [vmem:[#allocation2 + $0x2c] sm:$0xff] }
0x2cec   :  { %18772 = vmatmul.mubr.bf16.vlgmr.msra.gmra.mrb[76].mxu1 %v7614_v47  ;;  %v7826_v51 = vld [vmem:[#allocation2 + $0x6] sm:$0xff]  ;;  %v7827_v52 = vld [vmem:[#allocation2 + $0xe] sm:$0xff] }
0x2ced   :  { %18776 = vmatpush3.bf16.msra.mxu1 %v21697_v3  ;;  %18791 = vmatprep.mubr.bf16.mxu1 %v7590_v2  ;;  %v7588_v3 = vld [vmem:[#allocation2 + $0x24] sm:$0xff]  ;;  %v7830_v11 = vpack.c.bf16 %v7827_v52, %v7826_v51  ;;  %v7829_v26 = vld [vmem:[#allocation2 + $0x2e] sm:$0xff] }
0x2cee   :  { %18777 = vmatprep.subr.bf16.mxu1 %v21698_v48  ;;  %v7591_v53 = vpack.c.bf16 %v23355_v50, %v7588_v3  ;;  %v7828_v8 = vld [vmem:[#allocation2 + $0x26] sm:$0xff]  ;;  %v7951_v6 = vld [vmem:[#allocation2 + $0xf] sm:$0xff] }
0x2cef   :  { %v7950_v7 = vld [vmem:[#allocation2 + $0x7] sm:$0xff]  ;;  %v7831_v36 = vpack.c.bf16 %v7829_v26, %v7828_v8  ;;  %v7953_v58 = vld [vmem:[#allocation2 + $0x2f] sm:$0xff] }
0x2cf0   :  { %v7954_v10 = vpack.c.bf16 %v7951_v6, %v7950_v7  ;;  %v7952_v38 = vld [vmem:[#allocation2 + $0x27] sm:$0xff]  ;;  %v21727_v54 = vld [vmem:[#allocation5 + $0x970] sm:$0xff]  }
0x2cf1   :  { %18778 = vmatpush3.bf16.msra.mxu1 %v21698_v48  ;;  %v7955_v41 = vpack.c.bf16 %v7953_v58, %v7952_v38  ;;  %v8198_v30 = vld [vmem:[#allocation2 + $0x9] sm:$0xff]  ;;  %v8199_v31 = vld [vmem:[#allocation2 + $0x11] sm:$0xff]  ;;  %v21733_v2 = vld [vmem:[#allocation5 + $0x9a0] sm:$0xff]  }
0x2cf2   :  { %18779 = vmatprep.subr.bf16.mxu1 %v21699_v4  ;;  %v21730_v42 = vld [vmem:[#allocation5 + $0x988] sm:$0xff]   ;;  %v8202_v45 = vpack.c.bf16 %v8199_v31, %v8198_v30  ;;  %v21731_v47 = vld [vmem:[#allocation5 + $0x990] sm:$0xff]   ;;  %v21732_v48 = vld [vmem:[#allocation5 + $0x998] sm:$0xff]  }
0x2cf3   :  { %v21738_v51 = vld [vmem:[#allocation5 + $0x9c8] sm:$0xff]   ;;  %v8447_v8 = vld [vmem:[#allocation2 + $0x13] sm:$0xff] }
0x2cf4   :  { %v21746_v7 = vld [vmem:[#allocation5 + $0xa08] sm:$0xff]  }
0x2cf5   :  { %18780 = vmatpush3.bf16.msra.mxu1 %v21699_v4  ;;  %v21734_v4 = vld [vmem:[#allocation5 + $0x9a8] sm:$0xff]  }
0x2cf6   :  { %18781 = vmatprep.subr.bf16.mxu1 %v21700_v49  ;;  %v21754_v58 = vld [vmem:[#allocation5 + $0xa48] sm:$0xff]  }
0x2cf9   :  { %18782 = vmatpush3.bf16.msra.mxu1 %v21700_v49  ;;  %v21735_v49 = vld [vmem:[#allocation5 + $0x9b0] sm:$0xff]  }
0x2cfa   :  { %18783 = vmatprep.subr.bf16.mxu1 %v21701_v62 }
0x2cfd   :  { %18784 = vmatpush3.bf16.msra.mxu1 %v21701_v62  ;;  %v21736_v62 = vld [vmem:[#allocation5 + $0x9b8] sm:$0xff]  }
0x2cfe   :  { %18785 = vmatprep.subr.bf16.mxu1 %v21702_v61 }
0x2d01   :  { %18786 = vmatpush3.bf16.msra.mxu1 %v21702_v61  ;;  %v8200_v61 = vld [vmem:[#allocation2 + $0x29] sm:$0xff] }
0x2d02   :  { %18787 = vmatprep.subr.bf16.mxu1 %v21703_v60 }
0x2d05   :  { %18788 = vmatpush3.bf16.msra.mxu1 %v21703_v60  ;;  %v8201_v60 = vld [vmem:[#allocation2 + $0x31] sm:$0xff] }
0x2d06   :  { %18789 = vmatprep.subr.bf16.mxu1 %v21704_v59  ;;  %v8203_v3 = vpack.c.bf16 %v8201_v60, %v8200_v61 }
0x2d09   :  { %18790 = vmatpush3.bf16.msra.mxu1 %v21704_v59  ;;  %v8322_v59 = vld [vmem:[#allocation2 + $0xa] sm:$0xff] }
0x2d0a   :  { %18795 = vmatprep.subr.bf16.mxu1 %v21705_v1 }
0x2d0c   :  { %18792 = vmatmul.mubr.bf16.vlgmr.msra.gmra.mrb[76].mxu1 %v7591_v53  ;;  %v21739_v53 = vld [vmem:[#allocation5 + $0x9d0] sm:$0xff]  }
0x2d0d   :  { %18796 = vmatpush3.bf16.msra.mxu1 %v21705_v1  ;;  %18811 = vmatprep.mubr.bf16.mxu1 %v7830_v11  ;;  %v8323_v1 = vld [vmem:[#allocation2 + $0x12] sm:$0xff]  ;;  %v21741_v11 = vld [vmem:[#allocation5 + $0x9e0] sm:$0xff]  }
0x2d0e   :  { %18797 = vmatprep.subr.bf16.mxu1 %v21706_v57  ;;  %v8326_v52 = vpack.c.bf16 %v8323_v1, %v8322_v59 }
0x2d11   :  { %18798 = vmatpush3.bf16.msra.mxu1 %v21706_v57  ;;  %v21740_v57 = vld [vmem:[#allocation5 + $0x9d8] sm:$0xff]  }
0x2d12   :  { %18799 = vmatprep.subr.bf16.mxu1 %v21707_v43 }
0x2d15   :  { %18800 = vmatpush3.bf16.msra.mxu1 %v21707_v43  ;;  %v21742_v43 = vld [vmem:[#allocation5 + $0x9e8] sm:$0xff]  }
0x2d16   :  { %18801 = vmatprep.subr.bf16.mxu1 %v21708_v55 }
0x2d19   :  { %18802 = vmatpush3.bf16.msra.mxu1 %v21708_v55  ;;  %v21743_v55 = vld [vmem:[#allocation5 + $0x9f0] sm:$0xff]  }
0x2d1a   :  { %18803 = vmatprep.subr.bf16.mxu1 %v21709_v40 }
0x2d1d   :  { %18804 = vmatpush3.bf16.msra.mxu1 %v21709_v40  ;;  %v21744_v40 = vld [vmem:[#allocation5 + $0x9f8] sm:$0xff]  }
0x2d1e   :  { %18805 = vmatprep.subr.bf16.mxu1 %v21710_v63 }
0x2d21   :  { %18806 = vmatpush3.bf16.msra.mxu1 %v21710_v63  ;;  %v21745_v63 = vld [vmem:[#allocation5 + $0xa00] sm:$0xff]  }
0x2d22   :  { %18807 = vmatprep.subr.bf16.mxu1 %v21711_v0 }
0x2d25   :  { %18808 = vmatpush3.bf16.msra.mxu1 %v21711_v0  ;;  %v8324_v0 = vld [vmem:[#allocation2 + $0x2a] sm:$0xff] }
0x2d26   :  { %18809 = vmatprep.subr.bf16.mxu1 %v21712_v5 }
0x2d29   :  { %18810 = vmatpush3.bf16.msra.mxu1 %v21712_v5  ;;  %v8325_v5 = vld [vmem:[#allocation2 + $0x32] sm:$0xff] }
0x2d2a   :  { %18815 = vmatprep.subr.bf16.mxu1 %v21713_v28  ;;  %v8327_v26 = vpack.c.bf16 %v8325_v5, %v8324_v0  ;;  %v21762_v0 = vld [vmem:[#allocation5 + $0xac8] sm:$0xff]   ;;  %v21763_v5 = vld [vmem:[#allocation5 + $0xad0] sm:$0xff]  }
0x2d2c   :  { %18812 = vmatmul.mubr.bf16.vlgmr.msra.gmra.mrb[76].mxu1 %v7831_v36  ;;  %v21747_v36 = vld [vmem:[#allocation5 + $0xa10] sm:$0xff]  }
0x2d2d   :  { %18816 = vmatpush3.bf16.msra.mxu1 %v21713_v28  ;;  %18831 = vmatprep.mubr.bf16.mxu1 %v7954_v10  ;;  %v8446_v28 = vld [vmem:[#allocation2 + $0xb] sm:$0xff]  ;;  %v21749_v10 = vld [vmem:[#allocation5 + $0xa20] sm:$0xff]  }
0x2d2e   :  { %18817 = vmatprep.subr.bf16.mxu1 %v21714_v15  ;;  %v8450_v6 = vpack.c.bf16 %v8447_v8, %v8446_v28  ;;  %v21764_v28 = vld [vmem:[#allocation5 + $0xad8] sm:$0xff]   ;;  %v21765_v8 = vld [vmem:[#allocation5 + $0xae0] sm:$0xff]  }
0x2d31   :  { %18818 = vmatpush3.bf16.msra.mxu1 %v21714_v15  ;;  %v21748_v15 = vld [vmem:[#allocation5 + $0xa18] sm:$0xff]  }
0x2d32   :  { %18819 = vmatprep.subr.bf16.mxu1 %v21715_v16 }
0x2d35   :  { %18820 = vmatpush3.bf16.msra.mxu1 %v21715_v16  ;;  %v21750_v16 = vld [vmem:[#allocation5 + $0xa28] sm:$0xff]  }
0x2d36   :  { %18821 = vmatprep.subr.bf16.mxu1 %v21716_v17 }
0x2d39   :  { %18822 = vmatpush3.bf16.msra.mxu1 %v21716_v17  ;;  %v21751_v17 = vld [vmem:[#allocation5 + $0xa30] sm:$0xff]  }
0x2d3a   :  { %18823 = vmatprep.subr.bf16.mxu1 %v21717_v18 }
0x2d3d   :  { %18824 = vmatpush3.bf16.msra.mxu1 %v21717_v18  ;;  %v21752_v18 = vld [vmem:[#allocation5 + $0xa38] sm:$0xff]  }
0x2d3e   :  { %18825 = vmatprep.subr.bf16.mxu1 %v21718_v20 }
0x2d41   :  { %18826 = vmatpush3.bf16.msra.mxu1 %v21718_v20  ;;  %v21753_v20 = vld [vmem:[#allocation5 + $0xa40] sm:$0xff]  }
0x2d42   :  { %18827 = vmatprep.subr.bf16.mxu1 %v21719_v21 }
0x2d45   :  { %18828 = vmatpush3.bf16.msra.mxu1 %v21719_v21  ;;  %v8448_v21 = vld [vmem:[#allocation2 + $0x2b] sm:$0xff] }
0x2d46   :  { %18829 = vmatprep.subr.bf16.mxu1 %v21720_v22 }
0x2d49   :  { %18830 = vmatpush3.bf16.msra.mxu1 %v21720_v22  ;;  %v8449_v22 = vld [vmem:[#allocation2 + $0x33] sm:$0xff] }
0x2d4a   :  { %18835 = vmatprep.subr.bf16.mxu1 %v21721_v39  ;;  %v8451_v38 = vpack.c.bf16 %v8449_v22, %v8448_v21 }
0x2d4c   :  { %18832 = vmatmul.mubr.bf16.vlgmr.msra.gmra.mrb[76].mxu1 %v7955_v41 }
0x2d4d   :  { %18836 = vmatpush3.bf16.msra.mxu1 %v21721_v39  ;;  %18851 = vmatprep.mubr.bf16.mxu1 %v23348_v56  ;;  %v21729_v56 = vld [vmem:[#allocation5 + $0x980] sm:$0xff]   ;;  %v8571_v39 = vld [vmem:[#allocation2 + $0x14] sm:$0xff] }
0x2d4e   :  { %18837 = vmatprep.subr.bf16.mxu1 %v21722_v24  ;;  %v8574_v41 = vpack.c.bf16 %v8571_v39, %v23352_v46  ;;  %v21760_v46 = vld [vmem:[#allocation5 + $0xa78] sm:$0xff]  }
0x2d51   :  { %18838 = vmatpush3.bf16.msra.mxu1 %v21722_v24  ;;  %v21755_v24 = vld [vmem:[#allocation5 + $0xa50] sm:$0xff]  }
0x2d52   :  { %18839 = vmatprep.subr.bf16.mxu1 %v21723_v25 }
0x2d55   :  { %18840 = vmatpush3.bf16.msra.mxu1 %v21723_v25  ;;  %v21756_v25 = vld [vmem:[#allocation5 + $0xa58] sm:$0xff]  }
0x2d56   :  { %18841 = vmatprep.subr.bf16.mxu1 %v21724_v29 }
0x2d59   :  { %18842 = vmatpush3.bf16.msra.mxu1 %v21724_v29  ;;  %v21757_v29 = vld [vmem:[#allocation5 + $0xa60] sm:$0xff]  }
0x2d5a   :  { %18843 = vmatprep.subr.bf16.mxu1 %v21725_v35 }
0x2d5d   :  { %18844 = vmatpush3.bf16.msra.mxu1 %v21725_v35  ;;  %v21758_v35 = vld [vmem:[#allocation5 + $0xa68] sm:$0xff]  }
0x2d5e   :  { %18845 = vmatprep.subr.bf16.mxu1 %v21726_v13 }
0x2d61   :  { %18846 = vmatpush3.bf16.msra.mxu1 %v21726_v13  ;;  %v21759_v13 = vld [vmem:[#allocation5 + $0xa70] sm:$0xff]  }
0x2d62   :  { %18847 = vmatprep.subr.bf16.mxu1 %v21727_v54 }
0x2d65   :  { %18848 = vmatpush3.bf16.msra.mxu1 %v21727_v54  ;;  %v8573_v54 = vld [vmem:[#allocation2 + $0x34] sm:$0xff] }
0x2d66   :  { %18849 = vmatprep.subr.bf16.mxu1 %v21728_v14 }
0x2d69   :  { %18850 = vmatpush3.bf16.msra.mxu1 %v21728_v14  ;;  %v8575_v14 = vpack.c.bf16 %v8573_v54, %v23355_v50  ;;  %v8896_v54 = vld [vmem:[#allocation12 + $0xf] sm:$0x1] }
0x2d6a   :  { %18855 = vmatprep.subr.bf16.mxu1 %v21729_v56 }
0x2d6c   :  { %18852 = vmatmul.mubr.bf16.vlgmr.msra.gmra.mrb[76].mxu1 %v23350_v44  ;;  %v21737_v44 = vld [vmem:[#allocation5 + $0x9c0] sm:$0xff]  }
0x2d6d   :  { %18856 = vmatpush3.bf16.msra.mxu1 %v21729_v56  ;;  %18871 = vmatprep.mubr.bf16.mxu1 %v8202_v45 }
0x2d6e   :  { %18857 = vmatprep.subr.bf16.mxu1 %v21730_v42 }
0x2d71   :  { %18858 = vmatpush3.bf16.msra.mxu1 %v21730_v42 }
0x2d72   :  { %18859 = vmatprep.subr.bf16.mxu1 %v21731_v47 }
0x2d75   :  { %18860 = vmatpush3.bf16.msra.mxu1 %v21731_v47 }
0x2d76   :  { %18861 = vmatprep.subr.bf16.mxu1 %v21732_v48 }
0x2d79   :  { %18862 = vmatpush3.bf16.msra.mxu1 %v21732_v48 }
0x2d7a   :  { %18863 = vmatprep.subr.bf16.mxu1 %v21733_v2 }
0x2d7d   :  { %18864 = vmatpush3.bf16.msra.mxu1 %v21733_v2 }
0x2d7e   :  { %18865 = vmatprep.subr.bf16.mxu1 %v21734_v4 }
0x2d81   :  { %18866 = vmatpush3.bf16.msra.mxu1 %v21734_v4 }
0x2d82   :  { %18867 = vmatprep.subr.bf16.mxu1 %v21735_v49 }
0x2d85   :  { %18868 = vmatpush3.bf16.msra.mxu1 %v21735_v49 }
0x2d86   :  { %18869 = vmatprep.subr.bf16.mxu1 %v21736_v62 }
0x2d89   :  { %18870 = vmatpush3.bf16.msra.mxu1 %v21736_v62 }
0x2d8a   :  { %18875 = vmatprep.subr.bf16.mxu1 %v21737_v44 }
0x2d8c   :  { %18872 = vmatmul.mubr.bf16.vlgmr.msra.gmra.mrb[76].mxu1 %v8203_v3 }
0x2d8d   :  { %18876 = vmatpush3.bf16.msra.mxu1 %v21737_v44  ;;  %18891 = vmatprep.mubr.bf16.mxu1 %v8326_v52 }
0x2d8e   :  { %18877 = vmatprep.subr.bf16.mxu1 %v21738_v51 }
0x2d91   :  { %18878 = vmatpush3.bf16.msra.mxu1 %v21738_v51 }
0x2d92   :  { %18879 = vmatprep.subr.bf16.mxu1 %v21739_v53 }
0x2d95   :  { %18880 = vmatpush3.bf16.msra.mxu1 %v21739_v53 }
0x2d96   :  { %18881 = vmatprep.subr.bf16.mxu1 %v21740_v57 }
0x2d99   :  { %18882 = vmatpush3.bf16.msra.mxu1 %v21740_v57 }
0x2d9a   :  { %18883 = vmatprep.subr.bf16.mxu1 %v21741_v11 }
0x2d9d   :  { %18884 = vmatpush3.bf16.msra.mxu1 %v21741_v11 }
0x2d9e   :  { %18885 = vmatprep.subr.bf16.mxu1 %v21742_v43 }
0x2da1   :  { %18886 = vmatpush3.bf16.msra.mxu1 %v21742_v43 }
0x2da2   :  { %18887 = vmatprep.subr.bf16.mxu1 %v21743_v55 }
0x2da5   :  { %18888 = vmatpush3.bf16.msra.mxu1 %v21743_v55 }
0x2da6   :  { %18889 = vmatprep.subr.bf16.mxu1 %v21744_v40 }
0x2da9   :  { %18890 = vmatpush3.bf16.msra.mxu1 %v21744_v40 }
0x2daa   :  { %18895 = vmatprep.subr.bf16.mxu1 %v21745_v63 }
0x2dac   :  { %18892 = vmatmul.mubr.bf16.vlgmr.msra.gmra.mrb[76].mxu1 %v8327_v26  ;;  %v21766_v26 = vld [vmem:[#allocation5 + $0xae8] sm:$0xff]  }
0x2dad   :  { %18896 = vmatpush3.bf16.msra.mxu1 %v21745_v63  ;;  %18911 = vmatprep.mubr.bf16.mxu1 %v8450_v6  ;;  %v21761_v63 = vld [vmem:[#allocation5 + $0xac0] sm:$0xff]   ;;  %v21768_v6 = vld [vmem:[#allocation5 + $0xaf8] sm:$0xff]  }
0x2dae   :  { %18897 = vmatprep.subr.bf16.mxu1 %v21746_v7 }
0x2db1   :  { %18898 = vmatpush3.bf16.msra.mxu1 %v21746_v7  ;;  %v21767_v7 = vld [vmem:[#allocation5 + $0xaf0] sm:$0xff]  }
0x2db2   :  { %18899 = vmatprep.subr.bf16.mxu1 %v21747_v36 }
0x2db5   :  { %18900 = vmatpush3.bf16.msra.mxu1 %v21747_v36  ;;  %v21769_v36 = vld [vmem:[#allocation5 + $0xa80] sm:$0xff]  }
0x2db6   :  { %18901 = vmatprep.subr.bf16.mxu1 %v21748_v15 }
0x2db9   :  { %18902 = vmatpush3.bf16.msra.mxu1 %v21748_v15 }
0x2dba   :  { %18903 = vmatprep.subr.bf16.mxu1 %v21749_v10 }
0x2dbd   :  { %18904 = vmatpush3.bf16.msra.mxu1 %v21749_v10 }
0x2dbe   :  { %18905 = vmatprep.subr.bf16.mxu1 %v21750_v16 }
0x2dc1   :  { %18906 = vmatpush3.bf16.msra.mxu1 %v21750_v16 }
0x2dc2   :  { %18907 = vmatprep.subr.bf16.mxu1 %v21751_v17 }
0x2dc5   :  { %18908 = vmatpush3.bf16.msra.mxu1 %v21751_v17 }
0x2dc6   :  { %18909 = vmatprep.subr.bf16.mxu1 %v21752_v18 }
0x2dc9   :  { %18910 = vmatpush3.bf16.msra.mxu1 %v21752_v18 }
0x2dca   :  { %18915 = vmatprep.subr.bf16.mxu1 %v21753_v20 }
0x2dcc   :  { %18912 = vmatmul.mubr.bf16.vlgmr.msra.gmra.mrb[76].mxu1 %v8451_v38 }
0x2dcd   :  { %18916 = vmatpush3.bf16.msra.mxu1 %v21753_v20  ;;  %18931 = vmatprep.mubr.bf16.mxu1 %v8574_v41 }
0x2dce   :  { %18917 = vmatprep.subr.bf16.mxu1 %v21754_v58 }
0x2dd1   :  { %18918 = vmatpush3.bf16.msra.mxu1 %v21754_v58 }
0x2dd2   :  { %18919 = vmatprep.subr.bf16.mxu1 %v21755_v24 }
0x2dd5   :  { %18920 = vmatpush3.bf16.msra.mxu1 %v21755_v24 }
0x2dd6   :  { %18921 = vmatprep.subr.bf16.mxu1 %v21756_v25 }
0x2dd9   :  { %18922 = vmatpush3.bf16.msra.mxu1 %v21756_v25 }
0x2dda   :  { %18923 = vmatprep.subr.bf16.mxu1 %v21757_v29 }
0x2ddd   :  { %18924 = vmatpush3.bf16.msra.mxu1 %v21757_v29 }
0x2dde   :  { %18925 = vmatprep.subr.bf16.mxu1 %v21758_v35 }
0x2de1   :  { %18926 = vmatpush3.bf16.msra.mxu1 %v21758_v35  ;;  %v8892_v35 = vld [vmem:[#allocation10 + $0xf] sm:$0x1] }
0x2de2   :  { %18927 = vmatprep.subr.bf16.mxu1 %v21759_v13 }
0x2de5   :  { %18928 = vmatpush3.bf16.msra.mxu1 %v21759_v13 }
0x2de6   :  { %18929 = vmatprep.subr.bf16.mxu1 %v21760_v46 }
0x2de9   :  { %18930 = vmatpush3.bf16.msra.mxu1 %v21760_v46 }
0x2dea   :  { %20968 = vmatprep.subr.bf16.mxu1 %v22363_v9 }
0x2dec   :  { %18932 = vmatmul.mubr.bf16.vlgmr.msra.gmra.mrb[76].mxu1 %v8575_v14 }
0x2ded   :  { %20970 = vmatpush3.bf16.msra.mxu1 %v22363_v9 }
0x2dee   :  { %20972 = vmatprep.subr.bf16.mxu1 %v22365_v12 }
0x2df1   :  { %20974 = vmatpush3.bf16.msra.mxu1 %v22365_v12 }
0x2df2   :  { %20976 = vmatprep.subr.bf16.mxu1 %v22370_v19 }
0x2df5   :  { %20978 = vmatpush3.bf16.msra.mxu1 %v22370_v19 }
0x2df6   :  { %20980 = vmatprep.subr.bf16.mxu1 %v22374_v23 }
0x2df9   :  { %20982 = vmatpush3.bf16.msra.mxu1 %v22374_v23 }
0x2dfa   :  { %20984 = vmatprep.subr.bf16.mxu1 %v22378_v27 }
0x2dfd   :  { %20986 = vmatpush3.bf16.msra.mxu1 %v22378_v27 }
0x2dfe   :  { %20988 = vmatprep.subr.bf16.mxu1 %v22388_v32 }
0x2e01   :  { %20990 = vmatpush3.bf16.msra.mxu1 %v22388_v32 }
0x2e02   :  { %20992 = vmatprep.subr.bf16.mxu1 %v22392_v34 }
0x2e05   :  { %20994 = vmatpush3.bf16.msra.mxu1 %v22392_v34 }
0x2e06   :  { %20996 = vmatprep.subr.bf16.mxu1 %v22411_v37 }
0x2e09   :  { %20998 = vmatpush3.bf16.msra.mxu1 %v22411_v37 }
0x2e0a   :  { %21000 = vmatprep.subr.bf16.mxu1 %v22363_v9 }
0x2ebf   :  { %v23379_v50 = vpop.f32.mrb[76].mxu1 }
0x2ec0   :  { %v23381_v56 = vpop.f32.mrb[77].mxu1 }
0x2ec1   :  { %v23383_v30 = vpop.f32.mrb[78].mxu1  ;;  %18967 = vmatprep.mubr.f32.mxu0 %v23381_v56 }
0x2ec2   :  { %v23386_v31 = vpop.f32.mrb[79].mxu1 }
0x2ec3   :  { %18968 = vmatmul.mubr.f32.vlgmr.msra.gmra.mrb[104].mxu0 %v23386_v31 }
0x2ec4   :  { %18970 = vmatprep.mubr.f32.mxu0 %v23379_v50  ;;  %20842 = vmatpush3.bf16.msra.mxu0 %v22363_v9 }
0x2ec5   :  { %20844 = vmatprep.subr.bf16.mxu0 %v22365_v12 }
0x2ec7   :  { %18971 = vmatmul.mubr.f32.gmra.mrb[106].mxu0 %v23383_v30 }
0x2ec8   :  { %20846 = vmatpush3.bf16.msra.mxu0 %v22365_v12 }
0x2ec9   :  { %20848 = vmatprep.subr.bf16.mxu0 %v22370_v19 }
0x2ecc   :  { %20850 = vmatpush3.bf16.msra.mxu0 %v22370_v19 }
0x2ecd   :  { %20852 = vmatprep.subr.bf16.mxu0 %v22374_v23 }
0x2ed0   :  { %20854 = vmatpush3.bf16.msra.mxu0 %v22374_v23 }
0x2ed1   :  { %20856 = vmatprep.subr.bf16.mxu0 %v22378_v27 }
0x2ed4   :  { %20858 = vmatpush3.bf16.msra.mxu0 %v22378_v27 }
0x2ed5   :  { %20860 = vmatprep.subr.bf16.mxu0 %v22388_v32 }
0x2ed8   :  { %20862 = vmatpush3.bf16.msra.mxu0 %v22388_v32 }
0x2ed9   :  { %20864 = vmatprep.subr.bf16.mxu0 %v22392_v34 }
0x2edc   :  { %20866 = vmatpush3.bf16.msra.mxu0 %v22392_v34 }
0x2edd   :  { %20868 = vmatprep.subr.bf16.mxu0 %v22411_v37 }
0x2ee0   :  { %20870 = vmatpush3.bf16.msra.mxu0 %v22411_v37 }
0x2ee1   :  { %19011 = vmatprep.subr.bf16.mxu0 %v21761_v63 }
0x2f96   :  { %v18969_v42 = vpop.f32.mrb[104].mxu0 }
0x2f97   :  { %v8760_v45 = vpop.f32.mrb[105].mxu0 }
0x2f98   :  { %v8779_v47 = vadd.f32 %v18969_v42, %v8760_v45 }
0x2f9a   :  { %v18972_v48 = vpop.f32.mrb[106].mxu0 }
0x2f9b   :  { %v8770_v2 = vpop.f32.mrb[107].mxu0 }
0x2f9c   :  { %v8780_v4 = vadd.f32 %v8779_v47, %v8770_v2 }
0x2f9e   :  { %v8781_v49 = vadd.f32 %v18972_v48, %v8780_v4 }
0x2fa0   :  { %v8782_v62 = vrot.slane %v8781_v49, 4 }
0x2fa2   :  { %v8783_v44 = vadd.f32 %v8782_v62, %v8781_v49 }
0x2fa4   :  { %v8784_v61 = vrot.slane %v8783_v44, 2 }
0x2fa6   :  { %v8785_v60 = vadd.f32 %v8784_v61, %v8783_v44 }
0x2fa8   :  { %v8786_v59 = vrot.slane %v8785_v60, 1 }
0x2faa   :  { %v8787_v1 = vadd.f32 %v8786_v59, %v8785_v60 }
0x2fac   :  { %v8788_v3 = vmul.f32 0.001953125, %v8787_v1 }
0x2fae   :  { %v8789_v51 = vsub.f32 %v23381_v56, %v8788_v3  ;;  %v8790_v52 = vsub.f32 %v23386_v31, %v8788_v3  ;;  %v8791_v53 = vsub.f32 %v23379_v50, %v8788_v3  ;;  %v8792_v43 = vsub.f32 %v23383_v30, %v8788_v3 }
0x2fb0   :  { %v8793_v57 = vmul.f32 %v8789_v51, %v8789_v51  ;;  %v8794_v11 = vmul.f32 %v8790_v52, %v8790_v52  ;;  %v8795_v55 = vmul.f32 %v8791_v53, %v8791_v53  ;;  %v8796_v40 = vmul.f32 %v8792_v43, %v8792_v43  ;;  %v21770_v52 = vld [vmem:[#allocation5 + $0xa88] sm:$0xff]   ;;  %v21773_v43 = vld [vmem:[#allocation5 + $0xaa0] sm:$0xff]  }
0x2fb2   :  { %19005 = vmatprep.mubr.f32.mxu0 %v8793_v57 }
0x2fb3   :  { %19006 = vmatmul.mubr.f32.vlgmr.msra.gmra.mrb[108].mxu0 %v8794_v11  ;;  %v21772_v11 = vld [vmem:[#allocation5 + $0xa98] sm:$0xff]  }
0x2fb4   :  { %19008 = vmatprep.mubr.f32.mxu0 %v8795_v55  ;;  %19012 = vmatpush3.bf16.msra.mxu0 %v21761_v63  ;;  %v21774_v55 = vld [vmem:[#allocation5 + $0xaa8] sm:$0xff]   ;;  %v21776_v63 = vld [vmem:[#allocation5 + $0xab8] sm:$0xff]  }
0x2fb5   :  { %19013 = vmatprep.subr.bf16.mxu0 %v21762_v0 }
0x2fb7   :  { %19009 = vmatmul.mubr.f32.gmra.mrb[110].mxu0 %v8796_v40  ;;  %v21775_v40 = vld [vmem:[#allocation5 + $0xab0] sm:$0xff]  }
0x2fb8   :  { %19014 = vmatpush3.bf16.msra.mxu0 %v21762_v0  ;;  %v21777_v0 = vld [vmem:[#allocation5 + $0xb00] sm:$0xff]  }
0x2fb9   :  { %19015 = vmatprep.subr.bf16.mxu0 %v21763_v5 }
0x2fbc   :  { %19016 = vmatpush3.bf16.msra.mxu0 %v21763_v5  ;;  %v8925_v5 = vld [vmem:[#allocation3 + $0x37] sm:$0xff] }
0x2fbd   :  { %19017 = vmatprep.subr.bf16.mxu0 %v21764_v28 }
0x2fc0   :  { %19018 = vmatpush3.bf16.msra.mxu0 %v21764_v28 }
0x2fc1   :  { %19019 = vmatprep.subr.bf16.mxu0 %v21765_v8 }
0x2fc4   :  { %19020 = vmatpush3.bf16.msra.mxu0 %v21765_v8 }
0x2fc5   :  { %19021 = vmatprep.subr.bf16.mxu0 %v21766_v26 }
0x2fc8   :  { %19022 = vmatpush3.bf16.msra.mxu0 %v21766_v26  ;;  %v9164_v26 = vld [vmem:[#allocation3 + $0x21] sm:$0xff] }
0x2fc9   :  { %19023 = vmatprep.subr.bf16.mxu0 %v21767_v7 }
0x2fcc   :  { %19024 = vmatpush3.bf16.msra.mxu0 %v21767_v7 }
0x2fcd   :  { %19025 = vmatprep.subr.bf16.mxu0 %v21768_v6 }
0x2fd0   :  { %19026 = vmatpush3.bf16.msra.mxu0 %v21768_v6  ;;  %v21778_v6 = vld [vmem:[#allocation5 + $0xb08] sm:$0xff]  }
0x2fd1   :  { %19031 = vmatprep.subr.bf16.mxu0 %v21769_v36 }
0x3086   :  { %v19007_v15 = vpop.f32.mrb[108].mxu0 }
0x3087   :  { %v8863_v10 = vpop.f32.mrb[109].mxu0 }
0x3088   :  { %v8882_v16 = vadd.f32 %v19007_v15, %v8863_v10  ;;  %v21779_v15 = vld [vmem:[#allocation5 + $0xb10] sm:$0xff]   ;;  %v21780_v10 = vld [vmem:[#allocation5 + $0xb18] sm:$0xff]  }
0x308a   :  { %v19010_v17 = vpop.f32.mrb[110].mxu0 }
0x308b   :  { %v8873_v18 = vpop.f32.mrb[111].mxu0 }
0x308c   :  { %v8883_v20 = vadd.f32 %v8882_v16, %v8873_v18  ;;  %v21781_v16 = vld [vmem:[#allocation5 + $0xb20] sm:$0xff]   ;;  %v21783_v18 = vld [vmem:[#allocation5 + $0xb30] sm:$0xff]  }
0x308e   :  { %v8884_v21 = vadd.f32 %v19010_v17, %v8883_v20  ;;  %v21782_v17 = vld [vmem:[#allocation5 + $0xb28] sm:$0xff]   ;;  %v21784_v20 = vld [vmem:[#allocation5 + $0xb38] sm:$0xff]  }
0x3090   :  { %v8885_v22 = vrot.slane %v8884_v21, 4 }
0x3092   :  { %v8886_v39 = vadd.f32 %v8885_v22, %v8884_v21  ;;  %v9166_v22 = vld [vmem:[#allocation3 + $0x51] sm:$0xff] }
0x3094   :  { %v8887_v38 = vrot.slane %v8886_v39, 2 }
0x3096   :  { %v8888_v58 = vadd.f32 %v8887_v38, %v8886_v39 }
0x3098   :  { %v8889_v41 = vrot.slane %v8888_v58, 1 }
0x309a   :  { %v8890_v24 = vadd.f32 %v8889_v41, %v8888_v58 }
0x309c   :  { %v8891_v25 = vmul.f32 0.001953125, %v8890_v24 }
0x309e   :  { %v8893_v29 = vadd.f32 1e-05, %v8891_v25 }
0x30a0   :  { %22087 = vrsqrt.f32 %v8893_v29 }
0x30aa   :  { %v22088_v13 = vpop.eup %22087 }
0x30ab   :  { %v8895_v46 = vmul.f32 %v22088_v13, %v8892_v35 }
0x30ad   :  { %v8897_v14 = vmul.f32 %v8895_v46, %v8788_v3  ;;  %v8902_v42 = vrot.slane %v8895_v46, %v22456_v33 }
0x30af   :  { %v8898_v45 = vsub.f32 %v8896_v54, %v8897_v14  ;;  %v8903_v47 = vmul.f32 %v8902_v42, %v23381_v56  ;;  %v8904_v48 = vmul.f32 %v8902_v42, %v23386_v31  ;;  %v8905_v2 = vmul.f32 %v23379_v50, %v8902_v42  ;;  %v8923_v50 = vld [vmem:[#allocation3 + $0x7] sm:$0xff] }
0x30b0   :  { %v8906_v4 = vmul.f32 %v23383_v30, %v8902_v42  ;;  %v21771_v30 = vld [vmem:[#allocation5 + $0xa90] sm:$0xff]  }
0x30b1   :  { %v8910_v49 = vrot.slane %v8898_v45, %v22456_v33 }
0x30b3   :  { %v8911_v62 = vadd.f32 %v8910_v49, %v8903_v47  ;;  %v8912_v44 = vadd.f32 %v8910_v49, %v8904_v48  ;;  %v8913_v61 = vadd.f32 %v8910_v49, %v8905_v2  ;;  %v8914_v60 = vadd.f32 %v8910_v49, %v8906_v4 }
0x30b5   :  { %v8915_v59 = vmax.f32 %v8911_v62, 0.0  ;;  %v8916_v1 = vmax.f32 %v8912_v44, 0.0  ;;  %v8917_v3 = vmax.f32 %v8913_v61, 0.0  ;;  %v8918_v51 = vmax.f32 %v8914_v60, 0.0 }
0x30b7   :  { %8919 = vst [vmem:[#allocation3 + $0x10] sm:$0xff] %v8915_v59  ;;  %8920 = vst [vmem:[#allocation3 + $0x18] sm:$0xff] %v8916_v1  ;;  %v8950_v56 = vpack.c.bf16 %v8916_v1, %v8915_v59  ;;  %v8951_v31 = vpack.c.bf16 %v8918_v51, %v8917_v3 }
0x30b8   :  { %8921 = vst [vmem:[#allocation3 + $0x40] sm:$0xff] %v8917_v3  ;;  %8922 = vst [vmem:[#allocation3 + $0x48] sm:$0xff] %v8918_v51 }
0x30b9   :  { %19027 = vmatprep.mubr.bf16.mxu0 %v8950_v56  ;;  %v21785_v56 = vld [vmem:[#allocation5 + $0xb40] sm:$0xff]  }
0x30ba   :  { %19028 = vmatmul.mubr.bf16.vlgmr.msra.gmra.mrb[112].mxu0 %v8951_v31  ;;  %v21786_v31 = vld [vmem:[#allocation5 + $0xb48] sm:$0xff]  }
0x30bb   :  { %19032 = vmatpush3.bf16.msra.mxu0 %v21769_v36 }
0x30bc   :  { %19033 = vmatprep.subr.bf16.mxu0 %v21770_v52 }
0x30be   :  { %v8924_v53 = vld [vmem:[#allocation3 + $0xf] sm:$0xff]  ;;  %v9163_v8 = vld [vmem:[#allocation3 + $0x19] sm:$0xff] }
0x30bf   :  { %v8927_v57 = vpack.c.bf16 %v8924_v53, %v8923_v50  ;;  %19034 = vmatpush3.bf16.msra.mxu0 %v21770_v52  ;;  %v8926_v28 = vld [vmem:[#allocation3 + $0x3f] sm:$0xff]  ;;  %v9167_v36 = vpack.c.bf16 %v9164_v26, %v9163_v8  ;;  %v9165_v21 = vld [vmem:[#allocation3 + $0x49] sm:$0xff] }
0x30c0   :  { %19035 = vmatprep.subr.bf16.mxu0 %v21771_v30  ;;  %v8928_v7 = vpack.c.bf16 %v8926_v28, %v8925_v5  ;;  %v9168_v39 = vpack.c.bf16 %v9166_v22, %v9165_v21  ;;  %v21787_v52 = vld [vmem:[#allocation5 + $0xb50] sm:$0xff]   ;;  %v21788_v50 = vld [vmem:[#allocation5 + $0xb58] sm:$0xff]   ;;  %v21790_v53 = vld [vmem:[#allocation5 + $0xb68] sm:$0xff]  }
0x30c1   :  { %19047 = vmatprep.mubr.bf16.mxu0 %v8927_v57  ;;  %v21791_v57 = vld [vmem:[#allocation5 + $0xb70] sm:$0xff]   ;;  %v9489_v21 = vld [vmem:[#allocation12 + $0x10] sm:$0x1] }
0x30c3   :  { %19036 = vmatpush3.bf16.msra.mxu0 %v21771_v30  ;;  %v21789_v30 = vld [vmem:[#allocation5 + $0xb60] sm:$0xff]  }
0x30c4   :  { %19037 = vmatprep.subr.bf16.mxu0 %v21772_v11 }
0x30c7   :  { %19038 = vmatpush3.bf16.msra.mxu0 %v21772_v11  ;;  %v21792_v11 = vld [vmem:[#allocation5 + $0xb78] sm:$0xff]  }
0x30c8   :  { %19039 = vmatprep.subr.bf16.mxu0 %v21773_v43 }
0x30cb   :  { %19040 = vmatpush3.bf16.msra.mxu0 %v21773_v43 }
0x30cc   :  { %19041 = vmatprep.subr.bf16.mxu0 %v21774_v55 }
0x30cf   :  { %19042 = vmatpush3.bf16.msra.mxu0 %v21774_v55 }
0x30d0   :  { %19043 = vmatprep.subr.bf16.mxu0 %v21775_v40 }
0x30d3   :  { %19044 = vmatpush3.bf16.msra.mxu0 %v21775_v40 }
0x30d4   :  { %19045 = vmatprep.subr.bf16.mxu0 %v21776_v63 }
0x30d7   :  { %19046 = vmatpush3.bf16.msra.mxu0 %v21776_v63 }
0x30d8   :  { %19051 = vmatprep.subr.bf16.mxu0 %v21777_v0 }
0x30da   :  { %19048 = vmatmul.mubr.bf16.vlgmr.msra.gmra.mrb[112].mxu0 %v8928_v7 }
0x30db   :  { %19052 = vmatpush3.bf16.msra.mxu0 %v21777_v0  ;;  %19067 = vmatprep.mubr.bf16.mxu0 %v9167_v36 }
0x30dc   :  { %19053 = vmatprep.subr.bf16.mxu0 %v21778_v6 }
0x30df   :  { %19054 = vmatpush3.bf16.msra.mxu0 %v21778_v6 }
0x30e0   :  { %19055 = vmatprep.subr.bf16.mxu0 %v21779_v15 }
0x30e3   :  { %19056 = vmatpush3.bf16.msra.mxu0 %v21779_v15 }
0x30e4   :  { %19057 = vmatprep.subr.bf16.mxu0 %v21780_v10 }
0x30e7   :  { %19058 = vmatpush3.bf16.msra.mxu0 %v21780_v10 }
0x30e8   :  { %19059 = vmatprep.subr.bf16.mxu0 %v21781_v16 }
0x30eb   :  { %19060 = vmatpush3.bf16.msra.mxu0 %v21781_v16 }
0x30ec   :  { %19061 = vmatprep.subr.bf16.mxu0 %v21782_v17 }
0x30ef   :  { %19062 = vmatpush3.bf16.msra.mxu0 %v21782_v17  ;;  %v9485_v17 = vld [vmem:[#allocation10 + $0x10] sm:$0x1] }
0x30f0   :  { %19063 = vmatprep.subr.bf16.mxu0 %v21783_v18 }
0x30f3   :  { %19064 = vmatpush3.bf16.msra.mxu0 %v21783_v18 }
0x30f4   :  { %19065 = vmatprep.subr.bf16.mxu0 %v21784_v20 }
0x30f7   :  { %19066 = vmatpush3.bf16.msra.mxu0 %v21784_v20 }
0x30f8   :  { %20872 = vmatprep.subr.bf16.mxu0 %v22363_v9 }
0x30fa   :  { %19068 = vmatmul.mubr.bf16.vlgmr.msra.gmra.mrb[112].mxu0 %v9168_v39 }
0x30fb   :  { %20874 = vmatpush3.bf16.msra.mxu0 %v22363_v9 }
0x30fc   :  { %20876 = vmatprep.subr.bf16.mxu0 %v22365_v12 }
0x30ff   :  { %20878 = vmatpush3.bf16.msra.mxu0 %v22365_v12 }
0x3100   :  { %20880 = vmatprep.subr.bf16.mxu0 %v22370_v19 }
0x3103   :  { %20882 = vmatpush3.bf16.msra.mxu0 %v22370_v19 }
0x3104   :  { %20884 = vmatprep.subr.bf16.mxu0 %v22374_v23 }
0x3107   :  { %20886 = vmatpush3.bf16.msra.mxu0 %v22374_v23 }
0x3108   :  { %20888 = vmatprep.subr.bf16.mxu0 %v22378_v27 }
0x310b   :  { %20890 = vmatpush3.bf16.msra.mxu0 %v22378_v27 }
0x310c   :  { %20892 = vmatprep.subr.bf16.mxu0 %v22388_v32 }
0x310f   :  { %20894 = vmatpush3.bf16.msra.mxu0 %v22388_v32 }
0x3110   :  { %20896 = vmatprep.subr.bf16.mxu0 %v22392_v34 }
0x3113   :  { %20898 = vmatpush3.bf16.msra.mxu0 %v22392_v34 }
0x3114   :  { %20900 = vmatprep.subr.bf16.mxu0 %v22411_v37 }
0x3117   :  { %20902 = vmatpush3.bf16.msra.mxu0 %v22411_v37 }
0x3118   :  { %20904 = vmatprep.subr.bf16.mxu0 %v22363_v9 }
0x31cd   :  { %v23433_v38 = vpop.f32.mrb[112].mxu0 }
0x31ce   :  { %v23435_v58 = vpop.f32.mrb[113].mxu0 }
0x31cf   :  { %v23437_v41 = vpop.f32.mrb[114].mxu0  ;;  %19103 = vmatprep.mubr.f32.mxu0 %v23435_v58 }
0x31d0   :  { %v23440_v24 = vpop.f32.mrb[115].mxu0 }
0x31d1   :  { %19104 = vmatmul.mubr.f32.vlgmr.msra.gmra.mrb[116].mxu0 %v23440_v24 }
0x31d2   :  { %19106 = vmatprep.mubr.f32.mxu0 %v23433_v38  ;;  %20906 = vmatpush3.bf16.msra.mxu0 %v22363_v9 }
0x31d3   :  { %20908 = vmatprep.subr.bf16.mxu0 %v22365_v12 }
0x31d5   :  { %19107 = vmatmul.mubr.f32.gmra.mrb[118].mxu0 %v23437_v41 }
0x31d6   :  { %20910 = vmatpush3.bf16.msra.mxu0 %v22365_v12 }
0x31d7   :  { %20912 = vmatprep.subr.bf16.mxu0 %v22370_v19 }
0x31da   :  { %20914 = vmatpush3.bf16.msra.mxu0 %v22370_v19 }
0x31db   :  { %20916 = vmatprep.subr.bf16.mxu0 %v22374_v23 }
0x31de   :  { %20918 = vmatpush3.bf16.msra.mxu0 %v22374_v23 }
0x31df   :  { %20920 = vmatprep.subr.bf16.mxu0 %v22378_v27 }
0x31e2   :  { %20922 = vmatpush3.bf16.msra.mxu0 %v22378_v27 }
0x31e3   :  { %20924 = vmatprep.subr.bf16.mxu0 %v22388_v32 }
0x31e6   :  { %20926 = vmatpush3.bf16.msra.mxu0 %v22388_v32 }
0x31e7   :  { %20928 = vmatprep.subr.bf16.mxu0 %v22392_v34 }
0x31ea   :  { %20930 = vmatpush3.bf16.msra.mxu0 %v22392_v34 }
0x31eb   :  { %20932 = vmatprep.subr.bf16.mxu0 %v22411_v37 }
0x31ee   :  { %20934 = vmatpush3.bf16.msra.mxu0 %v22411_v37 }
0x31ef   :  { %19147 = vmatprep.subr.bf16.mxu0 %v21785_v56 }
0x32a4   :  { %v19105_v25 = vpop.f32.mrb[116].mxu0 }
0x32a5   :  { %v9353_v29 = vpop.f32.mrb[117].mxu0 }
0x32a6   :  { %v9372_v35 = vadd.f32 %v19105_v25, %v9353_v29 }
0x32a8   :  { %v19108_v13 = vpop.f32.mrb[118].mxu0 }
0x32a9   :  { %v9363_v46 = vpop.f32.mrb[119].mxu0 }
0x32aa   :  { %v9373_v54 = vadd.f32 %v9372_v35, %v9363_v46 }
0x32ac   :  { %v9374_v14 = vadd.f32 %v19108_v13, %v9373_v54 }
0x32ae   :  { %v9375_v42 = vrot.slane %v9374_v14, 4 }
0x32b0   :  { %v9376_v45 = vadd.f32 %v9375_v42, %v9374_v14 }
0x32b2   :  { %v9377_v47 = vrot.slane %v9376_v45, 2 }
0x32b4   :  { %v9378_v48 = vadd.f32 %v9377_v47, %v9376_v45 }
0x32b6   :  { %v9379_v2 = vrot.slane %v9378_v48, 1 }
0x32b8   :  { %v9380_v4 = vadd.f32 %v9379_v2, %v9378_v48 }
0x32ba   :  { %v9381_v49 = vmul.f32 0.001953125, %v9380_v4 }
0x32bc   :  { %v9382_v62 = vsub.f32 %v23435_v58, %v9381_v49  ;;  %v9383_v44 = vsub.f32 %v23440_v24, %v9381_v49  ;;  %v9384_v61 = vsub.f32 %v23433_v38, %v9381_v49  ;;  %v9385_v1 = vsub.f32 %v23437_v41, %v9381_v49 }
0x32be   :  { %v9386_v60 = vmul.f32 %v9382_v62, %v9382_v62  ;;  %v9387_v59 = vmul.f32 %v9383_v44, %v9383_v44  ;;  %v9388_v3 = vmul.f32 %v9384_v61, %v9384_v61  ;;  %v9389_v51 = vmul.f32 %v9385_v1, %v9385_v1  ;;  %v22119_v62 = vld [vmem:[%s23950_s0 + $0x10] sm:$0xff]  ;;  %v22120_v61 = vld [vmem:[%s23950_s0 + $0x18] sm:$0xff] }
0x32c0   :  { %19141 = vmatprep.mubr.f32.mxu0 %v9386_v60 }
0x32c1   :  { %19142 = vmatmul.mubr.f32.vlgmr.msra.gmra.mrb[120].mxu0 %v9387_v59 }
0x32c2   :  { %19144 = vmatprep.mubr.f32.mxu0 %v9388_v3  ;;  %19148 = vmatpush3.bf16.msra.mxu0 %v21785_v56 }
0x32c3   :  { %19149 = vmatprep.subr.bf16.mxu0 %v21786_v31 }
0x32c5   :  { %19145 = vmatmul.mubr.f32.gmra.mrb[122].mxu0 %v9389_v51 }
0x32c6   :  { %19150 = vmatpush3.bf16.msra.mxu0 %v21786_v31 }
0x32c7   :  { %19151 = vmatprep.subr.bf16.mxu0 %v21787_v52 }
0x32ca   :  { %19152 = vmatpush3.bf16.msra.mxu0 %v21787_v52 }
0x32cb   :  { %19153 = vmatprep.subr.bf16.mxu0 %v21788_v50 }
0x32ce   :  { %19154 = vmatpush3.bf16.msra.mxu0 %v21788_v50 }
0x32cf   :  { %19155 = vmatprep.subr.bf16.mxu0 %v21789_v30 }
0x32d2   :  { %19156 = vmatpush3.bf16.msra.mxu0 %v21789_v30 }
0x32d3   :  { %19157 = vmatprep.subr.bf16.mxu0 %v21790_v53 }
0x32d6   :  { %19158 = vmatpush3.bf16.msra.mxu0 %v21790_v53 }
0x32d7   :  { %19159 = vmatprep.subr.bf16.mxu0 %v21791_v57 }
0x32da   :  { %19160 = vmatpush3.bf16.msra.mxu0 %v21791_v57 }
0x32db   :  { %19161 = vmatprep.subr.bf16.mxu0 %v21792_v11 }
0x32de   :  { %19162 = vmatpush3.bf16.msra.mxu0 %v21792_v11 }
0x32df   :  { %20936 = vmatprep.subr.bf16.mxu0 %v22363_v9 }
0x3394   :  { %v19143_v43 = vpop.f32.mrb[120].mxu0 }
0x3395   :  { %v9456_v55 = vpop.f32.mrb[121].mxu0 }
0x3396   :  { %v9475_v40 = vadd.f32 %v19143_v43, %v9456_v55 }
0x3398   :  { %v19146_v63 = vpop.f32.mrb[122].mxu0 }
0x3399   :  { %v9466_v0 = vpop.f32.mrb[123].mxu0 }
0x339a   :  { %v9476_v5 = vadd.f32 %v9475_v40, %v9466_v0 }
0x339c   :  { %v9477_v28 = vadd.f32 %v19146_v63, %v9476_v5 }
0x339e   :  { %v9478_v8 = vrot.slane %v9477_v28, 4 }
0x33a0   :  { %v9479_v26 = vadd.f32 %v9478_v8, %v9477_v28 }
0x33a2   :  { %v9480_v7 = vrot.slane %v9479_v26, 2 }
0x33a4   :  { %v9481_v6 = vadd.f32 %v9480_v7, %v9479_v26 }
0x33a6   :  { %v9482_v36 = vrot.slane %v9481_v6, 1 }
0x33a8   :  { %v9483_v15 = vadd.f32 %v9482_v36, %v9481_v6 }
0x33aa   :  { %v9484_v10 = vmul.f32 0.001953125, %v9483_v15 }
0x33ac   :  { %v9486_v16 = vadd.f32 1e-05, %v9484_v10 }
0x33ae   :  { %22089 = vrsqrt.f32 %v9486_v16 }
0x33b8   :  { %v22090_v18 = vpop.eup %22089 }
0x33b9   :  { %v9488_v20 = vmul.f32 %v22090_v18, %v9485_v17  ;;  %v21793_v18 = vld [vmem:[#allocation5 + $0xb80] sm:$0xff]  }
0x33bb   :  { %v9490_v22 = vmul.f32 %v9488_v20, %v9381_v49  ;;  %v9495_v39 = vrot.slane %v9488_v20, %v22456_v33  ;;  %v21794_v20 = vld [vmem:[#allocation5 + $0xb88] sm:$0xff]  }
0x33bd   :  { %v9491_v25 = vsub.f32 %v9489_v21, %v9490_v22  ;;  %v9496_v29 = vmul.f32 %v9495_v39, %v23435_v58  ;;  %v9497_v35 = vmul.f32 %v9495_v39, %v23440_v24  ;;  %v9498_v13 = vmul.f32 %v23433_v38, %v9495_v39  ;;  %v22117_v58 = vld [vmem:[%s23950_s0] sm:$0xff]  ;;  %v22118_v38 = vld [vmem:[%s23950_s0 + $0x8] sm:$0xff]  ;;  %v21795_v21 = vld [vmem:[#allocation5 + $0xb90] sm:$0xff]  }
0x33be   :  { %v9499_v46 = vmul.f32 %v23437_v41, %v9495_v39  ;;  %v21796_v22 = vld [vmem:[#allocation5 + $0xb98] sm:$0xff]   ;;  %v21797_v39 = vld [vmem:[#allocation5 + $0xba0] sm:$0xff]  }
0x33bf   :  { %v9503_v54 = vrot.slane %v9491_v25, %v22456_v33  ;;  %v21798_v25 = vld [vmem:[#allocation5 + $0xba8] sm:$0xff]  }
0x33c1   :  { %v9504_v14 = vadd.f32 %v9503_v54, %v9496_v29  ;;  %v9505_v42 = vadd.f32 %v9503_v54, %v9497_v35  ;;  %v9506_v45 = vadd.f32 %v9503_v54, %v9498_v13  ;;  %v9507_v47 = vadd.f32 %v9503_v54, %v9499_v46  ;;  %v21799_v29 = vld [vmem:[#allocation5 + $0xbb0] sm:$0xff]   ;;  %v21800_v35 = vld [vmem:[#allocation5 + $0xbb8] sm:$0xff]  }
0x33c3   :  { %v9508_v48 = vmax.f32 %v9504_v14, 0.0  ;;  %v9509_v2 = vmax.f32 %v9505_v42, 0.0  ;;  %v9510_v4 = vmax.f32 %v9506_v45, 0.0  ;;  %v9511_v49 = vmax.f32 %v9507_v47, 0.0 }
0x33c5   :  { %9512 = vst [vmem:[#allocation4 + $0x50] sm:$0xff] %v9508_v48  ;;  %9513 = vst [vmem:[#allocation4 + $0x80] sm:$0xff] %v9509_v2  ;;  %v9516_v24 = vadd.f32 %v22117_v58, %v9508_v48  ;;  %v9517_v41 = vadd.f32 %v22118_v38, %v9509_v2  ;;  %v9518_v44 = vadd.f32 %v22119_v62, %v9510_v4  ;;  %v9834_v62 = vld [vmem:[#allocation10 + $0x11] sm:$0x1] }
0x33c6   :  { %9514 = vst [vmem:[#allocation4 + $0x110] sm:$0xff] %v9510_v4  ;;  %9515 = vst [vmem:[#allocation4 + $0x140] sm:$0xff] %v9511_v49  ;;  %v9519_v60 = vadd.f32 %v22120_v61, %v9511_v49 }
0x33c7   :  { %v9520_v59 = vpack.c.bf16 %v9517_v41, %v9516_v24 }
0x33c8   :  { %v9521_v1 = vpack.c.bf16 %v9519_v60, %v9518_v44  ;;  %v9838_v60 = vld [vmem:[#allocation12 + $0x11] sm:$0x1] }
0x33c9   :  { %19163 = vmatprep.mubr.bf16.mxu0 %v9520_v59 }
0x33ca   :  { %19164 = vmatmul.mubr.bf16.vlgmr.msra.gmra.mrb[124].mxu0 %v9521_v1 }
0x33cb   :  { %20938 = vmatpush3.bf16.msra.mxu0 %v22363_v9 }
0x33cc   :  { %20940 = vmatprep.subr.bf16.mxu0 %v22365_v12 }
0x33cf   :  { %20942 = vmatpush3.bf16.msra.mxu0 %v22365_v12 }
0x33d0   :  { %20944 = vmatprep.subr.bf16.mxu0 %v22370_v19 }
0x33d3   :  { %20946 = vmatpush3.bf16.msra.mxu0 %v22370_v19 }
0x33d4   :  { %20948 = vmatprep.subr.bf16.mxu0 %v22374_v23 }
0x33d7   :  { %20950 = vmatpush3.bf16.msra.mxu0 %v22374_v23 }
0x33d8   :  { %20952 = vmatprep.subr.bf16.mxu0 %v22378_v27 }
0x33db   :  { %20954 = vmatpush3.bf16.msra.mxu0 %v22378_v27 }
0x33dc   :  { %20956 = vmatprep.subr.bf16.mxu0 %v22388_v32 }
0x33df   :  { %20958 = vmatpush3.bf16.msra.mxu0 %v22388_v32 }
0x33e0   :  { %20960 = vmatprep.subr.bf16.mxu0 %v22392_v34 }
0x33e3   :  { %20962 = vmatpush3.bf16.msra.mxu0 %v22392_v34 }
0x33e4   :  { %20964 = vmatprep.subr.bf16.mxu0 %v22411_v37 }
0x33e7   :  { %20966 = vmatpush3.bf16.msra.mxu0 %v22411_v37 }
0x33e8   :  { %19243 = vmatprep.subr.bf16.mxu0 %v21793_v18 }
0x349d   :  { %v23498_v3 = vpop.f32.mrb[124].mxu0 }
0x349e   :  { %v23500_v51 = vpop.f32.mrb[125].mxu0 }
0x349f   :  { %v23502_v56 = vpop.f32.mrb[126].mxu0  ;;  %19199 = vmatprep.mubr.f32.mxu0 %v23500_v51 }
0x34a0   :  { %v23505_v31 = vpop.f32.mrb[127].mxu0 }
0x34a1   :  { %19200 = vmatmul.mubr.f32.vlgmr.msra.gmra.mrb[128].mxu0 %v23505_v31 }
0x34a2   :  { %19202 = vmatprep.mubr.f32.mxu0 %v23498_v3  ;;  %19244 = vmatpush3.bf16.msra.mxu0 %v21793_v18 }
0x34a3   :  { %19245 = vmatprep.subr.bf16.mxu0 %v21794_v20 }
0x34a5   :  { %19203 = vmatmul.mubr.f32.gmra.mrb[130].mxu0 %v23502_v56 }
0x34a6   :  { %19246 = vmatpush3.bf16.msra.mxu0 %v21794_v20 }
0x34a7   :  { %19247 = vmatprep.subr.bf16.mxu0 %v21795_v21 }
0x34aa   :  { %19248 = vmatpush3.bf16.msra.mxu0 %v21795_v21 }
0x34ab   :  { %19249 = vmatprep.subr.bf16.mxu0 %v21796_v22 }
0x34ae   :  { %19250 = vmatpush3.bf16.msra.mxu0 %v21796_v22 }
0x34af   :  { %19251 = vmatprep.subr.bf16.mxu0 %v21797_v39 }
0x34b2   :  { %19252 = vmatpush3.bf16.msra.mxu0 %v21797_v39 }
0x34b3   :  { %19253 = vmatprep.subr.bf16.mxu0 %v21798_v25 }
0x34b6   :  { %19254 = vmatpush3.bf16.msra.mxu0 %v21798_v25 }
0x34b7   :  { %19255 = vmatprep.subr.bf16.mxu0 %v21799_v29 }
0x34ba   :  { %19256 = vmatpush3.bf16.msra.mxu0 %v21799_v29 }
0x34bb   :  { %19257 = vmatprep.subr.bf16.mxu0 %v21800_v35 }
0x34be   :  { %19258 = vmatpush3.bf16.msra.mxu0 %v21800_v35 }
0x34bf   :  { %21032 = vmatprep.subr.bf16.mxu0 %v22363_v9 }
0x3574   :  { %v19201_v52 = vpop.f32.mrb[128].mxu0 }
0x3575   :  { %v9702_v50 = vpop.f32.mrb[129].mxu0 }
0x3576   :  { %v9721_v30 = vadd.f32 %v19201_v52, %v9702_v50 }
0x3578   :  { %v19204_v53 = vpop.f32.mrb[130].mxu0 }
0x3579   :  { %v9712_v57 = vpop.f32.mrb[131].mxu0 }
0x357a   :  { %v9722_v11 = vadd.f32 %v9721_v30, %v9712_v57 }
0x357c   :  { %v9723_v43 = vadd.f32 %v19204_v53, %v9722_v11 }
0x357e   :  { %v9724_v55 = vrot.slane %v9723_v43, 4 }
0x3580   :  { %v9725_v40 = vadd.f32 %v9724_v55, %v9723_v43 }
0x3582   :  { %v9726_v63 = vrot.slane %v9725_v40, 2 }
0x3584   :  { %v9727_v0 = vadd.f32 %v9726_v63, %v9725_v40 }
0x3586   :  { %v9728_v5 = vrot.slane %v9727_v0, 1 }
0x3588   :  { %v9729_v28 = vadd.f32 %v9728_v5, %v9727_v0 }
0x358a   :  { %v23510_v8 = vmul.f32 0.001953125, %v9729_v28 }
0x358c   :  { %v9731_v26 = vsub.f32 %v23500_v51, %v23510_v8  ;;  %v9732_v7 = vsub.f32 %v23505_v31, %v23510_v8  ;;  %v9733_v6 = vsub.f32 %v23498_v3, %v23510_v8  ;;  %v9734_v10 = vsub.f32 %v23502_v56, %v23510_v8 }
0x358e   :  { %v9735_v36 = vmul.f32 %v9731_v26, %v9731_v26  ;;  %v9736_v15 = vmul.f32 %v9732_v7, %v9732_v7  ;;  %v9737_v16 = vmul.f32 %v9733_v6, %v9733_v6  ;;  %v9738_v17 = vmul.f32 %v9734_v10, %v9734_v10 }
0x3590   :  { %19237 = vmatprep.mubr.f32.mxu1 %v9735_v36 }
0x3591   :  { %19238 = vmatmul.mubr.f32.vlgmr.msra.gmra.mrb[80].mxu1 %v9736_v15 }
0x3592   :  { %19240 = vmatprep.mubr.f32.mxu1 %v9737_v16  ;;  %21002 = vmatpush3.bf16.msra.mxu1 %v22363_v9 }
0x3593   :  { %21004 = vmatprep.subr.bf16.mxu1 %v22365_v12 }
0x3595   :  { %19241 = vmatmul.mubr.f32.gmra.mrb[82].mxu1 %v9738_v17 }
0x3596   :  { %21006 = vmatpush3.bf16.msra.mxu1 %v22365_v12 }
0x3597   :  { %21008 = vmatprep.subr.bf16.mxu1 %v22370_v19 }
0x359a   :  { %21010 = vmatpush3.bf16.msra.mxu1 %v22370_v19 }
0x359b   :  { %21012 = vmatprep.subr.bf16.mxu1 %v22374_v23 }
0x359e   :  { %21014 = vmatpush3.bf16.msra.mxu1 %v22374_v23 }
0x359f   :  { %21016 = vmatprep.subr.bf16.mxu1 %v22378_v27 }
0x35a2   :  { %21018 = vmatpush3.bf16.msra.mxu1 %v22378_v27 }
0x35a3   :  { %21020 = vmatprep.subr.bf16.mxu1 %v22388_v32 }
0x35a6   :  { %21022 = vmatpush3.bf16.msra.mxu1 %v22388_v32 }
0x35a7   :  { %21024 = vmatprep.subr.bf16.mxu1 %v22392_v34 }
0x35aa   :  { %21026 = vmatpush3.bf16.msra.mxu1 %v22392_v34 }
0x35ab   :  { %21028 = vmatprep.subr.bf16.mxu1 %v22411_v37 }
0x35ae   :  { %21030 = vmatpush3.bf16.msra.mxu1 %v22411_v37 }
0x3664   :  { %v19239_v13 = vpop.f32.mrb[80].mxu1 }
0x3665   :  { %v9805_v46 = vpop.f32.mrb[81].mxu1 }
0x3666   :  { %v9824_v54 = vadd.f32 %v19239_v13, %v9805_v46 }
0x3668   :  { %v19242_v14 = vpop.f32.mrb[82].mxu1 }
0x3669   :  { %v9815_v42 = vpop.f32.mrb[83].mxu1 }
0x366a   :  { %v9825_v45 = vadd.f32 %v9824_v54, %v9815_v42 }
0x366c   :  { %v9826_v47 = vadd.f32 %v19242_v14, %v9825_v45 }
0x366e   :  { %v9827_v48 = vrot.slane %v9826_v47, 4 }
0x3670   :  { %v9828_v2 = vadd.f32 %v9827_v48, %v9826_v47 }
0x3672   :  { %v9829_v4 = vrot.slane %v9828_v2, 2 }
0x3674   :  { %v9830_v49 = vadd.f32 %v9829_v4, %v9828_v2  ;;  %v21801_v2 = vld [vmem:[#allocation5 + $0xc00] sm:$0xff]   ;;  %v21802_v4 = vld [vmem:[#allocation5 + $0xc08] sm:$0xff]  }
0x3675   :  { %19339 = vmatprep.subr.bf16.mxu1 %v21801_v2 }
0x3676   :  { %v9831_v58 = vrot.slane %v9830_v49, 1 }
0x3678   :  { %v9832_v24 = vadd.f32 %v9831_v58, %v9830_v49  ;;  %v21803_v49 = vld [vmem:[#allocation5 + $0xc10] sm:$0xff]   ;;  %v21804_v58 = vld [vmem:[#allocation5 + $0xc18] sm:$0xff]  }
0x367a   :  { %v9833_v38 = vmul.f32 0.001953125, %v9832_v24  ;;  %v21805_v24 = vld [vmem:[#allocation5 + $0xc20] sm:$0xff]  }
0x367c   :  { %v9835_v41 = vadd.f32 1e-05, %v9833_v38  ;;  %v21806_v38 = vld [vmem:[#allocation5 + $0xc28] sm:$0xff]  }
0x367e   :  { %22091 = vrsqrt.f32 %v9835_v41  ;;  %v21807_v41 = vld [vmem:[#allocation5 + $0xc30] sm:$0xff]  }
0x3688   :  { %v22092_v44 = vpop.eup %22091 }
0x3689   :  { %v9837_v61 = vmul.f32 %v22092_v44, %v9834_v62  ;;  %v21808_v62 = vld [vmem:[#allocation5 + $0xc38] sm:$0xff]   ;;  %v21809_v44 = vld [vmem:[#allocation5 + $0xbc0] sm:$0xff]  }
0x368b   :  { %v9839_v59 = vmul.f32 %v9837_v61, %v23510_v8  ;;  %v9844_v1 = vrot.slane %v9837_v61, %v22456_v33 }
0x368d   :  { %v9840_v52 = vsub.f32 %v9838_v60, %v9839_v59  ;;  %v9845_v50 = vmul.f32 %v9844_v1, %v23500_v51  ;;  %v9846_v30 = vmul.f32 %v9844_v1, %v23505_v31  ;;  %v9847_v53 = vmul.f32 %v23498_v3, %v9844_v1 }
0x368e   :  { %v9848_v57 = vmul.f32 %v23502_v56, %v9844_v1 }
0x368f   :  { %v9852_v11 = vrot.slane %v9840_v52, %v22456_v33 }
0x3691   :  { %v9853_v43 = vadd.f32 %v9852_v11, %v9845_v50  ;;  %v9854_v55 = vadd.f32 %v9852_v11, %v9846_v30  ;;  %v9855_v40 = vadd.f32 %v9852_v11, %v9847_v53  ;;  %v9856_v63 = vadd.f32 %v9852_v11, %v9848_v57 }
0x3693   :  { %v9857_v0 = vmax.f32 %v9853_v43, 0.0  ;;  %v9858_v5 = vmax.f32 %v9854_v55, 0.0  ;;  %v9859_v28 = vmax.f32 %v9855_v40, 0.0  ;;  %v9860_v8 = vmax.f32 %v9856_v63, 0.0 }
0x3695   :  { %v9861_v26 = vpack.c.bf16 %v9858_v5, %v9857_v0  ;;  %v9862_v7 = vpack.c.bf16 %v9860_v8, %v9859_v28  ;;  %v10175_v5 = vld [vmem:[#allocation10 + $0x12] sm:$0x1] }
0x3697   :  { %19259 = vmatprep.mubr.bf16.mxu0 %v9861_v26  ;;  %v10179_v26 = vld [vmem:[#allocation12 + $0x12] sm:$0x1] }
0x3698   :  { %19260 = vmatmul.mubr.bf16.vlgmr.msra.gmra.mrb[132].mxu0 %v9862_v7 }
0x3699   :  { %21034 = vmatpush3.bf16.msra.mxu0 %v22363_v9 }
0x369a   :  { %21036 = vmatprep.subr.bf16.mxu0 %v22365_v12 }
0x369d   :  { %21038 = vmatpush3.bf16.msra.mxu0 %v22365_v12 }
0x369e   :  { %21040 = vmatprep.subr.bf16.mxu0 %v22370_v19 }
0x36a1   :  { %21042 = vmatpush3.bf16.msra.mxu0 %v22370_v19 }
0x36a2   :  { %21044 = vmatprep.subr.bf16.mxu0 %v22374_v23 }
0x36a5   :  { %21046 = vmatpush3.bf16.msra.mxu0 %v22374_v23 }
0x36a6   :  { %21048 = vmatprep.subr.bf16.mxu0 %v22378_v27 }
0x36a9   :  { %21050 = vmatpush3.bf16.msra.mxu0 %v22378_v27 }
0x36aa   :  { %21052 = vmatprep.subr.bf16.mxu0 %v22388_v32 }
0x36ad   :  { %21054 = vmatpush3.bf16.msra.mxu0 %v22388_v32 }
0x36ae   :  { %21056 = vmatprep.subr.bf16.mxu0 %v22392_v34 }
0x36b1   :  { %21058 = vmatpush3.bf16.msra.mxu0 %v22392_v34 }
0x36b2   :  { %21060 = vmatprep.subr.bf16.mxu0 %v22411_v37 }
0x36b5   :  { %21062 = vmatpush3.bf16.msra.mxu0 %v22411_v37 }
0x36b6   :  { %21064 = vmatprep.subr.bf16.mxu0 %v22363_v9 }
0x376b   :  { %v23559_v3 = vpop.f32.mrb[132].mxu0 }
0x376c   :  { %v23561_v51 = vpop.f32.mrb[133].mxu0 }
0x376d   :  { %v23563_v56 = vpop.f32.mrb[134].mxu0  ;;  %19295 = vmatprep.mubr.f32.mxu1 %v23561_v51 }
0x376e   :  { %v23566_v31 = vpop.f32.mrb[135].mxu0 }
0x376f   :  { %19296 = vmatmul.mubr.f32.vlgmr.msra.gmra.mrb[84].mxu1 %v23566_v31 }
0x3770   :  { %19298 = vmatprep.mubr.f32.mxu1 %v23559_v3  ;;  %19340 = vmatpush3.bf16.msra.mxu1 %v21801_v2 }
0x3771   :  { %19341 = vmatprep.subr.bf16.mxu1 %v21802_v4 }
0x3773   :  { %19299 = vmatmul.mubr.f32.gmra.mrb[86].mxu1 %v23563_v56 }
0x3774   :  { %19342 = vmatpush3.bf16.msra.mxu1 %v21802_v4  ;;  %v21811_v4 = vld [vmem:[#allocation5 + $0xbd0] sm:$0xff]  }
0x3775   :  { %19343 = vmatprep.subr.bf16.mxu1 %v21803_v49 }
0x3778   :  { %19344 = vmatpush3.bf16.msra.mxu1 %v21803_v49  ;;  %v21812_v49 = vld [vmem:[#allocation5 + $0xbd8] sm:$0xff]  }
0x3779   :  { %19345 = vmatprep.subr.bf16.mxu1 %v21804_v58 }
0x377c   :  { %19346 = vmatpush3.bf16.msra.mxu1 %v21804_v58  ;;  %v21813_v58 = vld [vmem:[#allocation5 + $0xbe0] sm:$0xff]  }
0x377d   :  { %19347 = vmatprep.subr.bf16.mxu1 %v21805_v24 }
0x3780   :  { %19348 = vmatpush3.bf16.msra.mxu1 %v21805_v24  ;;  %v21814_v24 = vld [vmem:[#allocation5 + $0xbe8] sm:$0xff]  }
0x3781   :  { %19349 = vmatprep.subr.bf16.mxu1 %v21806_v38 }
0x3784   :  { %19350 = vmatpush3.bf16.msra.mxu1 %v21806_v38  ;;  %v21815_v38 = vld [vmem:[#allocation5 + $0xbf0] sm:$0xff]  }
0x3785   :  { %19351 = vmatprep.subr.bf16.mxu1 %v21807_v41 }
0x3788   :  { %19352 = vmatpush3.bf16.msra.mxu1 %v21807_v41  ;;  %v21816_v41 = vld [vmem:[#allocation5 + $0xbf8] sm:$0xff]  }
0x3789   :  { %19353 = vmatprep.subr.bf16.mxu1 %v21808_v62 }
0x378c   :  { %19354 = vmatpush3.bf16.msra.mxu1 %v21808_v62  ;;  %v21817_v62 = vld [vmem:[#allocation5 + $0xc40] sm:$0xff]  }
0x378d   :  { %19359 = vmatprep.subr.bf16.mxu1 %v21809_v44 }
0x3842   :  { %v19297_v6 = vpop.f32.mrb[84].mxu1 }
0x3843   :  { %v10043_v36 = vpop.f32.mrb[85].mxu1 }
0x3844   :  { %v10062_v15 = vadd.f32 %v19297_v6, %v10043_v36 }
0x3846   :  { %v19300_v10 = vpop.f32.mrb[86].mxu1 }
0x3847   :  { %v10053_v16 = vpop.f32.mrb[87].mxu1 }
0x3848   :  { %v10063_v17 = vadd.f32 %v10062_v15, %v10053_v16 }
0x384a   :  { %v10064_v18 = vadd.f32 %v19300_v10, %v10063_v17 }
0x384c   :  { %v10065_v20 = vrot.slane %v10064_v18, 4 }
0x384e   :  { %v10066_v21 = vadd.f32 %v10065_v20, %v10064_v18 }
0x3850   :  { %v10067_v22 = vrot.slane %v10066_v21, 2 }
0x3852   :  { %v10068_v39 = vadd.f32 %v10067_v22, %v10066_v21 }
0x3854   :  { %v10069_v25 = vrot.slane %v10068_v39, 1 }
0x3856   :  { %v10070_v29 = vadd.f32 %v10069_v25, %v10068_v39 }
0x3858   :  { %v23571_v35 = vmul.f32 0.001953125, %v10070_v29 }
0x385a   :  { %v10072_v13 = vsub.f32 %v23561_v51, %v23571_v35  ;;  %v10073_v46 = vsub.f32 %v23566_v31, %v23571_v35  ;;  %v10074_v54 = vsub.f32 %v23559_v3, %v23571_v35  ;;  %v10075_v45 = vsub.f32 %v23563_v56, %v23571_v35 }
0x385c   :  { %v10076_v14 = vmul.f32 %v10072_v13, %v10072_v13  ;;  %v10077_v42 = vmul.f32 %v10073_v46, %v10073_v46  ;;  %v10078_v47 = vmul.f32 %v10074_v54, %v10074_v54  ;;  %v10079_v48 = vmul.f32 %v10075_v45, %v10075_v45 }
0x385e   :  { %19333 = vmatprep.mubr.f32.mxu0 %v10076_v14 }
0x385f   :  { %19334 = vmatmul.mubr.f32.vlgmr.msra.gmra.mrb[136].mxu0 %v10077_v42 }
0x3860   :  { %19336 = vmatprep.mubr.f32.mxu0 %v10078_v47  ;;  %21066 = vmatpush3.bf16.msra.mxu0 %v22363_v9 }
0x3861   :  { %21068 = vmatprep.subr.bf16.mxu0 %v22365_v12 }
0x3863   :  { %19337 = vmatmul.mubr.f32.gmra.mrb[138].mxu0 %v10079_v48  ;;  %v21810_v48 = vld [vmem:[#allocation5 + $0xbc8] sm:$0xff]  }
0x3864   :  { %21070 = vmatpush3.bf16.msra.mxu0 %v22365_v12 }
0x3865   :  { %21072 = vmatprep.subr.bf16.mxu0 %v22370_v19 }
0x3868   :  { %21074 = vmatpush3.bf16.msra.mxu0 %v22370_v19 }
0x3869   :  { %21076 = vmatprep.subr.bf16.mxu0 %v22374_v23 }
0x386c   :  { %21078 = vmatpush3.bf16.msra.mxu0 %v22374_v23 }
0x386d   :  { %21080 = vmatprep.subr.bf16.mxu0 %v22378_v27 }
0x3870   :  { %21082 = vmatpush3.bf16.msra.mxu0 %v22378_v27 }
0x3871   :  { %21084 = vmatprep.subr.bf16.mxu0 %v22388_v32 }
0x3874   :  { %21086 = vmatpush3.bf16.msra.mxu0 %v22388_v32 }
0x3875   :  { %21088 = vmatprep.subr.bf16.mxu0 %v22392_v34 }
0x3878   :  { %21090 = vmatpush3.bf16.msra.mxu0 %v22392_v34 }
0x3879   :  { %21092 = vmatprep.subr.bf16.mxu0 %v22411_v37 }
0x387c   :  { %21094 = vmatpush3.bf16.msra.mxu0 %v22411_v37 }
0x387d   :  { %21096 = vmatprep.subr.bf16.mxu0 %v22363_v9 }
0x3932   :  { %v19335_v61 = vpop.f32.mrb[136].mxu0 }
0x3933   :  { %v10146_v60 = vpop.f32.mrb[137].mxu0 }
0x3934   :  { %v10165_v59 = vadd.f32 %v19335_v61, %v10146_v60 }
0x3936   :  { %v19338_v1 = vpop.f32.mrb[138].mxu0 }
0x3937   :  { %v10156_v52 = vpop.f32.mrb[139].mxu0 }
0x3938   :  { %v10166_v50 = vadd.f32 %v10165_v59, %v10156_v52  ;;  %v21818_v52 = vld [vmem:[#allocation5 + $0xc48] sm:$0xff]  }
0x393a   :  { %v10167_v30 = vadd.f32 %v19338_v1, %v10166_v50 }
0x393c   :  { %v10168_v53 = vrot.slane %v10167_v30, 4 }
0x393e   :  { %v10169_v57 = vadd.f32 %v10168_v53, %v10167_v30  ;;  %v21819_v30 = vld [vmem:[#allocation5 + $0xc50] sm:$0xff]   ;;  %v21820_v53 = vld [vmem:[#allocation5 + $0xc58] sm:$0xff]  }
0x3940   :  { %v10170_v11 = vrot.slane %v10169_v57, 2 }
0x3942   :  { %v10171_v43 = vadd.f32 %v10170_v11, %v10169_v57  ;;  %v21821_v57 = vld [vmem:[#allocation5 + $0xc60] sm:$0xff]   ;;  %v21822_v11 = vld [vmem:[#allocation5 + $0xc68] sm:$0xff]  }
0x3944   :  { %v10172_v55 = vrot.slane %v10171_v43, 1 }
0x3946   :  { %v10173_v40 = vadd.f32 %v10172_v55, %v10171_v43  ;;  %v21823_v43 = vld [vmem:[#allocation5 + $0xc70] sm:$0xff]   ;;  %v21824_v55 = vld [vmem:[#allocation5 + $0xc78] sm:$0xff]  }
0x3948   :  { %v10174_v63 = vmul.f32 0.001953125, %v10173_v40  ;;  %v21825_v40 = vld [vmem:[#allocation5 + $0xc80] sm:$0xff]  }
0x394a   :  { %v10176_v0 = vadd.f32 1e-05, %v10174_v63 }
0x394c   :  { %22093 = vrsqrt.f32 %v10176_v0 }
0x3956   :  { %v22094_v28 = vpop.eup %22093 }
0x3957   :  { %v10178_v8 = vmul.f32 %v22094_v28, %v10175_v5 }
0x3959   :  { %v10180_v7 = vmul.f32 %v10178_v8, %v23571_v35  ;;  %v10185_v6 = vrot.slane %v10178_v8, %v22456_v33 }
0x395b   :  { %v10181_v36 = vsub.f32 %v10179_v26, %v10180_v7  ;;  %v10186_v15 = vmul.f32 %v10185_v6, %v23561_v51  ;;  %v10187_v10 = vmul.f32 %v10185_v6, %v23566_v31  ;;  %v10188_v16 = vmul.f32 %v23559_v3, %v10185_v6  ;;  %v21826_v26 = vld [vmem:[#allocation5 + $0xc88] sm:$0xff]  }
0x395c   :  { %v10189_v17 = vmul.f32 %v23563_v56, %v10185_v6  ;;  %v21827_v6 = vld [vmem:[#allocation5 + $0xc90] sm:$0xff]  }
0x395d   :  { %v10193_v18 = vrot.slane %v10181_v36, %v22456_v33  ;;  %v21828_v36 = vld [vmem:[#allocation5 + $0xc98] sm:$0xff]  }
0x395f   :  { %v10194_v20 = vadd.f32 %v10193_v18, %v10186_v15  ;;  %v10195_v21 = vadd.f32 %v10193_v18, %v10187_v10  ;;  %v10196_v22 = vadd.f32 %v10193_v18, %v10188_v16  ;;  %v10197_v39 = vadd.f32 %v10193_v18, %v10189_v17  ;;  %v21829_v15 = vld [vmem:[#allocation5 + $0xca0] sm:$0xff]   ;;  %v21830_v10 = vld [vmem:[#allocation5 + $0xca8] sm:$0xff]   ;;  %v21831_v16 = vld [vmem:[#allocation5 + $0xcb0] sm:$0xff]  }
0x3960   :  { %v21832_v17 = vld [vmem:[#allocation5 + $0xcb8] sm:$0xff]   ;;  %v21833_v18 = vld [vmem:[#allocation5 + $0xcc0] sm:$0xff]  }
0x3961   :  { %v10198_v25 = vmax.f32 %v10194_v20, 0.0  ;;  %v10199_v29 = vmax.f32 %v10195_v21, 0.0  ;;  %v10200_v35 = vmax.f32 %v10196_v22, 0.0  ;;  %v10201_v13 = vmax.f32 %v10197_v39, 0.0 }
0x3963   :  { %10202 = vst [vmem:[#allocation2 + $0x8] sm:$0xff] %v10198_v25  ;;  %10203 = vst [vmem:[#allocation2 + $0x10] sm:$0xff] %v10199_v29  ;;  %v23604_v51 = vpack.c.bf16 %v10199_v29, %v10198_v25  ;;  %v23606_v31 = vpack.c.bf16 %v10201_v13, %v10200_v35  ;;  %v21834_v29 = vld [vmem:[#allocation5 + $0xcc8] sm:$0xff]  }
0x3964   :  { %10204 = vst [vmem:[#allocation2 + $0x28] sm:$0xff] %v10200_v35  ;;  %10205 = vst [vmem:[#allocation2 + $0x30] sm:$0xff] %v10201_v13  ;;  %v21835_v13 = vld [vmem:[#allocation5 + $0xcd0] sm:$0xff]  }
0x396a   :  { %v10229_v3 = vld [vmem:[#allocation2 + $0x4] sm:$0xff]  ;;  %v23608_v56 = vld [vmem:[#allocation2 + $0xc] sm:$0xff] }
0x396b   :  { %v10231_v46 = vld [vmem:[#allocation2 + $0x24] sm:$0xff]  ;;  %v10233_v54 = vpack.c.bf16 %v23608_v56, %v10229_v3  ;;  %v23611_v14 = vld [vmem:[#allocation2 + $0x2c] sm:$0xff]  ;;  %v21836_v3 = vld [vmem:[#allocation5 + $0xcd8] sm:$0xff]  }
0x396c   :  { %v10206_v42 = vld [vmem:[#allocation2 + $0x3] sm:$0xff]  ;;  %v23613_v45 = vld [vmem:[#allocation2 + $0xb] sm:$0xff]  ;;  %v10234_v47 = vpack.c.bf16 %v23611_v14, %v10231_v46 }
0x396d   :  { %19355 = vmatprep.mubr.bf16.mxu1 %v10233_v54  ;;  %v10210_v2 = vpack.c.bf16 %v23613_v45, %v10206_v42  ;;  %v23617_v61 = vld [vmem:[#allocation2 + $0x2b] sm:$0xff]  ;;  %v21837_v46 = vld [vmem:[#allocation5 + $0xce0] sm:$0xff]  }
0x396e   :  { %19356 = vmatmul.mubr.bf16.vlgmr.msra.gmra.mrb[88].mxu1 %v10234_v47  ;;  %v10446_v60 = vld [vmem:[#allocation2 + $0x5] sm:$0xff]  ;;  %v23619_v59 = vld [vmem:[#allocation2 + $0xd] sm:$0xff]  ;;  %v21840_v47 = vld [vmem:[#allocation5 + $0xcf8] sm:$0xff]  }
0x396f   :  { %19360 = vmatpush3.bf16.msra.mxu1 %v21809_v44  ;;  %19375 = vmatprep.mubr.bf16.mxu1 %v10210_v2  ;;  %v10208_v44 = vld [vmem:[#allocation2 + $0x23] sm:$0xff]  ;;  %v10450_v50 = vpack.c.bf16 %v23619_v59, %v10446_v60  ;;  %v23623_v0 = vld [vmem:[#allocation2 + $0x2d] sm:$0xff]  ;;  %v21848_v60 = vld [vmem:[#allocation5 + $0xd38] sm:$0xff]  }
0x3970   :  { %19361 = vmatprep.subr.bf16.mxu1 %v21810_v48  ;;  %v10211_v1 = vpack.c.bf16 %v23617_v61, %v10208_v44  ;;  %v10448_v63 = vld [vmem:[#allocation2 + $0x25] sm:$0xff]  ;;  %v10571_v28 = vld [vmem:[#allocation2 + $0xe] sm:$0xff] }
0x3971   :  { %v10570_v5 = vld [vmem:[#allocation2 + $0x6] sm:$0xff]  ;;  %v10451_v8 = vpack.c.bf16 %v23623_v0, %v10448_v63  ;;  %v10573_v21 = vld [vmem:[#allocation2 + $0x2e] sm:$0xff] }
0x3972   :  { %v10574_v7 = vpack.c.bf16 %v10571_v28, %v10570_v5  ;;  %v10572_v20 = vld [vmem:[#allocation2 + $0x26] sm:$0xff]  ;;  %v10695_v39 = vld [vmem:[#allocation2 + $0xf] sm:$0xff] }
0x3973   :  { %19362 = vmatpush3.bf16.msra.mxu1 %v21810_v48  ;;  %v10694_v22 = vld [vmem:[#allocation2 + $0x7] sm:$0xff]  ;;  %v10575_v25 = vpack.c.bf16 %v10573_v21, %v10572_v20  ;;  %v21839_v42 = vld [vmem:[#allocation5 + $0xcf0] sm:$0xff]  }
0x3974   :  { %19363 = vmatprep.subr.bf16.mxu1 %v21811_v4  ;;  %v10698_v35 = vpack.c.bf16 %v10695_v39, %v10694_v22  ;;  %v21838_v54 = vld [vmem:[#allocation5 + $0xce8] sm:$0xff]   ;;  %v21841_v48 = vld [vmem:[#allocation5 + $0xd00] sm:$0xff]   ;;  %v21847_v44 = vld [vmem:[#allocation5 + $0xd30] sm:$0xff]  }
0x3975   :  { %v10696_v2 = vld [vmem:[#allocation2 + $0x27] sm:$0xff]  ;;  %v10945_v5 = vld [vmem:[#allocation2 + $0x31] sm:$0xff] }
0x3976   :  { %v10944_v63 = vld [vmem:[#allocation2 + $0x29] sm:$0xff]  ;;  %v21865_v20 = vld [vmem:[#allocation5 + $0xdc0] sm:$0xff]   ;;  %v11069_v22 = vld [vmem:[#allocation2 + $0x32] sm:$0xff] }
0x3977   :  { %19364 = vmatpush3.bf16.msra.mxu1 %v21811_v4  ;;  %v10697_v4 = vld [vmem:[#allocation2 + $0x2f] sm:$0xff] }
0x3978   :  { %19365 = vmatprep.subr.bf16.mxu1 %v21812_v49  ;;  %v11066_v28 = vld [vmem:[#allocation2 + $0xa] sm:$0xff]  ;;  %v11191_v39 = vld [vmem:[#allocation2 + $0x13] sm:$0xff] }
0x3979   :  { %v11068_v21 = vld [vmem:[#allocation2 + $0x2a] sm:$0xff] }
0x397b   :  { %19366 = vmatpush3.bf16.msra.mxu1 %v21812_v49  ;;  %v10699_v49 = vpack.c.bf16 %v10697_v4, %v10696_v2  ;;  %v11315_v2 = vld [vmem:[#allocation2 + $0x14] sm:$0xff] }
0x397c   :  { %19367 = vmatprep.subr.bf16.mxu1 %v21813_v58 }
0x397f   :  { %19368 = vmatpush3.bf16.msra.mxu1 %v21813_v58  ;;  %v21842_v58 = vld [vmem:[#allocation5 + $0xd08] sm:$0xff]  }
0x3980   :  { %19369 = vmatprep.subr.bf16.mxu1 %v21814_v24 }
0x3983   :  { %19370 = vmatpush3.bf16.msra.mxu1 %v21814_v24  ;;  %v21843_v24 = vld [vmem:[#allocation5 + $0xd10] sm:$0xff]  }
0x3984   :  { %19371 = vmatprep.subr.bf16.mxu1 %v21815_v38 }
0x3987   :  { %19372 = vmatpush3.bf16.msra.mxu1 %v21815_v38  ;;  %v21844_v38 = vld [vmem:[#allocation5 + $0xd18] sm:$0xff]  }
0x3988   :  { %19373 = vmatprep.subr.bf16.mxu1 %v21816_v41 }
0x398b   :  { %19374 = vmatpush3.bf16.msra.mxu1 %v21816_v41  ;;  %v21845_v41 = vld [vmem:[#allocation5 + $0xd20] sm:$0xff]  }
0x398c   :  { %19379 = vmatprep.subr.bf16.mxu1 %v21817_v62 }
0x398e   :  { %19376 = vmatmul.mubr.bf16.vlgmr.msra.gmra.mrb[88].mxu1 %v10211_v1  ;;  %v10942_v1 = vld [vmem:[#allocation2 + $0x9] sm:$0xff] }
0x398f   :  { %19380 = vmatpush3.bf16.msra.mxu1 %v21817_v62  ;;  %19395 = vmatprep.mubr.bf16.mxu1 %v10450_v50  ;;  %v21846_v62 = vld [vmem:[#allocation5 + $0xd28] sm:$0xff]  }
0x3990   :  { %19381 = vmatprep.subr.bf16.mxu1 %v21818_v52  ;;  %v21850_v50 = vld [vmem:[#allocation5 + $0xd48] sm:$0xff]  }
0x3993   :  { %19382 = vmatpush3.bf16.msra.mxu1 %v21818_v52  ;;  %v10943_v52 = vld [vmem:[#allocation2 + $0x11] sm:$0xff] }
0x3994   :  { %19383 = vmatprep.subr.bf16.mxu1 %v21819_v30 }
0x3997   :  { %19384 = vmatpush3.bf16.msra.mxu1 %v21819_v30  ;;  %v10946_v30 = vpack.c.bf16 %v10943_v52, %v10942_v1  ;;  %v21882_v52 = vld [vmem:[#allocation5 + $0xe48] sm:$0xff]  }
0x3998   :  { %19385 = vmatprep.subr.bf16.mxu1 %v21820_v53 }
0x399b   :  { %19386 = vmatpush3.bf16.msra.mxu1 %v21820_v53  ;;  %v21851_v53 = vld [vmem:[#allocation5 + $0xd50] sm:$0xff]  }
0x399c   :  { %19387 = vmatprep.subr.bf16.mxu1 %v21821_v57 }
0x399f   :  { %19388 = vmatpush3.bf16.msra.mxu1 %v21821_v57  ;;  %v21852_v57 = vld [vmem:[#allocation5 + $0xd58] sm:$0xff]  }
0x39a0   :  { %19389 = vmatprep.subr.bf16.mxu1 %v21822_v11 }
0x39a3   :  { %19390 = vmatpush3.bf16.msra.mxu1 %v21822_v11  ;;  %v21853_v11 = vld [vmem:[#allocation5 + $0xd60] sm:$0xff]  }
0x39a4   :  { %19391 = vmatprep.subr.bf16.mxu1 %v21823_v43 }
0x39a7   :  { %19392 = vmatpush3.bf16.msra.mxu1 %v21823_v43  ;;  %v21854_v43 = vld [vmem:[#allocation5 + $0xd68] sm:$0xff]  }
0x39a8   :  { %19393 = vmatprep.subr.bf16.mxu1 %v21824_v55 }
0x39ab   :  { %19394 = vmatpush3.bf16.msra.mxu1 %v21824_v55  ;;  %v21855_v55 = vld [vmem:[#allocation5 + $0xd70] sm:$0xff]  }
0x39ac   :  { %19399 = vmatprep.subr.bf16.mxu1 %v21825_v40 }
0x39ae   :  { %19396 = vmatmul.mubr.bf16.vlgmr.msra.gmra.mrb[88].mxu1 %v10451_v8  ;;  %v11067_v8 = vld [vmem:[#allocation2 + $0x12] sm:$0xff] }
0x39af   :  { %19400 = vmatpush3.bf16.msra.mxu1 %v21825_v40  ;;  %19415 = vmatprep.mubr.bf16.mxu1 %v10574_v7  ;;  %v21856_v40 = vld [vmem:[#allocation5 + $0xd78] sm:$0xff]   ;;  %v21858_v7 = vld [vmem:[#allocation5 + $0xd88] sm:$0xff]  }
0x39b0   :  { %19401 = vmatprep.subr.bf16.mxu1 %v21826_v26 }
0x39b3   :  { %19402 = vmatpush3.bf16.msra.mxu1 %v21826_v26  ;;  %v10947_v26 = vpack.c.bf16 %v10945_v5, %v10944_v63 }
0x39b4   :  { %19403 = vmatprep.subr.bf16.mxu1 %v21827_v6 }
0x39b7   :  { %19404 = vmatpush3.bf16.msra.mxu1 %v21827_v6  ;;  %v11070_v6 = vpack.c.bf16 %v11067_v8, %v11066_v28  ;;  %v21889_v28 = vld [vmem:[#allocation7 + $0xc0] sm:$0xff]   ;;  %v11441_v8 = vld [vmem:[#allocation2 + $0x35] sm:$0xff] }
0x39b8   :  { %19405 = vmatprep.subr.bf16.mxu1 %v21828_v36 }
0x39bb   :  { %19406 = vmatpush3.bf16.msra.mxu1 %v21828_v36  ;;  %v21859_v36 = vld [vmem:[#allocation5 + $0xd90] sm:$0xff]  }
0x39bc   :  { %19407 = vmatprep.subr.bf16.mxu1 %v21829_v15 }
0x39bf   :  { %19408 = vmatpush3.bf16.msra.mxu1 %v21829_v15  ;;  %v21860_v15 = vld [vmem:[#allocation5 + $0xd98] sm:$0xff]  }
0x39c0   :  { %19409 = vmatprep.subr.bf16.mxu1 %v21830_v10 }
0x39c3   :  { %19410 = vmatpush3.bf16.msra.mxu1 %v21830_v10  ;;  %v21861_v10 = vld [vmem:[#allocation5 + $0xda0] sm:$0xff]  }
0x39c4   :  { %19411 = vmatprep.subr.bf16.mxu1 %v21831_v16 }
0x39c7   :  { %19412 = vmatpush3.bf16.msra.mxu1 %v21831_v16  ;;  %v21862_v16 = vld [vmem:[#allocation5 + $0xda8] sm:$0xff]  }
0x39c8   :  { %19413 = vmatprep.subr.bf16.mxu1 %v21832_v17 }
0x39cb   :  { %19414 = vmatpush3.bf16.msra.mxu1 %v21832_v17  ;;  %v21863_v17 = vld [vmem:[#allocation5 + $0xdb0] sm:$0xff]  }
0x39cc   :  { %19419 = vmatprep.subr.bf16.mxu1 %v21833_v18 }
0x39ce   :  { %19416 = vmatmul.mubr.bf16.vlgmr.msra.gmra.mrb[88].mxu1 %v10575_v25  ;;  %v11071_v25 = vpack.c.bf16 %v11069_v22, %v11068_v21  ;;  %v21896_v21 = vld [vmem:[#allocation7 + $0x98] sm:$0xff]   ;;  %v21897_v22 = vld [vmem:[#allocation7 + $0xe0] sm:$0xff]  }
0x39cf   :  { %19420 = vmatpush3.bf16.msra.mxu1 %v21833_v18  ;;  %19435 = vmatprep.mubr.bf16.mxu1 %v10698_v35  ;;  %v21864_v18 = vld [vmem:[#allocation5 + $0xdb8] sm:$0xff]   ;;  %v11194_v35 = vpack.c.bf16 %v11191_v39, %v23613_v45  ;;  %v21898_v39 = vld [vmem:[#allocation7 + $0xa0] sm:$0xff]  }
0x39d0   :  { %19421 = vmatprep.subr.bf16.mxu1 %v21834_v29  ;;  %v21872_v45 = vld [vmem:[#allocation5 + $0xdf8] sm:$0xff]  }
0x39d3   :  { %19422 = vmatpush3.bf16.msra.mxu1 %v21834_v29  ;;  %v21866_v29 = vld [vmem:[#allocation5 + $0xdc8] sm:$0xff]  }
0x39d4   :  { %19423 = vmatprep.subr.bf16.mxu1 %v21835_v13 }
0x39d7   :  { %19424 = vmatpush3.bf16.msra.mxu1 %v21835_v13  ;;  %v21867_v13 = vld [vmem:[#allocation5 + $0xdd0] sm:$0xff]  }
0x39d8   :  { %19425 = vmatprep.subr.bf16.mxu1 %v21836_v3 }
0x39db   :  { %19426 = vmatpush3.bf16.msra.mxu1 %v21836_v3  ;;  %v21868_v3 = vld [vmem:[#allocation5 + $0xdd8] sm:$0xff]  }
0x39dc   :  { %19427 = vmatprep.subr.bf16.mxu1 %v21837_v46 }
0x39df   :  { %19428 = vmatpush3.bf16.msra.mxu1 %v21837_v46  ;;  %v21869_v46 = vld [vmem:[#allocation5 + $0xde0] sm:$0xff]  }
0x39e0   :  { %19429 = vmatprep.subr.bf16.mxu1 %v21838_v54 }
0x39e3   :  { %19430 = vmatpush3.bf16.msra.mxu1 %v21838_v54  ;;  %v21870_v54 = vld [vmem:[#allocation5 + $0xde8] sm:$0xff]  }
0x39e4   :  { %19431 = vmatprep.subr.bf16.mxu1 %v21839_v42 }
0x39e7   :  { %19432 = vmatpush3.bf16.msra.mxu1 %v21839_v42  ;;  %v21871_v42 = vld [vmem:[#allocation5 + $0xdf0] sm:$0xff]  }
0x39e8   :  { %19433 = vmatprep.subr.bf16.mxu1 %v21840_v47 }
0x39eb   :  { %19434 = vmatpush3.bf16.msra.mxu1 %v21840_v47  ;;  %v21873_v47 = vld [vmem:[#allocation5 + $0xe00] sm:$0xff]  }
0x39ec   :  { %19439 = vmatprep.subr.bf16.mxu1 %v21841_v48 }
0x39ee   :  { %19436 = vmatmul.mubr.bf16.vlgmr.msra.gmra.mrb[88].mxu1 %v10699_v49  ;;  %v21874_v49 = vld [vmem:[#allocation5 + $0xe08] sm:$0xff]  }
0x39ef   :  { %19440 = vmatpush3.bf16.msra.mxu1 %v21841_v48  ;;  %19455 = vmatprep.mubr.bf16.mxu1 %v23604_v51  ;;  %v21849_v51 = vld [vmem:[#allocation5 + $0xd40] sm:$0xff]   ;;  %v11193_v48 = vld [vmem:[#allocation2 + $0x33] sm:$0xff] }
0x39f0   :  { %19441 = vmatprep.subr.bf16.mxu1 %v21842_v58  ;;  %v11195_v4 = vpack.c.bf16 %v11193_v48, %v23617_v61  ;;  %v21879_v61 = vld [vmem:[#allocation5 + $0xe30] sm:$0xff]  }
0x39f3   :  { %19442 = vmatpush3.bf16.msra.mxu1 %v21842_v58  ;;  %v11318_v58 = vpack.c.bf16 %v11315_v2, %v23608_v56  ;;  %v21880_v56 = vld [vmem:[#allocation5 + $0xe38] sm:$0xff]  }
0x39f4   :  { %19443 = vmatprep.subr.bf16.mxu1 %v21843_v24 }
0x39f7   :  { %19444 = vmatpush3.bf16.msra.mxu1 %v21843_v24  ;;  %v21875_v24 = vld [vmem:[#allocation5 + $0xe10] sm:$0xff]  }
0x39f8   :  { %19445 = vmatprep.subr.bf16.mxu1 %v21844_v38 }
0x39fb   :  { %19446 = vmatpush3.bf16.msra.mxu1 %v21844_v38  ;;  %v21876_v38 = vld [vmem:[#allocation5 + $0xe18] sm:$0xff]  }
0x39fc   :  { %19447 = vmatprep.subr.bf16.mxu1 %v21845_v41 }
0x39ff   :  { %19448 = vmatpush3.bf16.msra.mxu1 %v21845_v41  ;;  %v21877_v41 = vld [vmem:[#allocation5 + $0xe20] sm:$0xff]  }
0x3a00   :  { %19449 = vmatprep.subr.bf16.mxu1 %v21846_v62 }
0x3a03   :  { %19450 = vmatpush3.bf16.msra.mxu1 %v21846_v62  ;;  %v21878_v62 = vld [vmem:[#allocation5 + $0xe28] sm:$0xff]  }
0x3a04   :  { %19451 = vmatprep.subr.bf16.mxu1 %v21847_v44 }
0x3a07   :  { %19452 = vmatpush3.bf16.msra.mxu1 %v21847_v44  ;;  %v21881_v44 = vld [vmem:[#allocation5 + $0xe40] sm:$0xff]  }
0x3a08   :  { %19453 = vmatprep.subr.bf16.mxu1 %v21848_v60 }
0x3a0b   :  { %19454 = vmatpush3.bf16.msra.mxu1 %v21848_v60  ;;  %v11317_v60 = vld [vmem:[#allocation2 + $0x34] sm:$0xff] }
0x3a0c   :  { %19459 = vmatprep.subr.bf16.mxu1 %v21849_v51  ;;  %v11319_v1 = vpack.c.bf16 %v11317_v60, %v23611_v14  ;;  %v21887_v14 = vld [vmem:[#allocation5 + $0xe70] sm:$0xff]  }
0x3a0e   :  { %19456 = vmatmul.mubr.bf16.vlgmr.msra.gmra.mrb[88].mxu1 %v23606_v31  ;;  %v21857_v31 = vld [vmem:[#allocation5 + $0xd80] sm:$0xff]  }
0x3a0f   :  { %19460 = vmatpush3.bf16.msra.mxu1 %v21849_v51  ;;  %19475 = vmatprep.mubr.bf16.mxu1 %v10946_v30  ;;  %v11439_v51 = vld [vmem:[#allocation2 + $0x15] sm:$0xff] }
0x3a10   :  { %19461 = vmatprep.subr.bf16.mxu1 %v21850_v50  ;;  %v21883_v30 = vld [vmem:[#allocation5 + $0xe50] sm:$0xff]  }
0x3a13   :  { %19462 = vmatpush3.bf16.msra.mxu1 %v21850_v50  ;;  %v11442_v50 = vpack.c.bf16 %v11439_v51, %v23619_v59  ;;  %v23633_v59 = vld [vmem:[#allocation4 + $0x48] sm:$0xff]  ;;  %v12404_v51 = vld [vmem:[#allocation4 + $0xd0] sm:$0x80] }
0x3a14   :  { %19463 = vmatprep.subr.bf16.mxu1 %v21851_v53  ;;  %v12467_v63 = vrot.slane %v23633_v59, 7 }
0x3a17   :  { %19464 = vmatpush3.bf16.msra.mxu1 %v21851_v53  ;;  %v21884_v53 = vld [vmem:[#allocation5 + $0xe58] sm:$0xff]  }
0x3a18   :  { %19465 = vmatprep.subr.bf16.mxu1 %v21852_v57 }
0x3a1b   :  { %19466 = vmatpush3.bf16.msra.mxu1 %v21852_v57  ;;  %v21885_v57 = vld [vmem:[#allocation5 + $0xe60] sm:$0xff]  }
0x3a1c   :  { %19467 = vmatprep.subr.bf16.mxu1 %v21853_v11 }
0x3a1f   :  { %19468 = vmatpush3.bf16.msra.mxu1 %v21853_v11  ;;  %v21886_v11 = vld [vmem:[#allocation5 + $0xe68] sm:$0xff]  }
0x3a20   :  { %19469 = vmatprep.subr.bf16.mxu1 %v21854_v43 }
0x3a23   :  { %19470 = vmatpush3.bf16.msra.mxu1 %v21854_v43  ;;  %v12387_v43 = vld [vmem:[#allocation4 + $0x18] sm:$0x80] }
0x3a24   :  { %19471 = vmatprep.subr.bf16.mxu1 %v21855_v55 }
0x3a27   :  { %19472 = vmatpush3.bf16.msra.mxu1 %v21855_v55  ;;  %v12399_v55 = vld [vmem:[#allocation4 + $0x78] sm:$0x7f] }
0x3a28   :  { %19473 = vmatprep.subr.bf16.mxu1 %v21856_v40  ;;  %v12481_v5 = vrot.slane %v12399_v55, 7 }
0x3a2b   :  { %19474 = vmatpush3.bf16.msra.mxu1 %v21856_v40  ;;  %v21888_v40 = vld [vmem:[#allocation5 + $0xe78] sm:$0xff]  }
0x3a2c   :  { %19479 = vmatprep.subr.bf16.mxu1 %v21857_v31 }
0x3a2e   :  { %19476 = vmatmul.mubr.bf16.vlgmr.msra.gmra.mrb[88].mxu1 %v10947_v26 }
0x3a2f   :  { %19480 = vmatpush3.bf16.msra.mxu1 %v21857_v31  ;;  %19495 = vmatprep.mubr.bf16.mxu1 %v11070_v6  ;;  %v12466_v31 = vrot.slane %v12387_v43, 7  ;;  %v21890_v6 = vld [vmem:[#allocation7 + $0x80] sm:$0xff]   ;;  %v12493_v43 = vrot.slane %v12404_v51, 7  ;;  %v13670_v51 = vld [vmem:[#allocation4 + $0x150] sm:$0x1] }
0x3a30   :  { %19481 = vmatprep.subr.bf16.mxu1 %v21858_v7 }
0x3a31   :  { %v12468_v26 = vsel %vm12456_vm0, %v12466_v31, %v12467_v63 }
0x3a33   :  { %19482 = vmatpush3.bf16.msra.mxu1 %v21858_v7  ;;  %v12482_v7 = vsel %vm12456_vm0, %v12467_v63, %v12481_v5 }
0x3a34   :  { %19483 = vmatprep.subr.bf16.mxu1 %v21859_v36 }
0x3a37   :  { %19484 = vmatpush3.bf16.msra.mxu1 %v21859_v36  ;;  %v11443_v36 = vpack.c.bf16 %v11441_v8, %v23623_v0  ;;  %v21899_v0 = vld [vmem:[#allocation7 + $0xe8] sm:$0xff]   ;;  %v21909_v8 = vld [vmem:[#allocation7 + $0x350] sm:$0xff]  }
0x3a38   :  { %19485 = vmatprep.subr.bf16.mxu1 %v21860_v15 }
0x3a3b   :  { %19486 = vmatpush3.bf16.msra.mxu1 %v21860_v15  ;;  %v21891_v15 = vld [vmem:[#allocation7 + $0xc8] sm:$0xff]  }
0x3a3c   :  { %19487 = vmatprep.subr.bf16.mxu1 %v21861_v10 }
0x3a3f   :  { %19488 = vmatpush3.bf16.msra.mxu1 %v21861_v10  ;;  %v12544_v10 = vpack.c.bf16 %v12482_v7, %v12468_v26 }
0x3a40   :  { %19489 = vmatprep.subr.bf16.mxu1 %v21862_v16 }
0x3a43   :  { %19490 = vmatpush3.bf16.msra.mxu1 %v21862_v16  ;;  %v21892_v16 = vld [vmem:[#allocation7 + $0x88] sm:$0xff]  }
0x3a44   :  { %19491 = vmatprep.subr.bf16.mxu1 %v21863_v17 }
0x3a47   :  { %19492 = vmatpush3.bf16.msra.mxu1 %v21863_v17  ;;  %v21893_v17 = vld [vmem:[#allocation7 + $0xd0] sm:$0xff]  }
0x3a48   :  { %19493 = vmatprep.subr.bf16.mxu1 %v21864_v18 }
0x3a4b   :  { %19494 = vmatpush3.bf16.msra.mxu1 %v21864_v18  ;;  %v21894_v18 = vld [vmem:[#allocation7 + $0x90] sm:$0xff]  }
0x3a4c   :  { %19499 = vmatprep.subr.bf16.mxu1 %v21865_v20 }
0x3a4e   :  { %19496 = vmatmul.mubr.bf16.vlgmr.msra.gmra.mrb[88].mxu1 %v11071_v25  ;;  %v21900_v25 = vld [vmem:[#allocation7 + $0xa8] sm:$0xff]  }
0x3a4f   :  { %19500 = vmatpush3.bf16.msra.mxu1 %v21865_v20  ;;  %19515 = vmatprep.mubr.bf16.mxu1 %v11194_v35  ;;  %v21895_v20 = vld [vmem:[#allocation7 + $0xd8] sm:$0xff]   ;;  %v12386_v35 = vld [vmem:[#allocation4 + $0x10] sm:$0x80] }
0x3a50   :  { %19501 = vmatprep.subr.bf16.mxu1 %v21866_v29  ;;  %v12463_v48 = vrot.slane %v12386_v35, 7  ;;  %v23659_v35 = vld [vmem:[#allocation4 + $0x60] sm:$0xff] }
0x3a53   :  { %19502 = vmatpush3.bf16.msra.mxu1 %v21866_v29  ;;  %v21901_v29 = vld [vmem:[#allocation7 + $0xf0] sm:$0xff]  }
0x3a54   :  { %19503 = vmatprep.subr.bf16.mxu1 %v21867_v13 }
0x3a57   :  { %19504 = vmatpush3.bf16.msra.mxu1 %v21867_v13  ;;  %v23639_v13 = vld [vmem:[#allocation4 + $0x40] sm:$0xff] }
0x3a58   :  { %19505 = vmatprep.subr.bf16.mxu1 %v21868_v3  ;;  %v12464_v2 = vrot.slane %v23639_v13, 7 }
0x3a5b   :  { %19506 = vmatpush3.bf16.msra.mxu1 %v21868_v3  ;;  %v12398_v3 = vld [vmem:[#allocation4 + $0x70] sm:$0x7f] }
0x3a5c   :  { %19507 = vmatprep.subr.bf16.mxu1 %v21869_v46 }
0x3a5f   :  { %19508 = vmatpush3.bf16.msra.mxu1 %v21869_v46  ;;  %v12405_v46 = vld [vmem:[#allocation4 + $0xd8] sm:$0x80] }
0x3a60   :  { %19509 = vmatprep.subr.bf16.mxu1 %v21870_v54 }
0x3a63   :  { %19510 = vmatpush3.bf16.msra.mxu1 %v21870_v54  ;;  %v21902_v54 = vld [vmem:[#allocation7 + $0xb0] sm:$0xff]  }
0x3a64   :  { %19511 = vmatprep.subr.bf16.mxu1 %v21871_v42 }
0x3a67   :  { %19512 = vmatpush3.bf16.msra.mxu1 %v21871_v42  ;;  %v23641_v42 = vld [vmem:[#allocation4 + $0x108] sm:$0xff] }
0x3a68   :  { %19513 = vmatprep.subr.bf16.mxu1 %v21872_v45 }
0x3a6b   :  { %19514 = vmatpush3.bf16.msra.mxu1 %v21872_v45  ;;  %v12417_v45 = vld [vmem:[#allocation4 + $0x138] sm:$0x7f] }
0x3a6c   :  { %19519 = vmatprep.subr.bf16.mxu1 %v21873_v47 }
0x3a6e   :  { %19516 = vmatmul.mubr.bf16.vlgmr.msra.gmra.mrb[88].mxu1 %v11195_v4  ;;  %v12479_v4 = vrot.slane %v12398_v3, 7  ;;  %v13671_v3 = vld [vmem:[#allocation4 + $0x158] sm:$0x1] }
0x3a6f   :  { %19520 = vmatpush3.bf16.msra.mxu1 %v21873_v47  ;;  %19535 = vmatprep.mubr.bf16.mxu1 %v11318_v58  ;;  %v21903_v47 = vld [vmem:[#allocation7 + $0xf8] sm:$0xff]   ;;  %v12497_v58 = vrot.slane %v23641_v42, 7 }
0x3a70   :  { %19521 = vmatprep.subr.bf16.mxu1 %v21874_v49 }
0x3a73   :  { %19522 = vmatpush3.bf16.msra.mxu1 %v21874_v49  ;;  %v12496_v49 = vrot.slane %v12405_v46, 7  ;;  %v21918_v46 = vld [vmem:[#allocation7 + $0x330] sm:$0xff]  }
0x3a74   :  { %19523 = vmatprep.subr.bf16.mxu1 %v21875_v24 }
0x3a77   :  { %19524 = vmatpush3.bf16.msra.mxu1 %v21875_v24  ;;  %v12511_v24 = vrot.slane %v12417_v45, 7  ;;  %v23661_v45 = vld [vmem:[#allocation4 + $0x128] sm:$0xff] }
0x3a78   :  { %19525 = vmatprep.subr.bf16.mxu1 %v21876_v38 }
0x3a79   :  { %v12512_v60 = vsel %vm12456_vm0, %v12497_v58, %v12511_v24  ;;  %v13763_v24 = vrot.slane %v13671_v3, 1 }
0x3a7b   :  { %19526 = vmatpush3.bf16.msra.mxu1 %v21876_v38  ;;  %v21904_v38 = vld [vmem:[#allocation7 + $0xb8] sm:$0xff]  }
0x3a7c   :  { %19527 = vmatprep.subr.bf16.mxu1 %v21877_v41 }
0x3a7f   :  { %19528 = vmatpush3.bf16.msra.mxu1 %v21877_v41  ;;  %v21905_v41 = vld [vmem:[#allocation7 + $0x340] sm:$0xff]  }
0x3a80   :  { %19529 = vmatprep.subr.bf16.mxu1 %v21878_v62 }
0x3a83   :  { %19530 = vmatpush3.bf16.msra.mxu1 %v21878_v62  ;;  %v12465_v62 = vsel %vm12456_vm0, %v12463_v48, %v12464_v2 }
0x3a84   :  { %19531 = vmatprep.subr.bf16.mxu1 %v21879_v61 }
0x3a87   :  { %19532 = vmatpush3.bf16.msra.mxu1 %v21879_v61  ;;  %v12480_v61 = vsel %vm12456_vm0, %v12464_v2, %v12479_v4  ;;  %v13714_v2 = vrot.slane %v23659_v35, 1 }
0x3a88   :  { %19533 = vmatprep.subr.bf16.mxu1 %v21880_v56 }
0x3a8b   :  { %19534 = vmatpush3.bf16.msra.mxu1 %v21880_v56  ;;  %v13653_v56 = vld [vmem:[#allocation4 + $0x98] sm:$0x1] }
0x3a8c   :  { %19539 = vmatprep.subr.bf16.mxu1 %v21881_v44  ;;  %v13733_v5 = vrot.slane %v13653_v56, 1 }
0x3a8e   :  { %19536 = vmatmul.mubr.bf16.vlgmr.msra.gmra.mrb[88].mxu1 %v11319_v1  ;;  %v23649_v1 = vld [vmem:[#allocation4 + $0x100] sm:$0xff] }
0x3a8f   :  { %19540 = vmatpush3.bf16.msra.mxu1 %v21881_v44  ;;  %19555 = vmatprep.mubr.bf16.mxu1 %v11442_v50  ;;  %v12498_v44 = vsel %vm12456_vm0, %v12496_v49, %v12497_v58  ;;  %v21906_v50 = vld [vmem:[#allocation7 + $0x300] sm:$0xff]   ;;  %v12494_v55 = vrot.slane %v23649_v1, 7  ;;  %v13747_v58 = vrot.slane %v23661_v45, 1 }
0x3a90   :  { %19541 = vmatprep.subr.bf16.mxu1 %v21882_v52 }
0x3a91   :  { %v12495_v26 = vsel %vm12456_vm0, %v12493_v43, %v12494_v55  ;;  %v13764_v56 = vsel %vm13712_vm1, %v13747_v58, %v13763_v24 }
0x3a93   :  { %19542 = vmatpush3.bf16.msra.mxu1 %v21882_v52  ;;  %v12416_v52 = vld [vmem:[#allocation4 + $0x130] sm:$0x7f] }
0x3a94   :  { %19543 = vmatprep.subr.bf16.mxu1 %v21883_v30 }
0x3a97   :  { %19544 = vmatpush3.bf16.msra.mxu1 %v21883_v30  ;;  %v13641_v30 = vld [vmem:[#allocation4 + $0x38] sm:$0xfe] }
0x3a98   :  { %19545 = vmatprep.subr.bf16.mxu1 %v21884_v53  ;;  %v13716_v31 = vrot.slane %v13641_v30, 1 }
0x3a9b   :  { %19546 = vmatpush3.bf16.msra.mxu1 %v21884_v53  ;;  %v23651_v53 = vld [vmem:[#allocation4 + $0x68] sm:$0xff] }
0x3a9c   :  { %19547 = vmatprep.subr.bf16.mxu1 %v21885_v57  ;;  %v13717_v63 = vrot.slane %v23651_v53, 1 }
0x3a9f   :  { %19548 = vmatpush3.bf16.msra.mxu1 %v21885_v57  ;;  %v12543_v57 = vpack.c.bf16 %v12480_v61, %v12465_v62 }
0x3aa0   :  { %19549 = vmatprep.subr.bf16.mxu1 %v21886_v11 }
0x3aa3   :  { %19550 = vmatpush3.bf16.msra.mxu1 %v21886_v11  ;;  %v21907_v11 = vld [vmem:[#allocation7 + $0x348] sm:$0xff]  }
0x3aa4   :  { %19551 = vmatprep.subr.bf16.mxu1 %v21887_v14 }
0x3aa7   :  { %19552 = vmatpush3.bf16.msra.mxu1 %v21887_v14  ;;  %v12550_v14 = vpack.c.bf16 %v12512_v60, %v12498_v44  ;;  %v13658_v44 = vld [vmem:[#allocation4 + $0xf0] sm:$0xfe]  ;;  %v23669_v60 = vld [vmem:[#allocation4 + $0x120] sm:$0xff] }
0x3aa8   :  { %19553 = vmatprep.subr.bf16.mxu1 %v21888_v40  ;;  %v13743_v30 = vrot.slane %v13658_v44, 1 }
0x3aab   :  { %19554 = vmatpush3.bf16.msra.mxu1 %v21888_v40  ;;  %v12509_v40 = vrot.slane %v12416_v52, 7 }
0x3aac   :  { %16775 = vmatprep.subr.bf16.mxu1 %v21889_v28  ;;  %v21908_v28 = vld [vmem:[#allocation7 + $0x308] sm:$0xff]  }
0x3aad   :  { %v12510_v7 = vsel %vm12456_vm0, %v12494_v55, %v12509_v40 }
0x3aae   :  { %19556 = vmatmul.mubr.bf16.vlgmr.msra.gmra.mrb[88].mxu1 %v11443_v36  ;;  %v13734_v36 = vsel %vm13712_vm1, %v13717_v63, %v13733_v5 }
0x3aaf   :  { %16776 = vmatpush3.bf16.msra.mxu1 %v21890_v6  ;;  %13574 = vmatprep.mubr.bf16.mxu1 %v12544_v10  ;;  %v13718_v6 = vsel %vm13712_vm1, %v13716_v31, %v13717_v63  ;;  %v12549_v10 = vpack.c.bf16 %v12510_v7, %v12495_v26 }
0x3ab0   :  { %16777 = vmatprep.subr.bf16.mxu1 %v21891_v15  ;;  %v21910_v15 = vld [vmem:[#allocation7 + $0x310] sm:$0xff]  }
0x3ab3   :  { %16778 = vmatpush3.bf16.msra.mxu1 %v21892_v16  ;;  %v21911_v16 = vld [vmem:[#allocation7 + $0x358] sm:$0xff]  }
0x3ab4   :  { %16779 = vmatprep.subr.bf16.mxu1 %v21893_v17  ;;  %v13798_v17 = vpack.c.bf16 %v13734_v36, %v13718_v6 }
0x3ab7   :  { %16780 = vmatpush3.bf16.msra.mxu1 %v21894_v18  ;;  %v21912_v18 = vld [vmem:[#allocation7 + $0x318] sm:$0xff]  }
0x3ab8   :  { %16781 = vmatprep.subr.bf16.mxu1 %v21895_v20  ;;  %v21913_v20 = vld [vmem:[#allocation7 + $0x360] sm:$0xff]  }
0x3abb   :  { %16782 = vmatpush3.bf16.msra.mxu1 %v21896_v21  ;;  %v21914_v21 = vld [vmem:[#allocation7 + $0x320] sm:$0xff]  }
0x3abc   :  { %16783 = vmatprep.subr.bf16.mxu1 %v21897_v22  ;;  %v21915_v22 = vld [vmem:[#allocation7 + $0x368] sm:$0xff]  }
0x3abf   :  { %16784 = vmatpush3.bf16.msra.mxu1 %v21898_v39  ;;  %v21916_v39 = vld [vmem:[#allocation7 + $0x328] sm:$0xff]  }
0x3ac0   :  { %16785 = vmatprep.subr.bf16.mxu1 %v21899_v0  ;;  %v21917_v0 = vld [vmem:[#allocation7 + $0x370] sm:$0xff]  }
0x3ac3   :  { %16786 = vmatpush3.bf16.msra.mxu1 %v21900_v25  ;;  %v13652_v25 = vld [vmem:[#allocation4 + $0x90] sm:$0x1] }
0x3ac4   :  { %16787 = vmatprep.subr.bf16.mxu1 %v21901_v29  ;;  %v13640_v29 = vld [vmem:[#allocation4 + $0x30] sm:$0xfe]  ;;  %v13731_v4 = vrot.slane %v13652_v25, 1 }
0x3ac5   :  { %v13713_v48 = vrot.slane %v13640_v29, 1 }
0x3ac6   :  { %v13732_v62 = vsel %vm13712_vm1, %v13714_v2, %v13731_v4 }
0x3ac7   :  { %16788 = vmatpush3.bf16.msra.mxu1 %v21902_v54  ;;  %v13659_v54 = vld [vmem:[#allocation4 + $0xf8] sm:$0xfe] }
0x3ac8   :  { %16789 = vmatprep.subr.bf16.mxu1 %v21903_v47  ;;  %v21919_v47 = vld [vmem:[#allocation7 + $0x378] sm:$0xff]   ;;  %v13746_v49 = vrot.slane %v13659_v54, 1 }
0x3aca   :  { %v13748_v61 = vsel %vm13712_vm1, %v13746_v49, %v13747_v58 }
0x3acb   :  { %16790 = vmatpush3.bf16.msra.mxu1 %v21904_v38  ;;  %v21920_v38 = vld [vmem:[#allocation7 + $0x338] sm:$0xff]  }
0x3acc   :  { %16831 = vmatprep.subr.bf16.mxu1 %v21905_v41  ;;  %v13715_v41 = vsel %vm13712_vm1, %v13713_v48, %v13714_v2 }
0x3acd   :  { %v13797_v52 = vpack.c.bf16 %v13732_v62, %v13715_v41 }
0x3ace   :  { %13575 = vmatmul.mubr.bf16.vlgmr.msra.gmra.mrb[92].mxu1 %v12543_v57  ;;  %v13744_v57 = vrot.slane %v23669_v60, 1 }
0x3acf   :  { %13582 = vmatprep.mubr.bf16.mxu1 %v12550_v14  ;;  %16832 = vmatpush3.bf16.msra.mxu1 %v21906_v50  ;;  %v13804_v50 = vpack.c.bf16 %v13764_v56, %v13748_v61 }
0x3ad0   :  { %16833 = vmatprep.subr.bf16.mxu1 %v21907_v11  ;;  %v13761_v11 = vrot.slane %v13670_v51, 1  ;;  %v13745_v14 = vsel %vm13712_vm1, %v13743_v30, %v13744_v57 }
0x3ad2   :  { %v13762_v43 = vsel %vm13712_vm1, %v13744_v57, %v13761_v11 }
0x3ad3   :  { %16834 = vmatpush3.bf16.msra.mxu1 %v21908_v28  ;;  %v13803_v55 = vpack.c.bf16 %v13762_v43, %v13745_v14 }
0x3ad4   :  { %16835 = vmatprep.subr.bf16.mxu1 %v21909_v8 }
0x3ad6   :  { %13583 = vmatmul.mubr.bf16.gmra.mrb[96].mxu1 %v12549_v10 }
0x3ad7   :  { %16836 = vmatpush3.bf16.msra.mxu1 %v21910_v15  ;;  %14226 = vmatprep.mubr.bf16.mxu1 %v13798_v17 }
0x3ad8   :  { %16837 = vmatprep.subr.bf16.mxu1 %v21911_v16 }
0x3adb   :  { %16838 = vmatpush3.bf16.msra.mxu1 %v21912_v18 }
0x3adc   :  { %16839 = vmatprep.subr.bf16.mxu1 %v21913_v20 }
0x3adf   :  { %16840 = vmatpush3.bf16.msra.mxu1 %v21914_v21 }
0x3ae0   :  { %16841 = vmatprep.subr.bf16.mxu1 %v21915_v22 }
0x3ae3   :  { %16842 = vmatpush3.bf16.msra.mxu1 %v21916_v39 }
0x3ae4   :  { %16843 = vmatprep.subr.bf16.mxu1 %v21917_v0 }
0x3ae7   :  { %16844 = vmatpush3.bf16.msra.mxu1 %v21918_v46 }
0x3ae8   :  { %16845 = vmatprep.subr.bf16.mxu1 %v21919_v47 }
0x3aeb   :  { %16846 = vmatpush3.bf16.msra.mxu1 %v21920_v38 }
0x3aee   :  { %14227 = vmatmul.mubr.bf16.vlgmr.msra.gmra.mrb[100].mxu1 %v13797_v52 }
0x3aef   :  { %14234 = vmatprep.mubr.bf16.mxu1 %v13804_v50 }
0x3af6   :  { %14235 = vmatmul.mubr.bf16.gmra.mrb[104].mxu1 %v13803_v55 }
0x3b81   :  { %v23674_v40 = vpop.f32.mrb[88].mxu1 }
0x3b82   :  { %v23676_v31 = vpop.f32.mrb[89].mxu1 }
0x3b83   :  { %v23678_v63 = vpop.f32.mrb[90].mxu1  ;;  %19591 = vmatprep.mubr.f32.mxu0 %v23676_v31 }
0x3b84   :  { %v23681_v5 = vpop.f32.mrb[91].mxu1 }
0x3b85   :  { %19592 = vmatmul.mubr.f32.vlgmr.msra.gmra.mrb[140].mxu0 %v23681_v5 }
0x3b86   :  { %19594 = vmatprep.mubr.f32.mxu0 %v23674_v40  ;;  %21098 = vmatpush3.bf16.msra.mxu0 %v22363_v9 }
0x3b87   :  { %21100 = vmatprep.subr.bf16.mxu0 %v22365_v12 }
0x3b89   :  { %19595 = vmatmul.mubr.f32.gmra.mrb[142].mxu0 %v23678_v63 }
0x3b8a   :  { %21102 = vmatpush3.bf16.msra.mxu0 %v22365_v12 }
0x3b8b   :  { %21104 = vmatprep.subr.bf16.mxu0 %v22370_v19 }
0x3b8e   :  { %21106 = vmatpush3.bf16.msra.mxu0 %v22370_v19 }
0x3b8f   :  { %21108 = vmatprep.subr.bf16.mxu0 %v22374_v23 }
0x3b92   :  { %21110 = vmatpush3.bf16.msra.mxu0 %v22374_v23 }
0x3b93   :  { %21112 = vmatprep.subr.bf16.mxu0 %v22378_v27 }
0x3b96   :  { %21114 = vmatpush3.bf16.msra.mxu0 %v22378_v27 }
0x3b97   :  { %21116 = vmatprep.subr.bf16.mxu0 %v22388_v32 }
0x3b9a   :  { %21118 = vmatpush3.bf16.msra.mxu0 %v22388_v32 }
0x3b9b   :  { %21120 = vmatprep.subr.bf16.mxu0 %v22392_v34 }
0x3b9e   :  { %21122 = vmatpush3.bf16.msra.mxu0 %v22392_v34 }
0x3b9f   :  { %21124 = vmatprep.subr.bf16.mxu0 %v22411_v37 }
0x3ba1   :  { %v16791_v28 = vpop.f32.mrb[92].mxu1 }
0x3ba2   :  { %v16792_v8 = vpop.f32.mrb[93].mxu1  ;;  %21126 = vmatpush3.bf16.msra.mxu0 %v22411_v37 }
0x3ba3   :  { %v23701_v26 = vadd.f32 %v16792_v8, %v16791_v28  ;;  %v16794_v7 = vpop.f32.mrb[94].mxu1 }
0x3ba4   :  { %v16795_v6 = vpop.f32.mrb[95].mxu1 }
0x3ba5   :  { %v23703_v36 = vadd.f32 %v16795_v6, %v16794_v7  ;;  %v21921_v6 = vld [vmem:[#allocation5 + $0xec0] sm:$0xff]  }
0x3ba6   :  { %19635 = vmatprep.subr.bf16.mxu0 %v21921_v6 }
0x3ba9   :  { %v16797_v15 = vpop.f32.mrb[96].mxu1 }
0x3baa   :  { %v16798_v10 = vpop.f32.mrb[97].mxu1 }
0x3bab   :  { %v23705_v16 = vadd.f32 %v16798_v10, %v16797_v15  ;;  %v16800_v17 = vpop.f32.mrb[98].mxu1  ;;  %v21922_v15 = vld [vmem:[#allocation5 + $0xec8] sm:$0xff]   ;;  %v21923_v10 = vld [vmem:[#allocation5 + $0xed0] sm:$0xff]  }
0x3bac   :  { %v16801_v18 = vpop.f32.mrb[99].mxu1 }
0x3bad   :  { %v23707_v20 = vadd.f32 %v16801_v18, %v16800_v17  ;;  %v21924_v17 = vld [vmem:[#allocation5 + $0xed8] sm:$0xff]   ;;  %v21925_v18 = vld [vmem:[#allocation5 + $0xee0] sm:$0xff]  }
0x3bc1   :  { %v16847_v21 = vpop.f32.mrb[100].mxu1 }
0x3bc2   :  { %v16848_v22 = vpop.f32.mrb[101].mxu1 }
0x3bc3   :  { %v23709_v39 = vadd.f32 %v16848_v22, %v16847_v21  ;;  %v16850_v0 = vpop.f32.mrb[102].mxu1  ;;  %v21926_v21 = vld [vmem:[#allocation5 + $0xee8] sm:$0xff]   ;;  %v21927_v22 = vld [vmem:[#allocation5 + $0xef0] sm:$0xff]  }
0x3bc4   :  { %v16851_v25 = vpop.f32.mrb[103].mxu1 }
0x3bc5   :  { %v23711_v29 = vadd.f32 %v16851_v25, %v16850_v0  ;;  %v21928_v0 = vld [vmem:[#allocation5 + $0xef8] sm:$0xff]   ;;  %v21929_v25 = vld [vmem:[#allocation5 + $0xe80] sm:$0xff]  }
0x3bc9   :  { %v16853_v3 = vpop.f32.mrb[104].mxu1 }
0x3bca   :  { %v16854_v46 = vpop.f32.mrb[105].mxu1 }
0x3bcb   :  { %v23713_v54 = vadd.f32 %v16854_v46, %v16853_v3  ;;  %v16856_v47 = vpop.f32.mrb[106].mxu1 }
0x3bcc   :  { %v16857_v48 = vpop.f32.mrb[107].mxu1 }
0x3bcd   :  { %v23715_v2 = vadd.f32 %v16857_v48, %v16856_v47 }
0x3c58   :  { %v19593_v4 = vpop.f32.mrb[140].mxu0 }
0x3c59   :  { %v11628_v49 = vpop.f32.mrb[141].mxu0 }
0x3c5a   :  { %v11647_v58 = vadd.f32 %v19593_v4, %v11628_v49 }
0x3c5c   :  { %v19596_v24 = vpop.f32.mrb[142].mxu0 }
0x3c5d   :  { %v11638_v38 = vpop.f32.mrb[143].mxu0 }
0x3c5e   :  { %v11648_v41 = vadd.f32 %v11647_v58, %v11638_v38 }
0x3c60   :  { %v11649_v62 = vadd.f32 %v19596_v24, %v11648_v41 }
0x3c62   :  { %v11650_v61 = vrot.slane %v11649_v62, 4 }
0x3c64   :  { %v11651_v56 = vadd.f32 %v11650_v61, %v11649_v62 }
0x3c66   :  { %v11652_v44 = vrot.slane %v11651_v56, 2 }
0x3c68   :  { %v11653_v51 = vadd.f32 %v11652_v44, %v11651_v56 }
0x3c6a   :  { %v11654_v52 = vrot.slane %v11653_v51, 1 }
0x3c6c   :  { %v11655_v50 = vadd.f32 %v11654_v52, %v11653_v51  ;;  %v11760_v52 = vld [vmem:[#allocation10 + $0x13] sm:$0x1] }
0x3c6e   :  { %v11656_v30 = vmul.f32 0.001953125, %v11655_v50 }
0x3c70   :  { %v11657_v57 = vsub.f32 %v23676_v31, %v11656_v30  ;;  %v11658_v11 = vsub.f32 %v23681_v5, %v11656_v30  ;;  %v11659_v14 = vsub.f32 %v23674_v40, %v11656_v30  ;;  %v11660_v28 = vsub.f32 %v23678_v63, %v11656_v30 }
0x3c72   :  { %v11661_v43 = vmul.f32 %v11657_v57, %v11657_v57  ;;  %v11662_v55 = vmul.f32 %v11658_v11, %v11658_v11  ;;  %v11663_v8 = vmul.f32 %v11659_v14, %v11659_v14  ;;  %v11664_v7 = vmul.f32 %v11660_v28, %v11660_v28  ;;  %v11764_v11 = vld [vmem:[#allocation12 + $0x13] sm:$0x1] }
0x3c74   :  { %19629 = vmatprep.mubr.f32.mxu0 %v11661_v43 }
0x3c75   :  { %19630 = vmatmul.mubr.f32.vlgmr.msra.gmra.mrb[144].mxu0 %v11662_v55 }
0x3c76   :  { %19632 = vmatprep.mubr.f32.mxu0 %v11663_v8  ;;  %19636 = vmatpush3.bf16.msra.mxu0 %v21921_v6 }
0x3c77   :  { %19637 = vmatprep.subr.bf16.mxu0 %v21922_v15 }
0x3c79   :  { %19633 = vmatmul.mubr.f32.gmra.mrb[146].mxu0 %v11664_v7 }
0x3c7a   :  { %19638 = vmatpush3.bf16.msra.mxu0 %v21922_v15 }
0x3c7b   :  { %19639 = vmatprep.subr.bf16.mxu0 %v21923_v10 }
0x3c7e   :  { %19640 = vmatpush3.bf16.msra.mxu0 %v21923_v10 }
0x3c7f   :  { %19641 = vmatprep.subr.bf16.mxu0 %v21924_v17 }
0x3c82   :  { %19642 = vmatpush3.bf16.msra.mxu0 %v21924_v17 }
0x3c83   :  { %19643 = vmatprep.subr.bf16.mxu0 %v21925_v18 }
0x3c86   :  { %19644 = vmatpush3.bf16.msra.mxu0 %v21925_v18 }
0x3c87   :  { %19645 = vmatprep.subr.bf16.mxu0 %v21926_v21 }
0x3c8a   :  { %19646 = vmatpush3.bf16.msra.mxu0 %v21926_v21 }
0x3c8b   :  { %19647 = vmatprep.subr.bf16.mxu0 %v21927_v22 }
0x3c8e   :  { %19648 = vmatpush3.bf16.msra.mxu0 %v21927_v22 }
0x3c8f   :  { %19649 = vmatprep.subr.bf16.mxu0 %v21928_v0 }
0x3c92   :  { %19650 = vmatpush3.bf16.msra.mxu0 %v21928_v0 }
0x3c93   :  { %19655 = vmatprep.subr.bf16.mxu0 %v21929_v25 }
0x3d48   :  { %v19631_v3 = vpop.f32.mrb[144].mxu0 }
0x3d49   :  { %v11731_v46 = vpop.f32.mrb[145].mxu0 }
0x3d4a   :  { %v11750_v47 = vadd.f32 %v19631_v3, %v11731_v46  ;;  %v21930_v46 = vld [vmem:[#allocation5 + $0xe88] sm:$0xff]  }
0x3d4c   :  { %v19634_v48 = vpop.f32.mrb[146].mxu0 }
0x3d4d   :  { %v11741_v4 = vpop.f32.mrb[147].mxu0 }
0x3d4e   :  { %v11751_v49 = vadd.f32 %v11750_v47, %v11741_v4  ;;  %v21932_v4 = vld [vmem:[#allocation5 + $0xe98] sm:$0xff]  }
0x3d50   :  { %v11752_v58 = vadd.f32 %v19634_v48, %v11751_v49  ;;  %v21933_v49 = vld [vmem:[#allocation5 + $0xea0] sm:$0xff]  }
0x3d52   :  { %v11753_v24 = vrot.slane %v11752_v58, 4 }
0x3d54   :  { %v11754_v38 = vadd.f32 %v11753_v24, %v11752_v58  ;;  %v21934_v58 = vld [vmem:[#allocation5 + $0xea8] sm:$0xff]   ;;  %v21935_v24 = vld [vmem:[#allocation5 + $0xeb0] sm:$0xff]  }
0x3d56   :  { %v11755_v41 = vrot.slane %v11754_v38, 2 }
0x3d58   :  { %v11756_v62 = vadd.f32 %v11755_v41, %v11754_v38  ;;  %v21937_v38 = vld [vmem:[#allocation5 + $0xf00] sm:$0xff]   ;;  %v11793_v41 = vld [vmem:[#allocation3 + $0x35] sm:$0xff] }
0x3d5a   :  { %v11757_v61 = vrot.slane %v11756_v62, 1 }
0x3d5c   :  { %v11758_v56 = vadd.f32 %v11757_v61, %v11756_v62 }
0x3d5e   :  { %v11759_v44 = vmul.f32 0.001953125, %v11758_v56  ;;  %v12032_v56 = vld [vmem:[#allocation3 + $0x23] sm:$0xff] }
0x3d60   :  { %v11761_v51 = vadd.f32 1e-05, %v11759_v44 }
0x3d62   :  { %22095 = vrsqrt.f32 %v11761_v51  ;;  %v21938_v51 = vld [vmem:[#allocation5 + $0xf08] sm:$0xff]  }
0x3d6c   :  { %v22096_v50 = vpop.eup %22095 }
0x3d6d   :  { %v11763_v57 = vmul.f32 %v22096_v50, %v11760_v52  ;;  %v21939_v50 = vld [vmem:[#allocation5 + $0xf10] sm:$0xff]  }
0x3d6f   :  { %v11765_v14 = vmul.f32 %v11763_v57, %v11656_v30  ;;  %v11770_v43 = vrot.slane %v11763_v57, %v22456_v33  ;;  %v21940_v57 = vld [vmem:[#allocation5 + $0xf18] sm:$0xff]  }
0x3d71   :  { %v11766_v55 = vsub.f32 %v11764_v11, %v11765_v14  ;;  %v11771_v28 = vmul.f32 %v11770_v43, %v23676_v31  ;;  %v11772_v8 = vmul.f32 %v11770_v43, %v23681_v5  ;;  %v11773_v7 = vmul.f32 %v23674_v40, %v11770_v43  ;;  %v11791_v40 = vld [vmem:[#allocation3 + $0x5] sm:$0xff] }
0x3d72   :  { %v11774_v6 = vmul.f32 %v23678_v63, %v11770_v43  ;;  %v21931_v63 = vld [vmem:[#allocation5 + $0xe90] sm:$0xff]   ;;  %v21941_v11 = vld [vmem:[#allocation5 + $0xf20] sm:$0xff]   ;;  %v21942_v14 = vld [vmem:[#allocation5 + $0xf28] sm:$0xff]  }
0x3d73   :  { %v11778_v15 = vrot.slane %v11766_v55, %v22456_v33  ;;  %v21943_v43 = vld [vmem:[#allocation5 + $0xf30] sm:$0xff]   ;;  %v21944_v55 = vld [vmem:[#allocation5 + $0xf38] sm:$0xff]  }
0x3d75   :  { %v11779_v10 = vadd.f32 %v11778_v15, %v11771_v28  ;;  %v11780_v17 = vadd.f32 %v11778_v15, %v11772_v8  ;;  %v11781_v18 = vadd.f32 %v11778_v15, %v11773_v7  ;;  %v11782_v21 = vadd.f32 %v11778_v15, %v11774_v6  ;;  %v12034_v8 = vld [vmem:[#allocation3 + $0x53] sm:$0xff] }
0x3d77   :  { %v11783_v22 = vmax.f32 %v11779_v10, 0.0  ;;  %v11784_v0 = vmax.f32 %v11780_v17, 0.0  ;;  %v11785_v30 = vmax.f32 %v11781_v18, 0.0  ;;  %v11786_v3 = vmax.f32 %v11782_v21, 0.0  ;;  %v21945_v18 = vld [vmem:[#allocation7 + $0x1c0] sm:$0xff]  }
0x3d79   :  { %11787 = vst [vmem:[#allocation3 + $0x10] sm:$0xff] %v11783_v22  ;;  %11788 = vst [vmem:[#allocation3 + $0x18] sm:$0xff] %v11784_v0  ;;  %v11818_v31 = vpack.c.bf16 %v11784_v0, %v11783_v22  ;;  %v11819_v5 = vpack.c.bf16 %v11786_v3, %v11785_v30 }
0x3d7a   :  { %11789 = vst [vmem:[#allocation3 + $0x40] sm:$0xff] %v11785_v30  ;;  %11790 = vst [vmem:[#allocation3 + $0x48] sm:$0xff] %v11786_v3 }
0x3d7b   :  { %19651 = vmatprep.mubr.bf16.mxu0 %v11818_v31 }
0x3d7c   :  { %19652 = vmatmul.mubr.bf16.vlgmr.msra.gmra.mrb[148].mxu0 %v11819_v5 }
0x3d7d   :  { %19656 = vmatpush3.bf16.msra.mxu0 %v21929_v25  ;;  %v21936_v25 = vld [vmem:[#allocation5 + $0xeb8] sm:$0xff]  }
0x3d7e   :  { %19657 = vmatprep.subr.bf16.mxu0 %v21930_v46 }
0x3d80   :  { %v11792_v47 = vld [vmem:[#allocation3 + $0xd] sm:$0xff]  ;;  %v12031_v61 = vld [vmem:[#allocation3 + $0x1b] sm:$0xff] }
0x3d81   :  { %v11795_v48 = vpack.c.bf16 %v11792_v47, %v11791_v40  ;;  %19658 = vmatpush3.bf16.msra.mxu0 %v21930_v46  ;;  %v11794_v62 = vld [vmem:[#allocation3 + $0x3d] sm:$0xff]  ;;  %v12035_v52 = vpack.c.bf16 %v12032_v56, %v12031_v61  ;;  %v12033_v28 = vld [vmem:[#allocation3 + $0x4b] sm:$0xff] }
0x3d82   :  { %19659 = vmatprep.subr.bf16.mxu0 %v21931_v63  ;;  %v11796_v44 = vpack.c.bf16 %v11794_v62, %v11793_v41  ;;  %v12036_v7 = vpack.c.bf16 %v12034_v8, %v12033_v28  ;;  %v21946_v62 = vld [vmem:[#allocation7 + $0x180] sm:$0xff]   ;;  %v21947_v61 = vld [vmem:[#allocation7 + $0x1c8] sm:$0xff]  }
0x3d83   :  { %19671 = vmatprep.mubr.bf16.mxu0 %v11795_v48  ;;  %v21953_v28 = vld [vmem:[#allocation7 + $0x1e0] sm:$0xff]  }
0x3d84   :  { %v21954_v8 = vld [vmem:[#allocation7 + $0x1a0] sm:$0xff]  }
0x3d85   :  { %19660 = vmatpush3.bf16.msra.mxu0 %v21931_v63 }
0x3d86   :  { %19661 = vmatprep.subr.bf16.mxu0 %v21932_v4 }
0x3d89   :  { %19662 = vmatpush3.bf16.msra.mxu0 %v21932_v4 }
0x3d8a   :  { %19663 = vmatprep.subr.bf16.mxu0 %v21933_v49 }
0x3d8d   :  { %19664 = vmatpush3.bf16.msra.mxu0 %v21933_v49 }
0x3d8e   :  { %19665 = vmatprep.subr.bf16.mxu0 %v21934_v58 }
0x3d91   :  { %19666 = vmatpush3.bf16.msra.mxu0 %v21934_v58 }
0x3d92   :  { %19667 = vmatprep.subr.bf16.mxu0 %v21935_v24 }
0x3d95   :  { %19668 = vmatpush3.bf16.msra.mxu0 %v21935_v24 }
0x3d96   :  { %19669 = vmatprep.subr.bf16.mxu0 %v21936_v25 }
0x3d99   :  { %19670 = vmatpush3.bf16.msra.mxu0 %v21936_v25 }
0x3d9a   :  { %19675 = vmatprep.subr.bf16.mxu0 %v21937_v38 }
0x3d9c   :  { %19672 = vmatmul.mubr.bf16.vlgmr.msra.gmra.mrb[148].mxu0 %v11796_v44 }
0x3d9d   :  { %19676 = vmatpush3.bf16.msra.mxu0 %v21937_v38  ;;  %19691 = vmatprep.mubr.bf16.mxu0 %v12035_v52  ;;  %v21948_v52 = vld [vmem:[#allocation7 + $0x188] sm:$0xff]  }
0x3d9e   :  { %19677 = vmatprep.subr.bf16.mxu0 %v21938_v51 }
0x3da1   :  { %19678 = vmatpush3.bf16.msra.mxu0 %v21938_v51  ;;  %v23781_v51 = vld [vmem:[#allocation4 + $0x38] sm:$0xff] }
0x3da2   :  { %19679 = vmatprep.subr.bf16.mxu0 %v21939_v50 }
0x3da5   :  { %19680 = vmatpush3.bf16.msra.mxu0 %v21939_v50 }
0x3da6   :  { %19681 = vmatprep.subr.bf16.mxu0 %v21940_v57 }
0x3da9   :  { %19682 = vmatpush3.bf16.msra.mxu0 %v21940_v57  ;;  %v21949_v57 = vld [vmem:[#allocation7 + $0x1d0] sm:$0xff]  }
0x3daa   :  { %19683 = vmatprep.subr.bf16.mxu0 %v21941_v11 }
0x3dad   :  { %19684 = vmatpush3.bf16.msra.mxu0 %v21941_v11  ;;  %v12662_v11 = vpack.c.bf16 %v23651_v53, %v23781_v51  ;;  %v21958_v53 = vld [vmem:[#allocation7 + $0x1b0] sm:$0xff]  }
0x3dae   :  { %19685 = vmatprep.subr.bf16.mxu0 %v21942_v14 }
0x3db1   :  { %19686 = vmatpush3.bf16.msra.mxu0 %v21942_v14  ;;  %v21950_v14 = vld [vmem:[#allocation7 + $0x190] sm:$0xff]  }
0x3db2   :  { %19687 = vmatprep.subr.bf16.mxu0 %v21943_v43 }
0x3db5   :  { %19688 = vmatpush3.bf16.msra.mxu0 %v21943_v43  ;;  %v21951_v43 = vld [vmem:[#allocation7 + $0x1d8] sm:$0xff]  }
0x3db6   :  { %19689 = vmatprep.subr.bf16.mxu0 %v21944_v55 }
0x3db9   :  { %19690 = vmatpush3.bf16.msra.mxu0 %v21944_v55  ;;  %v21952_v55 = vld [vmem:[#allocation7 + $0x198] sm:$0xff]  }
0x3dba   :  { %21128 = vmatprep.subr.bf16.mxu0 %v22363_v9 }
0x3dbc   :  { %19692 = vmatmul.mubr.bf16.vlgmr.msra.gmra.mrb[148].mxu0 %v12036_v7  ;;  %v21955_v7 = vld [vmem:[#allocation7 + $0x1e8] sm:$0xff]  }
0x3dbd   :  { %21130 = vmatpush3.bf16.msra.mxu0 %v22363_v9 }
0x3dbe   :  { %21132 = vmatprep.subr.bf16.mxu0 %v22365_v12 }
0x3dc1   :  { %21134 = vmatpush3.bf16.msra.mxu0 %v22365_v12 }
0x3dc2   :  { %21136 = vmatprep.subr.bf16.mxu0 %v22370_v19 }
0x3dc5   :  { %21138 = vmatpush3.bf16.msra.mxu0 %v22370_v19 }
0x3dc6   :  { %21140 = vmatprep.subr.bf16.mxu0 %v22374_v23 }
0x3dc9   :  { %21142 = vmatpush3.bf16.msra.mxu0 %v22374_v23 }
0x3dca   :  { %21144 = vmatprep.subr.bf16.mxu0 %v22378_v27 }
0x3dcd   :  { %21146 = vmatpush3.bf16.msra.mxu0 %v22378_v27 }
0x3dce   :  { %21148 = vmatprep.subr.bf16.mxu0 %v22388_v32 }
0x3dd1   :  { %21150 = vmatpush3.bf16.msra.mxu0 %v22388_v32 }
0x3dd2   :  { %21152 = vmatprep.subr.bf16.mxu0 %v22392_v34 }
0x3dd5   :  { %21154 = vmatpush3.bf16.msra.mxu0 %v22392_v34 }
0x3dd6   :  { %21156 = vmatprep.subr.bf16.mxu0 %v22411_v37 }
0x3dd9   :  { %21158 = vmatpush3.bf16.msra.mxu0 %v22411_v37 }
0x3dda   :  { %21160 = vmatprep.subr.bf16.mxu0 %v22363_v9 }
0x3e8f   :  { %v23744_v6 = vpop.f32.mrb[148].mxu0 }
0x3e90   :  { %v23746_v15 = vpop.f32.mrb[149].mxu0 }
0x3e91   :  { %v23748_v10 = vpop.f32.mrb[150].mxu0  ;;  %19727 = vmatprep.mubr.f32.mxu0 %v23746_v15 }
0x3e92   :  { %v23751_v17 = vpop.f32.mrb[151].mxu0 }
0x3e93   :  { %19728 = vmatmul.mubr.f32.vlgmr.msra.gmra.mrb[152].mxu0 %v23751_v17 }
0x3e94   :  { %19730 = vmatprep.mubr.f32.mxu0 %v23744_v6  ;;  %21162 = vmatpush3.bf16.msra.mxu0 %v22363_v9 }
0x3e95   :  { %21164 = vmatprep.subr.bf16.mxu0 %v22365_v12 }
0x3e97   :  { %19731 = vmatmul.mubr.f32.gmra.mrb[154].mxu0 %v23748_v10 }
0x3e98   :  { %21166 = vmatpush3.bf16.msra.mxu0 %v22365_v12 }
0x3e99   :  { %21168 = vmatprep.subr.bf16.mxu0 %v22370_v19 }
0x3e9c   :  { %21170 = vmatpush3.bf16.msra.mxu0 %v22370_v19 }
0x3e9d   :  { %21172 = vmatprep.subr.bf16.mxu0 %v22374_v23 }
0x3ea0   :  { %21174 = vmatpush3.bf16.msra.mxu0 %v22374_v23 }
0x3ea1   :  { %21176 = vmatprep.subr.bf16.mxu0 %v22378_v27 }
0x3ea4   :  { %21178 = vmatpush3.bf16.msra.mxu0 %v22378_v27 }
0x3ea5   :  { %21180 = vmatprep.subr.bf16.mxu0 %v22388_v32 }
0x3ea8   :  { %21182 = vmatpush3.bf16.msra.mxu0 %v22388_v32 }
0x3ea9   :  { %21184 = vmatprep.subr.bf16.mxu0 %v22392_v34 }
0x3eac   :  { %21186 = vmatpush3.bf16.msra.mxu0 %v22392_v34 }
0x3ead   :  { %21188 = vmatprep.subr.bf16.mxu0 %v22411_v37 }
0x3eb0   :  { %21190 = vmatpush3.bf16.msra.mxu0 %v22411_v37 }
0x3eb1   :  { %16663 = vmatprep.subr.bf16.mxu0 %v21945_v18  ;;  %v21956_v18 = vld [vmem:[#allocation7 + $0x1a8] sm:$0xff]  }
0x3f66   :  { %v19729_v21 = vpop.f32.mrb[152].mxu0 }
0x3f67   :  { %v12221_v22 = vpop.f32.mrb[153].mxu0 }
0x3f68   :  { %v12240_v0 = vadd.f32 %v19729_v21, %v12221_v22  ;;  %v21957_v21 = vld [vmem:[#allocation7 + $0x1f0] sm:$0xff]   ;;  %v21959_v22 = vld [vmem:[#allocation7 + $0x1f8] sm:$0xff]  }
0x3f6a   :  { %v19732_v30 = vpop.f32.mrb[154].mxu0 }
0x3f6b   :  { %v12231_v3 = vpop.f32.mrb[155].mxu0 }
0x3f6c   :  { %v12241_v31 = vadd.f32 %v12240_v0, %v12231_v3  ;;  %v21960_v0 = vld [vmem:[#allocation7 + $0x1b8] sm:$0xff]   ;;  %v23785_v3 = vld [vmem:[#allocation4 + $0x30] sm:$0xff] }
0x3f6e   :  { %v12242_v5 = vadd.f32 %v19732_v30, %v12241_v31  ;;  %v21961_v30 = vld [vmem:[#allocation7 + $0x240] sm:$0xff]   ;;  %v23787_v31 = vld [vmem:[#allocation4 + $0xf8] sm:$0xff] }
0x3f70   :  { %v12243_v46 = vrot.slane %v12242_v5, 4 }
0x3f72   :  { %v12244_v40 = vadd.f32 %v12243_v46, %v12242_v5  ;;  %v21962_v5 = vld [vmem:[#allocation7 + $0x200] sm:$0xff]   ;;  %v12661_v46 = vpack.c.bf16 %v23659_v35, %v23785_v3  ;;  %v21967_v35 = vld [vmem:[#allocation7 + $0x258] sm:$0xff]  }
0x3f74   :  { %v12245_v63 = vrot.slane %v12244_v40, 2 }
0x3f76   :  { %v12246_v47 = vadd.f32 %v12245_v63, %v12244_v40  ;;  %v21963_v40 = vld [vmem:[#allocation7 + $0x248] sm:$0xff]   ;;  %v12668_v63 = vpack.c.bf16 %v23661_v45, %v23787_v31  ;;  %v21968_v45 = vld [vmem:[#allocation7 + $0x218] sm:$0xff]  }
0x3f78   :  { %v12247_v48 = vrot.slane %v12246_v47, 1 }
0x3f7a   :  { %v12248_v4 = vadd.f32 %v12247_v48, %v12246_v47  ;;  %v21964_v47 = vld [vmem:[#allocation7 + $0x208] sm:$0xff]   ;;  %v21965_v48 = vld [vmem:[#allocation7 + $0x250] sm:$0xff]  }
0x3f7c   :  { %v23771_v49 = vmul.f32 0.001953125, %v12248_v4  ;;  %v23793_v4 = vld [vmem:[#allocation4 + $0xf0] sm:$0xff] }
0x3f7e   :  { %v12250_v58 = vsub.f32 %v23746_v15, %v23771_v49  ;;  %v12251_v24 = vsub.f32 %v23751_v17, %v23771_v49  ;;  %v12252_v25 = vsub.f32 %v23744_v6, %v23771_v49  ;;  %v12253_v56 = vsub.f32 %v23748_v10, %v23771_v49 }
0x3f80   :  { %v12254_v38 = vmul.f32 %v12250_v58, %v12250_v58  ;;  %v12255_v41 = vmul.f32 %v12251_v24, %v12251_v24  ;;  %v12256_v44 = vmul.f32 %v12252_v25, %v12252_v25  ;;  %v12257_v50 = vmul.f32 %v12253_v56, %v12253_v56  ;;  %v12652_v58 = vld [vmem:[#allocation4 + $0x78] sm:$0xff]  ;;  %v21966_v24 = vld [vmem:[#allocation7 + $0x210] sm:$0xff]   ;;  %v21972_v56 = vld [vmem:[#allocation7 + $0x228] sm:$0xff]  }
0x3f81   :  { %v12667_v25 = vpack.c.bf16 %v23669_v60, %v23793_v4  ;;  %v21974_v60 = vld [vmem:[#allocation7 + $0x230] sm:$0xff]  }
0x3f82   :  { %19765 = vmatprep.mubr.f32.mxu0 %v12254_v38  ;;  %v12664_v38 = vpack.c.bf16 %v12652_v58, %v23633_v59  ;;  %v21976_v59 = vld [vmem:[#allocation7 + $0x238] sm:$0xff]  }
0x3f83   :  { %19766 = vmatmul.mubr.f32.vlgmr.msra.gmra.mrb[156].mxu0 %v12255_v41  ;;  %v21969_v41 = vld [vmem:[#allocation7 + $0x260] sm:$0xff]   ;;  %v21992_v58 = vld [vmem:[#allocation7 + $0x458] sm:$0xff]  }
0x3f84   :  { %16664 = vmatpush3.bf16.msra.mxu0 %v21946_v62  ;;  %19768 = vmatprep.mubr.f32.mxu0 %v12256_v44  ;;  %v21970_v62 = vld [vmem:[#allocation7 + $0x220] sm:$0xff]   ;;  %v21973_v44 = vld [vmem:[#allocation7 + $0x270] sm:$0xff]  }
0x3f85   :  { %16665 = vmatprep.subr.bf16.mxu0 %v21947_v61  ;;  %v21971_v61 = vld [vmem:[#allocation7 + $0x268] sm:$0xff]  }
0x3f87   :  { %19769 = vmatmul.mubr.f32.gmra.mrb[158].mxu0 %v12257_v50  ;;  %v12651_v50 = vld [vmem:[#allocation4 + $0x70] sm:$0xff] }
0x3f88   :  { %16666 = vmatpush3.bf16.msra.mxu0 %v21948_v52  ;;  %13090 = vmatprep.mubr.bf16.mxu0 %v12662_v11  ;;  %v21975_v52 = vld [vmem:[#allocation7 + $0x278] sm:$0xff]   ;;  %v12663_v11 = vpack.c.bf16 %v12651_v50, %v23639_v13  ;;  %v21980_v13 = vld [vmem:[#allocation7 + $0x440] sm:$0xff]  }
0x3f89   :  { %16667 = vmatprep.subr.bf16.mxu0 %v21949_v57  ;;  %v12658_v57 = vld [vmem:[#allocation4 + $0x138] sm:$0xff]  ;;  %16887 = vmatprep.subr.bf16.mxu1 %v21980_v13 }
0x3f8a   :  { %v22010_v50 = vld [vmem:[#allocation7 + $0x438] sm:$0xff]  }
0x3f8c   :  { %16668 = vmatpush3.bf16.msra.mxu0 %v21950_v14  ;;  %v12670_v14 = vpack.c.bf16 %v12658_v57, %v23641_v42  ;;  %v21987_v42 = vld [vmem:[#allocation7 + $0x2d8] sm:$0xff]  }
0x3f8d   :  { %16669 = vmatprep.subr.bf16.mxu0 %v21951_v43  ;;  %v12657_v43 = vld [vmem:[#allocation4 + $0x130] sm:$0xff] }
0x3f90   :  { %16670 = vmatpush3.bf16.msra.mxu0 %v21952_v55  ;;  %v12669_v55 = vpack.c.bf16 %v12657_v43, %v23649_v1  ;;  %v21984_v1 = vld [vmem:[#allocation7 + $0x448] sm:$0xff]  }
0x3f91   :  { %16671 = vmatprep.subr.bf16.mxu0 %v21953_v28  ;;  %v21977_v28 = vld [vmem:[#allocation7 + $0x2c0] sm:$0xff]  }
0x3f94   :  { %16672 = vmatpush3.bf16.msra.mxu0 %v21954_v8  ;;  %v21978_v8 = vld [vmem:[#allocation7 + $0x280] sm:$0xff]  }
0x3f95   :  { %16673 = vmatprep.subr.bf16.mxu0 %v21955_v7  ;;  %v21979_v7 = vld [vmem:[#allocation7 + $0x2c8] sm:$0xff]  }
0x3f98   :  { %16674 = vmatpush3.bf16.msra.mxu0 %v21956_v18  ;;  %v21981_v18 = vld [vmem:[#allocation7 + $0x288] sm:$0xff]  }
0x3f99   :  { %16675 = vmatprep.subr.bf16.mxu0 %v21957_v21  ;;  %v21983_v21 = vld [vmem:[#allocation7 + $0x2d0] sm:$0xff]  }
0x3f9c   :  { %16676 = vmatpush3.bf16.msra.mxu0 %v21958_v53  ;;  %v21985_v53 = vld [vmem:[#allocation7 + $0x290] sm:$0xff]  }
0x3f9d   :  { %16677 = vmatprep.subr.bf16.mxu0 %v21959_v22  ;;  %v21982_v22 = vld [vmem:[#allocation7 + $0x400] sm:$0xff]  }
0x3f9e   :  { %16888 = vmatpush3.bf16.msra.mxu1 %v21982_v22 }
0x3f9f   :  { %16889 = vmatprep.subr.bf16.mxu1 %v21984_v1 }
0x3fa0   :  { %16678 = vmatpush3.bf16.msra.mxu0 %v21960_v0  ;;  %v21989_v0 = vld [vmem:[#allocation7 + $0x298] sm:$0xff]  }
0x3fa1   :  { %16691 = vmatprep.subr.bf16.mxu0 %v21961_v30  ;;  %v21991_v30 = vld [vmem:[#allocation7 + $0x2e0] sm:$0xff]  }
0x3fa3   :  { %13091 = vmatmul.mubr.bf16.vlgmr.msra.gmra.mrb[160].mxu0 %v12661_v46  ;;  %v21993_v46 = vld [vmem:[#allocation7 + $0x2a0] sm:$0xff]  }
0x3fa4   :  { %13098 = vmatprep.mubr.bf16.mxu0 %v12668_v63  ;;  %16692 = vmatpush3.bf16.msra.mxu0 %v21962_v5  ;;  %v21986_v5 = vld [vmem:[#allocation7 + $0x408] sm:$0xff]  }
0x3fa5   :  { %16693 = vmatprep.subr.bf16.mxu0 %v21963_v40  ;;  %16890 = vmatpush3.bf16.msra.mxu1 %v21986_v5  ;;  %v21988_v40 = vld [vmem:[#allocation7 + $0x450] sm:$0xff]   ;;  %v21995_v63 = vld [vmem:[#allocation7 + $0x2e8] sm:$0xff]  }
0x3fa6   :  { %16891 = vmatprep.subr.bf16.mxu1 %v21988_v40  ;;  %v12353_v5 = vld [vmem:[#allocation10 + $0x14] sm:$0x1] }
0x3fa8   :  { %16694 = vmatpush3.bf16.msra.mxu0 %v21964_v47  ;;  %v21990_v47 = vld [vmem:[#allocation7 + $0x410] sm:$0xff]  }
0x3fa9   :  { %16695 = vmatprep.subr.bf16.mxu0 %v21965_v48  ;;  %v21997_v48 = vld [vmem:[#allocation7 + $0x2a8] sm:$0xff]   ;;  %16892 = vmatpush3.bf16.msra.mxu1 %v21990_v47 }
0x3faa   :  { %16893 = vmatprep.subr.bf16.mxu1 %v21992_v58 }
0x3fab   :  { %13099 = vmatmul.mubr.bf16.gmra.mrb[164].mxu0 %v12667_v25  ;;  %v21999_v25 = vld [vmem:[#allocation7 + $0x2f0] sm:$0xff]  }
0x3fac   :  { %16696 = vmatpush3.bf16.msra.mxu0 %v21966_v24  ;;  %13139 = vmatprep.mubr.bf16.mxu0 %v12664_v38  ;;  %v21994_v24 = vld [vmem:[#allocation7 + $0x418] sm:$0xff]   ;;  %v22001_v38 = vld [vmem:[#allocation7 + $0x2b0] sm:$0xff]  }
0x3fad   :  { %16697 = vmatprep.subr.bf16.mxu0 %v21967_v35  ;;  %v21996_v35 = vld [vmem:[#allocation7 + $0x460] sm:$0xff]   ;;  %16894 = vmatpush3.bf16.msra.mxu1 %v21994_v24  ;;  %v12357_v24 = vld [vmem:[#allocation12 + $0x14] sm:$0x1] }
0x3fae   :  { %16895 = vmatprep.subr.bf16.mxu1 %v21996_v35 }
0x3fb0   :  { %16698 = vmatpush3.bf16.msra.mxu0 %v21968_v45  ;;  %v22003_v45 = vld [vmem:[#allocation7 + $0x2f8] sm:$0xff]  }
0x3fb1   :  { %16699 = vmatprep.subr.bf16.mxu0 %v21969_v41  ;;  %v21998_v41 = vld [vmem:[#allocation7 + $0x420] sm:$0xff]  }
0x3fb2   :  { %16896 = vmatpush3.bf16.msra.mxu1 %v21998_v41 }
0x3fb4   :  { %16700 = vmatpush3.bf16.msra.mxu0 %v21970_v62  ;;  %v22005_v62 = vld [vmem:[#allocation7 + $0x2b8] sm:$0xff]  }
0x3fb5   :  { %16701 = vmatprep.subr.bf16.mxu0 %v21971_v61  ;;  %v22000_v61 = vld [vmem:[#allocation7 + $0x468] sm:$0xff]  }
0x3fb6   :  { %16897 = vmatprep.subr.bf16.mxu1 %v22000_v61 }
0x3fb8   :  { %16702 = vmatpush3.bf16.msra.mxu0 %v21972_v56  ;;  %v22007_v56 = vld [vmem:[#allocation7 + $0x40] sm:$0xff]  }
0x3fb9   :  { %16703 = vmatprep.subr.bf16.mxu0 %v21973_v44  ;;  %v22002_v44 = vld [vmem:[#allocation7 + $0x428] sm:$0xff]  }
0x3fba   :  { %16898 = vmatpush3.bf16.msra.mxu1 %v22002_v44 }
0x3fbc   :  { %16704 = vmatpush3.bf16.msra.mxu0 %v21974_v60  ;;  %v22004_v60 = vld [vmem:[#allocation7 + $0x470] sm:$0xff]  }
0x3fbd   :  { %16705 = vmatprep.subr.bf16.mxu0 %v21975_v52  ;;  %v22006_v52 = vld [vmem:[#allocation7 + $0x430] sm:$0xff]   ;;  %16899 = vmatprep.subr.bf16.mxu1 %v22004_v60 }
0x3fbe   :  { %16900 = vmatpush3.bf16.msra.mxu1 %v22006_v52 }
0x3fc0   :  { %16706 = vmatpush3.bf16.msra.mxu0 %v21976_v59  ;;  %v22008_v59 = vld [vmem:[#allocation7 + $0x478] sm:$0xff]  }
0x3fc1   :  { %16719 = vmatprep.subr.bf16.mxu0 %v21977_v28  ;;  %16901 = vmatprep.subr.bf16.mxu1 %v22008_v59 }
0x3fc2   :  { %16902 = vmatpush3.bf16.msra.mxu1 %v22010_v50 }
0x3fc3   :  { %13140 = vmatmul.mubr.bf16.vlgmr.msra.gmra.mrb[168].mxu0 %v12663_v11  ;;  %21224 = vmatprep.subr.bf16.mxu1 %v22363_v9 }
0x3fc4   :  { %13147 = vmatprep.mubr.bf16.mxu0 %v12670_v14  ;;  %16720 = vmatpush3.bf16.msra.mxu0 %v21978_v8 }
0x3fc5   :  { %16721 = vmatprep.subr.bf16.mxu0 %v21979_v7 }
0x3fc8   :  { %16722 = vmatpush3.bf16.msra.mxu0 %v21981_v18 }
0x3fc9   :  { %16723 = vmatprep.subr.bf16.mxu0 %v21983_v21 }
0x3fcb   :  { %13148 = vmatmul.mubr.bf16.gmra.mrb[172].mxu0 %v12669_v55 }
0x3fcc   :  { %16724 = vmatpush3.bf16.msra.mxu0 %v21985_v53 }
0x3fcd   :  { %16725 = vmatprep.subr.bf16.mxu0 %v21987_v42 }
0x3fd0   :  { %16726 = vmatpush3.bf16.msra.mxu0 %v21989_v0 }
0x3fd1   :  { %16727 = vmatprep.subr.bf16.mxu0 %v21991_v30 }
0x3fd4   :  { %16728 = vmatpush3.bf16.msra.mxu0 %v21993_v46 }
0x3fd5   :  { %16729 = vmatprep.subr.bf16.mxu0 %v21995_v63 }
0x3fd8   :  { %16730 = vmatpush3.bf16.msra.mxu0 %v21997_v48 }
0x3fd9   :  { %16731 = vmatprep.subr.bf16.mxu0 %v21999_v25 }
0x3fdc   :  { %16732 = vmatpush3.bf16.msra.mxu0 %v22001_v38 }
0x3fdd   :  { %16733 = vmatprep.subr.bf16.mxu0 %v22003_v45 }
0x3fe0   :  { %16734 = vmatpush3.bf16.msra.mxu0 %v22005_v62 }
0x3fe1   :  { %16747 = vmatprep.subr.bf16.mxu0 %v22007_v56 }
0x4056   :  { %v19767_v57 = vpop.f32.mrb[156].mxu0 }
0x4057   :  { %v12324_v11 = vpop.f32.mrb[157].mxu0 }
0x4058   :  { %v12343_v14 = vadd.f32 %v19767_v57, %v12324_v11 }
0x405a   :  { %v19770_v43 = vpop.f32.mrb[158].mxu0 }
0x405b   :  { %v12334_v55 = vpop.f32.mrb[159].mxu0 }
0x405c   :  { %v12344_v28 = vadd.f32 %v12343_v14, %v12334_v55 }
0x405e   :  { %v12345_v8 = vadd.f32 %v19770_v43, %v12344_v28  ;;  %v23821_v28 = vld [vmem:[#allocation4 + $0x50] sm:$0xff] }
0x4060   :  { %v12346_v7 = vrot.slane %v12345_v8, 4 }
0x4062   :  { %v12347_v18 = vadd.f32 %v12346_v7, %v12345_v8  ;;  %v22009_v7 = vld [vmem:[#allocation7] sm:$0xff]  }
0x4064   :  { %v12348_v21 = vrot.slane %v12347_v18, 2 }
0x4066   :  { %v12349_v53 = vadd.f32 %v12348_v21, %v12347_v18  ;;  %v12385_v21 = vld [vmem:[#allocation4 + $0x8] sm:$0x80] }
0x4068   :  { %v12350_v13 = vrot.slane %v12349_v53, 1 }
0x406a   :  { %v12351_v42 = vadd.f32 %v12350_v13, %v12349_v53  ;;  %v12397_v53 = vld [vmem:[#allocation4 + $0x68] sm:$0x7f] }
0x406c   :  { %v12352_v22 = vmul.f32 0.001953125, %v12351_v42  ;;  %v22011_v42 = vld [vmem:[#allocation7 + $0x48] sm:$0xff]  }
0x406e   :  { %v12354_v0 = vadd.f32 1e-05, %v12352_v22  ;;  %v13644_v22 = vld [vmem:[#allocation4 + $0x50] sm:$0xfe] }
0x4070   :  { %22097 = vrsqrt.f32 %v12354_v0  ;;  %v13656_v0 = vld [vmem:[#allocation4 + $0xb0] sm:$0x1] }
0x4076   :  { %v16679_v1 = vpop.f32.mrb[160].mxu0 }
0x4077   :  { %v16680_v30 = vpop.f32.mrb[161].mxu0 }
0x4078   :  { %v23802_v46 = vadd.f32 %v16680_v30, %v16679_v1  ;;  %v16682_v40 = vpop.f32.mrb[162].mxu0  ;;  %v12461_v1 = vrot.slane %v23781_v51, 7  ;;  %v13657_v30 = vld [vmem:[#allocation4 + $0xb8] sm:$0x1] }
0x4079   :  { %v16683_v63 = vpop.f32.mrb[163].mxu0 }
0x407a   :  { %v22098_v47 = vpop.eup %22097  ;;  %v23804_v48 = vadd.f32 %v16683_v63, %v16682_v40  ;;  %v12477_v40 = vrot.slane %v12397_v53, 7  ;;  %v22012_v63 = vld [vmem:[#allocation7 + $0x8] sm:$0xff]   ;;  %v13662_v53 = vld [vmem:[#allocation4 + $0x110] sm:$0xfe] }
0x407b   :  { %v12356_v58 = vmul.f32 %v22098_v47, %v12353_v5  ;;  %v12460_v5 = vrot.slane %v12385_v21, 7  ;;  %v13725_v47 = vrot.slane %v13644_v22, 1 }
0x407d   :  { %v12358_v25 = vmul.f32 %v12356_v58, %v23771_v49  ;;  %v12363_v35 = vrot.slane %v12356_v58, %v22456_v33 }
0x407e   :  { %v16685_v38 = vpop.f32.mrb[164].mxu0 }
0x407f   :  { %v12359_v45 = vsub.f32 %v12357_v24, %v12358_v25  ;;  %v12364_v41 = vmul.f32 %v12363_v35, %v23746_v15  ;;  %v12365_v62 = vmul.f32 %v12363_v35, %v23751_v17  ;;  %v12366_v61 = vmul.f32 %v23744_v6, %v12363_v35  ;;  %v16686_v56 = vpop.f32.mrb[165].mxu0  ;;  %v13675_v25 = vld [vmem:[#allocation4 + $0x178] sm:$0x1] }
0x4080   :  { %v12367_v44 = vmul.f32 %v23748_v10, %v12363_v35  ;;  %v23812_v60 = vadd.f32 %v16686_v56, %v16685_v38  ;;  %v16688_v52 = vpop.f32.mrb[166].mxu0  ;;  %v12653_v10 = vld [vmem:[#allocation4 + $0x80] sm:$0xff]  ;;  %v13739_v24 = vrot.slane %v13656_v0, 1  ;;  %v22013_v35 = vld [vmem:[#allocation7 + $0x50] sm:$0xff]   ;;  %v12462_v56 = vsel %vm12456_vm0, %v12460_v5, %v12461_v1  ;;  %v22016_v0 = vld [vmem:[#allocation7 + $0x18] sm:$0xff]  }
0x4081   :  { %v12371_v59 = vrot.slane %v12359_v45, %v22456_v33  ;;  %v16689_v50 = vpop.f32.mrb[167].mxu0  ;;  %v12665_v13 = vpack.c.bf16 %v12653_v10, %v23821_v28  ;;  %v13726_v58 = vrot.slane %v12653_v10, 1  ;;  %v13741_v45 = vrot.slane %v13657_v30, 1  ;;  %v22015_v10 = vld [vmem:[#allocation7 + $0x58] sm:$0xff]  }
0x4082   :  { %v23815_v49 = vadd.f32 %v16689_v50, %v16688_v52  ;;  %v13755_v30 = vrot.slane %v13662_v53, 1 }
0x4083   :  { %v12372_v57 = vadd.f32 %v12371_v59, %v12364_v41  ;;  %v12373_v11 = vadd.f32 %v12371_v59, %v12365_v62  ;;  %v12374_v14 = vadd.f32 %v12371_v59, %v12366_v61  ;;  %v12375_v43 = vadd.f32 %v12371_v59, %v12367_v44  ;;  %v23829_v41 = vld [vmem:[#allocation4 + $0x110] sm:$0xff]  ;;  %v12659_v62 = vld [vmem:[#allocation4 + $0x140] sm:$0xff] }
0x4084   :  { %v12478_v44 = vsel %vm12456_vm0, %v12461_v1, %v12477_v40  ;;  %v13756_v5 = vrot.slane %v12659_v62, 1 }
0x4085   :  { %v23817_v15 = vmax.f32 %v12372_v57, 0.0  ;;  %v12377_v17 = vmax.f32 %v12373_v11, 0.0  ;;  %v23819_v55 = vmax.f32 %v12374_v14, 0.0  ;;  %v12379_v6 = vmax.f32 %v12375_v43, 0.0  ;;  %v22014_v11 = vld [vmem:[#allocation7 + $0x10] sm:$0xff]  }
0x4086   :  { %v13771_v57 = vrot.slane %v13675_v25, 1  ;;  %v13727_v14 = vsel %vm13712_vm1, %v13725_v47, %v13726_v58  ;;  %v13740_v43 = vsel %vm13712_vm1, %v13726_v58, %v13739_v24  ;;  %v12542_v21 = vpack.c.bf16 %v12478_v44, %v12462_v56  ;;  %v22018_v24 = vld [vmem:[#allocation7 + $0x20] sm:$0xff]  }
0x4087   :  { %12380 = vst [vmem:[#allocation4 + $0x58] sm:$0xff] %v23817_v15  ;;  %12381 = vst [vmem:[#allocation4 + $0x88] sm:$0xff] %v12377_v17  ;;  %v12666_v8 = vpack.c.bf16 %v12377_v17, %v23817_v15  ;;  %v12672_v18 = vpack.c.bf16 %v12379_v6, %v23819_v55  ;;  %v13729_v38 = vrot.slane %v12377_v17, 1  ;;  %v13759_v50 = vrot.slane %v12379_v6, 1 }
0x4088   :  { %12382 = vst [vmem:[#allocation4 + $0x118] sm:$0xff] %v23819_v55  ;;  %12383 = vst [vmem:[#allocation4 + $0x148] sm:$0xff] %v12379_v6  ;;  %v12671_v17 = vpack.c.bf16 %v12659_v62, %v23829_v41  ;;  %v22019_v62 = vld [vmem:[#allocation7 + $0x68] sm:$0xff]  }
0x4089   :  { %13188 = vmatprep.mubr.bf16.mxu0 %v12666_v8  ;;  %v13772_v22 = vsel %vm13712_vm1, %v13759_v50, %v13771_v57  ;;  %v12384_v57 = vld [vmem:[#allocation4] sm:$0x80] }
0x408a   :  { %13189 = vmatmul.mubr.bf16.vlgmr.msra.gmra.mrb[176].mxu0 %v12665_v13  ;;  %v13674_v13 = vld [vmem:[#allocation4 + $0x170] sm:$0x1]  ;;  %v12457_v53 = vrot.slane %v12384_v57, 7 }
0x408b   :  { %16748 = vmatpush3.bf16.msra.mxu0 %v22009_v7  ;;  %13196 = vmatprep.mubr.bf16.mxu0 %v12672_v18  ;;  %v13742_v7 = vsel %vm13712_vm1, %v13729_v38, %v13741_v45  ;;  %v13769_v40 = vrot.slane %v13674_v13, 1  ;;  %v22029_v57 = vld [vmem:[#allocation7 + $0x150] sm:$0xff]  }
0x408c   :  { %16749 = vmatprep.subr.bf16.mxu0 %v22011_v42  ;;  %v13801_v42 = vpack.c.bf16 %v13740_v43, %v13727_v14  ;;  %v12396_v14 = vld [vmem:[#allocation4 + $0x60] sm:$0x7f]  ;;  %v12403_v43 = vld [vmem:[#allocation4 + $0xc8] sm:$0x80] }
0x408d   :  { %v13770_v45 = vsel %vm13712_vm1, %v13756_v5, %v13769_v40  ;;  %v12475_v13 = vrot.slane %v12396_v14, 7 }
0x408e   :  { %v13645_v61 = vld [vmem:[#allocation4 + $0x58] sm:$0xfe] }
0x408f   :  { %v13663_v51 = vld [vmem:[#allocation4 + $0x118] sm:$0xfe]  ;;  %v13728_v52 = vrot.slane %v13645_v61, 1  ;;  %16750 = vmatpush3.bf16.msra.mxu0 %v22012_v63  ;;  %v22017_v63 = vld [vmem:[#allocation7 + $0x60] sm:$0xff]  }
0x4090   :  { %v13758_v59 = vrot.slane %v13663_v51, 1  ;;  %16751 = vmatprep.subr.bf16.mxu0 %v22013_v35 }
0x4091   :  { %v13730_v8 = vsel %vm13712_vm1, %v13728_v52, %v13729_v38  ;;  %v13757_v38 = vsel %vm13712_vm1, %v13755_v30, %v13756_v5  ;;  %v22020_v52 = vld [vmem:[#allocation7 + $0x28] sm:$0xff]   ;;  %v22024_v30 = vld [vmem:[#allocation7 + $0x38] sm:$0xff]  }
0x4092   :  { %v13760_v18 = vsel %vm13712_vm1, %v13758_v59, %v13759_v50  ;;  %v13802_v6 = vpack.c.bf16 %v13742_v7, %v13730_v8  ;;  %13197 = vmatmul.mubr.bf16.gmra.mrb[180].mxu0 %v12671_v17  ;;  %v13807_v44 = vpack.c.bf16 %v13770_v45, %v13757_v38  ;;  %v22021_v50 = vld [vmem:[#allocation7 + $0x70] sm:$0xff]   ;;  %v12488_v38 = vrot.slane %v23793_v4, 7 }
0x4093   :  { %16752 = vmatpush3.bf16.msra.mxu0 %v22014_v11  ;;  %13525 = vmatprep.mubr.bf16.mxu0 %v12542_v21  ;;  %v13808_v1 = vpack.c.bf16 %v13772_v22, %v13760_v18  ;;  %v22022_v17 = vld [vmem:[#allocation7 + $0x30] sm:$0xff]   ;;  %v12458_v18 = vrot.slane %v23785_v3, 7  ;;  %v22025_v3 = vld [vmem:[#allocation7 + $0x140] sm:$0xff]  }
0x4094   :  { %14324 = vmatprep.mubr.bf16.mxu1 %v13802_v6  ;;  %16753 = vmatprep.subr.bf16.mxu0 %v22015_v10  ;;  %v12415_v10 = vld [vmem:[#allocation4 + $0x128] sm:$0x7f]  ;;  %v12490_v6 = vrot.slane %v12403_v43, 7 }
0x4095   :  { %14325 = vmatmul.mubr.bf16.vlgmr.msra.gmra.mrb[108].mxu1 %v13801_v42  ;;  %v12491_v42 = vrot.slane %v23787_v31, 7  ;;  %v12459_v40 = vsel %vm12456_vm0, %v12457_v53, %v12458_v18  ;;  %v12476_v31 = vsel %vm12456_vm0, %v12458_v18, %v12475_v13  ;;  %v22034_v18 = vld [vmem:[#allocation7 + $0x120] sm:$0xff]   ;;  %v22036_v53 = vld [vmem:[#allocation7 + $0x128] sm:$0xff]   ;;  %v22037_v13 = vld [vmem:[#allocation7 + $0x170] sm:$0xff]  }
0x4096   :  { %v16707_v47 = vpop.f32.mrb[168].mxu0  ;;  %14332 = vmatprep.mubr.bf16.mxu1 %v13808_v1  ;;  %21226 = vmatpush3.bf16.msra.mxu1 %v22363_v9  ;;  %v12507_v1 = vrot.slane %v12415_v10, 7  ;;  %v22031_v10 = vld [vmem:[#allocation7 + $0x158] sm:$0xff]  }
0x4097   :  { %v16708_v58 = vpop.f32.mrb[169].mxu0  ;;  %16754 = vmatpush3.bf16.msra.mxu0 %v22016_v0  ;;  %21228 = vmatprep.subr.bf16.mxu1 %v22365_v12 }
0x4098   :  { %v16709_v25 = vadd.f32 %v16708_v58, %v16707_v47  ;;  %v16710_v35 = vpop.f32.mrb[170].mxu0  ;;  %16755 = vmatprep.subr.bf16.mxu0 %v22017_v63  ;;  %v12508_v63 = vsel %vm12456_vm0, %v12491_v42, %v12507_v1  ;;  %v12402_v47 = vld [vmem:[#allocation4 + $0xc0] sm:$0x80]  ;;  %v12414_v58 = vld [vmem:[#allocation4 + $0x120] sm:$0x7f] }
0x4099   :  { %v16711_v61 = vpop.f32.mrb[171].mxu0  ;;  %v12419_v1 = vld [vmem:[#allocation4 + $0x148] sm:$0x7f] }
0x409a   :  { %v23845_v51 = vadd.f32 %v16709_v25, %v23802_v46  ;;  %v16712_v56 = vadd.f32 %v16711_v61, %v16710_v35  ;;  %21230 = vmatpush3.bf16.msra.mxu1 %v22365_v12  ;;  %v12401_v25 = vld [vmem:[#allocation4 + $0x88] sm:$0x7f]  ;;  %v12505_v61 = vrot.slane %v12414_v58, 7  ;;  %v12503_v58 = vrot.slane %v23819_v55, 7 }
0x409b   :  { %16756 = vmatpush3.bf16.msra.mxu0 %v22018_v24  ;;  %21232 = vmatprep.subr.bf16.mxu1 %v22370_v19  ;;  %v22026_v24 = vld [vmem:[#allocation7 + $0x100] sm:$0xff]   ;;  %v22027_v35 = vld [vmem:[#allocation7 + $0x148] sm:$0xff]  }
0x409c   :  { %v23850_v59 = vadd.f32 %v16712_v56, %v23804_v48  ;;  %16757 = vmatprep.subr.bf16.mxu0 %v22019_v62  ;;  %v22023_v48 = vld [vmem:[#allocation7 + $0x78] sm:$0xff]   ;;  %v12487_v62 = vrot.slane %v12402_v47, 7  ;;  %v12389_v56 = vld [vmem:[#allocation4 + $0x28] sm:$0x80]  ;;  %v12506_v14 = vsel %vm12456_vm0, %v12488_v38, %v12505_v61  ;;  %v22042_v61 = vld [vmem:[#allocation7 + $0x380] sm:$0xff]  }
0x409d   :  { %14333 = vmatmul.mubr.bf16.gmra.mrb[112].mxu1 %v13807_v44  ;;  %v12485_v44 = vrot.slane %v12401_v25, 7  ;;  %v22040_v47 = vld [vmem:[#allocation7 + $0x138] sm:$0xff]  }
0x409e   :  { %v16713_v11 = vpop.f32.mrb[172].mxu0  ;;  %21234 = vmatpush3.bf16.msra.mxu1 %v22370_v19  ;;  %v12489_v4 = vsel %vm12456_vm0, %v12487_v62, %v12488_v38  ;;  %v12418_v62 = vld [vmem:[#allocation4 + $0x140] sm:$0x7f] }
0x409f   :  { %v16714_v46 = vpop.f32.mrb[173].mxu0  ;;  %16758 = vmatpush3.bf16.msra.mxu0 %v22020_v52  ;;  %21236 = vmatprep.subr.bf16.mxu1 %v22374_v23  ;;  %v22028_v52 = vld [vmem:[#allocation7 + $0x108] sm:$0xff]  }
0x40a0   :  { %v16715_v8 = vadd.f32 %v16714_v46, %v16713_v11  ;;  %v16716_v7 = vpop.f32.mrb[174].mxu0  ;;  %16759 = vmatprep.subr.bf16.mxu0 %v22021_v50  ;;  %v12473_v50 = vrot.slane %v23817_v15, 7  ;;  %v12472_v11 = vrot.slane %v12389_v56, 7  ;;  %v22030_v46 = vld [vmem:[#allocation7 + $0x110] sm:$0xff]   ;;  %v13643_v56 = vld [vmem:[#allocation4 + $0x48] sm:$0xfe] }
0x40a1   :  { %v16717_v21 = vpop.f32.mrb[175].mxu0 }
0x40a2   :  { %v23857_v22 = vadd.f32 %v16715_v8, %v23812_v60  ;;  %v16718_v0 = vadd.f32 %v16717_v21, %v16716_v7  ;;  %21238 = vmatpush3.bf16.msra.mxu1 %v22374_v23  ;;  %v12492_v60 = vsel %vm12456_vm0, %v12490_v6, %v12491_v42  ;;  %v12486_v43 = vsel %vm12456_vm0, %v12473_v50, %v12485_v44  ;;  %v22032_v7 = vld [vmem:[#allocation7 + $0x118] sm:$0xff]   ;;  %v22035_v21 = vld [vmem:[#allocation7 + $0x168] sm:$0xff]   ;;  %v12388_v6 = vld [vmem:[#allocation4 + $0x20] sm:$0x80] }
0x40a3   :  { %16760 = vmatpush3.bf16.msra.mxu0 %v22022_v17  ;;  %21240 = vmatprep.subr.bf16.mxu1 %v22378_v27  ;;  %v12548_v45 = vpack.c.bf16 %v12508_v63, %v12492_v60  ;;  %v12547_v17 = vpack.c.bf16 %v12506_v14, %v12489_v4  ;;  %v12474_v15 = vsel %vm12456_vm0, %v12472_v11, %v12473_v50  ;;  %v12400_v42 = vld [vmem:[#allocation4 + $0x80] sm:$0x7f]  ;;  %v12407_v60 = vld [vmem:[#allocation4 + $0xe8] sm:$0x80]  ;;  %v12515_v63 = vrot.slane %v12419_v1, 7  ;;  %v13649_v44 = vld [vmem:[#allocation4 + $0x78] sm:$0xff] }
0x40a4   :  { %v23862_v5 = vadd.f32 %v16718_v0, %v23815_v49  ;;  %16761 = vmatprep.subr.bf16.mxu0 %v22023_v48  ;;  %v12541_v49 = vpack.c.bf16 %v12476_v31, %v12459_v40  ;;  %v12546_v8 = vpack.c.bf16 %v12486_v43, %v12474_v15  ;;  %v22033_v48 = vld [vmem:[#allocation7 + $0x160] sm:$0xff]   ;;  %v22038_v0 = vld [vmem:[#allocation7 + $0x130] sm:$0xff]   ;;  %v12469_v40 = vrot.slane %v12388_v6, 7  ;;  %v22043_v50 = vld [vmem:[#allocation7 + $0x3c8] sm:$0xff]  }
0x40a5   :  { %v12483_v31 = vrot.slane %v12400_v42, 7  ;;  %v12502_v25 = vrot.slane %v12407_v60, 7  ;;  %v12516_v38 = vsel %vm12456_vm0, %v12503_v58, %v12515_v63  ;;  %v12513_v14 = vrot.slane %v12418_v62, 7  ;;  %v22044_v15 = vld [vmem:[#allocation7 + $0x388] sm:$0xff]   ;;  %v22048_v6 = vld [vmem:[#allocation7 + $0x398] sm:$0xff]   ;;  %v22049_v42 = vld [vmem:[#allocation7 + $0x3e0] sm:$0xff]  }
0x40a6   :  { %21242 = vmatpush3.bf16.msra.mxu1 %v22378_v27  ;;  %v13722_v43 = vrot.slane %v13643_v56, 1  ;;  %v22051_v1 = vld [vmem:[#allocation7 + $0x3e8] sm:$0xff]   ;;  %v13648_v60 = vld [vmem:[#allocation4 + $0x70] sm:$0xff] }
0x40a7   :  { %16762 = vmatpush3.bf16.msra.mxu0 %v22024_v30  ;;  %21244 = vmatprep.subr.bf16.mxu1 %v22388_v32  ;;  %v22039_v30 = vld [vmem:[#allocation7 + $0x178] sm:$0xff]   ;;  %v12504_v55 = vsel %vm12456_vm0, %v12502_v25, %v12503_v58  ;;  %v13673_v63 = vld [vmem:[#allocation4 + $0x168] sm:$0x1]  ;;  %v13661_v58 = vld [vmem:[#allocation4 + $0x108] sm:$0xfe] }
0x40a8   :  { %16803 = vmatprep.subr.bf16.mxu0 %v22025_v3  ;;  %v12470_v3 = vrot.slane %v23821_v28, 7  ;;  %v13655_v28 = vld [vmem:[#allocation4 + $0xa8] sm:$0x1]  ;;  %v12552_v11 = vpack.c.bf16 %v12516_v38, %v12504_v55  ;;  %v22055_v25 = vld [vmem:[#allocation7 + $0x3f8] sm:$0xff]  }
0x40aa   :  { %13526 = vmatmul.mubr.bf16.vlgmr.msra.gmra.mrb[184].mxu0 %v12541_v49  ;;  %21246 = vmatpush3.bf16.msra.mxu1 %v22388_v32  ;;  %v12471_v49 = vsel %vm12456_vm0, %v12469_v40, %v12470_v3  ;;  %v13654_v40 = vld [vmem:[#allocation4 + $0xa0] sm:$0x1] }
0x40ab   :  { %13533 = vmatprep.mubr.bf16.mxu0 %v12548_v45  ;;  %16804 = vmatpush3.bf16.msra.mxu0 %v22026_v24  ;;  %v22041_v24 = vld [vmem:[#allocation7 + $0x3c0] sm:$0xff]   ;;  %v13735_v38 = vrot.slane %v13654_v40, 1 }
0x40ac   :  { %16805 = vmatprep.subr.bf16.mxu0 %v22027_v35  ;;  %21248 = vmatprep.subr.bf16.mxu1 %v22392_v34  ;;  %v12484_v35 = vsel %vm12456_vm0, %v12470_v3, %v12483_v31  ;;  %v12406_v45 = vld [vmem:[#allocation4 + $0xe0] sm:$0x80]  ;;  %v22053_v3 = vld [vmem:[#allocation7 + $0x3f0] sm:$0xff]  }
0x40ad   :  { %v12499_v4 = vrot.slane %v12406_v45, 7  ;;  %v13642_v31 = vld [vmem:[#allocation4 + $0x40] sm:$0xfe]  ;;  %v13752_v45 = vrot.slane %v13661_v58, 1 }
0x40ae   :  { %21250 = vmatpush3.bf16.msra.mxu1 %v22392_v34 }
0x40af   :  { %16806 = vmatpush3.bf16.msra.mxu0 %v22028_v52  ;;  %21252 = vmatprep.subr.bf16.mxu1 %v22411_v37  ;;  %v12545_v52 = vpack.c.bf16 %v12484_v35, %v12471_v49  ;;  %v13719_v49 = vrot.slane %v13642_v31, 1  ;;  %v13720_v35 = vrot.slane %v13648_v60, 1 }
0x40b0   :  { %16807 = vmatprep.subr.bf16.mxu0 %v22029_v57  ;;  %v12500_v57 = vrot.slane %v23829_v41, 7 }
0x40b1   :  { %v13721_v56 = vsel %vm13712_vm1, %v13719_v49, %v13720_v35 }
0x40b2   :  { %13534 = vmatmul.mubr.bf16.gmra.mrb[188].mxu0 %v12547_v17  ;;  %21254 = vmatpush3.bf16.msra.mxu1 %v22411_v37  ;;  %v13737_v17 = vrot.slane %v13655_v28, 1  ;;  %v13767_v28 = vrot.slane %v13673_v63, 1 }
0x40b3   :  { %16808 = vmatpush3.bf16.msra.mxu0 %v22030_v46  ;;  %13623 = vmatprep.mubr.bf16.mxu0 %v12546_v8  ;;  %v13723_v46 = vrot.slane %v13649_v44, 1  ;;  %v12501_v8 = vsel %vm12456_vm0, %v12499_v4, %v12500_v57  ;;  %v13736_v44 = vsel %vm13712_vm1, %v13720_v35, %v13735_v38 }
0x40b4   :  { %16809 = vmatprep.subr.bf16.mxu0 %v22031_v10  ;;  %v22045_v10 = vld [vmem:[#allocation7 + $0x3d0] sm:$0xff]   ;;  %v13799_v4 = vpack.c.bf16 %v13736_v44, %v13721_v56 }
0x40b5   :  { %v13738_v41 = vsel %vm13712_vm1, %v13723_v46, %v13737_v17 }
0x40b7   :  { %16810 = vmatpush3.bf16.msra.mxu0 %v22032_v7  ;;  %v12514_v7 = vsel %vm12456_vm0, %v12500_v57, %v12513_v14  ;;  %v13666_v57 = vld [vmem:[#allocation4 + $0x130] sm:$0xff] }
0x40b8   :  { %16811 = vmatprep.subr.bf16.mxu0 %v22033_v48  ;;  %v13724_v48 = vsel %vm13712_vm1, %v13722_v43, %v13723_v46  ;;  %v13750_v46 = vrot.slane %v13666_v57, 1 }
0x40bb   :  { %16812 = vmatpush3.bf16.msra.mxu0 %v22034_v18  ;;  %v22046_v18 = vld [vmem:[#allocation7 + $0x390] sm:$0xff]  }
0x40bc   :  { %16813 = vmatprep.subr.bf16.mxu0 %v22035_v21  ;;  %v12551_v21 = vpack.c.bf16 %v12514_v7, %v12501_v8 }
0x40bf   :  { %16814 = vmatpush3.bf16.msra.mxu0 %v22036_v53  ;;  %v22047_v53 = vld [vmem:[#allocation7 + $0x3d8] sm:$0xff]  }
0x40c0   :  { %16815 = vmatprep.subr.bf16.mxu0 %v22037_v13  ;;  %v13800_v13 = vpack.c.bf16 %v13738_v41, %v13724_v48 }
0x40c3   :  { %16816 = vmatpush3.bf16.msra.mxu0 %v22038_v0  ;;  %v22050_v0 = vld [vmem:[#allocation7 + $0x3a0] sm:$0xff]  }
0x40c4   :  { %16817 = vmatprep.subr.bf16.mxu0 %v22039_v30  ;;  %v22052_v30 = vld [vmem:[#allocation7 + $0x3a8] sm:$0xff]  }
0x40c7   :  { %16818 = vmatpush3.bf16.msra.mxu0 %v22040_v47  ;;  %v22054_v47 = vld [vmem:[#allocation7 + $0x3b0] sm:$0xff]  }
0x40c8   :  { %16859 = vmatprep.subr.bf16.mxu0 %v22041_v24  ;;  %v13667_v24 = vld [vmem:[#allocation4 + $0x138] sm:$0xff] }
0x40c9   :  { %v13753_v62 = vrot.slane %v13667_v24, 1 }
0x40ca   :  { %13624 = vmatmul.mubr.bf16.vlgmr.msra.gmra.mrb[192].mxu0 %v12545_v52 }
0x40cb   :  { %13631 = vmatprep.mubr.bf16.mxu0 %v12552_v11  ;;  %16860 = vmatpush3.bf16.msra.mxu0 %v22042_v61  ;;  %v22056_v61 = vld [vmem:[#allocation7 + $0x3b8] sm:$0xff]   ;;  %v13754_v52 = vsel %vm13712_vm1, %v13752_v45, %v13753_v62  ;;  %v13768_v55 = vsel %vm13712_vm1, %v13753_v62, %v13767_v28  ;;  %v13672_v11 = vld [vmem:[#allocation4 + $0x160] sm:$0x1] }
0x40cc   :  { %16861 = vmatprep.subr.bf16.mxu0 %v22043_v50  ;;  %v13660_v50 = vld [vmem:[#allocation4 + $0x100] sm:$0xfe]  ;;  %v13806_v14 = vpack.c.bf16 %v13768_v55, %v13754_v52  ;;  %v13765_v17 = vrot.slane %v13672_v11, 1 }
0x40cd   :  { %v13749_v43 = vrot.slane %v13660_v50, 1 }
0x40cf   :  { %16862 = vmatpush3.bf16.msra.mxu0 %v22044_v15  ;;  %v13751_v15 = vsel %vm13712_vm1, %v13749_v43, %v13750_v46 }
0x40d0   :  { %16863 = vmatprep.subr.bf16.mxu0 %v22045_v10  ;;  %v13766_v10 = vsel %vm13712_vm1, %v13750_v46, %v13765_v17 }
0x40d1   :  { %v13805_v8 = vpack.c.bf16 %v13766_v10, %v13751_v15 }
0x40d2   :  { %13632 = vmatmul.mubr.bf16.gmra.mrb[196].mxu0 %v12551_v21 }
0x40d3   :  { %16864 = vmatpush3.bf16.msra.mxu0 %v22046_v18  ;;  %14275 = vmatprep.mubr.bf16.mxu0 %v13800_v13 }
0x40d4   :  { %16865 = vmatprep.subr.bf16.mxu0 %v22047_v53 }
0x40d7   :  { %16866 = vmatpush3.bf16.msra.mxu0 %v22048_v6 }
0x40d8   :  { %16867 = vmatprep.subr.bf16.mxu0 %v22049_v42 }
0x40db   :  { %16868 = vmatpush3.bf16.msra.mxu0 %v22050_v0 }
0x40dc   :  { %16869 = vmatprep.subr.bf16.mxu0 %v22051_v1 }
0x40df   :  { %16870 = vmatpush3.bf16.msra.mxu0 %v22052_v30 }
0x40e0   :  { %16871 = vmatprep.subr.bf16.mxu0 %v22053_v3 }
0x40e3   :  { %16872 = vmatpush3.bf16.msra.mxu0 %v22054_v47 }
0x40e4   :  { %16873 = vmatprep.subr.bf16.mxu0 %v22055_v25 }
0x40e7   :  { %16874 = vmatpush3.bf16.msra.mxu0 %v22056_v61 }
0x40e8   :  { %21192 = vmatprep.subr.bf16.mxu0 %v22363_v9 }
0x40ea   :  { %14276 = vmatmul.mubr.bf16.vlgmr.msra.gmra.mrb[200].mxu0 %v13799_v4 }
0x40eb   :  { %14283 = vmatprep.mubr.bf16.mxu0 %v13806_v14  ;;  %21194 = vmatpush3.bf16.msra.mxu0 %v22363_v9 }
0x40ec   :  { %21196 = vmatprep.subr.bf16.mxu0 %v22365_v12 }
0x40ef   :  { %21198 = vmatpush3.bf16.msra.mxu0 %v22365_v12 }
0x40f0   :  { %21200 = vmatprep.subr.bf16.mxu0 %v22370_v19 }
0x40f2   :  { %14284 = vmatmul.mubr.bf16.gmra.mrb[204].mxu0 %v13805_v8 }
0x40f3   :  { %21202 = vmatpush3.bf16.msra.mxu0 %v22370_v19 }
0x40f4   :  { %21204 = vmatprep.subr.bf16.mxu0 %v22374_v23 }
0x40f7   :  { %21206 = vmatpush3.bf16.msra.mxu0 %v22374_v23 }
0x40f8   :  { %21208 = vmatprep.subr.bf16.mxu0 %v22378_v27 }
0x40fb   :  { %21210 = vmatpush3.bf16.msra.mxu0 %v22378_v27 }
0x40fc   :  { %21212 = vmatprep.subr.bf16.mxu0 %v22388_v32 }
0x40ff   :  { %21214 = vmatpush3.bf16.msra.mxu0 %v22388_v32 }
0x4100   :  { %21216 = vmatprep.subr.bf16.mxu0 %v22392_v34 }
0x4103   :  { %21218 = vmatpush3.bf16.msra.mxu0 %v22392_v34 }
0x4104   :  { %21220 = vmatprep.subr.bf16.mxu0 %v22411_v37 }
0x4107   :  { %21222 = vmatpush3.bf16.msra.mxu0 %v22411_v37 }
0x415d   :  { %v16735_v9 = vpop.f32.mrb[176].mxu0 }
0x415e   :  { %v16736_v12 = vpop.f32.mrb[177].mxu0 }
0x415f   :  { %v16737_v19 = vadd.f32 %v16736_v12, %v16735_v9  ;;  %v16738_v23 = vpop.f32.mrb[178].mxu0 }
0x4160   :  { %v16739_v7 = vpop.f32.mrb[179].mxu0 }
0x4161   :  { %v13191_v48 = vadd.f32 %v16737_v19, %v23845_v51  ;;  %v16740_v27 = vadd.f32 %v16739_v7, %v16738_v23 }
0x4163   :  { %v13194_v41 = vadd.f32 %v16740_v27, %v23850_v59 }
0x4165   :  { %v16741_v18 = vpop.f32.mrb[180].mxu0 }
0x4166   :  { %v16742_v32 = vpop.f32.mrb[181].mxu0 }
0x4167   :  { %v16743_v21 = vadd.f32 %v16742_v32, %v16741_v18  ;;  %v16744_v53 = vpop.f32.mrb[182].mxu0 }
0x4168   :  { %v16903_v13 = vpop.f32.mrb[108].mxu1  ;;  %v16745_v34 = vpop.f32.mrb[183].mxu0 }
0x4169   :  { %v16904_v6 = vpop.f32.mrb[109].mxu1  ;;  %v13199_v42 = vadd.f32 %v16743_v21, %v23857_v22  ;;  %v16746_v37 = vadd.f32 %v16745_v34, %v16744_v53 }
0x416a   :  { %v16905_v0 = vadd.f32 %v16904_v6, %v16903_v13  ;;  %v16906_v1 = vpop.f32.mrb[110].mxu1 }
0x416b   :  { %v16907_v30 = vpop.f32.mrb[111].mxu1  ;;  %v13202_v3 = vadd.f32 %v16746_v37, %v23862_v5 }
0x416c   :  { %v16908_v40 = vadd.f32 %v16907_v30, %v16906_v1 }
0x4170   :  { %v16909_v51 = vpop.f32.mrb[112].mxu1 }
0x4171   :  { %v16910_v31 = vpop.f32.mrb[113].mxu1 }
0x4172   :  { %v16911_v60 = vadd.f32 %v16910_v31, %v16909_v51  ;;  %v16912_v59 = vpop.f32.mrb[114].mxu1 }
0x4173   :  { %v16913_v63 = vpop.f32.mrb[115].mxu1 }
0x4174   :  { %v16914_v47 = vadd.f32 %v16913_v63, %v16912_v59 }
0x417d   :  { %v16763_v58 = vpop.f32.mrb[184].mxu0 }
0x417e   :  { %v16764_v24 = vpop.f32.mrb[185].mxu0 }
0x417f   :  { %v16765_v25 = vadd.f32 %v16764_v24, %v16763_v58  ;;  %v16766_v49 = vpop.f32.mrb[186].mxu0 }
0x4180   :  { %v16767_v35 = vpop.f32.mrb[187].mxu0 }
0x4181   :  { %v13528_v38 = vadd.f32 %v16765_v25, %v13191_v48  ;;  %v16768_v22 = vadd.f32 %v16767_v35, %v16766_v49 }
0x4183   :  { %v13531_v45 = vadd.f32 %v16768_v22, %v13194_v41  ;;  %v13577_v62 = vadd.f32 %v23701_v26, %v13528_v38 }
0x4185   :  { %v16769_v28 = vpop.f32.mrb[188].mxu0  ;;  %v13580_v5 = vadd.f32 %v23703_v36, %v13531_v45 }
0x4186   :  { %v16770_v61 = vpop.f32.mrb[189].mxu0 }
0x4187   :  { %v16771_v56 = vadd.f32 %v16770_v61, %v16769_v28  ;;  %v16772_v44 = vpop.f32.mrb[190].mxu0 }
0x4188   :  { %v16773_v52 = vpop.f32.mrb[191].mxu0 }
0x4189   :  { %v13536_v55 = vadd.f32 %v16771_v56, %v13199_v42  ;;  %v16774_v50 = vadd.f32 %v16773_v52, %v16772_v44 }
0x418b   :  { %v13539_v57 = vadd.f32 %v16774_v50, %v13202_v3  ;;  %v13585_v11 = vadd.f32 %v23705_v16, %v13536_v55 }
0x418d   :  { %v13588_v4 = vadd.f32 %v23707_v20, %v13539_v57 }
0x419d   :  { %v16819_v14 = vpop.f32.mrb[192].mxu0 }
0x419e   :  { %v16820_v43 = vpop.f32.mrb[193].mxu0 }
0x419f   :  { %v16821_v46 = vadd.f32 %v16820_v43, %v16819_v14  ;;  %v16822_v17 = vpop.f32.mrb[194].mxu0 }
0x41a0   :  { %v16823_v15 = vpop.f32.mrb[195].mxu0 }
0x41a1   :  { %v13626_v26 = vadd.f32 %v16821_v46, %v13577_v62  ;;  %v16824_v10 = vadd.f32 %v16823_v15, %v16822_v17 }
0x41a3   :  { %v13629_v8 = vadd.f32 %v16824_v10, %v13580_v5 }
0x41a5   :  { %v16825_v36 = vpop.f32.mrb[196].mxu0 }
0x41a6   :  { %v16826_v9 = vpop.f32.mrb[197].mxu0 }
0x41a7   :  { %v16827_v12 = vadd.f32 %v16826_v9, %v16825_v36  ;;  %v16828_v19 = vpop.f32.mrb[198].mxu0 }
0x41a8   :  { %v16829_v23 = vpop.f32.mrb[199].mxu0 }
0x41a9   :  { %v13634_v7 = vadd.f32 %v16827_v12, %v13585_v11  ;;  %v16830_v48 = vadd.f32 %v16829_v23, %v16828_v19 }
0x41ab   :  { %v13637_v27 = vadd.f32 %v16830_v48, %v13588_v4  ;;  %v14543_v48 = vld [vmem:[#allocation10 + $0x15] sm:$0x1] }
0x41bd   :  { %v16875_v41 = vpop.f32.mrb[200].mxu0 }
0x41be   :  { %v16876_v16 = vpop.f32.mrb[201].mxu0 }
0x41bf   :  { %v16877_v18 = vadd.f32 %v16876_v16, %v16875_v41  ;;  %v16878_v20 = vpop.f32.mrb[202].mxu0  ;;  %v14547_v16 = vld [vmem:[#allocation12 + $0x15] sm:$0x1] }
0x41c0   :  { %v16879_v32 = vpop.f32.mrb[203].mxu0 }
0x41c1   :  { %v14278_v21 = vadd.f32 %v16877_v18, %v23709_v39  ;;  %v16880_v53 = vadd.f32 %v16879_v32, %v16878_v20 }
0x41c3   :  { %v14327_v13 = vadd.f32 %v16905_v0, %v14278_v21  ;;  %v14281_v34 = vadd.f32 %v16880_v53, %v23711_v29 }
0x41c5   :  { %v14330_v6 = vadd.f32 %v16908_v40, %v14281_v34  ;;  %v16881_v42 = vpop.f32.mrb[204].mxu0  ;;  %v23924_v37 = vadd.f32 %v14327_v13, %v13626_v26 }
0x41c6   :  { %v16882_v1 = vpop.f32.mrb[205].mxu0 }
0x41c7   :  { %v23926_v30 = vadd.f32 %v14330_v6, %v13629_v8  ;;  %v16883_v3 = vadd.f32 %v16882_v1, %v16881_v42  ;;  %v16884_v51 = vpop.f32.mrb[206].mxu0  ;;  %19803 = vmatprep.mubr.f32.mxu0 %v23924_v37 }
0x41c8   :  { %v16885_v31 = vpop.f32.mrb[207].mxu0 }
0x41c9   :  { %v14286_v59 = vadd.f32 %v16883_v3, %v23713_v54  ;;  %v16886_v63 = vadd.f32 %v16885_v31, %v16884_v51  ;;  %19804 = vmatmul.mubr.f32.vlgmr.msra.gmra.mrb[208].mxu0 %v23926_v30 }
0x41cb   :  { %v14335_v39 = vadd.f32 %v16911_v60, %v14286_v59  ;;  %v14289_v29 = vadd.f32 %v16886_v63, %v23715_v2 }
0x41cd   :  { %v14338_v0 = vadd.f32 %v16914_v47, %v14289_v29  ;;  %v14343_v40 = vadd.f32 %v14335_v39, %v13634_v7 }
0x41cf   :  { %19806 = vmatprep.mubr.f32.mxu0 %v14343_v40  ;;  %v14344_v58 = vadd.f32 %v14338_v0, %v13637_v27 }
0x41d1   :  { %19807 = vmatmul.mubr.f32.gmra.mrb[210].mxu0 %v14344_v58 }
0x429c   :  { %v19805_v24 = vpop.f32.mrb[208].mxu0 }
0x429d   :  { %v14411_v25 = vpop.f32.mrb[209].mxu0 }
0x429e   :  { %v14430_v49 = vadd.f32 %v19805_v24, %v14411_v25 }
0x42a4   :  { %v19808_v35 = vpop.f32.mrb[210].mxu0 }
0x42a5   :  { %v14421_v38 = vpop.f32.mrb[211].mxu0 }
0x42a6   :  { %v14431_v22 = vadd.f32 %v14430_v49, %v14421_v38 }
0x42a8   :  { %v14432_v45 = vadd.f32 %v19808_v35, %v14431_v22 }
0x42aa   :  { %v14433_v62 = vrot.slane %v14432_v45, 4 }
0x42ac   :  { %v14434_v54 = vadd.f32 %v14433_v62, %v14432_v45 }
0x42ae   :  { %v14435_v28 = vrot.slane %v14434_v54, 2 }
0x42b0   :  { %v14436_v5 = vadd.f32 %v14435_v28, %v14434_v54 }
0x42b2   :  { %v14437_v61 = vrot.slane %v14436_v5, 1 }
0x42b4   :  { %v14438_v60 = vadd.f32 %v14437_v61, %v14436_v5 }
0x42b6   :  { %v14439_v56 = vmul.f32 0.001953125, %v14438_v60 }
0x42b8   :  { %v14440_v2 = vsub.f32 %v23924_v37, %v14439_v56  ;;  %v14441_v47 = vsub.f32 %v23926_v30, %v14439_v56  ;;  %v14442_v44 = vsub.f32 %v14343_v40, %v14439_v56  ;;  %v14443_v50 = vsub.f32 %v14344_v58, %v14439_v56 }
0x42ba   :  { %v14444_v52 = vmul.f32 %v14440_v2, %v14440_v2  ;;  %v14445_v55 = vmul.f32 %v14441_v47, %v14441_v47  ;;  %v14446_v57 = vmul.f32 %v14442_v44, %v14442_v44  ;;  %v14447_v11 = vmul.f32 %v14443_v50, %v14443_v50 }
0x42bc   :  { %19841 = vmatprep.mubr.f32.mxu1 %v14444_v52 }
0x42bd   :  { %19842 = vmatmul.mubr.f32.vlgmr.msra.gmra.mrb[116].mxu1 %v14445_v55 }
0x42be   :  { %19844 = vmatprep.mubr.f32.mxu1 %v14446_v57 }
0x42c1   :  { %19845 = vmatmul.mubr.f32.gmra.mrb[118].mxu1 %v14447_v11 }
0x4390   :  { %v19843_v4 = vpop.f32.mrb[116].mxu1 }
0x4391   :  { %v14514_v14 = vpop.f32.mrb[117].mxu1 }
0x4392   :  { %v14533_v43 = vadd.f32 %v19843_v4, %v14514_v14 }
0x4394   :  { %v19846_v46 = vpop.f32.mrb[118].mxu1 }
0x4395   :  { %v14524_v17 = vpop.f32.mrb[119].mxu1 }
0x4396   :  { %v14534_v15 = vadd.f32 %v14533_v43, %v14524_v17 }
0x4398   :  { %v14535_v26 = vadd.f32 %v19846_v46, %v14534_v15 }
0x439a   :  { %v14536_v10 = vrot.slane %v14535_v26, 4 }
0x439c   :  { %v14537_v8 = vadd.f32 %v14536_v10, %v14535_v26 }
0x439e   :  { %v14538_v36 = vrot.slane %v14537_v8, 2 }
0x43a0   :  { %v14539_v9 = vadd.f32 %v14538_v36, %v14537_v8 }
0x43a2   :  { %v14540_v12 = vrot.slane %v14539_v9, 1 }
0x43a4   :  { %v14541_v19 = vadd.f32 %v14540_v12, %v14539_v9 }
0x43a6   :  { %v14542_v23 = vmul.f32 0.001953125, %v14541_v19 }
0x43a8   :  { %v14544_v7 = vadd.f32 1e-05, %v14542_v23 }
0x43aa   :  { %22099 = vrsqrt.f32 %v14544_v7 }
0x43b4   :  { %v22100_v27 = vpop.eup %22099 }
0x43b5   :  { %v14546_v41 = vmul.f32 %v22100_v27, %v14543_v48 }
0x43b7   :  { %v14548_v18 = vmul.f32 %v14546_v41, %v14439_v56  ;;  %v14553_v20 = vrot.slane %v14546_v41, %v22456_v33 }
0x43b9   :  { %v14549_v32 = vsub.f32 %v14547_v16, %v14548_v18  ;;  %v14554_v21 = vmul.f32 %v14553_v20, %v23924_v37  ;;  %v14555_v53 = vmul.f32 %v14553_v20, %v23926_v30  ;;  %v14556_v13 = vmul.f32 %v14553_v20, %v14343_v40 }
0x43ba   :  { %v14557_v34 = vmul.f32 %v14553_v20, %v14344_v58 }
0x43bb   :  { %v14561_v6 = vrot.slane %v14549_v32, %v22456_v33 }
0x43bd   :  { %v14562_v42 = vadd.f32 %v14561_v6, %v14554_v21  ;;  %v14563_v1 = vadd.f32 %v14561_v6, %v14555_v53  ;;  %v14564_v3 = vadd.f32 %v14561_v6, %v14556_v13  ;;  %v14565_v51 = vadd.f32 %v14561_v6, %v14557_v34 }
0x43bf   :  { %v14566_v31 = vmax.f32 %v14562_v42, 0.0  ;;  %v14567_v59 = vmax.f32 %v14563_v1, 0.0  ;;  %v14568_v63 = vmax.f32 %v14564_v3, 0.0  ;;  %v14569_v39 = vmax.f32 %v14565_v51, 0.0 }
0x43c1   :  { %14570 = vst [vmem:[%s23956_s6] sm:$0xff] %v14566_v31  ;;  %14571 = vst [vmem:[%s23956_s6 + $0x8] sm:$0xff] %v14567_v59 }
0x43c2   :  { %14572 = vst [vmem:[%s23956_s6 + $0x10] sm:$0xff] %v14568_v63  ;;  %14573 = vst [vmem:[%s23956_s6 + $0x18] sm:$0xff] %v14569_v39 }
0x43c3   :  { %14578 = vsyncpa [#allocation6], 1 }
0x43c4   :  { %14579 = vsyncpa [#allocation8], 1 }
0x43c5   :  { %14580 = vsyncpa [#allocation11], 1 }

</bundles_post_ra>
